<compile_context>
chip_gen: v7x
topology: tpu7x:2x2x1
jax: 0.10.0
libtpu: 0.0.40
codegen_flags: <defaults>
</compile_context>

<pallas_src>
import functools

import jax
import jax.numpy as jnp
from jax import lax
from jax.experimental import pallas as pl
from jax.experimental.pallas import tpu as pltpu

LATENT_DIM = 100
LATENT_PAD = 128            # lane-aligned contraction dim for the first matmul
HIDDEN_DIMS = (256, 512, 1024)
OUT_DIM = 3 * 128 * 128     # 49152
BN_EPS = 1e-5
LRELU_SLOPE = 0.2

TILE_N = 4096               # output-feature tile of the streamed int8 weight
N_TILES = OUT_DIM // TILE_N  # 12 steps (even -> balanced 6/6 megacore split)


# ----------------------------------------------------------------------------
# Single fused kernel.  Per grid step j:
#   * recompute the three hidden stages (tiny, hidden under the weight DMA)
#   * dequantize one int8 weight block and do Linear tile + Tanh
# ----------------------------------------------------------------------------
def _generator_kernel(batch,
                      z_ref,
                      w1_ref, b1_ref, g1_ref, be1_ref,
                      w2_ref, b2_ref, g2_ref, be2_ref,
                      w3_ref, b3_ref, g3_ref, be3_ref,
                      wq_ref, sc_ref, bo_ref,
                      o_ref):
    bp = z_ref.shape[0]
    inv_b = 1.0 / batch
    # Only the first `batch` rows are real; padded rows must not contribute
    # to the BatchNorm statistics.
    row = lax.broadcasted_iota(jnp.int32, (bp, 1), 0)
    mask = (row < batch).astype(jnp.float32)

    def stage(h_bf16, w_ref, b_ref, g_ref, be_ref):
        # Linear: bf16 x bf16 -> fp32 accumulation on the MXU.
        y = jnp.dot(h_bf16, w_ref[...], preferred_element_type=jnp.float32)
        y = y + b_ref[...]
        # BatchNorm1d (training mode): biased variance over the true batch.
        mean = jnp.sum(y * mask, axis=0, keepdims=True) * inv_b
        c = y - mean
        var = jnp.sum(c * c * mask, axis=0, keepdims=True) * inv_b
        t = g_ref[...] * (c * lax.rsqrt(var + BN_EPS)) + be_ref[...]
        # LeakyReLU(0.2)
        a = jnp.where(t >= 0, t, LRELU_SLOPE * t)
        return a.astype(jnp.bfloat16)

    h = z_ref[...].astype(jnp.bfloat16)
    h = stage(h, w1_ref, b1_ref, g1_ref, be1_ref)
    h = stage(h, w2_ref, b2_ref, g2_ref, be2_ref)
    h = stage(h, w3_ref, b3_ref, g3_ref, be3_ref)

    # Final Linear tile: int8 weight block, dequant-after-matmul with the
    # per-output-channel scale, then Tanh.
    wq = wq_ref[0].astype(jnp.bfloat16)                        # (K, TILE_N)
    y = jnp.dot(h, wq, preferred_element_type=jnp.float32)     # (BP, TILE_N)
    o_ref[...] = jnp.tanh(y * sc_ref[...] + bo_ref[...])


def generator_pallas(kp, zp, *, batch):
    bp = zp.shape[0]
    k_final = HIDDEN_DIMS[-1]

    flat_inputs = [zp]
    in_specs = [pl.BlockSpec((bp, LATENT_PAD), lambda j: (0, 0))]
    # Hidden-layer params: constant index maps -> DMA'd once, kept resident.
    for layer in kp["hidden"]:
        for name in ("w", "b", "gamma", "beta"):
            arr = layer[name]
            flat_inputs.append(arr)
            in_specs.append(pl.BlockSpec(arr.shape, lambda j: (0, 0)))
    # Streamed final-layer params (pre-packed weight: contiguous block DMAs).
    flat_inputs += [kp["wq"], kp["scale"], kp["b_out"]]
    in_specs += [
        pl.BlockSpec((1, k_final, TILE_N), lambda j: (j, 0, 0)),
        pl.BlockSpec((1, TILE_N), lambda j: (0, j)),
        pl.BlockSpec((1, TILE_N), lambda j: (0, j)),
    ]

    return pl.pallas_call(
        functools.partial(_generator_kernel, batch),
        out_shape=jax.ShapeDtypeStruct((bp, OUT_DIM), jnp.float32),
        grid=(N_TILES,),
        in_specs=in_specs,
        out_specs=pl.BlockSpec((bp, TILE_N), lambda j: (0, j)),
        compiler_params=pltpu.CompilerParams(
            # "parallel" lets v7x shard the 12 weight-streaming steps over both
            # TensorCores (6/6); no-op on single-TC v5e/v6e.
            dimension_semantics=("parallel",),
            # ~20 MiB actually used (2x4 MiB int8 block + 8 MiB bf16 dequant
            # temp + 2.6 MiB hidden weights); 48 MiB gives headroom on all
            # generations, incl. v7x's 64 MiB VMEM.
            vmem_limit_bytes=48 << 20,
            # NOTE: pipeline_mode=pl.Buffered(3) on the weight spec is an
            # option if profiling shows the stream below HBM roofline.
        ),
    )(*flat_inputs)


# ----------------------------------------------------------------------------
# Parameter init (deterministic, PyTorch-style U(-1/sqrt(fan_in), +)) and
# packing/quantization of the kernel-side parameters.
# ----------------------------------------------------------------------------
def init_master_params(key):
    dims = (LATENT_DIM,) + HIDDEN_DIMS + (OUT_DIM,)
    params = []
    for i in range(len(dims) - 1):
        fan_in, fan_out = dims[i], dims[i + 1]
        key, kw, kb = jax.random.split(key, 3)
        bound = 1.0 / (fan_in ** 0.5)
        w = jax.random.uniform(kw, (fan_in, fan_out), jnp.float32, -bound, bound)
        b = jax.random.uniform(kb, (1, fan_out), jnp.float32, -bound, bound)
        layer = {"w": w, "b": b}
        if i < len(dims) - 2:               # hidden layers: BatchNorm affine
            layer["gamma"] = jnp.ones((1, fan_out), jnp.float32)
            layer["beta"] = jnp.zeros((1, fan_out), jnp.float32)
        params.append(layer)
    return params


def prepare_kernel_params(masters):
    hidden = []
    for i, layer in enumerate(masters[:-1]):
        w = layer["w"]
        if i == 0:
            # zero-pad latent 100 -> 128 rows (mathematically identical,
            # matching the zero-padded z columns).
            w = jnp.pad(w, ((0, LATENT_PAD - LATENT_DIM), (0, 0)))
        hidden.append({
            "w": w.astype(jnp.bfloat16),
            "b": layer["b"],
            "gamma": layer["gamma"],
            "beta": layer["beta"],
        })

    # Final layer: per-output-channel symmetric int8 quantization.
    wf = masters[-1]["w"]                                   # (1024, 49152) f32
    amax = jnp.max(jnp.abs(wf), axis=0, keepdims=True)      # (1, 49152)
    scale = jnp.maximum(amax, 1e-12) / 127.0
    q = jnp.clip(jnp.round(wf / scale), -127.0, 127.0).astype(jnp.int8)
    # Pre-pack to (N_TILES, K, TILE_N): each streamed block is one contiguous DMA.
    k = wf.shape[0]
    wq = q.reshape(k, N_TILES, TILE_N).transpose(1, 0, 2)

    return {"hidden": hidden, "wq": wq, "scale": scale, "b_out": masters[-1]["b"]}


# ----------------------------------------------------------------------------
# Full forward: pad (batch -> mult of 8, latent -> 128), one fused pallas_call,
# slice + reshape to NCHW (row-major, same as torch .view()).
# ----------------------------------------------------------------------------
@jax.jit
def generator_forward(kparams, z):
    b = z.shape[0]
    bp = ((b + 7) // 8) * 8
    zp = jnp.zeros((bp, LATENT_PAD), jnp.float32).at[:b, :LATENT_DIM].set(z)
    img = generator_pallas(kparams, zp, batch=b)
    return img[:b].reshape(b, 3, 128, 128)


# ----------------------------------------------------------------------------
# Pure-JAX fp32 reference for a tolerance check.
# ----------------------------------------------------------------------------
def reference_forward(masters, z):
    h = z
    for layer in masters[:-1]:
        y = h @ layer["w"] + layer["b"]
        mean = jnp.mean(y, axis=0, keepdims=True)
        var = jnp.mean((y - mean) ** 2, axis=0, keepdims=True)
        t = layer["gamma"] * (y - mean) * lax.rsqrt(var + BN_EPS) + layer["beta"]
        h = jnp.where(t >= 0, t, LRELU_SLOPE * t)
    img = jnp.tanh(h @ masters[-1]["w"] + masters[-1]["b"])
    return img.reshape(z.shape[0], 3, 128, 128)


if __name__ == "__main__":
    key = jax.random.PRNGKey(0)
    kparam_key, kz = jax.random.split(key)
    masters = init_master_params(kparam_key)
    kparams = prepare_kernel_params(masters)

    batch = 4   # BatchNorm1d (training-mode batch stats) needs batch > 1
    z = jax.random.normal(kz, (batch, LATENT_DIM), jnp.float32)

    img = jax.block_until_ready(generator_forward(kparams, z))

    assert img.shape == (batch, 3, 128, 128)
    assert img.dtype == jnp.float32
    assert bool(jnp.all(jnp.isfinite(img)))
    assert bool(jnp.max(jnp.abs(img)) <= 1.0 + 1e-6)       # tanh-bounded

    ref = reference_forward(masters, z)
    max_diff = float(jnp.max(jnp.abs(img - ref)))
    # int8 (per-channel) final weight + bf16 hidden path vs fp32 reference:
    # expected deviation is a few 1e-3 at the tanh output.
    assert max_diff < 5e-2, f"max diff vs fp32 reference too large: {max_diff}"

    print("KERNEL_OK")
</pallas_src>

<mosaic_0001>
module attributes {stable_mosaic.version = 11 : i64} {
  func.func @_generator_kernel(%arg0: i32, %arg1: memref<8x128xf32, #tpu.memory_space<vmem>>, %arg2: memref<128x256xbf16, #tpu.memory_space<vmem>>, %arg3: memref<1x256xf32, #tpu.memory_space<vmem>>, %arg4: memref<1x256xf32, #tpu.memory_space<vmem>>, %arg5: memref<1x256xf32, #tpu.memory_space<vmem>>, %arg6: memref<256x512xbf16, #tpu.memory_space<vmem>>, %arg7: memref<1x512xf32, #tpu.memory_space<vmem>>, %arg8: memref<1x512xf32, #tpu.memory_space<vmem>>, %arg9: memref<1x512xf32, #tpu.memory_space<vmem>>, %arg10: memref<512x1024xbf16, #tpu.memory_space<vmem>>, %arg11: memref<1x1024xf32, #tpu.memory_space<vmem>>, %arg12: memref<1x1024xf32, #tpu.memory_space<vmem>>, %arg13: memref<1x1024xf32, #tpu.memory_space<vmem>>, %arg14: memref<1x1024x4096xi8, #tpu.memory_space<vmem>>, %arg15: memref<1x4096xf32, #tpu.memory_space<vmem>>, %arg16: memref<1x4096xf32, #tpu.memory_space<vmem>>, %arg17: memref<8x4096xf32, #tpu.memory_space<vmem>>) attributes {dimension_semantics = [#tpu.dimension_semantics<parallel>], iteration_bounds = array<i64: 12>, scalar_prefetch = 0 : i64, scratch_operands = 0 : i64, tpu.core_type = #tpu.core_type<tc>, window_params = [{pipeline_mode = #tpu.pipeline_mode<synchronous>, transform_indices = @transform_0, window_bounds = array<i64: 8, 128>}, {pipeline_mode = #tpu.pipeline_mode<synchronous>, transform_indices = @transform_1, window_bounds = array<i64: 128, 256>}, {pipeline_mode = #tpu.pipeline_mode<synchronous>, transform_indices = @transform_2, window_bounds = array<i64: 1, 256>}, {pipeline_mode = #tpu.pipeline_mode<synchronous>, transform_indices = @transform_3, window_bounds = array<i64: 1, 256>}, {pipeline_mode = #tpu.pipeline_mode<synchronous>, transform_indices = @transform_4, window_bounds = array<i64: 1, 256>}, {pipeline_mode = #tpu.pipeline_mode<synchronous>, transform_indices = @transform_5, window_bounds = array<i64: 256, 512>}, {pipeline_mode = #tpu.pipeline_mode<synchronous>, transform_indices = @transform_6, window_bounds = array<i64: 1, 512>}, {pipeline_mode = #tpu.pipeline_mode<synchronous>, transform_indices = @transform_7, window_bounds = array<i64: 1, 512>}, {pipeline_mode = #tpu.pipeline_mode<synchronous>, transform_indices = @transform_8, window_bounds = array<i64: 1, 512>}, {pipeline_mode = #tpu.pipeline_mode<synchronous>, transform_indices = @transform_9, window_bounds = array<i64: 512, 1024>}, {pipeline_mode = #tpu.pipeline_mode<synchronous>, transform_indices = @transform_10, window_bounds = array<i64: 1, 1024>}, {pipeline_mode = #tpu.pipeline_mode<synchronous>, transform_indices = @transform_11, window_bounds = array<i64: 1, 1024>}, {pipeline_mode = #tpu.pipeline_mode<synchronous>, transform_indices = @transform_12, window_bounds = array<i64: 1, 1024>}, {transform_indices = @transform_13, window_bounds = array<i64: 1, 1024, 4096>}, {transform_indices = @transform_14, window_bounds = array<i64: 1, 4096>}, {transform_indices = @transform_15, window_bounds = array<i64: 1, 4096>}, {transform_indices = @transform_16, window_bounds = array<i64: 8, 4096>}]} {
    %0 = tpu.iota {dimensions = array<i32: 0>} : vector<8x1xi32>
    %c4_i32 = arith.constant 4 : i32
    %1 = vector.broadcast %c4_i32 : i32 to vector<8x1xi32>
    %2 = arith.cmpi slt, %0, %1 : vector<8x1xi32>
    %3 = arith.extui %2 : vector<8x1xi1> to vector<8x1xi32>
    %4 = arith.sitofp %3 : vector<8x1xi32> to vector<8x1xf32>
    %c0 = arith.constant 0 : index
    %c0_0 = arith.constant 0 : index
    %5 = vector.load %arg1[%c0, %c0_0] : memref<8x128xf32, #tpu.memory_space<vmem>>, vector<8x128xf32>
    %6 = arith.truncf %5 : vector<8x128xf32> to vector<8x128xbf16>
    %c0_1 = arith.constant 0 : index
    %c0_2 = arith.constant 0 : index
    %7 = vector.load %arg2[%c0_1, %c0_2] : memref<128x256xbf16, #tpu.memory_space<vmem>>, vector<128x256xbf16>
    %cst = arith.constant dense<0.000000e+00> : vector<8x256xf32>
    %8 = tpu.matmul %6, %7, %cst {dimension_numbers = #tpu.dot_dimension_numbers<[1], [0], [0], [1], [0, 0, 1, 1], [], []>} : vector<8x128xbf16>, vector<128x256xbf16>, vector<8x256xf32> -> vector<8x256xf32>
    %c0_3 = arith.constant 0 : index
    %c0_4 = arith.constant 0 : index
    %9 = vector.load %arg3[%c0_3, %c0_4] : memref<1x256xf32, #tpu.memory_space<vmem>>, vector<1x256xf32>
    %10 = vector.broadcast %9 : vector<1x256xf32> to vector<8x256xf32>
    %11 = arith.addf %8, %10 : vector<8x256xf32>
    %12 = vector.broadcast %4 : vector<8x1xf32> to vector<8x256xf32>
    %13 = arith.mulf %11, %12 : vector<8x256xf32>
    %cst_5 = arith.constant dense<0.000000e+00> : vector<256xf32>
    %14 = vector.multi_reduction <add>, %13, %cst_5 [0] : vector<8x256xf32> to vector<256xf32>
    %15 = vector.shape_cast %14 : vector<256xf32> to vector<1x256xf32>
    %cst_6 = arith.constant 2.500000e-01 : f32
    %16 = vector.broadcast %cst_6 : f32 to vector<1x256xf32>
    %17 = arith.mulf %15, %16 : vector<1x256xf32>
    %18 = vector.broadcast %17 : vector<1x256xf32> to vector<8x256xf32>
    %19 = arith.subf %11, %18 : vector<8x256xf32>
    %20 = arith.mulf %19, %19 : vector<8x256xf32>
    %21 = vector.broadcast %4 : vector<8x1xf32> to vector<8x256xf32>
    %22 = arith.mulf %20, %21 : vector<8x256xf32>
    %cst_7 = arith.constant dense<0.000000e+00> : vector<256xf32>
    %23 = vector.multi_reduction <add>, %22, %cst_7 [0] : vector<8x256xf32> to vector<256xf32>
    %24 = vector.shape_cast %23 : vector<256xf32> to vector<1x256xf32>
    %cst_8 = arith.constant 2.500000e-01 : f32
    %25 = vector.broadcast %cst_8 : f32 to vector<1x256xf32>
    %26 = arith.mulf %24, %25 : vector<1x256xf32>
    %c0_9 = arith.constant 0 : index
    %c0_10 = arith.constant 0 : index
    %27 = vector.load %arg4[%c0_9, %c0_10] : memref<1x256xf32, #tpu.memory_space<vmem>>, vector<1x256xf32>
    %cst_11 = arith.constant 9.99999974E-6 : f32
    %28 = vector.broadcast %cst_11 : f32 to vector<1x256xf32>
    %29 = arith.addf %26, %28 : vector<1x256xf32>
    %30 = math.rsqrt %29 : vector<1x256xf32>
    %31 = vector.broadcast %30 : vector<1x256xf32> to vector<8x256xf32>
    %32 = arith.mulf %19, %31 : vector<8x256xf32>
    %33 = vector.broadcast %27 : vector<1x256xf32> to vector<8x256xf32>
    %34 = arith.mulf %33, %32 : vector<8x256xf32>
    %c0_12 = arith.constant 0 : index
    %c0_13 = arith.constant 0 : index
    %35 = vector.load %arg5[%c0_12, %c0_13] : memref<1x256xf32, #tpu.memory_space<vmem>>, vector<1x256xf32>
    %36 = vector.broadcast %35 : vector<1x256xf32> to vector<8x256xf32>
    %37 = arith.addf %34, %36 : vector<8x256xf32>
    %cst_14 = arith.constant 0.000000e+00 : f32
    %38 = vector.broadcast %cst_14 : f32 to vector<8x256xf32>
    %39 = arith.cmpf oge, %37, %38 : vector<8x256xf32>
    %cst_15 = arith.constant 2.000000e-01 : f32
    %40 = vector.broadcast %cst_15 : f32 to vector<8x256xf32>
    %41 = arith.mulf %40, %37 : vector<8x256xf32>
    %42 = arith.select %39, %37, %41 : vector<8x256xi1>, vector<8x256xf32>
    %43 = arith.truncf %42 : vector<8x256xf32> to vector<8x256xbf16>
    %c0_16 = arith.constant 0 : index
    %c0_17 = arith.constant 0 : index
    %44 = vector.load %arg6[%c0_16, %c0_17] : memref<256x512xbf16, #tpu.memory_space<vmem>>, vector<256x512xbf16>
    %cst_18 = arith.constant dense<0.000000e+00> : vector<8x512xf32>
    %45 = tpu.matmul %43, %44, %cst_18 {dimension_numbers = #tpu.dot_dimension_numbers<[1], [0], [0], [1], [0, 0, 1, 1], [], []>} : vector<8x256xbf16>, vector<256x512xbf16>, vector<8x512xf32> -> vector<8x512xf32>
    %c0_19 = arith.constant 0 : index
    %c0_20 = arith.constant 0 : index
    %46 = vector.load %arg7[%c0_19, %c0_20] : memref<1x512xf32, #tpu.memory_space<vmem>>, vector<1x512xf32>
    %47 = vector.broadcast %46 : vector<1x512xf32> to vector<8x512xf32>
    %48 = arith.addf %45, %47 : vector<8x512xf32>
    %49 = vector.broadcast %4 : vector<8x1xf32> to vector<8x512xf32>
    %50 = arith.mulf %48, %49 : vector<8x512xf32>
    %cst_21 = arith.constant dense<0.000000e+00> : vector<512xf32>
    %51 = vector.multi_reduction <add>, %50, %cst_21 [0] : vector<8x512xf32> to vector<512xf32>
    %52 = vector.shape_cast %51 : vector<512xf32> to vector<1x512xf32>
    %cst_22 = arith.constant 2.500000e-01 : f32
    %53 = vector.broadcast %cst_22 : f32 to vector<1x512xf32>
    %54 = arith.mulf %52, %53 : vector<1x512xf32>
    %55 = vector.broadcast %54 : vector<1x512xf32> to vector<8x512xf32>
    %56 = arith.subf %48, %55 : vector<8x512xf32>
    %57 = arith.mulf %56, %56 : vector<8x512xf32>
    %58 = vector.broadcast %4 : vector<8x1xf32> to vector<8x512xf32>
    %59 = arith.mulf %57, %58 : vector<8x512xf32>
    %cst_23 = arith.constant dense<0.000000e+00> : vector<512xf32>
    %60 = vector.multi_reduction <add>, %59, %cst_23 [0] : vector<8x512xf32> to vector<512xf32>
    %61 = vector.shape_cast %60 : vector<512xf32> to vector<1x512xf32>
    %cst_24 = arith.constant 2.500000e-01 : f32
    %62 = vector.broadcast %cst_24 : f32 to vector<1x512xf32>
    %63 = arith.mulf %61, %62 : vector<1x512xf32>
    %c0_25 = arith.constant 0 : index
    %c0_26 = arith.constant 0 : index
    %64 = vector.load %arg8[%c0_25, %c0_26] : memref<1x512xf32, #tpu.memory_space<vmem>>, vector<1x512xf32>
    %cst_27 = arith.constant 9.99999974E-6 : f32
    %65 = vector.broadcast %cst_27 : f32 to vector<1x512xf32>
    %66 = arith.addf %63, %65 : vector<1x512xf32>
    %67 = math.rsqrt %66 : vector<1x512xf32>
    %68 = vector.broadcast %67 : vector<1x512xf32> to vector<8x512xf32>
    %69 = arith.mulf %56, %68 : vector<8x512xf32>
    %70 = vector.broadcast %64 : vector<1x512xf32> to vector<8x512xf32>
    %71 = arith.mulf %70, %69 : vector<8x512xf32>
    %c0_28 = arith.constant 0 : index
    %c0_29 = arith.constant 0 : index
    %72 = vector.load %arg9[%c0_28, %c0_29] : memref<1x512xf32, #tpu.memory_space<vmem>>, vector<1x512xf32>
    %73 = vector.broadcast %72 : vector<1x512xf32> to vector<8x512xf32>
    %74 = arith.addf %71, %73 : vector<8x512xf32>
    %cst_30 = arith.constant 0.000000e+00 : f32
    %75 = vector.broadcast %cst_30 : f32 to vector<8x512xf32>
    %76 = arith.cmpf oge, %74, %75 : vector<8x512xf32>
    %cst_31 = arith.constant 2.000000e-01 : f32
    %77 = vector.broadcast %cst_31 : f32 to vector<8x512xf32>
    %78 = arith.mulf %77, %74 : vector<8x512xf32>
    %79 = arith.select %76, %74, %78 : vector<8x512xi1>, vector<8x512xf32>
    %80 = arith.truncf %79 : vector<8x512xf32> to vector<8x512xbf16>
    %c0_32 = arith.constant 0 : index
    %c0_33 = arith.constant 0 : index
    %81 = vector.load %arg10[%c0_32, %c0_33] : memref<512x1024xbf16, #tpu.memory_space<vmem>>, vector<512x1024xbf16>
    %cst_34 = arith.constant dense<0.000000e+00> : vector<8x1024xf32>
    %82 = tpu.matmul %80, %81, %cst_34 {dimension_numbers = #tpu.dot_dimension_numbers<[1], [0], [0], [1], [0, 0, 1, 1], [], []>} : vector<8x512xbf16>, vector<512x1024xbf16>, vector<8x1024xf32> -> vector<8x1024xf32>
    %c0_35 = arith.constant 0 : index
    %c0_36 = arith.constant 0 : index
    %83 = vector.load %arg11[%c0_35, %c0_36] : memref<1x1024xf32, #tpu.memory_space<vmem>>, vector<1x1024xf32>
    %84 = vector.broadcast %83 : vector<1x1024xf32> to vector<8x1024xf32>
    %85 = arith.addf %82, %84 : vector<8x1024xf32>
    %86 = vector.broadcast %4 : vector<8x1xf32> to vector<8x1024xf32>
    %87 = arith.mulf %85, %86 : vector<8x1024xf32>
    %cst_37 = arith.constant dense<0.000000e+00> : vector<1024xf32>
    %88 = vector.multi_reduction <add>, %87, %cst_37 [0] : vector<8x1024xf32> to vector<1024xf32>
    %89 = vector.shape_cast %88 : vector<1024xf32> to vector<1x1024xf32>
    %cst_38 = arith.constant 2.500000e-01 : f32
    %90 = vector.broadcast %cst_38 : f32 to vector<1x1024xf32>
    %91 = arith.mulf %89, %90 : vector<1x1024xf32>
    %92 = vector.broadcast %91 : vector<1x1024xf32> to vector<8x1024xf32>
    %93 = arith.subf %85, %92 : vector<8x1024xf32>
    %94 = arith.mulf %93, %93 : vector<8x1024xf32>
    %95 = vector.broadcast %4 : vector<8x1xf32> to vector<8x1024xf32>
    %96 = arith.mulf %94, %95 : vector<8x1024xf32>
    %cst_39 = arith.constant dense<0.000000e+00> : vector<1024xf32>
    %97 = vector.multi_reduction <add>, %96, %cst_39 [0] : vector<8x1024xf32> to vector<1024xf32>
    %98 = vector.shape_cast %97 : vector<1024xf32> to vector<1x1024xf32>
    %cst_40 = arith.constant 2.500000e-01 : f32
    %99 = vector.broadcast %cst_40 : f32 to vector<1x1024xf32>
    %100 = arith.mulf %98, %99 : vector<1x1024xf32>
    %c0_41 = arith.constant 0 : index
    %c0_42 = arith.constant 0 : index
    %101 = vector.load %arg12[%c0_41, %c0_42] : memref<1x1024xf32, #tpu.memory_space<vmem>>, vector<1x1024xf32>
    %cst_43 = arith.constant 9.99999974E-6 : f32
    %102 = vector.broadcast %cst_43 : f32 to vector<1x1024xf32>
    %103 = arith.addf %100, %102 : vector<1x1024xf32>
    %104 = math.rsqrt %103 : vector<1x1024xf32>
    %105 = vector.broadcast %104 : vector<1x1024xf32> to vector<8x1024xf32>
    %106 = arith.mulf %93, %105 : vector<8x1024xf32>
    %107 = vector.broadcast %101 : vector<1x1024xf32> to vector<8x1024xf32>
    %108 = arith.mulf %107, %106 : vector<8x1024xf32>
    %c0_44 = arith.constant 0 : index
    %c0_45 = arith.constant 0 : index
    %109 = vector.load %arg13[%c0_44, %c0_45] : memref<1x1024xf32, #tpu.memory_space<vmem>>, vector<1x1024xf32>
    %110 = vector.broadcast %109 : vector<1x1024xf32> to vector<8x1024xf32>
    %111 = arith.addf %108, %110 : vector<8x1024xf32>
    %cst_46 = arith.constant 0.000000e+00 : f32
    %112 = vector.broadcast %cst_46 : f32 to vector<8x1024xf32>
    %113 = arith.cmpf oge, %111, %112 : vector<8x1024xf32>
    %cst_47 = arith.constant 2.000000e-01 : f32
    %114 = vector.broadcast %cst_47 : f32 to vector<8x1024xf32>
    %115 = arith.mulf %114, %111 : vector<8x1024xf32>
    %116 = arith.select %113, %111, %115 : vector<8x1024xi1>, vector<8x1024xf32>
    %117 = arith.truncf %116 : vector<8x1024xf32> to vector<8x1024xbf16>
    %c0_48 = arith.constant 0 : index
    %c0_49 = arith.constant 0 : index
    %c0_50 = arith.constant 0 : index
    %118 = vector.load %arg14[%c0_48, %c0_49, %c0_50] : memref<1x1024x4096xi8, #tpu.memory_space<vmem>>, vector<1x1024x4096xi8>
    %119 = vector.shape_cast %118 : vector<1x1024x4096xi8> to vector<1024x4096xi8>
    %120 = arith.sitofp %119 : vector<1024x4096xi8> to vector<1024x4096xbf16>
    %cst_51 = arith.constant dense<0.000000e+00> : vector<8x4096xf32>
    %121 = tpu.matmul %117, %120, %cst_51 {dimension_numbers = #tpu.dot_dimension_numbers<[1], [0], [0], [1], [0, 0, 1, 1], [], []>} : vector<8x1024xbf16>, vector<1024x4096xbf16>, vector<8x4096xf32> -> vector<8x4096xf32>
    %c0_52 = arith.constant 0 : index
    %c0_53 = arith.constant 0 : index
    %122 = vector.load %arg15[%c0_52, %c0_53] : memref<1x4096xf32, #tpu.memory_space<vmem>>, vector<1x4096xf32>
    %123 = vector.broadcast %122 : vector<1x4096xf32> to vector<8x4096xf32>
    %124 = arith.mulf %121, %123 : vector<8x4096xf32>
    %c0_54 = arith.constant 0 : index
    %c0_55 = arith.constant 0 : index
    %125 = vector.load %arg16[%c0_54, %c0_55] : memref<1x4096xf32, #tpu.memory_space<vmem>>, vector<1x4096xf32>
    %126 = vector.broadcast %125 : vector<1x4096xf32> to vector<8x4096xf32>
    %127 = arith.addf %124, %126 : vector<8x4096xf32>
    %128 = math.tanh %127 : vector<8x4096xf32>
    %c0_56 = arith.constant 0 : index
    %c0_57 = arith.constant 0 : index
    %129 = vector.load %arg17[%c0_56, %c0_57] : memref<8x4096xf32, #tpu.memory_space<vmem>>, vector<8x4096xf32>
    tpu.vector_store %arg17[%c0_56, %c0_57], %128 {strides = array<i32>} : memref<8x4096xf32, #tpu.memory_space<vmem>>, vector<8x4096xf32>,
    return
  }
  func.func @transform_0(%arg0: i32) -> (i32, i32) {
    %c0_i32 = arith.constant 0 : i32
    %c0_i32_0 = arith.constant 0 : i32
    %c0_i32_1 = arith.constant 0 : i32
    return %c0_i32, %c0_i32_0 : i32, i32
  }
  func.func @transform_1(%arg0: i32) -> (i32, i32) {
    %c0_i32 = arith.constant 0 : i32
    %c0_i32_0 = arith.constant 0 : i32
    %c0_i32_1 = arith.constant 0 : i32
    return %c0_i32, %c0_i32_0 : i32, i32
  }
  func.func @transform_2(%arg0: i32) -> (i32, i32) {
    %c0_i32 = arith.constant 0 : i32
    %c0_i32_0 = arith.constant 0 : i32
    %c0_i32_1 = arith.constant 0 : i32
    return %c0_i32, %c0_i32_0 : i32, i32
  }
  func.func @transform_3(%arg0: i32) -> (i32, i32) {
    %c0_i32 = arith.constant 0 : i32
    %c0_i32_0 = arith.constant 0 : i32
    %c0_i32_1 = arith.constant 0 : i32
    return %c0_i32, %c0_i32_0 : i32, i32
  }
  func.func @transform_4(%arg0: i32) -> (i32, i32) {
    %c0_i32 = arith.constant 0 : i32
    %c0_i32_0 = arith.constant 0 : i32
    %c0_i32_1 = arith.constant 0 : i32
    return %c0_i32, %c0_i32_0 : i32, i32
  }
  func.func @transform_5(%arg0: i32) -> (i32, i32) {
    %c0_i32 = arith.constant 0 : i32
    %c0_i32_0 = arith.constant 0 : i32
    %c0_i32_1 = arith.constant 0 : i32
    return %c0_i32, %c0_i32_0 : i32, i32
  }
  func.func @transform_6(%arg0: i32) -> (i32, i32) {
    %c0_i32 = arith.constant 0 : i32
    %c0_i32_0 = arith.constant 0 : i32
    %c0_i32_1 = arith.constant 0 : i32
    return %c0_i32, %c0_i32_0 : i32, i32
  }
  func.func @transform_7(%arg0: i32) -> (i32, i32) {
    %c0_i32 = arith.constant 0 : i32
    %c0_i32_0 = arith.constant 0 : i32
    %c0_i32_1 = arith.constant 0 : i32
    return %c0_i32, %c0_i32_0 : i32, i32
  }
  func.func @transform_8(%arg0: i32) -> (i32, i32) {
    %c0_i32 = arith.constant 0 : i32
    %c0_i32_0 = arith.constant 0 : i32
    %c0_i32_1 = arith.constant 0 : i32
    return %c0_i32, %c0_i32_0 : i32, i32
  }
  func.func @transform_9(%arg0: i32) -> (i32, i32) {
    %c0_i32 = arith.constant 0 : i32
    %c0_i32_0 = arith.constant 0 : i32
    %c0_i32_1 = arith.constant 0 : i32
    return %c0_i32, %c0_i32_0 : i32, i32
  }
  func.func @transform_10(%arg0: i32) -> (i32, i32) {
    %c0_i32 = arith.constant 0 : i32
    %c0_i32_0 = arith.constant 0 : i32
    %c0_i32_1 = arith.constant 0 : i32
    return %c0_i32, %c0_i32_0 : i32, i32
  }
  func.func @transform_11(%arg0: i32) -> (i32, i32) {
    %c0_i32 = arith.constant 0 : i32
    %c0_i32_0 = arith.constant 0 : i32
    %c0_i32_1 = arith.constant 0 : i32
    return %c0_i32, %c0_i32_0 : i32, i32
  }
  func.func @transform_12(%arg0: i32) -> (i32, i32) {
    %c0_i32 = arith.constant 0 : i32
    %c0_i32_0 = arith.constant 0 : i32
    %c0_i32_1 = arith.constant 0 : i32
    return %c0_i32, %c0_i32_0 : i32, i32
  }
  func.func @transform_13(%arg0: i32) -> (i32, i32, i32) {
    %c0_i32 = arith.constant 0 : i32
    %c0_i32_0 = arith.constant 0 : i32
    %c0_i32_1 = arith.constant 0 : i32
    return %arg0, %c0_i32, %c0_i32_0 : i32, i32, i32
  }
  func.func @transform_14(%arg0: i32) -> (i32, i32) {
    %c0_i32 = arith.constant 0 : i32
    %c0_i32_0 = arith.constant 0 : i32
    return %c0_i32, %arg0 : i32, i32
  }
  func.func @transform_15(%arg0: i32) -> (i32, i32) {
    %c0_i32 = arith.constant 0 : i32
    %c0_i32_0 = arith.constant 0 : i32
    return %c0_i32, %arg0 : i32, i32
  }
  func.func @transform_16(%arg0: i32) -> (i32, i32) {
    %c0_i32 = arith.constant 0 : i32
    %c0_i32_0 = arith.constant 0 : i32
    return %c0_i32, %arg0 : i32, i32
  }
}

</mosaic_0001>

<bundles_post_ra>
// kernel: generator_forward.1
= control target key start
LH: loop header
LB: loop body
LE: loop exit
PB: predicated region body
PF: predicated region fallthrough
CT: control target
= control target key end

     0   :  { %s13846_s0 = inlined_call_operand.vmem [shape: f32[8,128], index: 0, kind: input, shape index: {}]   ;;  %s13847_s1 = inlined_call_operand.hbm [shape: bf16[128,256], index: 1, kind: input, shape index: {}]   ;;  %s13848_s2 = inlined_call_operand.hbm [shape: f32[1,256], index: 2, kind: input, shape index: {}]   ;;  %s13849_s3 = inlined_call_operand.hbm [shape: f32[1,256], index: 3, kind: input, shape index: {}]   ;;  %s13850_s4 = inlined_call_operand.hbm [shape: f32[1,256], index: 4, kind: input, shape index: {}]   ;;  %s13851_s5 = inlined_call_operand.hbm [shape: bf16[256,512], index: 5, kind: input, shape index: {}]   ;;  %s13852_s6 = inlined_call_operand.hbm [shape: f32[1,512], index: 6, kind: input, shape index: {}]   ;;  %s13853_s7 = inlined_call_operand.hbm [shape: f32[1,512], index: 7, kind: input, shape index: {}]   ;;  %s13854_s8 = inlined_call_operand.hbm [shape: f32[1,512], index: 8, kind: input, shape index: {}]   ;;  %s13855_s9 = inlined_call_operand.hbm [shape: bf16[512,1024], index: 9, kind: input, shape index: {}]   ;;  %s13856_s10 = inlined_call_operand.hbm [shape: f32[1,1024], index: 10, kind: input, shape index: {}]   ;;  %s13857_s11 = inlined_call_operand.hbm [shape: f32[1,1024], index: 11, kind: input, shape index: {}]   ;;  %s13858_s12 = inlined_call_operand.hbm [shape: f32[1,1024], index: 12, kind: input, shape index: {}]   ;;  %s13859_s13 = inlined_call_operand.hbm [shape: s8[12,1024,4096], index: 13, kind: input, shape index: {}]   ;;  %s13860_s14 = inlined_call_operand.hbm [shape: f32[1,49152], index: 14, kind: input, shape index: {}]   ;;  %s13861_s15 = inlined_call_operand.hbm [shape: f32[1,49152], index: 15, kind: input, shape index: {}]   ;;  %s13862_s16 = inlined_call_operand.vmem [shape: f32[8,49152], index: 16, kind: output, shape index: {}]  }
   0x1   :  { %13890 = sst [smem:[#allocation37_spill]] %s13846_s0 }
   0x2   :  { %13891 = sst [smem:[#allocation38_spill]] %s13847_s1 }
   0x3   :  { %13892 = sst [smem:[#allocation39_spill]] %s13848_s2 }
   0x4   :  { %13893 = sst [smem:[#allocation40_spill]] %s13849_s3 }
   0x5   :  { %13894 = sst [smem:[#allocation41_spill]] %s13850_s4 }
   0x6   :  { %13895 = sst [smem:[#allocation42_spill]] %s13857_s11 }
   0x7   :  { %13896 = sst [smem:[#allocation43_spill]] %s13858_s12 }
   0x8   :  { %13897 = sst [smem:[#allocation44_spill]] %s13859_s13 }
   0x9   :  { %13898 = sst [smem:[#allocation45_spill]] %s13861_s15 }
   0xa   :  { %13899 = sst [smem:[#allocation46_spill]] %s13862_s16 }
   0xb   :  { %21 = vsyncpa [#allocation3], 0 }
   0xc   :  { %22 = vsyncpa [#allocation5], 0 }
   0xd   :  { %23 = vsyncpa [#allocation8], 0 }
   0xe   :  { %24 = vsyncpa [#allocation11], 0 }
   0xf   :  { %25 = vsyncpa [#allocation14], 0 }
  0x10   :  { %26 = vsyncpa [#allocation17], 0 }
  0x11   :  { %27 = vsyncpa [#allocation20], 0  ;;  %s11830_s21 = smov 0   ;;  %s11832_s22 = smov 0  }
  0x12   :  { %s11834_s23 = smov 0   ;;  %s11836_s24 = smov 0  }
  0x13 LB: > { %13900 = sst [smem:[#allocation32_spill]] %s11711_s22  ;;  %s11721_s25 = smov [#allocation2]   ;;  %s11719_s24 = sphi %s11836_s24, %s13953_s24   ;;  %s11715_s23 = sphi %s11834_s23, %s13957_s23   ;;  %s11711_s22 = sphi %s11832_s22, %s13956_s22   ;;  %s11707_s21 = sphi %s11830_s21, %s13954_s21  }
  0x14   : > { %s430_s26 = sshll.u32 %s11721_s25, 4  ;;  %s11851_s27 = sadd.s32 4294967295, %s11719_s24   ;;  %s431_s26 = int_to_ptr.vmem [resolvable:$true] %s430_s26 }
  0x15   : > { %p10233_p0 = scmp.ge.s32.totalorder %s11719_s24, 1  ;;  %p13864_p1 = scmp.eq.s32.totalorder %s11851_s27, 0 }
  0x16   : > { %p415_p2 = scmp.lt.s32.totalorder %s11719_s24, 13  ;;  %s11869_s30 = sadd.s32 1, %s11719_s24  }
  0x17   : > { %13904 = sst [smem:[#allocation34_spill]] %s11869_s30  ;;  %s13905_s1 = sld [smem:[#allocation38_spill]] }
  0x18   : > { %p11856_p3 = pnand %p10233_p0, %p415_p2 }
  0x1a   : > { %s13901_s28 = scalar_select %p11856_p3, 1, 0 }
  0x1b   : > { %p10886_p4 = pneg %p11856_p3 }
  0x1c   : > { %13902 = sst [smem:[#allocation33_spill]] %s13901_s28 }
  0x1d   : > { %p11864_p5 = pnand %p10886_p4, %p13864_p1  ;;  %s11231_s18 = scalar_lea.hbm %s13905_s1, 2048 }
  0x1e   : > { %p11232_p6 = scmp.ne.s32.totalorder %s13905_s1, %s11231_s18  ;;  %p11238_p10 = scmp.lt.u32.totalorder %s11231_s18, %s13905_s1 }
  0x1f   : > { %s13903_s29 = scalar_select %p11864_p5, 1, 0 }
  0x20   : > { %p11879_p7 = pneg %p11864_p5 }
  0x22   : > { %s13906_s25 = scalar_select %p11879_p7, 1, 0 }
  0x23   : > { %p11234_p8 = pnand %p11879_p7, %p11232_p6 }
  0x25   : > { %p11235_p9 = pneg %p11234_p8 }
  0x27   : > { %p11240_p11 = pnand %p11238_p10, %p11235_p9 }
  0x29   : > { %11243 = shalt.err (!%p11240_p11)
}
  0x2a   : > { %s11244_s0 = scalar_lea.vmem %s431_s26, 2048  ;;  %p11252_p2 = scmp.lt.s32.totalorder %s431_s26, %s431_s26 }
  0x2b   : > { %p11245_p12 = scmp.ne.s32.totalorder %s431_s26, %s11244_s0  ;;  %p11253_p4 = scmp.lt.s32.totalorder %s11244_s0, %s11244_s0 }
  0x2d   : > { %p11247_p13 = pnand %p11245_p12, %p11879_p7  ;;  %p11254_p1 = por %p11253_p4, %p11252_p2 }
  0x2f   : > { %p11248_p0 = pneg %p11247_p13 }
  0x31   : > { %p11255_p3 = pnand %p11254_p1, %p11248_p0 }
  0x33   : > { %11258 = shalt.err (!%p11255_p3)
}
  0x34   : > { %s11722_s17 = smov 128   ;;  %s11723_s16 = smov 8  }
  0x35   : > { %10889 = dma.hbm_to_vmem [thread:$0]  (!%p11864_p5), %s13905_s1, 2048, %s431_s26, [#allocation3], %s11722_s17, %s11722_s17, %s11723_s16  }
  0x36   : > { %s310_s19 = ssub.s32 %s11719_s24, %s11869_s30  ;;  %s313_s20 = sadd.s32 1, %s11715_s23 }
  0x37   : > { %p311_p1 = scmp.eq.s32.totalorder %s310_s19, 0  ;;  %p320_p3 = scmp.ne.s32.totalorder %s11715_s23, %s11711_s22 }
  0x38   : > { %p321_p6 = scmp.eq.s32.totalorder %s11719_s24, 0  ;;  %p326_p8 = scmp.ne.s32.totalorder %s11711_s22, %s11707_s21 }
  0x39   : > { %s11904_s0 = scalar_select %p311_p1, %s11715_s23, %s313_s20  }
  0x3a   : > { %p322_p9 = por %p321_p6, %p320_p3  ;;  %p13908_p10 = scmp.eq.s32.totalorder %s11851_s27, 0 }
  0x3b   : > { %13907 = sst [smem:[#allocation35_spill]] %s11904_s0  ;;  %p10945_p12 = scmp.lt.s32.totalorder %s11719_s24, 12 }
  0x3c   : > { %p11908_p11 = por %p13908_p10, %p326_p8  ;;  %s569_s12 = sand.u32 1, %s11719_s24  }
  0x3d   : > { %s13869_s11 = sand.u32 1, %s11715_s23   ;;  %s10613_s26 = sshll.u32 %s11719_s24, 17 }
  0x3e   : > { %s13909_s15 = scalar_select %p11908_p11, 1, 0 }
  0x3f   : > { %s10247_s28 = sshll.u32 %s13869_s11, 13  ;;  %s13911_s13 = sld [smem:[#allocation44_spill]] }
  0x40   : > { %13910 = sst [smem:[#allocation36_spill]] %s13909_s15  ;;  %s573_s21 = scalar_lea.vmem [#allocation21], %s10247_s28 }
  0x41   : > { %s580_s19 = sshll.u32 %s573_s21, 4  ;;  %p11925_p13 = pnand %p10945_p12, %p322_p9  ;;  %s11923_s19 = int_to_ptr.vmem [resolvable:$true] %s580_s19 }
  0x42   : > { %s11724_s11 = smov [#allocation4]   ;;  %s11931_s0 = scalar_lea.sflag [#allocation3], %s569_s12 }
  0x43   : > { %s13912_s20 = scalar_select %p11925_p13, 1, 0 }
  0x44   : > { %s11929_s1 = sshll.u32 %s11724_s11, 4  ;;  %p11937_p2 = pneg %p11925_p13  ;;  %s445_s1 = int_to_ptr.vmem [resolvable:$true] %s11929_s1 }
  0x45   : > { %s11921_s18 = scalar_lea.hbm %s13911_s13, %s10613_s26  ;;  %s11264_s21 = scalar_lea.hbm %s13911_s13, 1572864 }
  0x46   : > { %s11259_s26 = scalar_lea.hbm %s11921_s18, 131072  ;;  %p11265_p3 = scmp.lt.u32.totalorder %s11921_s18, %s13911_s13 }
  0x47   : > { %p11260_p0 = scmp.ne.s32.totalorder %s11921_s18, %s11259_s26  ;;  %p11266_p6 = scmp.lt.u32.totalorder %s11264_s21, %s11259_s26 }
  0x48   : > { %s13913_s17 = scalar_select %p11937_p2, 1, 0 }
  0x49   : > { %p11262_p4 = pnand %p11937_p2, %p11260_p0  ;;  %p11267_p8 = por %p11266_p6, %p11265_p3 }
  0x4a   : > { %p11268_p9 = scmp.lt.u32.totalorder %s11259_s26, %s11921_s18 }
  0x4b   : > { %p11263_p1 = pneg %p11262_p4 }
  0x4c   : > { %p11269_p10 = por %p11268_p9, %p11267_p8 }
  0x4e   : > { %p11270_p12 = pnand %p11269_p10, %p11263_p1 }
  0x50   : > { %11273 = shalt.err (!%p11270_p12)
}
  0x51   : > { %s11274_s12 = scalar_lea.vmem %s11923_s19, 131072  ;;  %s11725_s28 = smov [#allocation21]  }
  0x52   : > { %p11275_p0 = scmp.ne.s32.totalorder %s11923_s19, %s11274_s12  ;;  %s11279_s16 = sshll.u32 %s11725_s28, 4  ;;  %s11280_s16 = int_to_ptr.vmem [resolvable:$false] %s11279_s16 }
  0x53   : > { %s11281_s30 = scalar_lea.vmem %s11280_s16, 262144  ;;  %p11282_p5 = scmp.lt.s32.totalorder %s11923_s19, %s11280_s16 }
  0x54   : > { %p11277_p4 = pnand %p11275_p0, %p11937_p2  ;;  %p11283_p7 = scmp.lt.s32.totalorder %s11281_s30, %s11274_s12 }
  0x56   : > { %p11278_p11 = pneg %p11277_p4  ;;  %p11284_p3 = por %p11283_p7, %p11282_p5 }
  0x58   : > { %p11285_p6 = pnand %p11284_p3, %p11278_p11 }
  0x5a   : > { %11288 = shalt.err (!%p11285_p6)
}
  0x5b   : > { %s11726_s26 = smov 4096   ;;  %s13883_s21 = smov 256  }
  0x5c   : > { %10926 = dma.hbm_to_vmem [thread:$0]  (!%p11925_p13), %s11921_s18, 131072, %s11923_s19, %s11931_s0, %s11726_s26, %s11726_s26, %s13883_s21  }
  0x5d   : > { %s13914_s2 = sld [smem:[#allocation39_spill]]  ;;  %p13915_p7 = scmp.ne.s32.totalorder %s13906_s25, 0 }
  0x63   : > { %s11289_s16 = scalar_lea.hbm %s13914_s2, 32 }
  0x64   : > { %p11290_p5 = scmp.ne.s32.totalorder %s13914_s2, %s11289_s16  ;;  %p11296_p8 = scmp.lt.u32.totalorder %s11289_s16, %s13914_s2 }
  0x66   : > { %p11292_p11 = pnand %p11290_p5, %p13915_p7 }
  0x68   : > { %p11293_p1 = pneg %p11292_p11 }
  0x6a   : > { %p11298_p9 = pnand %p11296_p8, %p11293_p1 }
  0x6c   : > { %11301 = shalt.err (!%p11298_p9)
}
  0x6d   : > { %s11302_s22 = scalar_lea.vmem %s445_s1, 32  ;;  %p11310_p4 = scmp.lt.s32.totalorder %s445_s1, %s445_s1 }
  0x6e   : > { %p11303_p10 = scmp.ne.s32.totalorder %s445_s1, %s11302_s22  ;;  %p11311_p3 = scmp.lt.s32.totalorder %s11302_s22, %s11302_s22 }
  0x70   : > { %p11305_p12 = pnand %p11303_p10, %p13915_p7  ;;  %p11312_p6 = por %p11311_p3, %p11310_p4 }
  0x72   : > { %p11306_p0 = pneg %p11305_p12 }
  0x74   : > { %p11313_p13 = pnand %p11312_p6, %p11306_p0 }
  0x76   : > { %11316 = shalt.err (!%p11313_p13)
}
  0x77   : > { %p13916_p5 = scmp.ne.s32.totalorder %s13903_s29, 0  ;;  %s11728_s13 = smov [#allocation7]  }
  0x78   : > { %s466_s15 = sshll.u32 %s11728_s13, 4  ;;  %s11729_s26 = smov [#allocation10]   ;;  %s467_s15 = int_to_ptr.vmem [resolvable:$true] %s466_s15 }
  0x79   : > { %10892 = dma.hbm_to_vmem [thread:$0]  (!%p13916_p5), %s13914_s2, 32, %s445_s1, [#allocation5]  }
  0x7a   : > { %s490_s11 = sshll.u32 %s11729_s26, 4  ;;  %s13917_s4 = sld [smem:[#allocation41_spill]]  ;;  %s491_s11 = int_to_ptr.vmem [resolvable:$true] %s490_s11 }
  0x80   : > { %s11317_s12 = scalar_lea.hbm %s13917_s4, 32 }
  0x81   : > { %p11318_p13 = scmp.ne.s32.totalorder %s13917_s4, %s11317_s12  ;;  %p11324_p8 = scmp.lt.u32.totalorder %s11317_s12, %s13917_s4 }
  0x83   : > { %p11320_p11 = pnand %p11318_p13, %p13915_p7 }
  0x85   : > { %p11321_p1 = pneg %p11320_p11 }
  0x87   : > { %p11326_p9 = pnand %p11324_p8, %p11321_p1 }
  0x89   : > { %11329 = shalt.err (!%p11326_p9)
}
  0x8a   : > { %s11330_s1 = scalar_lea.vmem %s467_s15, 32  ;;  %p11338_p4 = scmp.lt.s32.totalorder %s467_s15, %s467_s15 }
  0x8b   : > { %p11331_p10 = scmp.ne.s32.totalorder %s467_s15, %s11330_s1  ;;  %p11339_p3 = scmp.lt.s32.totalorder %s11330_s1, %s11330_s1 }
  0x8d   : > { %p11333_p12 = pnand %p11331_p10, %p13915_p7  ;;  %p11340_p6 = por %p11339_p3, %p11338_p4 }
  0x8f   : > { %p11334_p0 = pneg %p11333_p12 }
  0x91   : > { %p11341_p2 = pnand %p11340_p6, %p11334_p0 }
  0x93   : > { %11344 = shalt.err (!%p11341_p2)
}
  0x94   : > { %10898 = dma.hbm_to_vmem [thread:$0]  (!%p13916_p5), %s13917_s4, 32, %s467_s15, [#allocation8]  }
  0x95   : > { %s11345_s28 = scalar_lea.hbm %s13852_s6, 64 }
  0x96   : > { %p11346_p13 = scmp.ne.s32.totalorder %s13852_s6, %s11345_s28  ;;  %p11352_p2 = scmp.lt.u32.totalorder %s11345_s28, %s13852_s6 }
  0x98   : > { %p11348_p11 = pnand %p11346_p13, %p13915_p7 }
  0x9a   : > { %p11349_p1 = pneg %p11348_p11 }
  0x9c   : > { %p11354_p8 = pnand %p11352_p2, %p11349_p1 }
  0x9e   : > { %11357 = shalt.err (!%p11354_p8)
}
  0x9f   : > { %s11358_s18 = scalar_lea.vmem %s491_s11, 64  ;;  %p11366_p0 = scmp.lt.s32.totalorder %s491_s11, %s491_s11 }
  0xa0   : > { %p11359_p9 = scmp.ne.s32.totalorder %s491_s11, %s11358_s18  ;;  %p11367_p4 = scmp.lt.s32.totalorder %s11358_s18, %s11358_s18 }
  0xa2   : > { %p11361_p10 = pnand %p11359_p9, %p13915_p7  ;;  %p11368_p3 = por %p11367_p4, %p11366_p0 }
  0xa4   : > { %p11362_p12 = pneg %p11361_p10 }
  0xa6   : > { %p11369_p6 = pnand %p11368_p3, %p11362_p12 }
  0xa8   : > { %11372 = shalt.err (!%p11369_p6)
}
  0xa9   : > { %10904 = dma.hbm_to_vmem [thread:$0]  (!%p13916_p5), %s13852_s6, 64, %s491_s11, [#allocation11]  }
  0xaa   : > { %s11730_s19 = smov [#allocation13]   ;;  %s11731_s21 = smov [#allocation16]  }
  0xab   : > { %s512_s13 = sshll.u32 %s11730_s19, 4  ;;  %s536_s26 = sshll.u32 %s11731_s21, 4  ;;  %s513_s13 = int_to_ptr.vmem [resolvable:$true] %s512_s13  ;;  %s537_s26 = int_to_ptr.vmem [resolvable:$true] %s536_s26 }
  0xac   : > { %s11373_s12 = scalar_lea.hbm %s13854_s8, 64 }
  0xad   : > { %p11374_p13 = scmp.ne.s32.totalorder %s13854_s8, %s11373_s12  ;;  %p11380_p2 = scmp.lt.u32.totalorder %s11373_s12, %s13854_s8 }
  0xaf   : > { %p11376_p11 = pnand %p11374_p13, %p13915_p7 }
  0xb1   : > { %p11377_p1 = pneg %p11376_p11 }
  0xb3   : > { %p11382_p8 = pnand %p11380_p2, %p11377_p1 }
  0xb5   : > { %11385 = shalt.err (!%p11382_p8)
}
  0xb6   : > { %s11386_s11 = scalar_lea.vmem %s513_s13, 64  ;;  %p11394_p0 = scmp.lt.s32.totalorder %s513_s13, %s513_s13 }
  0xb7   : > { %p11387_p9 = scmp.ne.s32.totalorder %s513_s13, %s11386_s11  ;;  %p11395_p4 = scmp.lt.s32.totalorder %s11386_s11, %s11386_s11 }
  0xb9   : > { %p11389_p10 = pnand %p11387_p9, %p13915_p7  ;;  %p11396_p3 = por %p11395_p4, %p11394_p0 }
  0xbb   : > { %p11390_p12 = pneg %p11389_p10 }
  0xbd   : > { %p11397_p6 = pnand %p11396_p3, %p11390_p12 }
  0xbf   : > { %11400 = shalt.err (!%p11397_p6)
}
  0xc0   : > { %10910 = dma.hbm_to_vmem [thread:$0]  (!%p13916_p5), %s13854_s8, 64, %s513_s13, [#allocation14]  }
  0xc1   : > { %s13918_s21 = sand.u32 1, %s11715_s23   ;;  %s11401_s22 = scalar_lea.hbm %s13856_s10, 128 }
  0xc2   : > { %s12037_s28 = sshll.u32 %s13918_s21, 5  ;;  %p11402_p13 = scmp.ne.s32.totalorder %s13856_s10, %s11401_s22 }
  0xc3   : > { %p11408_p2 = scmp.lt.u32.totalorder %s11401_s22, %s13856_s10 }
  0xc4   : > { %p11404_p11 = pnand %p11402_p13, %p13915_p7 }
  0xc6   : > { %p11405_p1 = pneg %p11404_p11 }
  0xc8   : > { %p11410_p8 = pnand %p11408_p2, %p11405_p1 }
  0xca   : > { %11413 = shalt.err (!%p11410_p8)
}
  0xcb   : > { %s11414_s13 = scalar_lea.vmem %s537_s26, 128  ;;  %p11422_p0 = scmp.lt.s32.totalorder %s537_s26, %s537_s26 }
  0xcc   : > { %p11415_p9 = scmp.ne.s32.totalorder %s537_s26, %s11414_s13  ;;  %p11423_p4 = scmp.lt.s32.totalorder %s11414_s13, %s11414_s13 }
  0xce   : > { %p11417_p10 = pnand %p11415_p9, %p13915_p7  ;;  %p11424_p3 = por %p11423_p4, %p11422_p0 }
  0xd0   : > { %p11418_p12 = pneg %p11417_p10 }
  0xd2   : > { %p11425_p6 = pnand %p11424_p3, %p11418_p12 }
  0xd4   : > { %11428 = shalt.err (!%p11425_p6)
}
  0xd5   : > { %10916 = dma.hbm_to_vmem [thread:$0]  (!%p13916_p5), %s13856_s10, 128, %s537_s26, [#allocation17]  }
  0xd6   : > { %s13888_s21 = sshll.u32 %s11719_s24, 9  ;;  %s594_s30 = scalar_lea.vmem [#allocation22], %s12037_s28 }
  0xd7   : > { %s12063_s22 = scalar_lea.hbm %s13860_s14, %s13888_s21  ;;  %s602_s18 = sshll.u32 %s594_s30, 4  ;;  %s603_s18 = int_to_ptr.vmem [resolvable:$true] %s602_s18 }
  0xd8   : > { %s11429_s15 = scalar_lea.hbm %s12063_s22, 512  ;;  %p13919_p11 = scmp.ne.s32.totalorder %s13913_s17, 0 }
  0xd9   : > { %p11430_p13 = scmp.ne.s32.totalorder %s12063_s22, %s11429_s15  ;;  %s11434_s13 = scalar_lea.hbm %s13860_s14, 6144 }
  0xda   : > { %p11435_p8 = scmp.lt.u32.totalorder %s12063_s22, %s13860_s14  ;;  %p11436_p9 = scmp.lt.u32.totalorder %s11434_s13, %s11429_s15 }
  0xdb   : > { %p11432_p1 = pnand %p11430_p13, %p13919_p11  ;;  %p11438_p12 = scmp.lt.u32.totalorder %s11429_s15, %s12063_s22 }
  0xdc   : > { %p11437_p10 = por %p11436_p9, %p11435_p8 }
  0xdd   : > { %p11433_p2 = pneg %p11432_p1 }
  0xde   : > { %p11439_p0 = por %p11438_p12, %p11437_p10 }
  0xe0   : > { %p11440_p4 = pnand %p11439_p0, %p11433_p2 }
  0xe2   : > { %11443 = shalt.err (!%p11440_p4)
}
  0xe3   : > { %s11444_s16 = scalar_lea.vmem %s603_s18, 512  ;;  %s11732_s12 = smov [#allocation22]  }
  0xe4   : > { %p11445_p3 = scmp.ne.s32.totalorder %s603_s18, %s11444_s16  ;;  %s11449_s30 = sshll.u32 %s11732_s12, 4  ;;  %s11450_s30 = int_to_ptr.vmem [resolvable:$false] %s11449_s30 }
  0xe5   : > { %s11451_s26 = scalar_lea.vmem %s11450_s30, 1024  ;;  %p11452_p1 = scmp.lt.s32.totalorder %s603_s18, %s11450_s30 }
  0xe6   : > { %p11447_p6 = pnand %p11445_p3, %p13919_p11  ;;  %p11453_p5 = scmp.lt.s32.totalorder %s11451_s26, %s11444_s16 }
  0xe8   : > { %p11448_p13 = pneg %p11447_p6  ;;  %p11454_p7 = por %p11453_p5, %p11452_p1 }
  0xea   : > { %p11455_p8 = pnand %p11454_p7, %p11448_p13 }
  0xec   : > { %11458 = shalt.err (!%p11455_p8)
}
  0xed   : > { %p13920_p9 = scmp.ne.s32.totalorder %s13912_s20, 0  ;;  %s11733_s15 = smov [#allocation6]  }
  0xee   : > { %s455_s11 = sshll.u32 %s11733_s15, 4  ;;  %s11734_s13 = smov [#allocation9]   ;;  %s456_s11 = int_to_ptr.vmem [resolvable:$true] %s455_s11 }
  0xef   : > { %10929 = dma.hbm_to_vmem [thread:$0]  (!%p13920_p9), %s12063_s22, 512, %s603_s18, %s11931_s0  }
  0xf0   : > { %s476_s1 = sshll.u32 %s11734_s13, 4  ;;  %s13921_s3 = sld [smem:[#allocation40_spill]]  ;;  %s477_s1 = int_to_ptr.vmem [resolvable:$true] %s476_s1 }
  0xf1   : > { %p13922_p5 = scmp.ne.s32.totalorder %s13906_s25, 0 }
  0xf6   : > { %s11459_s21 = scalar_lea.hbm %s13921_s3, 32 }
  0xf7   : > { %p11460_p7 = scmp.ne.s32.totalorder %s13921_s3, %s11459_s21  ;;  %p11466_p12 = scmp.lt.u32.totalorder %s11459_s21, %s13921_s3 }
  0xf9   : > { %p11462_p2 = pnand %p11460_p7, %p13922_p5 }
  0xfb   : > { %p11463_p10 = pneg %p11462_p2 }
  0xfd   : > { %p11468_p0 = pnand %p11466_p12, %p11463_p10 }
  0xff   : > { %11471 = shalt.err (!%p11468_p0)
}
 0x100   : > { %s11472_s22 = scalar_lea.vmem %s456_s11, 32  ;;  %p11480_p13 = scmp.lt.s32.totalorder %s456_s11, %s456_s11 }
 0x101   : > { %p11473_p4 = scmp.ne.s32.totalorder %s456_s11, %s11472_s22  ;;  %p11481_p1 = scmp.lt.s32.totalorder %s11472_s22, %s11472_s22 }
 0x103   : > { %p11475_p3 = pnand %p11473_p4, %p13922_p5  ;;  %p11482_p8 = por %p11481_p1, %p11480_p13 }
 0x105   : > { %p11476_p6 = pneg %p11475_p3 }
 0x107   : > { %p11483_p9 = pnand %p11482_p8, %p11476_p6 }
 0x109   : > { %11486 = shalt.err (!%p11483_p9)
}
 0x10a   : > { %p13923_p7 = scmp.ne.s32.totalorder %s13903_s29, 0  ;;  %s11487_s13 = scalar_lea.hbm %s13851_s5, 8192 }
 0x10b   : > { %p11488_p2 = scmp.ne.s32.totalorder %s13851_s5, %s11487_s13  ;;  %p11494_p9 = scmp.lt.u32.totalorder %s11487_s13, %s13851_s5 }
 0x10c   : > { %10895 = dma.hbm_to_vmem [thread:$0]  (!%p13923_p7), %s13921_s3, 32, %s456_s11, [#allocation5]  }
 0x10d   : > { %p11490_p10 = pnand %p11488_p2, %p13922_p5 }
 0x10f   : > { %p11491_p12 = pneg %p11490_p10 }
 0x111   : > { %p11496_p0 = pnand %p11494_p9, %p11491_p12 }
 0x113   : > { %11499 = shalt.err (!%p11496_p0)
}
 0x114   : > { %s11500_s26 = scalar_lea.vmem %s477_s1, 8192  ;;  %p11508_p13 = scmp.lt.s32.totalorder %s477_s1, %s477_s1 }
 0x115   : > { %p11501_p4 = scmp.ne.s32.totalorder %s477_s1, %s11500_s26  ;;  %p11509_p1 = scmp.lt.s32.totalorder %s11500_s26, %s11500_s26 }
 0x117   : > { %p11503_p3 = pnand %p11501_p4, %p13922_p5  ;;  %p11510_p8 = por %p11509_p1, %p11508_p13 }
 0x119   : > { %p11504_p6 = pneg %p11503_p3 }
 0x11b   : > { %p11511_p11 = pnand %p11510_p8, %p11504_p6 }
 0x11d   : > { %11514 = shalt.err (!%p11511_p11)
}
 0x11e   : > { %s11735_s11 = smov 16   ;;  %s13924_s22 = smov 256  }
 0x11f   : > { %10901 = dma.hbm_to_vmem [thread:$0]  (!%p13923_p7), %s13851_s5, 8192, %s477_s1, [#allocation8], %s13924_s22, %s13924_s22, %s11735_s11  }
 0x120   : > { %s11736_s2 = smov [#allocation12]   ;;  %s11737_s13 = smov [#allocation15]  }
 0x121   : > { %s501_s21 = sshll.u32 %s11736_s2, 4  ;;  %s522_s19 = sshll.u32 %s11737_s13, 4  ;;  %s502_s21 = int_to_ptr.vmem [resolvable:$true] %s501_s21  ;;  %s12122_s19 = int_to_ptr.vmem [resolvable:$true] %s522_s19 }
 0x122   : > { %s11515_s16 = scalar_lea.hbm %s13853_s7, 64 }
 0x123   : > { %p11516_p11 = scmp.ne.s32.totalorder %s13853_s7, %s11515_s16  ;;  %p11522_p12 = scmp.lt.u32.totalorder %s11515_s16, %s13853_s7 }
 0x125   : > { %p11518_p2 = pnand %p11516_p11, %p13922_p5 }
 0x127   : > { %p11519_p10 = pneg %p11518_p2 }
 0x129   : > { %p11524_p9 = pnand %p11522_p12, %p11519_p10 }
 0x12b   : > { %11527 = shalt.err (!%p11524_p9)
}
 0x12c   : > { %s11528_s11 = scalar_lea.vmem %s502_s21, 64  ;;  %p11536_p6 = scmp.lt.s32.totalorder %s502_s21, %s502_s21 }
 0x12d   : > { %p11529_p0 = scmp.ne.s32.totalorder %s502_s21, %s11528_s11  ;;  %p11537_p13 = scmp.lt.s32.totalorder %s11528_s11, %s11528_s11 }
 0x12f   : > { %p11531_p4 = pnand %p11529_p0, %p13922_p5  ;;  %p11538_p1 = por %p11537_p13, %p11536_p6 }
 0x131   : > { %p11532_p3 = pneg %p11531_p4 }
 0x133   : > { %p11539_p8 = pnand %p11538_p1, %p11532_p3 }
 0x135   : > { %11542 = shalt.err (!%p11539_p8)
}
 0x136   : > { %10907 = dma.hbm_to_vmem [thread:$0]  (!%p13923_p7), %s13853_s7, 64, %s502_s21, [#allocation11]  }
 0x137   : > { %s11543_s13 = scalar_lea.hbm %s13855_s9, 32768 }
 0x138   : > { %p11544_p11 = scmp.ne.s32.totalorder %s13855_s9, %s11543_s13  ;;  %p11550_p12 = scmp.lt.u32.totalorder %s11543_s13, %s13855_s9 }
 0x13a   : > { %p11546_p2 = pnand %p11544_p11, %p13922_p5 }
 0x13c   : > { %p11547_p10 = pneg %p11546_p2 }
 0x13e   : > { %p11552_p9 = pnand %p11550_p12, %p11547_p10 }
 0x140   : > { %11555 = shalt.err (!%p11552_p9)
}
 0x141   : > { %s11556_s21 = scalar_lea.vmem %s12122_s19, 32768  ;;  %p11564_p6 = scmp.lt.s32.totalorder %s12122_s19, %s12122_s19 }
 0x142   : > { %p11557_p0 = scmp.ne.s32.totalorder %s12122_s19, %s11556_s21  ;;  %p11565_p13 = scmp.lt.s32.totalorder %s11556_s21, %s11556_s21 }
 0x144   : > { %p11559_p4 = pnand %p11557_p0, %p13922_p5  ;;  %p11566_p1 = por %p11565_p13, %p11564_p6 }
 0x146   : > { %p11560_p3 = pneg %p11559_p4 }
 0x148   : > { %p11567_p8 = pnand %p11566_p1, %p11560_p3 }
 0x14a   : > { %11570 = shalt.err (!%p11567_p8)
}
 0x14b   : > { %s11738_s18 = smov 512   ;;  %s11739_s1 = smov 32  }
 0x14c   : > { %10913 = dma.hbm_to_vmem [thread:$0]  (!%p13923_p7), %s13855_s9, 32768, %s12122_s19, [#allocation14], %s11738_s18, %s11738_s18, %s11739_s1  }
 0x14d   : > { %s11740_s22 = smov [#allocation18]   ;;  %s11741_s2 = smov [#allocation19]  }
 0x14e   : > { %s547_s15 = sshll.u32 %s11740_s22, 4  ;;  %s558_s13 = sshll.u32 %s11741_s2, 4  ;;  %s548_s15 = int_to_ptr.vmem [resolvable:$true] %s547_s15  ;;  %s12165_s13 = int_to_ptr.vmem [resolvable:$true] %s558_s13 }
 0x14f   : > { %s13925_s16 = sld [smem:[#allocation42_spill]] }
 0x155   : > { %s11571_s26 = scalar_lea.hbm %s13925_s16, 128 }
 0x156   : > { %p11572_p11 = scmp.ne.s32.totalorder %s13925_s16, %s11571_s26  ;;  %p11578_p12 = scmp.lt.u32.totalorder %s11571_s26, %s13925_s16 }
 0x158   : > { %p11574_p2 = pnand %p11572_p11, %p13922_p5 }
 0x15a   : > { %p11575_p10 = pneg %p11574_p2 }
 0x15c   : > { %p11580_p9 = pnand %p11578_p12, %p11575_p10 }
 0x15e   : > { %11583 = shalt.err (!%p11580_p9)
}
 0x15f   : > { %s11584_s18 = scalar_lea.vmem %s548_s15, 128  ;;  %p11592_p6 = scmp.lt.s32.totalorder %s548_s15, %s548_s15 }
 0x160   : > { %p11585_p0 = scmp.ne.s32.totalorder %s548_s15, %s11584_s18  ;;  %p11593_p13 = scmp.lt.s32.totalorder %s11584_s18, %s11584_s18 }
 0x162   : > { %p11587_p4 = pnand %p11585_p0, %p13922_p5  ;;  %p11594_p1 = por %p11593_p13, %p11592_p6 }
 0x164   : > { %p11588_p3 = pneg %p11587_p4 }
 0x166   : > { %p11595_p8 = pnand %p11594_p1, %p11588_p3 }
 0x168   : > { %11598 = shalt.err (!%p11595_p8)
}
 0x169   : > { %10919 = dma.hbm_to_vmem [thread:$0]  (!%p13923_p7), %s13925_s16, 128, %s548_s15, [#allocation17]  }
 0x16a   : > { %s13926_s2 = sld [smem:[#allocation43_spill]] }
 0x170   : > { %s11599_s12 = scalar_lea.hbm %s13926_s2, 128 }
 0x171   : > { %p11600_p11 = scmp.ne.s32.totalorder %s13926_s2, %s11599_s12  ;;  %p11606_p12 = scmp.lt.u32.totalorder %s11599_s12, %s13926_s2 }
 0x173   : > { %p11602_p2 = pnand %p11600_p11, %p13922_p5 }
 0x175   : > { %p11603_p10 = pneg %p11602_p2 }
 0x177   : > { %p11608_p9 = pnand %p11606_p12, %p11603_p10 }
 0x179   : > { %11611 = shalt.err (!%p11608_p9)
}
 0x17a   : > { %s11612_s15 = scalar_lea.vmem %s12165_s13, 128  ;;  %p11620_p6 = scmp.lt.s32.totalorder %s12165_s13, %s12165_s13 }
 0x17b   : > { %p11613_p0 = scmp.ne.s32.totalorder %s12165_s13, %s11612_s15  ;;  %p11621_p13 = scmp.lt.s32.totalorder %s11612_s15, %s11612_s15 }
 0x17d   : > { %p11615_p4 = pnand %p11613_p0, %p13922_p5  ;;  %p11622_p1 = por %p11621_p13, %p11620_p6 }
 0x17f   : > { %p11616_p3 = pneg %p11615_p4 }
 0x181   : > { %p11623_p8 = pnand %p11622_p1, %p11616_p3 }
 0x183   : > { %11626 = shalt.err (!%p11623_p8)
}
 0x184   : > { %10922 = dma.hbm_to_vmem [thread:$0]  (!%p13923_p7), %s13926_s2, 128, %s12165_s13, [#allocation20]  }
 0x185   : > { %s13927_s4 = sshll.u32 %s11719_s24, 9  ;;  %s13928_s3 = sld [smem:[#allocation45_spill]] }
 0x186   : > { %s613_s12 = scalar_lea.vmem [#allocation23], %s12037_s28  ;;  %p13929_p11 = scmp.ne.s32.totalorder %s13913_s17, 0 }
 0x187   : > { %s621_s29 = sshll.u32 %s613_s12, 4  ;;  %s622_s29 = int_to_ptr.vmem [resolvable:$true] %s621_s29 }
 0x18b   : > { %s12213_s22 = scalar_lea.hbm %s13928_s3, %s13927_s4  ;;  %s11632_s24 = scalar_lea.hbm %s13928_s3, 6144 }
 0x18c   : > { %s11627_s30 = scalar_lea.hbm %s12213_s22, 512  ;;  %p11633_p7 = scmp.lt.u32.totalorder %s12213_s22, %s13928_s3 }
 0x18d   : > { %p11628_p5 = scmp.ne.s32.totalorder %s12213_s22, %s11627_s30  ;;  %p11634_p12 = scmp.lt.u32.totalorder %s11632_s24, %s11627_s30 }
 0x18e   : > { %p11636_p0 = scmp.lt.u32.totalorder %s11627_s30, %s12213_s22 }
 0x18f   : > { %p11630_p2 = pnand %p11628_p5, %p13929_p11  ;;  %p11635_p9 = por %p11634_p12, %p11633_p7 }
 0x191   : > { %p11631_p10 = pneg %p11630_p2  ;;  %p11637_p4 = por %p11636_p0, %p11635_p9 }
 0x193   : > { %p11638_p3 = pnand %p11637_p4, %p11631_p10 }
 0x195   : > { %11641 = shalt.err (!%p11638_p3)
}
 0x196   : > { %s11642_s28 = scalar_lea.vmem %s622_s29, 512  ;;  %s11742_s15 = smov [#allocation23]  }
 0x197   : > { %p11643_p6 = scmp.ne.s32.totalorder %s622_s29, %s11642_s28  ;;  %s11647_s19 = sshll.u32 %s11742_s15, 4  ;;  %s11648_s19 = int_to_ptr.vmem [resolvable:$false] %s11647_s19 }
 0x198   : > { %s11649_s18 = scalar_lea.vmem %s11648_s19, 1024  ;;  %p11650_p8 = scmp.lt.s32.totalorder %s622_s29, %s11648_s19 }
 0x199   : > { %p11645_p13 = pnand %p11643_p6, %p13929_p11  ;;  %p11651_p5 = scmp.lt.s32.totalorder %s11649_s18, %s11642_s28 }
 0x19b   : > { %p11646_p1 = pneg %p11645_p13  ;;  %p11652_p2 = por %p11651_p5, %p11650_p8 }
 0x19d   : > { %p11653_p7 = pnand %p11652_p2, %p11646_p1 }
 0x19f   : > { %11656 = shalt.err (!%p11653_p7)
}
 0x1a0   : > { %p13930_p12 = scmp.ne.s32.totalorder %s13912_s20, 0  ;;  %s13931_s4 = sld [smem:[#allocation33_spill]] }
 0x1a2   : > { %10932 = dma.hbm_to_vmem [thread:$0]  (!%p13930_p12), %s12213_s22, 512, %s622_s29, %s11931_s0  }
 0x1a6   : > { %p13932_p10 = scmp.ne.s32.totalorder %s13931_s4, 0 }
 0x1a7   : > { %p13933_p11 = scmp.eq.s32.totalorder (!%p13932_p10), %s11851_s27, 0 }
 0x1a8   : > { %630 = sbr.rel (%p13932_p10) target bundleno = 3602 (0xe12), region = 84 }
 0x1af   : > { %11674 = dma.done.wait (%p13933_p11), [#allocation3], 2048   ;;  %p13934_p9 = pmov %p13933_p11 }
 0x1b1   : > { %11676 = vsyncadd (%p13934_p9), [#allocation3], 4294965248  ;;  %p13935_p0 = pmov %p13934_p9 }
 0x1b3   : > { %11678 = dma.done.wait (%p13935_p0), [#allocation5], 64   ;;  %p13936_p4 = pmov %p13935_p0 }
 0x1b4   : > { %p13937_p3 = pmov %p13935_p0 }
 0x1b5   : > { %11680 = vsyncadd (%p13936_p4), [#allocation5], 4294967232 }
 0x1b6   : > { %11682 = dma.done.wait (%p13937_p3), [#allocation8], 8224   ;;  %p13938_p6 = pmov %p13935_p0 }
 0x1b7   : > { %p13939_p13 = pmov %p13935_p0 }
 0x1b8   : > { %11684 = vsyncadd (%p13938_p6), [#allocation8], 4294959072 }
 0x1b9   : > { %11686 = dma.done.wait (%p13939_p13), [#allocation11], 128   ;;  %p13940_p1 = pmov %p13935_p0 }
 0x1ba   : > { %p13941_p8 = pmov %p13935_p0 }
 0x1bb   : > { %11688 = vsyncadd (%p13940_p1), [#allocation11], 4294967168 }
 0x1bc   : > { %11690 = dma.done.wait (%p13941_p8), [#allocation14], 32832   ;;  %p13942_p5 = pmov %p13935_p0 }
 0x1bd   : > { %p13943_p2 = pmov %p13935_p0 }
 0x1be   : > { %11692 = vsyncadd (%p13942_p5), [#allocation14], 4294934464 }
 0x1bf   : > { %11694 = dma.done.wait (%p13943_p2), [#allocation17], 256   ;;  %p13944_p7 = pmov %p13935_p0 }
 0x1c0   : > { %p13945_p12 = pmov %p13935_p0 }
 0x1c1   : > { %11696 = vsyncadd (%p13944_p7), [#allocation17], 4294967040 }
 0x1c2   : > { %11698 = dma.done.wait (%p13945_p12), [#allocation20], 128   ;;  %p13946_p10 = pmov %p13935_p0 }
 0x1c3   : > { %s13947_s0 = sld [smem:[#allocation32_spill]]  ;;  %s13948_s20 = sld [smem:[#allocation36_spill]] }
 0x1c4   : > { %11700 = vsyncadd (%p13946_p10), [#allocation20], 4294967168  ;;  %s680_s17 = sand.u32 1, %s11851_s27  }
 0x1c5   : > { %s681_s22 = scalar_lea.sflag [#allocation3], %s680_s17 }
 0x1c9   : > { %s682_s25 = sand.u32 1, %s13947_s0   ;;  %p13949_p11 = scmp.ne.s32.totalorder %s13948_s20, 0 }
 0x1ca   : > { %s10269_s1 = sshll.u32 %s682_s25, 13 }
 0x1cb   : > { %s12268_s12 = scalar_lea.vmem [#allocation21], %s10269_s1 }
 0x1cc   : > { %11702 = dma.done.wait (%p13949_p11), %s681_s22, 132096  }
 0x1cd   : > { %11704 = vsyncadd (%p13949_p11), %s681_s22, 4294835200  ;;  %v11743_v0 = vmov 0   ;;  %v11011_v1 = vld [vmem:[#allocation2 + $0x4] ss:$8 sps:$4 sm:$0xff]   ;;  %v11013_v2 = vld [vmem:[#allocation2] ss:$8 sps:$4 sm:$0xff]  }
 0x1ce   : > { %917 = vmatprep.mubr.bf16.mxu0 %v11743_v0  ;;  %885 = vmatprep.subr.bf16.mxu0 %v11011_v1  ;;  %v11014_v3 = vld [vmem:[#allocation2 + $0x14] ss:$8 sps:$4 sm:$0xff]   ;;  %v11016_v4 = vld [vmem:[#allocation2 + $0x10] ss:$8 sps:$4 sm:$0xff]   ;;  %v11017_v5 = vld [vmem:[#allocation2 + $0x24] ss:$8 sps:$4 sm:$0xff]  }
 0x1cf   : > { %886 = vmatpush1.bf16.msra.mxu0 %v11013_v2  ;;  %v11019_v6 = vld [vmem:[#allocation2 + $0x20] ss:$8 sps:$4 sm:$0xff]   ;;  %v11020_v7 = vld [vmem:[#allocation2 + $0x34] ss:$8 sps:$4 sm:$0xff]   ;;  %v11022_v8 = vld [vmem:[#allocation2 + $0x30] ss:$8 sps:$4 sm:$0xff]  }
 0x1d0   : > { %887 = vmatprep.subr.bf16.mxu0 %v11014_v3  ;;  %v11023_v9 = vld [vmem:[#allocation2 + $0x44] ss:$8 sps:$4 sm:$0xff]   ;;  %v11025_v10 = vld [vmem:[#allocation2 + $0x40] ss:$8 sps:$4 sm:$0xff]   ;;  %v11026_v11 = vld [vmem:[#allocation2 + $0x54] ss:$8 sps:$4 sm:$0xff]  }
 0x1d1   : > { %v11028_v12 = vld [vmem:[#allocation2 + $0x50] ss:$8 sps:$4 sm:$0xff]   ;;  %v11029_v13 = vld [vmem:[#allocation2 + $0x64] ss:$8 sps:$4 sm:$0xff]   ;;  %v11031_v14 = vld [vmem:[#allocation2 + $0x60] ss:$8 sps:$4 sm:$0xff]  }
 0x1d2   : > { %v11032_v15 = vld [vmem:[#allocation2 + $0x74] ss:$8 sps:$4 sm:$0xff]   ;;  %v11034_v16 = vld [vmem:[#allocation2 + $0x70] ss:$8 sps:$4 sm:$0xff]   ;;  %s13950_s26 = sld [smem:[#allocation37_spill]]  ;;  %s10270_s13 = sshll.u32 %s682_s25, 5 }
 0x1d3   : > { %888 = vmatpush1.bf16.msra.mxu0 %v11016_v4  ;;  %v11035_v19 = vld [vmem:[#allocation9 + $0x4] ss:$16 sps:$4 sm:$0xff]   ;;  %v11039_v20 = vld [vmem:[#allocation9 + $0xc] ss:$16 sps:$4 sm:$0xff]   ;;  %v11037_v21 = vld [vmem:[#allocation9 + $0x8] ss:$16 sps:$4 sm:$0xff]  }
 0x1d4   : > { %889 = vmatprep.subr.bf16.mxu0 %v11017_v5  ;;  %v11040_v22 = vld [vmem:[#allocation9] ss:$16 sps:$4 sm:$0xff]   ;;  %1410 = vmatprep.subr.bf16.mxu1 %v11035_v19  ;;  %v11041_v23 = vld [vmem:[#allocation9 + $0x24] ss:$16 sps:$4 sm:$0xff]   ;;  %v11045_v24 = vld [vmem:[#allocation9 + $0x2c] ss:$16 sps:$4 sm:$0xff]   ;;  %v770_v19 = vlaneseq }
 0x1d5   : > { %1411 = vmatpush1.bf16.msra.mxu1 %v11040_v22  ;;  %v11043_v25 = vld [vmem:[#allocation9 + $0x28] ss:$16 sps:$4 sm:$0xff]   ;;  %v11046_v26 = vld [vmem:[#allocation9 + $0x20] ss:$16 sps:$4 sm:$0xff]   ;;  %v11047_v27 = vld [vmem:[#allocation9 + $0x44] ss:$16 sps:$4 sm:$0xff]  }
 0x1d6   : > { %1412 = vmatprep.subr.bf16.mxu1 %v11041_v23  ;;  %v11051_v28 = vld [vmem:[#allocation9 + $0x4c] ss:$16 sps:$4 sm:$0xff]   ;;  %v11049_v29 = vld [vmem:[#allocation9 + $0x48] ss:$16 sps:$4 sm:$0xff]   ;;  %v11052_v30 = vld [vmem:[#allocation9 + $0x40] ss:$16 sps:$4 sm:$0xff]  }
 0x1d7   : > { %890 = vmatpush1.bf16.msra.mxu0 %v11019_v6  ;;  %v11053_v31 = vld [vmem:[#allocation9 + $0x64] ss:$16 sps:$4 sm:$0xff]   ;;  %v11057_v32 = vld [vmem:[#allocation9 + $0x6c] ss:$16 sps:$4 sm:$0xff]   ;;  %v11055_v33 = vld [vmem:[#allocation9 + $0x68] ss:$16 sps:$4 sm:$0xff]  }
 0x1d8   : > { %891 = vmatprep.subr.bf16.mxu0 %v11020_v7  ;;  %v775_v17 = vld [vmem:[%s13950_s26] sm:$0xff]  ;;  %v11059_v35 = vld [vmem:[#allocation9 + $0x84] ss:$16 sps:$4 sm:$0xff]   ;;  %s12797_s24 = scalar_lea.vmem [#allocation22], %s10270_s13  ;;  %s12800_s21 = scalar_lea.vmem [#allocation23], %s10270_s13 }
 0x1d9   : > { %v776_v18 = vpack.c.bf16 %v775_v17, %v775_v17  ;;  %1413 = vmatpush1.bf16.msra.mxu1 %v11046_v26  ;;  %v11058_v34 = vld [vmem:[#allocation9 + $0x60] ss:$16 sps:$4 sm:$0xff]   ;;  %v11063_v36 = vld [vmem:[#allocation9 + $0x8c] ss:$16 sps:$4 sm:$0xff]   ;;  %v11061_v37 = vld [vmem:[#allocation9 + $0x88] ss:$16 sps:$4 sm:$0xff]  }
 0x1da   : > { %1414 = vmatprep.subr.bf16.mxu1 %v11047_v27  ;;  %v11064_v38 = vld [vmem:[#allocation9 + $0x80] ss:$16 sps:$4 sm:$0xff]   ;;  %v11065_v39 = vld [vmem:[#allocation9 + $0xa4] ss:$16 sps:$4 sm:$0xff]   ;;  %v11069_v40 = vld [vmem:[#allocation9 + $0xac] ss:$16 sps:$4 sm:$0xff]  }
 0x1db   : > { %892 = vmatpush1.bf16.msra.mxu0 %v11022_v8  ;;  %v11067_v41 = vld [vmem:[#allocation9 + $0xa8] ss:$16 sps:$4 sm:$0xff]   ;;  %v11070_v42 = vld [vmem:[#allocation9 + $0xa0] ss:$16 sps:$4 sm:$0xff]   ;;  %v11071_v43 = vld [vmem:[#allocation9 + $0xc4] ss:$16 sps:$4 sm:$0xff]  }
 0x1dc   : > { %893 = vmatprep.subr.bf16.mxu0 %v11023_v9  ;;  %v11075_v44 = vld [vmem:[#allocation9 + $0xcc] ss:$16 sps:$4 sm:$0xff]   ;;  %v11073_v45 = vld [vmem:[#allocation9 + $0xc8] ss:$16 sps:$4 sm:$0xff]   ;;  %v11076_v46 = vld [vmem:[#allocation9 + $0xc0] ss:$16 sps:$4 sm:$0xff]  }
 0x1dd   : > { %1415 = vmatpush1.bf16.msra.mxu1 %v11052_v30  ;;  %v11077_v47 = vld [vmem:[#allocation9 + $0xe4] ss:$16 sps:$4 sm:$0xff]   ;;  %v11081_v48 = vld [vmem:[#allocation9 + $0xec] ss:$16 sps:$4 sm:$0xff]   ;;  %v11079_v49 = vld [vmem:[#allocation9 + $0xe8] ss:$16 sps:$4 sm:$0xff]  }
 0x1de   : > { %1416 = vmatprep.subr.bf16.mxu1 %v11053_v31  ;;  %v11082_v50 = vld [vmem:[#allocation9 + $0xe0] ss:$16 sps:$4 sm:$0xff]   ;;  %v11083_v51 = vld [vmem:[#allocation9 + $0x104] ss:$16 sps:$4 sm:$0xff]   ;;  %v11087_v52 = vld [vmem:[#allocation9 + $0x10c] ss:$16 sps:$4 sm:$0xff]  }
 0x1df   : > { %894 = vmatpush1.bf16.msra.mxu0 %v11025_v10  ;;  %v11085_v53 = vld [vmem:[#allocation9 + $0x108] ss:$16 sps:$4 sm:$0xff]   ;;  %v11088_v54 = vld [vmem:[#allocation9 + $0x100] ss:$16 sps:$4 sm:$0xff]   ;;  %v11089_v55 = vld [vmem:[#allocation9 + $0x124] ss:$16 sps:$4 sm:$0xff]  }
 0x1e0   : > { %895 = vmatprep.subr.bf16.mxu0 %v11026_v11  ;;  %v11093_v56 = vld [vmem:[#allocation9 + $0x12c] ss:$16 sps:$4 sm:$0xff]   ;;  %v11091_v57 = vld [vmem:[#allocation9 + $0x128] ss:$16 sps:$4 sm:$0xff]   ;;  %v11094_v58 = vld [vmem:[#allocation9 + $0x120] ss:$16 sps:$4 sm:$0xff]  }
 0x1e1   : > { %1417 = vmatpush1.bf16.msra.mxu1 %v11058_v34  ;;  %v11095_v59 = vld [vmem:[#allocation9 + $0x144] ss:$16 sps:$4 sm:$0xff]   ;;  %v11099_v60 = vld [vmem:[#allocation9 + $0x14c] ss:$16 sps:$4 sm:$0xff]   ;;  %v11097_v61 = vld [vmem:[#allocation9 + $0x148] ss:$16 sps:$4 sm:$0xff]  }
 0x1e2   : > { %1418 = vmatprep.subr.bf16.mxu1 %v11059_v35  ;;  %v11100_v62 = vld [vmem:[#allocation9 + $0x140] ss:$16 sps:$4 sm:$0xff]   ;;  %v11101_v63 = vld [vmem:[#allocation9 + $0x164] ss:$16 sps:$4 sm:$0xff]   ;;  %v11105_v0 = vld [vmem:[#allocation9 + $0x16c] ss:$16 sps:$4 sm:$0xff]  }
 0x1e3   : > { %896 = vmatpush1.bf16.msra.mxu0 %v11028_v12  ;;  %v11103_v1 = vld [vmem:[#allocation9 + $0x168] ss:$16 sps:$4 sm:$0xff]   ;;  %v11106_v2 = vld [vmem:[#allocation9 + $0x160] ss:$16 sps:$4 sm:$0xff]   ;;  %v11107_v3 = vld [vmem:[#allocation9 + $0x184] ss:$16 sps:$4 sm:$0xff]  }
 0x1e4   : > { %897 = vmatprep.subr.bf16.mxu0 %v11029_v13  ;;  %v11111_v4 = vld [vmem:[#allocation9 + $0x18c] ss:$16 sps:$4 sm:$0xff]   ;;  %v11109_v5 = vld [vmem:[#allocation9 + $0x188] ss:$16 sps:$4 sm:$0xff]   ;;  %v11112_v6 = vld [vmem:[#allocation9 + $0x180] ss:$16 sps:$4 sm:$0xff]  }
 0x1e5   : > { %1419 = vmatpush1.bf16.msra.mxu1 %v11064_v38  ;;  %v11113_v7 = vld [vmem:[#allocation9 + $0x1a4] ss:$16 sps:$4 sm:$0xff]   ;;  %v11117_v8 = vld [vmem:[#allocation9 + $0x1ac] ss:$16 sps:$4 sm:$0xff]   ;;  %v11115_v9 = vld [vmem:[#allocation9 + $0x1a8] ss:$16 sps:$4 sm:$0xff]  }
 0x1e6   : > { %1420 = vmatprep.subr.bf16.mxu1 %v11065_v39  ;;  %v11118_v10 = vld [vmem:[#allocation9 + $0x1a0] ss:$16 sps:$4 sm:$0xff]   ;;  %v11119_v11 = vld [vmem:[#allocation9 + $0x1c4] ss:$16 sps:$4 sm:$0xff]   ;;  %v11123_v12 = vld [vmem:[#allocation9 + $0x1cc] ss:$16 sps:$4 sm:$0xff]  }
 0x1e7   : > { %898 = vmatpush1.bf16.msra.mxu0 %v11031_v14  ;;  %v11121_v13 = vld [vmem:[#allocation9 + $0x1c8] ss:$16 sps:$4 sm:$0xff]   ;;  %v11124_v14 = vld [vmem:[#allocation9 + $0x1c0] ss:$16 sps:$4 sm:$0xff]   ;;  %v11744_v26 = vmov 0.0   ;;  %s10272_s11 = sshll.u32 %s11851_s27, 5 }
 0x1e8   : > { %899 = vmatprep.subr.bf16.mxu0 %v11032_v15  ;;  %v11125_v15 = vld [vmem:[#allocation9 + $0x1e4] ss:$16 sps:$4 sm:$0xff]   ;;  %v11127_v17 = vld [vmem:[#allocation9 + $0x1e8] ss:$16 sps:$4 sm:$0xff]   ;;  %p12818_p9 = scmp.lt.s32.totalorder %s10272_s11, 383  ;;  %s13952_s18 = sld [smem:[#allocation46_spill]] }
 0x1e9   : > { %1421 = vmatpush1.bf16.msra.mxu1 %v11070_v42  ;;  %v793_v22 = vld [vmem:[#allocation4] sm:$0x3] }
 0x1ea   : > { %1422 = vmatprep.subr.bf16.mxu1 %v11071_v43  ;;  %s13959_s11 = smov (!%p12818_p9, %s10272_s11), 383 }
 0x1eb   : > { %900 = vmatpush1.bf16.msra.mxu0 %v11034_v16  ;;  %v11129_v16 = vld [vmem:[#allocation9 + $0x1ec] ss:$16 sps:$4 sm:$0xff]   ;;  %s10273_s15 = sshll.u32 %s13959_s11, 3 }
 0x1ec   : > { %1451 = vmatprep.subr.bf16.mxu0 %v11039_v20  ;;  %v12277_v20 = vshrl.u32 %v770_v19, 7 }
 0x1ed   : > { %1423 = vmatpush1.bf16.msra.mxu1 %v11076_v46 }
 0x1ee   : > { %918 = vmatmul.mubr.bf16.vlgmr.msra.gmra.mrb[0].mxu0 %v776_v18  ;;  %1424 = vmatprep.subr.bf16.mxu1 %v11077_v47  ;;  %v11130_v18 = vld [vmem:[#allocation9 + $0x1e0] ss:$16 sps:$4 sm:$0xff]   ;;  %v12283_v23 = vsub.s32 1, %v12277_v20  ;;  %vm772_vm0 = vcmp.lt.s32.totalorder %v12277_v20, 4  ;;  %s12834_s4 = scalar_lea.vmem %s13952_s18, %s10273_s15 }
 0x1ef   : > { %1452 = vmatpush1.bf16.msra.mxu0 %v11037_v21  ;;  %v12280_v21 = vsub.s32 0, %v12277_v20  ;;  %v12288_v27 = vsel %vm772_vm0, 1.0, %v11744_v26 }
 0x1f0   : > { %1453 = vmatprep.subr.bf16.mxu0 %v11045_v24 }
 0x1f1   : > { %1425 = vmatpush1.bf16.msra.mxu1 %v11082_v50  ;;  %v798_v24 = vrot.slane %v793_v22, %v12280_v21 }
 0x1f2   : > { %1426 = vmatprep.subr.bf16.mxu1 %v11083_v51 }
 0x1f3   : > { %1454 = vmatpush1.bf16.msra.mxu0 %v11043_v25  ;;  %v802_v25 = vrot.slane %v793_v22, %v12283_v23 }
 0x1f4   : > { %1455 = vmatprep.subr.bf16.mxu0 %v11051_v28 }
 0x1f5   : > { %1427 = vmatpush1.bf16.msra.mxu1 %v11088_v54 }
 0x1f6   : > { %1428 = vmatprep.subr.bf16.mxu1 %v11089_v55 }
 0x1f7   : > { %1456 = vmatpush1.bf16.msra.mxu0 %v11049_v29 }
 0x1f8   : > { %1457 = vmatprep.subr.bf16.mxu0 %v11057_v32 }
 0x1f9   : > { %1429 = vmatpush1.bf16.msra.mxu1 %v11094_v58 }
 0x1fa   : > { %1430 = vmatprep.subr.bf16.mxu1 %v11095_v59 }
 0x1fb   : > { %1458 = vmatpush1.bf16.msra.mxu0 %v11055_v33 }
 0x1fc   : > { %1459 = vmatprep.subr.bf16.mxu0 %v11063_v36 }
 0x1fd   : > { %1431 = vmatpush1.bf16.msra.mxu1 %v11100_v62 }
 0x1fe   : > { %1432 = vmatprep.subr.bf16.mxu1 %v11101_v63 }
 0x1ff   : > { %1460 = vmatpush1.bf16.msra.mxu0 %v11061_v37 }
 0x200   : > { %1461 = vmatprep.subr.bf16.mxu0 %v11069_v40 }
 0x201   : > { %1433 = vmatpush1.bf16.msra.mxu1 %v11106_v2 }
 0x202   : > { %1434 = vmatprep.subr.bf16.mxu1 %v11107_v3 }
 0x203   : > { %1462 = vmatpush1.bf16.msra.mxu0 %v11067_v41 }
 0x204   : > { %1463 = vmatprep.subr.bf16.mxu0 %v11075_v44 }
 0x205   : > { %1435 = vmatpush1.bf16.msra.mxu1 %v11112_v6 }
 0x206   : > { %1436 = vmatprep.subr.bf16.mxu1 %v11113_v7 }
 0x207   : > { %1464 = vmatpush1.bf16.msra.mxu0 %v11073_v45 }
 0x208   : > { %1465 = vmatprep.subr.bf16.mxu0 %v11081_v48 }
 0x209   : > { %1437 = vmatpush1.bf16.msra.mxu1 %v11118_v10 }
 0x20a   : > { %1438 = vmatprep.subr.bf16.mxu1 %v11119_v11 }
 0x20b   : > { %1466 = vmatpush1.bf16.msra.mxu0 %v11079_v49 }
 0x20c   : > { %1467 = vmatprep.subr.bf16.mxu0 %v11087_v52 }
 0x20d   : > { %1439 = vmatpush1.bf16.msra.mxu1 %v11124_v14 }
 0x20e   : > { %1440 = vmatprep.subr.bf16.mxu1 %v11125_v15 }
 0x20f   : > { %1468 = vmatpush1.bf16.msra.mxu0 %v11085_v53 }
 0x210   : > { %1469 = vmatprep.subr.bf16.mxu0 %v11093_v56 }
 0x211   : > { %1441 = vmatpush1.bf16.msra.mxu1 %v11130_v18 }
 0x213   : > { %1470 = vmatpush1.bf16.msra.mxu0 %v11091_v57 }
 0x214   : > { %1471 = vmatprep.subr.bf16.mxu0 %v11099_v60 }
 0x217   : > { %1472 = vmatpush1.bf16.msra.mxu0 %v11097_v61 }
 0x218   : > { %1473 = vmatprep.subr.bf16.mxu0 %v11105_v0 }
 0x21b   : > { %1474 = vmatpush1.bf16.msra.mxu0 %v11103_v1 }
 0x21c   : > { %1475 = vmatprep.subr.bf16.mxu0 %v11111_v4 }
 0x21f   : > { %1476 = vmatpush1.bf16.msra.mxu0 %v11109_v5 }
 0x220   : > { %1477 = vmatprep.subr.bf16.mxu0 %v11117_v8  ;;  %v962_v8 = vld [vmem:[#allocation6] sm:$0x3] }
 0x221   : > { %v973_v10 = vrot.slane %v962_v8, %v12280_v21 }
 0x223   : > { %1478 = vmatpush1.bf16.msra.mxu0 %v11115_v9  ;;  %v982_v9 = vld [vmem:[#allocation7] sm:$0x3] }
 0x224   : > { %1479 = vmatprep.subr.bf16.mxu0 %v11123_v12  ;;  %v977_v12 = vrot.slane %v962_v8, %v12283_v23  ;;  %v987_v15 = vrot.slane %v982_v9, %v12280_v21  ;;  %v1684_v8 = vld [vmem:[#allocation15 + $0x140] sm:$0xff] }
 0x227   : > { %1480 = vmatpush1.bf16.msra.mxu0 %v11121_v13 }
 0x228   : > { %1481 = vmatprep.subr.bf16.mxu0 %v11129_v16 }
 0x22b   : > { %1482 = vmatpush1.bf16.msra.mxu0 %v11127_v17  ;;  %v991_v17 = vrot.slane %v982_v9, %v12283_v23  ;;  %v1688_v9 = vld [vmem:[#allocation15 + $0x160] sm:$0xff] }
 0x2c1   : > { %v919_v28 = vpop.f32.mrb[0].mxu0 }
 0x2c2   : > { %v920_v29 = vadd.f32 %v919_v28, %v798_v24  ;;  %v921_v30 = vpop.f32.mrb[1].mxu0 }
 0x2c3   : > { %v922_v31 = vadd.f32 %v921_v30, %v802_v25  ;;  %v923_v32 = vpop.f32.mrb[2].mxu0 }
 0x2c4   : > { %v926_v33 = vmul.f32 %v12288_v27, %v920_v29  ;;  %v924_v34 = vpop.f32.mrb[3].mxu0  ;;  %v1644_v32 = vld [vmem:[#allocation15] sm:$0xff] }
 0x2c5   : > { %v927_v35 = vmul.f32 %v12288_v27, %v922_v31  ;;  %v1645_v34 = vld [vmem:[#allocation15 + $0x8] sm:$0xff] }
 0x2c6   : > { %v928_v36 = vrot.slane %v926_v33, 4 }
 0x2c7   : > { %v934_v37 = vrot.slane %v927_v35, 4 }
 0x2c8   : > { %v929_v38 = vadd.f32 %v928_v36, %v926_v33  ;;  %v1648_v33 = vld [vmem:[#allocation15 + $0x20] sm:$0xff]  ;;  %v1649_v36 = vld [vmem:[#allocation15 + $0x28] sm:$0xff] }
 0x2c9   : > { %v935_v39 = vadd.f32 %v934_v37, %v927_v35  ;;  %v10356_v35 = vcombine.high %v1644_v32, %v1648_v33  ;;  %v10355_v37 = vcombine.low %v1644_v32, %v1648_v33  ;;  %v1705_v32 = vld [vmem:[#allocation15 + $0x1e8] sm:$0xff] }
 0x2ca   : > { %v930_v40 = vrot.slane %v929_v38, 2 }
 0x2cb   : > { %v936_v41 = vrot.slane %v935_v39, 2  ;;  %3222 = vmatprep.subr.bf16.mxu1 %v10356_v35 }
 0x2cc   : > { %v931_v42 = vadd.f32 %v930_v40, %v929_v38  ;;  %v10357_v38 = vcombine.low %v1645_v34, %v1649_v36  ;;  %v1652_v40 = vld [vmem:[#allocation15 + $0x40] sm:$0xff] }
 0x2cd   : > { %v937_v43 = vadd.f32 %v936_v41, %v935_v39  ;;  %v10358_v39 = vcombine.high %v1645_v34, %v1649_v36  ;;  %v1656_v41 = vld [vmem:[#allocation15 + $0x60] sm:$0xff] }
 0x2ce   : > { %v932_v44 = vrot.slane %v931_v42, 1  ;;  %v1708_v36 = vld [vmem:[#allocation15 + $0x200] sm:$0xff] }
 0x2cf   : > { %v938_v45 = vrot.slane %v937_v43, 1  ;;  %3304 = vmatprep.subr.bf16.mxu0 %v10358_v39 }
 0x2d0   : > { %v933_v46 = vadd.f32 %v932_v44, %v931_v42  ;;  %v1653_v42 = vld [vmem:[#allocation15 + $0x48] sm:$0xff] }
 0x2d1   : > { %v939_v47 = vadd.f32 %v938_v45, %v937_v43  ;;  %v10364_v43 = vcombine.high %v1652_v40, %v1656_v41  ;;  %v1657_v44 = vld [vmem:[#allocation15 + $0x68] sm:$0xff]  ;;  %v10363_v45 = vcombine.low %v1652_v40, %v1656_v41 }
 0x2d2   : > { %v940_v48 = vmul.f32 0.25, %v933_v46  ;;  %v10365_v46 = vcombine.low %v1653_v42, %v1657_v44  ;;  %v1713_v40 = vld [vmem:[#allocation15 + $0x228] sm:$0xff] }
 0x2d3   : > { %v941_v49 = vmul.f32 0.25, %v939_v47  ;;  %v10366_v47 = vcombine.high %v1653_v42, %v1657_v44  ;;  %v1716_v44 = vld [vmem:[#allocation15 + $0x240] sm:$0xff] }
 0x2d4   : > { %v942_v50 = vsub.f32 %v920_v29, %v940_v48  ;;  %v1660_v48 = vld [vmem:[#allocation15 + $0x80] sm:$0xff] }
 0x2d5   : > { %v943_v51 = vsub.f32 %v922_v31, %v941_v49  ;;  %v1664_v49 = vld [vmem:[#allocation15 + $0xa0] sm:$0xff] }
 0x2d6   : > { %v944_v52 = vmul.f32 %v942_v50, %v942_v50 }
 0x2d7   : > { %v945_v53 = vmul.f32 %v943_v51, %v943_v51 }
 0x2d8   : > { %v946_v54 = vmul.f32 %v12288_v27, %v944_v52  ;;  %v1665_v52 = vld [vmem:[#allocation15 + $0xa8] sm:$0xff] }
 0x2d9   : > { %v947_v55 = vmul.f32 %v12288_v27, %v945_v53  ;;  %v10371_v53 = vcombine.low %v1660_v48, %v1664_v49 }
 0x2da   : > { %v948_v56 = vrot.slane %v946_v54, 4 }
 0x2db   : > { %v954_v57 = vrot.slane %v947_v55, 4 }
 0x2dc   : > { %v949_v58 = vadd.f32 %v948_v56, %v946_v54  ;;  %v1668_v56 = vld [vmem:[#allocation15 + $0xc0] sm:$0xff] }
 0x2dd   : > { %v955_v59 = vadd.f32 %v954_v57, %v947_v55  ;;  %v1672_v57 = vld [vmem:[#allocation15 + $0xe0] sm:$0xff] }
 0x2de   : > { %v950_v60 = vrot.slane %v949_v58, 2 }
 0x2df   : > { %v956_v61 = vrot.slane %v955_v59, 2 }
 0x2e0   : > { %v951_v62 = vadd.f32 %v950_v60, %v949_v58  ;;  %v1669_v58 = vld [vmem:[#allocation15 + $0xc8] sm:$0xff] }
 0x2e1   : > { %v957_v63 = vadd.f32 %v956_v61, %v955_v59  ;;  %v10380_v59 = vcombine.high %v1668_v56, %v1672_v57  ;;  %v1673_v60 = vld [vmem:[#allocation15 + $0xe8] sm:$0xff]  ;;  %v10379_v61 = vcombine.low %v1668_v56, %v1672_v57 }
 0x2e2   : > { %v952_v0 = vrot.slane %v951_v62, 1  ;;  %v1729_v56 = vld [vmem:[#allocation15 + $0x2a8] sm:$0xff] }
 0x2e3   : > { %v958_v1 = vrot.slane %v957_v63, 1 }
 0x2e4   : > { %v953_v2 = vadd.f32 %v952_v0, %v951_v62  ;;  %v10381_v62 = vcombine.low %v1669_v58, %v1673_v60  ;;  %v1676_v0 = vld [vmem:[#allocation15 + $0x100] sm:$0xff] }
 0x2e5   : > { %v959_v3 = vadd.f32 %v958_v1, %v957_v63  ;;  %v10382_v63 = vcombine.high %v1669_v58, %v1673_v60  ;;  %v1680_v1 = vld [vmem:[#allocation15 + $0x120] sm:$0xff] }
 0x2e6   : > { %v960_v4 = vmul.f32 0.25, %v953_v2  ;;  %v1677_v2 = vld [vmem:[#allocation15 + $0x108] sm:$0xff]  ;;  %v1732_v60 = vld [vmem:[#allocation15 + $0x2c0] sm:$0xff] }
 0x2e7   : > { %v961_v5 = vmul.f32 0.25, %v959_v3  ;;  %v10388_v3 = vcombine.high %v1676_v0, %v1680_v1 }
 0x2e8   : > { %v963_v6 = vadd.f32 1e-05, %v960_v4  ;;  %v1681_v4 = vld [vmem:[#allocation15 + $0x128] sm:$0xff] }
 0x2e9   : > { %v964_v7 = vadd.f32 1e-05, %v961_v5  ;;  %v10387_v5 = vcombine.low %v1676_v0, %v1680_v1  ;;  %v1737_v0 = vld [vmem:[#allocation15 + $0x2e8] sm:$0xff] }
 0x2ea   : > { %11131 = vrsqrt.f32 %v963_v6  ;;  %v10389_v6 = vcombine.low %v1677_v2, %v1681_v4 }
 0x2eb   : > { %11133 = vrsqrt.f32 %v964_v7  ;;  %v10390_v7 = vcombine.high %v1677_v2, %v1681_v4  ;;  %v1740_v4 = vld [vmem:[#allocation15 + $0x300] sm:$0xff] }
 0x2f4   : > { %v11132_v11 = vpop.eup %11131 }
 0x2f5   : > { %v11134_v13 = vpop.eup %11133  ;;  %v967_v14 = vmul.f32 %v11132_v11, %v942_v50  ;;  %v1661_v50 = vld [vmem:[#allocation15 + $0x88] sm:$0xff]  ;;  %v10396_v11 = vcombine.high %v1684_v8, %v1688_v9 }
 0x2f6   : > { %v968_v16 = vmul.f32 %v11134_v13, %v943_v51  ;;  %v10372_v51 = vcombine.high %v1660_v48, %v1664_v49  ;;  %v10373_v54 = vcombine.low %v1661_v50, %v1665_v52  ;;  %v10374_v55 = vcombine.high %v1661_v50, %v1665_v52  ;;  %v1721_v48 = vld [vmem:[#allocation15 + $0x268] sm:$0xff]  ;;  %v1724_v52 = vld [vmem:[#allocation15 + $0x280] sm:$0xff] }
 0x2f7   : > { %v980_v18 = vmul.f32 %v973_v10, %v967_v14  ;;  %v1685_v10 = vld [vmem:[#allocation15 + $0x148] sm:$0xff]  ;;  %v10395_v13 = vcombine.low %v1684_v8, %v1688_v9 }
 0x2f8   : > { %v981_v19 = vmul.f32 %v977_v12, %v968_v16  ;;  %v1689_v12 = vld [vmem:[#allocation15 + $0x168] sm:$0xff]  ;;  %v1692_v16 = vld [vmem:[#allocation15 + $0x180] sm:$0xff] }
 0x2f9   : > { %v994_v22 = vadd.f32 %v987_v15, %v980_v18  ;;  %v10397_v14 = vcombine.low %v1685_v10, %v1689_v12  ;;  %v10398_v15 = vcombine.high %v1685_v10, %v1689_v12  ;;  %v1693_v18 = vld [vmem:[#allocation15 + $0x188] sm:$0xff]  ;;  %v1748_v12 = vld [vmem:[#allocation15 + $0x340] sm:$0xff] }
 0x2fa   : > { %v995_v24 = vadd.f32 %v991_v17, %v981_v19  ;;  %v1696_v17 = vld [vmem:[#allocation15 + $0x1a0] sm:$0xff]  ;;  %v1745_v8 = vld [vmem:[#allocation15 + $0x328] sm:$0xff] }
 0x2fb   : > { %vm996_vm1 = vcmp.ge.f32.partialorder %v994_v22, 0.0  ;;  %v998_v25 = vmul.f32 0.2, %v994_v22  ;;  %v10404_v19 = vcombine.high %v1692_v16, %v1696_v17 }
 0x2fc   : > { %vm997_vm2 = vcmp.ge.f32.partialorder %v995_v24, 0.0  ;;  %v999_v26 = vmul.f32 0.2, %v995_v24 }
 0x2fd   : > { %v1000_v28 = vsel %vm996_vm1, %v994_v22, %v998_v25  ;;  %v1697_v22 = vld [vmem:[#allocation15 + $0x1a8] sm:$0xff] }
 0x2fe   : > { %v1001_v29 = vsel %vm997_vm2, %v995_v24, %v999_v26  ;;  %v1002_v31 = vpack.c.bf16 %v1000_v28, %v1000_v28  ;;  %v10403_v24 = vcombine.low %v1692_v16, %v1696_v17  ;;  %v10405_v25 = vcombine.low %v1693_v18, %v1697_v22  ;;  %v1700_v28 = vld [vmem:[#allocation15 + $0x1c0] sm:$0xff]  ;;  %v1753_v16 = vld [vmem:[#allocation15 + $0x368] sm:$0xff] }
 0x2ff   : > { %v1003_v30 = vpack.c.bf16 %v1001_v29, %v1001_v29  ;;  %v10406_v26 = vcombine.high %v1693_v18, %v1697_v22  ;;  %v1704_v29 = vld [vmem:[#allocation15 + $0x1e0] sm:$0xff] }
 0x300   : > { %v10411_v33 = vcombine.low %v1700_v28, %v1704_v29  ;;  %v1756_v22 = vld [vmem:[#allocation15 + $0x380] sm:$0xff] }
 0x301   : > { %1442 = vmatprep.mubr.bf16.mxu1 %v1003_v30  ;;  %1483 = vmatprep.mubr.bf16.mxu0 %v1003_v30  ;;  %v1701_v30 = vld [vmem:[#allocation15 + $0x1c8] sm:$0xff] }
 0x302   : > { %1443 = vmatmul.mubr.bf16.vlgmr.msra.gmra.mrb[0].mxu1 %v1002_v31  ;;  %1484 = vmatmul.mubr.bf16.vlgmr.msra.gmra.mrb[4].mxu0 %v1002_v31  ;;  %v10412_v31 = vcombine.high %v1700_v28, %v1704_v29  ;;  %v10413_v34 = vcombine.low %v1701_v30, %v1705_v32  ;;  %v10414_v35 = vcombine.high %v1701_v30, %v1705_v32  ;;  %v1761_v28 = vld [vmem:[#allocation15 + $0x3a8] sm:$0xff]  ;;  %v1764_v32 = vld [vmem:[#allocation15 + $0x3c0] sm:$0xff] }
 0x303   : > { %3223 = vmatpush1.bf16.msra.mxu1 %v10355_v37  ;;  %3305 = vmatpush1.bf16.msra.mxu0 %v10357_v38  ;;  %v1712_v37 = vld [vmem:[#allocation15 + $0x220] sm:$0xff]  ;;  %v1709_v38 = vld [vmem:[#allocation15 + $0x208] sm:$0xff] }
 0x304   : > { %3224 = vmatprep.subr.bf16.mxu1 %v10364_v43  ;;  %3306 = vmatprep.subr.bf16.mxu0 %v10366_v47  ;;  %v10420_v39 = vcombine.high %v1708_v36, %v1712_v37  ;;  %v10419_v41 = vcombine.low %v1708_v36, %v1712_v37  ;;  %v10421_v42 = vcombine.low %v1709_v38, %v1713_v40  ;;  %v1769_v37 = vld [vmem:[#allocation15 + $0x3e8] sm:$0xff] }
 0x305   : > { %v10422_v43 = vcombine.high %v1709_v38, %v1713_v40  ;;  %v12298_v40 = vld [vmem:[#allocation15 + $0x400] sm:$0xff] }
 0x307   : > { %3225 = vmatpush1.bf16.msra.mxu1 %v10363_v45  ;;  %3307 = vmatpush1.bf16.msra.mxu0 %v10365_v46  ;;  %v1720_v45 = vld [vmem:[#allocation15 + $0x260] sm:$0xff]  ;;  %v1717_v46 = vld [vmem:[#allocation15 + $0x248] sm:$0xff] }
 0x308   : > { %3226 = vmatprep.subr.bf16.mxu1 %v10372_v51  ;;  %3308 = vmatprep.subr.bf16.mxu0 %v10374_v55  ;;  %v10428_v47 = vcombine.high %v1716_v44, %v1720_v45  ;;  %v10427_v49 = vcombine.low %v1716_v44, %v1720_v45  ;;  %v10429_v50 = vcombine.low %v1717_v46, %v1721_v48  ;;  %v12306_v44 = vld [vmem:[#allocation15 + $0x428] sm:$0xff] }
 0x309   : > { %v10430_v51 = vcombine.high %v1717_v46, %v1721_v48  ;;  %v12315_v48 = vsub.s32 2, %v12277_v20 }
 0x30b   : > { %3227 = vmatpush1.bf16.msra.mxu1 %v10371_v53  ;;  %3309 = vmatpush1.bf16.msra.mxu0 %v10373_v54  ;;  %v1728_v53 = vld [vmem:[#allocation15 + $0x2a0] sm:$0xff]  ;;  %v1725_v54 = vld [vmem:[#allocation15 + $0x288] sm:$0xff] }
 0x30c   : > { %3228 = vmatprep.subr.bf16.mxu1 %v10380_v59  ;;  %3310 = vmatprep.subr.bf16.mxu0 %v10382_v63  ;;  %v10436_v55 = vcombine.high %v1724_v52, %v1728_v53  ;;  %v10435_v57 = vcombine.low %v1724_v52, %v1728_v53  ;;  %v10437_v58 = vcombine.low %v1725_v54, %v1729_v56 }
 0x30d   : > { %v10438_v59 = vcombine.high %v1725_v54, %v1729_v56 }
 0x30f   : > { %3229 = vmatpush1.bf16.msra.mxu1 %v10379_v61  ;;  %3311 = vmatpush1.bf16.msra.mxu0 %v10381_v62  ;;  %v1736_v61 = vld [vmem:[#allocation15 + $0x2e0] sm:$0xff]  ;;  %v1733_v62 = vld [vmem:[#allocation15 + $0x2c8] sm:$0xff] }
 0x310   : > { %3230 = vmatprep.subr.bf16.mxu1 %v10388_v3  ;;  %3312 = vmatprep.subr.bf16.mxu0 %v10390_v7  ;;  %v10444_v63 = vcombine.high %v1732_v60, %v1736_v61  ;;  %v10443_v1 = vcombine.low %v1732_v60, %v1736_v61  ;;  %v10445_v2 = vcombine.low %v1733_v62, %v1737_v0 }
 0x311   : > { %v10446_v3 = vcombine.high %v1733_v62, %v1737_v0 }
 0x313   : > { %3231 = vmatpush1.bf16.msra.mxu1 %v10387_v5  ;;  %3313 = vmatpush1.bf16.msra.mxu0 %v10389_v6  ;;  %v1744_v5 = vld [vmem:[#allocation15 + $0x320] sm:$0xff]  ;;  %v1741_v6 = vld [vmem:[#allocation15 + $0x308] sm:$0xff] }
 0x314   : > { %3232 = vmatprep.subr.bf16.mxu1 %v10396_v11  ;;  %3314 = vmatprep.subr.bf16.mxu0 %v10398_v15  ;;  %v10452_v7 = vcombine.high %v1740_v4, %v1744_v5  ;;  %v10451_v9 = vcombine.low %v1740_v4, %v1744_v5  ;;  %v10453_v10 = vcombine.low %v1741_v6, %v1745_v8 }
 0x315   : > { %v10454_v11 = vcombine.high %v1741_v6, %v1745_v8 }
 0x317   : > { %3233 = vmatpush1.bf16.msra.mxu1 %v10395_v13  ;;  %3315 = vmatpush1.bf16.msra.mxu0 %v10397_v14  ;;  %v1752_v13 = vld [vmem:[#allocation15 + $0x360] sm:$0xff]  ;;  %v1749_v14 = vld [vmem:[#allocation15 + $0x348] sm:$0xff] }
 0x318   : > { %3234 = vmatprep.subr.bf16.mxu1 %v10404_v19  ;;  %3316 = vmatprep.subr.bf16.mxu0 %v10406_v26  ;;  %v10460_v15 = vcombine.high %v1748_v12, %v1752_v13  ;;  %v10459_v17 = vcombine.low %v1748_v12, %v1752_v13  ;;  %v10461_v18 = vcombine.low %v1749_v14, %v1753_v16 }
 0x319   : > { %v10462_v19 = vcombine.high %v1749_v14, %v1753_v16 }
 0x31b   : > { %3235 = vmatpush1.bf16.msra.mxu1 %v10403_v24  ;;  %3317 = vmatpush1.bf16.msra.mxu0 %v10405_v25  ;;  %v1760_v24 = vld [vmem:[#allocation15 + $0x3a0] sm:$0xff]  ;;  %v1757_v25 = vld [vmem:[#allocation15 + $0x388] sm:$0xff] }
 0x31c   : > { %3236 = vmatprep.subr.bf16.mxu1 %v10412_v31  ;;  %3318 = vmatprep.subr.bf16.mxu0 %v10414_v35  ;;  %v10468_v26 = vcombine.high %v1756_v22, %v1760_v24  ;;  %v10467_v29 = vcombine.low %v1756_v22, %v1760_v24  ;;  %v10469_v30 = vcombine.low %v1757_v25, %v1761_v28 }
 0x31d   : > { %v10470_v31 = vcombine.high %v1757_v25, %v1761_v28 }
 0x31f   : > { %3237 = vmatpush1.bf16.msra.mxu1 %v10411_v33  ;;  %3319 = vmatpush1.bf16.msra.mxu0 %v10413_v34  ;;  %v1768_v33 = vld [vmem:[#allocation15 + $0x3e0] sm:$0xff]  ;;  %v1765_v34 = vld [vmem:[#allocation15 + $0x3c8] sm:$0xff] }
 0x320   : > { %3238 = vmatprep.subr.bf16.mxu1 %v10420_v39  ;;  %3320 = vmatprep.subr.bf16.mxu0 %v10422_v43  ;;  %v10475_v35 = vcombine.low %v1764_v32, %v1768_v33  ;;  %v10476_v36 = vcombine.high %v1764_v32, %v1768_v33  ;;  %v10477_v38 = vcombine.low %v1765_v34, %v1769_v37 }
 0x321   : > { %v10478_v39 = vcombine.high %v1765_v34, %v1769_v37 }
 0x323   : > { %3239 = vmatpush1.bf16.msra.mxu1 %v10419_v41  ;;  %3321 = vmatpush1.bf16.msra.mxu0 %v10421_v42  ;;  %v12300_v41 = vld [vmem:[#allocation15 + $0x420] sm:$0xff]  ;;  %v12302_v42 = vld [vmem:[#allocation15 + $0x408] sm:$0xff] }
 0x324   : > { %3240 = vmatprep.subr.bf16.mxu1 %v10428_v47  ;;  %3322 = vmatprep.subr.bf16.mxu0 %v10430_v51  ;;  %v10484_v43 = vcombine.high %v12298_v40, %v12300_v41  ;;  %v10483_v45 = vcombine.low %v12298_v40, %v12300_v41  ;;  %v10485_v46 = vcombine.low %v12302_v42, %v12306_v44 }
 0x325   : > { %v10486_v47 = vcombine.high %v12302_v42, %v12306_v44 }
 0x327   : > { %3241 = vmatpush1.bf16.msra.mxu1 %v10427_v49  ;;  %3323 = vmatpush1.bf16.msra.mxu0 %v10429_v50  ;;  %v1068_v49 = vld [vmem:[#allocation10] sm:$0xf]  ;;  %v12318_v50 = vsub.s32 3, %v12277_v20 }
 0x328   : > { %3242 = vmatprep.subr.bf16.mxu1 %v10436_v55  ;;  %3324 = vmatprep.subr.bf16.mxu0 %v10438_v59  ;;  %v1073_v51 = vrot.slane %v1068_v49, %v12280_v21  ;;  %v1081_v52 = vrot.slane %v1068_v49, %v12315_v48  ;;  %v1077_v53 = vrot.slane %v1068_v49, %v12283_v23 }
 0x329   : > { %v1085_v54 = vrot.slane %v1068_v49, %v12318_v50 }
 0x32b   : > { %3243 = vmatpush1.bf16.msra.mxu1 %v10435_v57  ;;  %3325 = vmatpush1.bf16.msra.mxu0 %v10437_v58 }
 0x32c   : > { %3244 = vmatprep.subr.bf16.mxu1 %v10444_v63  ;;  %3326 = vmatprep.subr.bf16.mxu0 %v10446_v3 }
 0x32f   : > { %3245 = vmatpush1.bf16.msra.mxu1 %v10443_v1  ;;  %3327 = vmatpush1.bf16.msra.mxu0 %v10445_v2 }
 0x330   : > { %3246 = vmatprep.subr.bf16.mxu1 %v10452_v7  ;;  %3328 = vmatprep.subr.bf16.mxu0 %v10454_v11 }
 0x333   : > { %3247 = vmatpush1.bf16.msra.mxu1 %v10451_v9  ;;  %3329 = vmatpush1.bf16.msra.mxu0 %v10453_v10 }
 0x334   : > { %3248 = vmatprep.subr.bf16.mxu1 %v10460_v15  ;;  %3330 = vmatprep.subr.bf16.mxu0 %v10462_v19 }
 0x337   : > { %3249 = vmatpush1.bf16.msra.mxu1 %v10459_v17  ;;  %3331 = vmatpush1.bf16.msra.mxu0 %v10461_v18 }
 0x338   : > { %3250 = vmatprep.subr.bf16.mxu1 %v10468_v26  ;;  %3332 = vmatprep.subr.bf16.mxu0 %v10470_v31 }
 0x33b   : > { %3251 = vmatpush1.bf16.msra.mxu1 %v10467_v29  ;;  %3333 = vmatpush1.bf16.msra.mxu0 %v10469_v30 }
 0x33c   : > { %3252 = vmatprep.subr.bf16.mxu1 %v10476_v36  ;;  %3334 = vmatprep.subr.bf16.mxu0 %v10478_v39 }
 0x33f   : > { %3253 = vmatpush1.bf16.msra.mxu1 %v10475_v35  ;;  %3335 = vmatpush1.bf16.msra.mxu0 %v10477_v38 }
 0x340   : > { %3263 = vmatprep.subr.bf16.mxu1 %v10484_v43  ;;  %3345 = vmatprep.subr.bf16.mxu0 %v10486_v47 }
 0x3d5   : > { %v1444_v55 = vpop.f32.mrb[0].mxu1  ;;  %v1485_v56 = vpop.f32.mrb[4].mxu0 }
 0x3d6   : > { %v1445_v57 = vadd.f32 %v1444_v55, %v1073_v51  ;;  %v1486_v58 = vadd.f32 %v1485_v56, %v1081_v52  ;;  %v1446_v59 = vpop.f32.mrb[1].mxu1  ;;  %v1487_v60 = vpop.f32.mrb[5].mxu0 }
 0x3d7   : > { %v1447_v61 = vadd.f32 %v1446_v59, %v1077_v53  ;;  %v1488_v62 = vadd.f32 %v1487_v60, %v1085_v54  ;;  %v1448_v63 = vpop.f32.mrb[2].mxu1  ;;  %v1489_v0 = vpop.f32.mrb[6].mxu0 }
 0x3d8   : > { %v1492_v1 = vmul.f32 %v12288_v27, %v1445_v57  ;;  %v1494_v2 = vmul.f32 %v12288_v27, %v1486_v58  ;;  %v1449_v3 = vpop.f32.mrb[3].mxu1  ;;  %v1490_v4 = vpop.f32.mrb[7].mxu0 }
 0x3d9   : > { %v1493_v5 = vmul.f32 %v12288_v27, %v1447_v61  ;;  %v1495_v6 = vmul.f32 %v12288_v27, %v1488_v62 }
 0x3da   : > { %v1496_v7 = vrot.slane %v1492_v1, 4  ;;  %v1508_v8 = vrot.slane %v1494_v2, 4 }
 0x3db   : > { %v1502_v9 = vrot.slane %v1493_v5, 4  ;;  %v1514_v10 = vrot.slane %v1495_v6, 4 }
 0x3dc   : > { %v1497_v11 = vadd.f32 %v1496_v7, %v1492_v1  ;;  %v1509_v12 = vadd.f32 %v1508_v8, %v1494_v2 }
 0x3dd   : > { %v1503_v13 = vadd.f32 %v1502_v9, %v1493_v5  ;;  %v1515_v14 = vadd.f32 %v1514_v10, %v1495_v6 }
 0x3de   : > { %v1498_v15 = vrot.slane %v1497_v11, 2  ;;  %v1510_v16 = vrot.slane %v1509_v12, 2 }
 0x3df   : > { %v1504_v17 = vrot.slane %v1503_v13, 2  ;;  %v1516_v18 = vrot.slane %v1515_v14, 2 }
 0x3e0   : > { %v1499_v19 = vadd.f32 %v1498_v15, %v1497_v11  ;;  %v1511_v22 = vadd.f32 %v1510_v16, %v1509_v12 }
 0x3e1   : > { %v1505_v24 = vadd.f32 %v1504_v17, %v1503_v13  ;;  %v1517_v25 = vadd.f32 %v1516_v18, %v1515_v14 }
 0x3e2   : > { %v1500_v26 = vrot.slane %v1499_v19, 1  ;;  %v1512_v28 = vrot.slane %v1511_v22, 1 }
 0x3e3   : > { %v1506_v29 = vrot.slane %v1505_v24, 1  ;;  %v1518_v30 = vrot.slane %v1517_v25, 1 }
 0x3e4   : > { %v1501_v31 = vadd.f32 %v1500_v26, %v1499_v19  ;;  %v1513_v32 = vadd.f32 %v1512_v28, %v1511_v22 }
 0x3e5   : > { %v1507_v33 = vadd.f32 %v1506_v29, %v1505_v24  ;;  %v1519_v34 = vadd.f32 %v1518_v30, %v1517_v25 }
 0x3e6   : > { %v1520_v35 = vmul.f32 0.25, %v1501_v31  ;;  %v1522_v36 = vmul.f32 0.25, %v1513_v32  ;;  %v1564_v31 = vld [vmem:[#allocation12] sm:$0xf]  ;;  %v1602_v32 = vld [vmem:[#allocation13] sm:$0xf] }
 0x3e7   : > { %v1521_v37 = vmul.f32 0.25, %v1507_v33  ;;  %v1523_v38 = vmul.f32 0.25, %v1519_v34  ;;  %v1581_v33 = vrot.slane %v1564_v31, %v12280_v21 }
 0x3e8   : > { %v1524_v39 = vsub.f32 %v1445_v57, %v1520_v35  ;;  %v1526_v43 = vsub.f32 %v1486_v58, %v1522_v36  ;;  %v1589_v35 = vrot.slane %v1564_v31, %v12315_v48 }
 0x3e9   : > { %v1525_v47 = vsub.f32 %v1447_v61, %v1521_v37  ;;  %v12328_v49 = vsub.f32 %v1488_v62, %v1523_v38  ;;  %v1607_v38 = vrot.slane %v1602_v32, %v12280_v21 }
 0x3ea   : > { %v1528_v51 = vmul.f32 %v1524_v39, %v1524_v39  ;;  %v1530_v52 = vmul.f32 %v1526_v43, %v1526_v43 }
 0x3eb   : > { %v1529_v53 = vmul.f32 %v1525_v47, %v1525_v47  ;;  %v1531_v54 = vmul.f32 %v12328_v49, %v12328_v49 }
 0x3ec   : > { %v1532_v55 = vmul.f32 %v12288_v27, %v1528_v51  ;;  %v1534_v56 = vmul.f32 %v12288_v27, %v1530_v52  ;;  %v1585_v51 = vrot.slane %v1564_v31, %v12283_v23 }
 0x3ed   : > { %v1533_v59 = vmul.f32 %v12288_v27, %v1529_v53  ;;  %v1535_v60 = vmul.f32 %v12288_v27, %v1531_v54  ;;  %v1615_v54 = vrot.slane %v1602_v32, %v12315_v48 }
 0x3ee   : > { %v1536_v63 = vrot.slane %v1532_v55, 4  ;;  %v1548_v57 = vrot.slane %v1534_v56, 4 }
 0x3ef   : > { %v1542_v58 = vrot.slane %v1533_v59, 4  ;;  %v1554_v61 = vrot.slane %v1535_v60, 4 }
 0x3f0   : > { %v1537_v62 = vadd.f32 %v1536_v63, %v1532_v55  ;;  %v1549_v0 = vadd.f32 %v1548_v57, %v1534_v56  ;;  %v1593_v55 = vrot.slane %v1564_v31, %v12318_v50  ;;  %v1611_v63 = vrot.slane %v1602_v32, %v12283_v23  ;;  %v1801_v31 = vld [vmem:[#allocation15 + $0x4e8] sm:$0xff] }
 0x3f1   : > { %v1543_v1 = vadd.f32 %v1542_v58, %v1533_v59  ;;  %v1555_v2 = vadd.f32 %v1554_v61, %v1535_v60 }
 0x3f2   : > { %v1538_v3 = vrot.slane %v1537_v62, 2  ;;  %v1550_v4 = vrot.slane %v1549_v0, 2 }
 0x3f3   : > { %v1544_v5 = vrot.slane %v1543_v1, 2  ;;  %v1556_v6 = vrot.slane %v1555_v2, 2 }
 0x3f4   : > { %v1539_v7 = vadd.f32 %v1538_v3, %v1537_v62  ;;  %v1551_v8 = vadd.f32 %v1550_v4, %v1549_v0 }
 0x3f5   : > { %v1545_v9 = vadd.f32 %v1544_v5, %v1543_v1  ;;  %v1557_v10 = vadd.f32 %v1556_v6, %v1555_v2  ;;  %v1780_v6 = vld [vmem:[#allocation15 + $0x440] sm:$0xff] }
 0x3f6   : > { %v1540_v11 = vrot.slane %v1539_v7, 1  ;;  %v1552_v12 = vrot.slane %v1551_v8, 1 }
 0x3f7   : > { %v1546_v13 = vrot.slane %v1545_v9, 1  ;;  %v1558_v14 = vrot.slane %v1557_v10, 1 }
 0x3f8   : > { %v1541_v15 = vadd.f32 %v1540_v11, %v1539_v7  ;;  %v1553_v16 = vadd.f32 %v1552_v12, %v1551_v8  ;;  %v1784_v8 = vld [vmem:[#allocation15 + $0x460] sm:$0xff] }
 0x3f9   : > { %v1547_v17 = vadd.f32 %v1546_v13, %v1545_v9  ;;  %v1559_v18 = vadd.f32 %v1558_v14, %v1557_v10  ;;  %v1785_v9 = vld [vmem:[#allocation15 + $0x468] sm:$0xff]  ;;  %v1788_v13 = vld [vmem:[#allocation15 + $0x480] sm:$0xff]  ;;  %v10492_v14 = vcombine.high %v1780_v6, %v1784_v8 }
 0x3fa   : > { %v1560_v19 = vmul.f32 0.25, %v1541_v15  ;;  %v1562_v22 = vmul.f32 0.25, %v1553_v16  ;;  %v1792_v16 = vld [vmem:[#allocation15 + $0x4a0] sm:$0xff] }
 0x3fb   : > { %v1561_v24 = vmul.f32 0.25, %v1547_v17  ;;  %v1563_v25 = vmul.f32 0.25, %v1559_v18  ;;  %v1789_v17 = vld [vmem:[#allocation15 + $0x488] sm:$0xff]  ;;  %v10499_v40 = vcombine.low %v1788_v13, %v1792_v16 }
 0x3fc   : > { %v1565_v26 = vadd.f32 1e-05, %v1560_v19  ;;  %v1567_v28 = vadd.f32 1e-05, %v1562_v22  ;;  %v1793_v18 = vld [vmem:[#allocation15 + $0x4a8] sm:$0xff]  ;;  %v10491_v22 = vcombine.low %v1780_v6, %v1784_v8  ;;  %v1836_v8 = vld [vmem:[#allocation15 + $0x600] sm:$0xff] }
 0x3fd   : > { %v1566_v29 = vadd.f32 1e-05, %v1561_v24  ;;  %v1568_v30 = vadd.f32 1e-05, %v1563_v25  ;;  %v10500_v25 = vcombine.high %v1788_v13, %v1792_v16  ;;  %v10501_v41 = vcombine.low %v1789_v17, %v1793_v18 }
 0x3fe   : > { %11135 = vrsqrt.f32 %v1565_v26  ;;  %v10502_v26 = vcombine.high %v1789_v17, %v1793_v18  ;;  %v1844_v17 = vld [vmem:[#allocation15 + $0x640] sm:$0xff] }
 0x3ff   : > { %11137 = vrsqrt.f32 %v1567_v28  ;;  %v1796_v28 = vld [vmem:[#allocation15 + $0x4c0] sm:$0xff] }
 0x400   : > { %11139 = vrsqrt.f32 %v1566_v29  ;;  %v1800_v29 = vld [vmem:[#allocation15 + $0x4e0] sm:$0xff] }
 0x401   : > { %11141 = vrsqrt.f32 %v1568_v30  ;;  %v1797_v30 = vld [vmem:[#allocation15 + $0x4c8] sm:$0xff]  ;;  %v10508_v42 = vcombine.high %v1796_v28, %v1800_v29  ;;  %v1848_v18 = vld [vmem:[#allocation15 + $0x660] sm:$0xff] }
 0x402   : > { %v10510_v44 = vcombine.high %v1797_v30, %v1801_v31 }
 0x408   : > { %v11136_v34 = vpop.eup %11135 }
 0x409   : > { %v11138_v36 = vpop.eup %11137  ;;  %v1573_v37 = vmul.f32 %v11136_v34, %v1524_v39  ;;  %v1619_v39 = vrot.slane %v1602_v32, %v12318_v50  ;;  %v1805_v32 = vld [vmem:[#allocation15 + $0x508] sm:$0xff]  ;;  %v10507_v34 = vcombine.low %v1796_v28, %v1800_v29  ;;  %v10556_v28 = vcombine.high %v1844_v17, %v1848_v18 }
 0x40a   : > { %v11140_v52 = vpop.eup %11139  ;;  %v1575_v53 = vmul.f32 %v11138_v36, %v1526_v43 }
 0x40b   : > { %v11142_v56 = vpop.eup %11141  ;;  %v1598_v59 = vmul.f32 %v1581_v33, %v1573_v37  ;;  %v1574_v60 = vmul.f32 %v11140_v52, %v1525_v47  ;;  %v1809_v33 = vld [vmem:[#allocation15 + $0x528] sm:$0xff] }
 0x40c   : > { %v1600_v57 = vmul.f32 %v1589_v35, %v1575_v53  ;;  %v1576_v58 = vmul.f32 %v11142_v56, %v12328_v49  ;;  %v1781_v49 = vld [vmem:[#allocation15 + $0x448] sm:$0xff]  ;;  %v10509_v35 = vcombine.low %v1797_v30, %v1801_v31  ;;  %v10518_v37 = vcombine.high %v1805_v32, %v1809_v33  ;;  %v1852_v30 = vld [vmem:[#allocation15 + $0x680] sm:$0xff] }
 0x40d   : > { %v1624_v61 = vadd.f32 %v1607_v38, %v1598_v59  ;;  %v1599_v62 = vmul.f32 %v1585_v51, %v1574_v60  ;;  %v10494_v15 = vcombine.high %v1781_v49, %v1785_v9  ;;  %v10493_v24 = vcombine.low %v1781_v49, %v1785_v9  ;;  %v1812_v38 = vld [vmem:[#allocation15 + $0x540] sm:$0xff]  ;;  %v1813_v52 = vld [vmem:[#allocation15 + $0x548] sm:$0xff] }
 0x40e   : > { %v12345_v0 = vadd.f32 %v1615_v54, %v1600_v57  ;;  %v1601_v1 = vmul.f32 %v1593_v55, %v1576_v58  ;;  %v1816_v51 = vld [vmem:[#allocation15 + $0x560] sm:$0xff]  ;;  %v1817_v53 = vld [vmem:[#allocation15 + $0x568] sm:$0xff]  ;;  %v10517_v55 = vcombine.low %v1805_v32, %v1809_v33 }
 0x40f   : > { %v1625_v43 = vadd.f32 %v1611_v63, %v1599_v62  ;;  %vm1628_vm3 = vcmp.ge.f32.partialorder %v1624_v61, 0.0  ;;  %v1632_v2 = vmul.f32 0.2, %v1624_v61  ;;  %v10524_v56 = vcombine.high %v1812_v38, %v1816_v51  ;;  %v1820_v60 = vld [vmem:[#allocation15 + $0x580] sm:$0xff]  ;;  %v1821_v57 = vld [vmem:[#allocation15 + $0x588] sm:$0xff] }
 0x410   : > { %v1627_v3 = vadd.f32 %v1619_v39, %v1601_v1  ;;  %v10526_v59 = vcombine.high %v1813_v52, %v1817_v53  ;;  %v1824_v63 = vld [vmem:[#allocation15 + $0x5a0] sm:$0xff]  ;;  %v1825_v58 = vld [vmem:[#allocation15 + $0x5a8] sm:$0xff]  ;;  %v10523_v39 = vcombine.low %v1812_v38, %v1816_v51  ;;  %vm1630_vm6 = vcmp.ge.f32.partialorder %v12345_v0, 0.0 }
 0x411   : > { %vm1629_vm4 = vcmp.ge.f32.partialorder %v1625_v43, 0.0  ;;  %v1633_v4 = vmul.f32 0.2, %v1625_v43  ;;  %v1636_v5 = vsel %vm1628_vm3, %v1624_v61, %v1632_v2  ;;  %v10525_v61 = vcombine.low %v1813_v52, %v1817_v53  ;;  %v1832_v2 = vld [vmem:[#allocation15 + $0x5e0] sm:$0xff]  ;;  %v1837_v9 = vld [vmem:[#allocation15 + $0x608] sm:$0xff] }
 0x412   : > { %vm1631_vm5 = vcmp.ge.f32.partialorder %v1627_v3, 0.0  ;;  %v1635_v47 = vmul.f32 0.2, %v1627_v3  ;;  %v12349_v12 = vpack.c.bf16 %v1636_v5, %v1636_v5  ;;  %v10532_v62 = vcombine.high %v1820_v60, %v1824_v63  ;;  %v1840_v49 = vld [vmem:[#allocation15 + $0x620] sm:$0xff] }
 0x413   : > { %v1637_v7 = vsel %vm1629_vm4, %v1625_v43, %v1633_v4  ;;  %v10534_v1 = vcombine.high %v1821_v57, %v1825_v58  ;;  %v1828_v43 = vld [vmem:[#allocation15 + $0x5c0] sm:$0xff]  ;;  %v1833_v4 = vld [vmem:[#allocation15 + $0x5e8] sm:$0xff]  ;;  %v10531_v5 = vcombine.low %v1820_v60, %v1824_v63 }
 0x414   : > { %v12347_v10 = vpack.c.bf16 %v1637_v7, %v1637_v7  ;;  %v1639_v11 = vsel %vm1631_vm5, %v1627_v3, %v1635_v47  ;;  %v1829_v3 = vld [vmem:[#allocation15 + $0x5c8] sm:$0xff]  ;;  %v10533_v47 = vcombine.low %v1821_v57, %v1825_v58  ;;  %v10540_v6 = vcombine.high %v1828_v43, %v1832_v2  ;;  %v1856_v31 = vld [vmem:[#allocation15 + $0x6a0] sm:$0xff] }
 0x415   : > { %v12355_v19 = vpack.c.bf16 %v1639_v11, %v1639_v11  ;;  %v10542_v7 = vcombine.high %v1829_v3, %v1833_v4  ;;  %v1841_v11 = vld [vmem:[#allocation15 + $0x628] sm:$0xff]  ;;  %v10539_v13 = vcombine.low %v1828_v43, %v1832_v2  ;;  %v1860_v32 = vld [vmem:[#allocation15 + $0x6c0] sm:$0xff] }
 0x416   : > { %3254 = vmatprep.mubr.bf16.mxu1 %v12347_v10  ;;  %3336 = vmatprep.mubr.bf16.mxu0 %v12347_v10  ;;  %v10550_v16 = vcombine.high %v1837_v9, %v1841_v11  ;;  %v1864_v33 = vld [vmem:[#allocation15 + $0x6e0] sm:$0xff] }
 0x417   : > { %3255 = vmatmul.mubr.bf16.vlgmr.msra.gmra.mrb[4].mxu1 %v12349_v12  ;;  %3337 = vmatmul.mubr.bf16.vlgmr.msra.gmra.mrb[8].mxu0 %v12349_v12  ;;  %v10572_v38 = vcombine.high %v1860_v32, %v1864_v33  ;;  %v1868_v52 = vld [vmem:[#allocation15 + $0x700] sm:$0xff] }
 0x418   : > { %3264 = vmatpush1.bf16.msra.mxu1 %v10483_v45  ;;  %3346 = vmatpush1.bf16.msra.mxu0 %v10485_v46  ;;  %v1804_v45 = vld [vmem:[#allocation15 + $0x500] sm:$0xff] }
 0x419   : > { %3295 = vmatprep.mubr.bf16.mxu1 %v12355_v19  ;;  %3377 = vmatprep.mubr.bf16.mxu0 %v12355_v19  ;;  %v1808_v46 = vld [vmem:[#allocation15 + $0x520] sm:$0xff] }
 0x41a   : > { %3265 = vmatprep.subr.bf16.mxu1 %v10492_v14  ;;  %3347 = vmatprep.subr.bf16.mxu0 %v10494_v15  ;;  %v10516_v36 = vcombine.high %v1804_v45, %v1808_v46  ;;  %v10515_v54 = vcombine.low %v1804_v45, %v1808_v46  ;;  %v10541_v14 = vcombine.low %v1829_v3, %v1833_v4  ;;  %v1872_v53 = vld [vmem:[#allocation15 + $0x720] sm:$0xff] }
 0x41b   : > { %v10548_v15 = vcombine.high %v1836_v8, %v1840_v49  ;;  %v10564_v45 = vcombine.high %v1852_v30, %v1856_v31  ;;  %v10580_v60 = vcombine.high %v1868_v52, %v1872_v53  ;;  %v1876_v57 = vld [vmem:[#allocation15 + $0x740] sm:$0xff] }
 0x41c   : > { %3266 = vmatpush1.bf16.msra.mxu1 %v10491_v22  ;;  %3348 = vmatpush1.bf16.msra.mxu0 %v10493_v24  ;;  %v1845_v22 = vld [vmem:[#allocation15 + $0x648] sm:$0xff]  ;;  %v1880_v58 = vld [vmem:[#allocation15 + $0x760] sm:$0xff] }
 0x41d   : > { %3267 = vmatprep.subr.bf16.mxu1 %v10500_v25  ;;  %3349 = vmatprep.subr.bf16.mxu0 %v10502_v26  ;;  %v1849_v24 = vld [vmem:[#allocation15 + $0x668] sm:$0xff]  ;;  %v10547_v25 = vcombine.low %v1836_v8, %v1840_v49  ;;  %v10549_v26 = vcombine.low %v1837_v9, %v1841_v11  ;;  %v10588_v43 = vcombine.high %v1876_v57, %v1880_v58  ;;  %v1884_v3 = vld [vmem:[#allocation15 + $0x780] sm:$0xff] }
 0x41e   : > { %v10558_v29 = vcombine.high %v1845_v22, %v1849_v24  ;;  %v1888_v4 = vld [vmem:[#allocation15 + $0x7a0] sm:$0xff] }
 0x41f   : > { %v10596_v8 = vcombine.high %v1884_v3, %v1888_v4  ;;  %v1892_v9 = vld [vmem:[#allocation15 + $0x7c0] sm:$0xff] }
 0x420   : > { %3268 = vmatpush1.bf16.msra.mxu1 %v10499_v40  ;;  %3350 = vmatpush1.bf16.msra.mxu0 %v10501_v41  ;;  %v1853_v40 = vld [vmem:[#allocation15 + $0x688] sm:$0xff]  ;;  %v1896_v11 = vld [vmem:[#allocation15 + $0x7e0] sm:$0xff] }
 0x421   : > { %3269 = vmatprep.subr.bf16.mxu1 %v10508_v42  ;;  %3351 = vmatprep.subr.bf16.mxu0 %v10510_v44  ;;  %v1857_v41 = vld [vmem:[#allocation15 + $0x6a8] sm:$0xff]  ;;  %v10555_v42 = vcombine.low %v1844_v17, %v1848_v18  ;;  %v10557_v44 = vcombine.low %v1845_v22, %v1849_v24  ;;  %v10604_v17 = vcombine.high %v1892_v9, %v1896_v11  ;;  %v1646_v22 = vld [vmem:[#allocation15 + $0x10] sm:$0xff]  ;;  %v1634_v24 = vmul.f32 0.2, %v12345_v0 }
 0x422   : > { %v10566_v46 = vcombine.high %v1853_v40, %v1857_v41 }
 0x424   : > { %3270 = vmatpush1.bf16.msra.mxu1 %v10507_v34  ;;  %3352 = vmatpush1.bf16.msra.mxu0 %v10509_v35  ;;  %v1861_v34 = vld [vmem:[#allocation15 + $0x6c8] sm:$0xff] }
 0x425   : > { %3271 = vmatprep.subr.bf16.mxu1 %v10516_v36  ;;  %3353 = vmatprep.subr.bf16.mxu0 %v10518_v37  ;;  %v1865_v35 = vld [vmem:[#allocation15 + $0x6e8] sm:$0xff]  ;;  %v10563_v36 = vcombine.low %v1852_v30, %v1856_v31  ;;  %v10565_v37 = vcombine.low %v1853_v40, %v1857_v41  ;;  %v1638_v41 = vsel %vm1630_vm6, %v12345_v0, %v1634_v24  ;;  %v1663_v0 = vld [vmem:[#allocation15 + $0x98] sm:$0xff] }
 0x426   : > { %v10574_v51 = vcombine.high %v1861_v34, %v1865_v35 }
 0x428   : > { %3272 = vmatpush1.bf16.msra.mxu1 %v10515_v54  ;;  %3354 = vmatpush1.bf16.msra.mxu0 %v10517_v55  ;;  %v1869_v54 = vld [vmem:[#allocation15 + $0x708] sm:$0xff] }
 0x429   : > { %3273 = vmatprep.subr.bf16.mxu1 %v10524_v56  ;;  %3355 = vmatprep.subr.bf16.mxu0 %v10526_v59  ;;  %v1873_v55 = vld [vmem:[#allocation15 + $0x728] sm:$0xff]  ;;  %v10571_v56 = vcombine.low %v1860_v32, %v1864_v33  ;;  %v10573_v59 = vcombine.low %v1861_v34, %v1865_v35  ;;  %v12368_v33 = vpack.c.bf16 %v1638_v41, %v1638_v41 }
 0x42a   : > { %v10582_v63 = vcombine.high %v1869_v54, %v1873_v55 }
 0x42c   : > { %3274 = vmatpush1.bf16.msra.mxu1 %v10523_v39  ;;  %3356 = vmatpush1.bf16.msra.mxu0 %v10525_v61  ;;  %v1877_v39 = vld [vmem:[#allocation15 + $0x748] sm:$0xff] }
 0x42d   : > { %3275 = vmatprep.subr.bf16.mxu1 %v10532_v62  ;;  %3357 = vmatprep.subr.bf16.mxu0 %v10534_v1  ;;  %v1881_v61 = vld [vmem:[#allocation15 + $0x768] sm:$0xff]  ;;  %v10579_v62 = vcombine.low %v1868_v52, %v1872_v53  ;;  %v10581_v1 = vcombine.low %v1869_v54, %v1873_v55 }
 0x42e   : > { %v10590_v2 = vcombine.high %v1877_v39, %v1881_v61 }
 0x430   : > { %3276 = vmatpush1.bf16.msra.mxu1 %v10531_v5  ;;  %3358 = vmatpush1.bf16.msra.mxu0 %v10533_v47  ;;  %v1885_v5 = vld [vmem:[#allocation15 + $0x788] sm:$0xff] }
 0x431   : > { %3277 = vmatprep.subr.bf16.mxu1 %v10540_v6  ;;  %3359 = vmatprep.subr.bf16.mxu0 %v10542_v7  ;;  %v1889_v47 = vld [vmem:[#allocation15 + $0x7a8] sm:$0xff]  ;;  %v10587_v6 = vcombine.low %v1876_v57, %v1880_v58  ;;  %v10589_v7 = vcombine.low %v1877_v39, %v1881_v61 }
 0x432   : > { %v10598_v49 = vcombine.high %v1885_v5, %v1889_v47 }
 0x434   : > { %3278 = vmatpush1.bf16.msra.mxu1 %v10539_v13  ;;  %3360 = vmatpush1.bf16.msra.mxu0 %v10541_v14  ;;  %v1893_v13 = vld [vmem:[#allocation15 + $0x7c8] sm:$0xff] }
 0x435   : > { %3279 = vmatprep.subr.bf16.mxu1 %v10548_v15  ;;  %3361 = vmatprep.subr.bf16.mxu0 %v10550_v16  ;;  %v1897_v14 = vld [vmem:[#allocation15 + $0x7e8] sm:$0xff]  ;;  %v10595_v15 = vcombine.low %v1884_v3, %v1888_v4  ;;  %v10597_v16 = vcombine.low %v1885_v5, %v1889_v47  ;;  %v1686_v47 = vld [vmem:[#allocation15 + $0x150] sm:$0xff] }
 0x436   : > { %v10606_v18 = vcombine.high %v1893_v13, %v1897_v14  ;;  %v10605_v30 = vcombine.low %v1893_v13, %v1897_v14  ;;  %v1694_v14 = vld [vmem:[#allocation15 + $0x190] sm:$0xff] }
 0x438   : > { %3280 = vmatpush1.bf16.msra.mxu1 %v10547_v25  ;;  %3362 = vmatpush1.bf16.msra.mxu0 %v10549_v26  ;;  %v1650_v25 = vld [vmem:[#allocation15 + $0x30] sm:$0xff]  ;;  %v1647_v26 = vld [vmem:[#allocation15 + $0x18] sm:$0xff] }
 0x439   : > { %3281 = vmatprep.subr.bf16.mxu1 %v10556_v28  ;;  %3363 = vmatprep.subr.bf16.mxu0 %v10558_v29  ;;  %v1651_v28 = vld [vmem:[#allocation15 + $0x38] sm:$0xff]  ;;  %v10603_v29 = vcombine.low %v1892_v9, %v1896_v11  ;;  %v10360_v31 = vcombine.high %v1646_v22, %v1650_v25  ;;  %v10359_v32 = vcombine.low %v1646_v22, %v1650_v25 }
 0x43a   : > { %v10362_v40 = vcombine.high %v1647_v26, %v1651_v28  ;;  %v10361_v34 = vcombine.low %v1647_v26, %v1651_v28  ;;  %v1702_v26 = vld [vmem:[#allocation15 + $0x1d0] sm:$0xff] }
 0x43b   : > { %v1706_v28 = vld [vmem:[#allocation15 + $0x1f0] sm:$0xff] }
 0x43c   : > { %3282 = vmatpush1.bf16.msra.mxu1 %v10555_v42  ;;  %3364 = vmatpush1.bf16.msra.mxu0 %v10557_v44  ;;  %v1654_v42 = vld [vmem:[#allocation15 + $0x50] sm:$0xff]  ;;  %v10416_v41 = vcombine.high %v1702_v26, %v1706_v28 }
 0x43d   : > { %3283 = vmatprep.subr.bf16.mxu1 %v10564_v45  ;;  %3365 = vmatprep.subr.bf16.mxu0 %v10566_v46  ;;  %v1658_v44 = vld [vmem:[#allocation15 + $0x70] sm:$0xff]  ;;  %v1655_v45 = vld [vmem:[#allocation15 + $0x58] sm:$0xff] }
 0x43e   : > { %v1659_v46 = vld [vmem:[#allocation15 + $0x78] sm:$0xff]  ;;  %v10368_v35 = vcombine.high %v1654_v42, %v1658_v44  ;;  %v10367_v52 = vcombine.low %v1654_v42, %v1658_v44  ;;  %v1710_v44 = vld [vmem:[#allocation15 + $0x210] sm:$0xff] }
 0x43f   : > { %v10369_v53 = vcombine.low %v1655_v45, %v1659_v46 }
 0x440   : > { %3284 = vmatpush1.bf16.msra.mxu1 %v10563_v36  ;;  %3366 = vmatpush1.bf16.msra.mxu0 %v10565_v37  ;;  %v10370_v36 = vcombine.high %v1655_v45, %v1659_v46  ;;  %v1662_v37 = vld [vmem:[#allocation15 + $0x90] sm:$0xff]  ;;  %v1711_v46 = vld [vmem:[#allocation15 + $0x218] sm:$0xff] }
 0x441   : > { %3285 = vmatprep.subr.bf16.mxu1 %v10572_v38  ;;  %3367 = vmatprep.subr.bf16.mxu0 %v10574_v51  ;;  %v1666_v38 = vld [vmem:[#allocation15 + $0xb0] sm:$0xff]  ;;  %v1667_v51 = vld [vmem:[#allocation15 + $0xb8] sm:$0xff] }
 0x442   : > { %v10376_v54 = vcombine.high %v1662_v37, %v1666_v38  ;;  %v10378_v55 = vcombine.high %v1663_v0, %v1667_v51  ;;  %v10375_v57 = vcombine.low %v1662_v37, %v1666_v38  ;;  %v10377_v58 = vcombine.low %v1663_v0, %v1667_v51  ;;  %v1714_v45 = vld [vmem:[#allocation15 + $0x230] sm:$0xff]  ;;  %v1719_v51 = vld [vmem:[#allocation15 + $0x258] sm:$0xff] }
 0x443   : > { %v1718_v38 = vld [vmem:[#allocation15 + $0x250] sm:$0xff] }
 0x444   : > { %3286 = vmatpush1.bf16.msra.mxu1 %v10571_v56  ;;  %3368 = vmatpush1.bf16.msra.mxu0 %v10573_v59  ;;  %v1670_v56 = vld [vmem:[#allocation15 + $0xd0] sm:$0xff] }
 0x445   : > { %3287 = vmatprep.subr.bf16.mxu1 %v10580_v60  ;;  %3369 = vmatprep.subr.bf16.mxu0 %v10582_v63  ;;  %v1674_v59 = vld [vmem:[#allocation15 + $0xf0] sm:$0xff]  ;;  %v1671_v60 = vld [vmem:[#allocation15 + $0xd8] sm:$0xff] }
 0x446   : > { %v1675_v63 = vld [vmem:[#allocation15 + $0xf8] sm:$0xff]  ;;  %v10384_v39 = vcombine.high %v1670_v56, %v1674_v59  ;;  %v1722_v0 = vld [vmem:[#allocation15 + $0x270] sm:$0xff] }
 0x447   : > { %v10386_v61 = vcombine.high %v1671_v60, %v1675_v63  ;;  %v10385_v3 = vcombine.low %v1671_v60, %v1675_v63  ;;  %v1730_v60 = vld [vmem:[#allocation15 + $0x2b0] sm:$0xff]  ;;  %v1727_v63 = vld [vmem:[#allocation15 + $0x298] sm:$0xff] }
 0x448   : > { %3288 = vmatpush1.bf16.msra.mxu1 %v10579_v62  ;;  %3370 = vmatpush1.bf16.msra.mxu0 %v10581_v1  ;;  %v1678_v62 = vld [vmem:[#allocation15 + $0x110] sm:$0xff] }
 0x449   : > { %3289 = vmatprep.subr.bf16.mxu1 %v10588_v43  ;;  %3371 = vmatprep.subr.bf16.mxu0 %v10590_v2  ;;  %v1682_v1 = vld [vmem:[#allocation15 + $0x130] sm:$0xff]  ;;  %v1683_v43 = vld [vmem:[#allocation15 + $0x138] sm:$0xff]  ;;  %v10383_v2 = vcombine.low %v1670_v56, %v1674_v59 }
 0x44a   : > { %v10392_v4 = vcombine.high %v1678_v62, %v1682_v1  ;;  %v1726_v59 = vld [vmem:[#allocation15 + $0x290] sm:$0xff] }
 0x44c   : > { %3290 = vmatpush1.bf16.msra.mxu1 %v10587_v6  ;;  %3372 = vmatpush1.bf16.msra.mxu0 %v10589_v7  ;;  %v1690_v6 = vld [vmem:[#allocation15 + $0x170] sm:$0xff]  ;;  %v1687_v7 = vld [vmem:[#allocation15 + $0x158] sm:$0xff] }
 0x44d   : > { %3291 = vmatprep.subr.bf16.mxu1 %v10596_v8  ;;  %3373 = vmatprep.subr.bf16.mxu0 %v10598_v49  ;;  %v1691_v8 = vld [vmem:[#allocation15 + $0x178] sm:$0xff]  ;;  %v10391_v49 = vcombine.low %v1678_v62, %v1682_v1  ;;  %v10400_v11 = vcombine.high %v1686_v47, %v1690_v6  ;;  %v1734_v1 = vld [vmem:[#allocation15 + $0x2d0] sm:$0xff] }
 0x44e   : > { %v10402_v13 = vcombine.high %v1687_v7, %v1691_v8  ;;  %v10401_v22 = vcombine.low %v1687_v7, %v1691_v8  ;;  %v1746_v7 = vld [vmem:[#allocation15 + $0x330] sm:$0xff]  ;;  %v1743_v8 = vld [vmem:[#allocation15 + $0x318] sm:$0xff] }
 0x450   : > { %3292 = vmatpush1.bf16.msra.mxu1 %v10595_v15  ;;  %3374 = vmatpush1.bf16.msra.mxu0 %v10597_v16  ;;  %v1698_v15 = vld [vmem:[#allocation15 + $0x1b0] sm:$0xff]  ;;  %v1695_v16 = vld [vmem:[#allocation15 + $0x198] sm:$0xff] }
 0x451   : > { %3293 = vmatprep.subr.bf16.mxu1 %v10604_v17  ;;  %3375 = vmatprep.subr.bf16.mxu0 %v10606_v18  ;;  %v1699_v17 = vld [vmem:[#allocation15 + $0x1b8] sm:$0xff]  ;;  %v10399_v18 = vcombine.low %v1686_v47, %v1690_v6  ;;  %v10408_v24 = vcombine.high %v1694_v14, %v1698_v15  ;;  %v1742_v6 = vld [vmem:[#allocation15 + $0x310] sm:$0xff] }
 0x452   : > { %v10410_v25 = vcombine.high %v1695_v16, %v1699_v17 }
 0x454   : > { %3294 = vmatpush1.bf16.msra.mxu1 %v10603_v29  ;;  %3376 = vmatpush1.bf16.msra.mxu0 %v10605_v30  ;;  %v1703_v29 = vld [vmem:[#allocation15 + $0x1d8] sm:$0xff] }
 0x455   : > { %3386 = vmatprep.subr.bf16.mxu1 %v10360_v31  ;;  %3468 = vmatprep.subr.bf16.mxu0 %v10362_v40  ;;  %v1707_v30 = vld [vmem:[#allocation15 + $0x1f8] sm:$0xff]  ;;  %v10407_v31 = vcombine.low %v1694_v14, %v1698_v15  ;;  %v10409_v40 = vcombine.low %v1695_v16, %v1699_v17  ;;  %v1750_v15 = vld [vmem:[#allocation15 + $0x350] sm:$0xff] }
 0x456   : > { %v10418_v42 = vcombine.high %v1703_v29, %v1707_v30  ;;  %v1754_v16 = vld [vmem:[#allocation15 + $0x370] sm:$0xff]  ;;  %v1751_v17 = vld [vmem:[#allocation15 + $0x358] sm:$0xff] }
 0x457   : > { %3296 = vmatmul.mubr.bf16.vlgmr.msra.gmra.mrb[4].mxu1 %v12368_v33  ;;  %3378 = vmatmul.mubr.bf16.vlgmr.msra.gmra.mrb[8].mxu0 %v12368_v33 }
 0x458   : > { %3387 = vmatpush1.bf16.msra.mxu1 %v10359_v32  ;;  %3418 = vmatprep.mubr.bf16.mxu1 %v12347_v10  ;;  %v1715_v32 = vld [vmem:[#allocation15 + $0x238] sm:$0xff] }
 0x459   : > { %3469 = vmatpush1.bf16.msra.mxu0 %v10361_v34  ;;  %3500 = vmatprep.mubr.bf16.mxu0 %v12347_v10  ;;  %v1679_v10 = vld [vmem:[#allocation15 + $0x118] sm:$0xff]  ;;  %v10415_v34 = vcombine.low %v1702_v26, %v1706_v28  ;;  %v10426_v37 = vcombine.high %v1711_v46, %v1715_v32  ;;  %v1758_v28 = vld [vmem:[#allocation15 + $0x390] sm:$0xff] }
 0x45a   : > { %3388 = vmatprep.subr.bf16.mxu1 %v10368_v35  ;;  %3470 = vmatprep.subr.bf16.mxu0 %v10370_v36  ;;  %v10394_v5 = vcombine.high %v1679_v10, %v1683_v43  ;;  %v10393_v9 = vcombine.low %v1679_v10, %v1683_v43  ;;  %v10417_v35 = vcombine.low %v1703_v29, %v1707_v30  ;;  %v1738_v10 = vld [vmem:[#allocation15 + $0x2f0] sm:$0xff]  ;;  %v1735_v43 = vld [vmem:[#allocation15 + $0x2d8] sm:$0xff] }
 0x45b   : > { %v10424_v36 = vcombine.high %v1710_v44, %v1714_v45  ;;  %v1762_v29 = vld [vmem:[#allocation15 + $0x3b0] sm:$0xff]  ;;  %v1759_v30 = vld [vmem:[#allocation15 + $0x398] sm:$0xff] }
 0x45c   : > { %3389 = vmatpush1.bf16.msra.mxu1 %v10367_v52  ;;  %v1723_v52 = vld [vmem:[#allocation15 + $0x278] sm:$0xff] }
 0x45d   : > { %3471 = vmatpush1.bf16.msra.mxu0 %v10369_v53  ;;  %3390 = vmatprep.subr.bf16.mxu1 %v10376_v54  ;;  %v10423_v53 = vcombine.low %v1710_v44, %v1714_v45  ;;  %v10425_v54 = vcombine.low %v1711_v46, %v1715_v32  ;;  %v10434_v56 = vcombine.high %v1719_v51, %v1723_v52  ;;  %v1766_v45 = vld [vmem:[#allocation15 + $0x3d0] sm:$0xff]  ;;  %v1767_v32 = vld [vmem:[#allocation15 + $0x3d8] sm:$0xff] }
 0x45e   : > { %3472 = vmatprep.subr.bf16.mxu0 %v10378_v55  ;;  %v10432_v55 = vcombine.high %v1718_v38, %v1722_v0  ;;  %v1770_v46 = vld [vmem:[#allocation15 + $0x3f0] sm:$0xff] }
 0x460   : > { %3391 = vmatpush1.bf16.msra.mxu1 %v10375_v57  ;;  %v1731_v57 = vld [vmem:[#allocation15 + $0x2b8] sm:$0xff] }
 0x461   : > { %3473 = vmatpush1.bf16.msra.mxu0 %v10377_v58  ;;  %3392 = vmatprep.subr.bf16.mxu1 %v10384_v39  ;;  %v10431_v58 = vcombine.low %v1718_v38, %v1722_v0  ;;  %v10433_v39 = vcombine.low %v1719_v51, %v1723_v52  ;;  %v10442_v62 = vcombine.high %v1727_v63, %v1731_v57  ;;  %v1774_v0 = vld [vmem:[#allocation15 + $0x410] sm:$0xff]  ;;  %v1775_v52 = vld [vmem:[#allocation15 + $0x418] sm:$0xff] }
 0x462   : > { %3474 = vmatprep.subr.bf16.mxu0 %v10386_v61  ;;  %v10440_v61 = vcombine.high %v1726_v59, %v1730_v60  ;;  %v1778_v51 = vld [vmem:[#allocation15 + $0x430] sm:$0xff] }
 0x464   : > { %3393 = vmatpush1.bf16.msra.mxu1 %v10383_v2  ;;  %v1739_v2 = vld [vmem:[#allocation15 + $0x2f8] sm:$0xff] }
 0x465   : > { %3475 = vmatpush1.bf16.msra.mxu0 %v10385_v3  ;;  %3394 = vmatprep.subr.bf16.mxu1 %v10392_v4  ;;  %v10439_v3 = vcombine.low %v1726_v59, %v1730_v60  ;;  %v10441_v4 = vcombine.low %v1727_v63, %v1731_v57  ;;  %v10450_v47 = vcombine.high %v1735_v43, %v1739_v2  ;;  %v1782_v60 = vld [vmem:[#allocation15 + $0x450] sm:$0xff] }
 0x466   : > { %3476 = vmatprep.subr.bf16.mxu0 %v10394_v5  ;;  %v10448_v5 = vcombine.high %v1734_v1, %v1738_v10  ;;  %v1786_v63 = vld [vmem:[#allocation15 + $0x470] sm:$0xff]  ;;  %v10487_v57 = vcombine.low %v1774_v0, %v1778_v51 }
 0x468   : > { %3395 = vmatpush1.bf16.msra.mxu1 %v10391_v49  ;;  %v1747_v49 = vld [vmem:[#allocation15 + $0x338] sm:$0xff] }
 0x469   : > { %3477 = vmatpush1.bf16.msra.mxu0 %v10393_v9  ;;  %3396 = vmatprep.subr.bf16.mxu1 %v10400_v11  ;;  %v10447_v9 = vcombine.low %v1734_v1, %v1738_v10  ;;  %v10449_v11 = vcombine.low %v1735_v43, %v1739_v2  ;;  %v10458_v14 = vcombine.high %v1743_v8, %v1747_v49  ;;  %v1790_v1 = vld [vmem:[#allocation15 + $0x490] sm:$0xff]  ;;  %v1791_v2 = vld [vmem:[#allocation15 + $0x498] sm:$0xff] }
 0x46a   : > { %3478 = vmatprep.subr.bf16.mxu0 %v10402_v13  ;;  %v10456_v13 = vcombine.high %v1742_v6, %v1746_v7  ;;  %v1794_v10 = vld [vmem:[#allocation15 + $0x4b0] sm:$0xff] }
 0x46c   : > { %3397 = vmatpush1.bf16.msra.mxu1 %v10399_v18  ;;  %v1755_v18 = vld [vmem:[#allocation15 + $0x378] sm:$0xff] }
 0x46d   : > { %3479 = vmatpush1.bf16.msra.mxu0 %v10401_v22  ;;  %3398 = vmatprep.subr.bf16.mxu1 %v10408_v24  ;;  %v10455_v22 = vcombine.low %v1742_v6, %v1746_v7  ;;  %v10457_v24 = vcombine.low %v1743_v8, %v1747_v49  ;;  %v10466_v26 = vcombine.high %v1751_v17, %v1755_v18  ;;  %v1798_v7 = vld [vmem:[#allocation15 + $0x4d0] sm:$0xff]  ;;  %v1799_v49 = vld [vmem:[#allocation15 + $0x4d8] sm:$0xff] }
 0x46e   : > { %3480 = vmatprep.subr.bf16.mxu0 %v10410_v25  ;;  %v10464_v25 = vcombine.high %v1750_v15, %v1754_v16  ;;  %v1802_v8 = vld [vmem:[#allocation15 + $0x4f0] sm:$0xff] }
 0x470   : > { %3399 = vmatpush1.bf16.msra.mxu1 %v10407_v31  ;;  %v1763_v31 = vld [vmem:[#allocation15 + $0x3b8] sm:$0xff] }
 0x471   : > { %3481 = vmatpush1.bf16.msra.mxu0 %v10409_v40  ;;  %3400 = vmatprep.subr.bf16.mxu1 %v10416_v41  ;;  %v10463_v40 = vcombine.low %v1750_v15, %v1754_v16  ;;  %v10465_v41 = vcombine.low %v1751_v17, %v1755_v18  ;;  %v10474_v44 = vcombine.high %v1759_v30, %v1763_v31  ;;  %v1806_v15 = vld [vmem:[#allocation15 + $0x510] sm:$0xff]  ;;  %v1807_v17 = vld [vmem:[#allocation15 + $0x518] sm:$0xff] }
 0x472   : > { %3482 = vmatprep.subr.bf16.mxu0 %v10418_v42  ;;  %v10472_v42 = vcombine.high %v1758_v28, %v1762_v29  ;;  %v1810_v16 = vld [vmem:[#allocation15 + $0x530] sm:$0xff]  ;;  %v1811_v18 = vld [vmem:[#allocation15 + $0x538] sm:$0xff] }
 0x474   : > { %3401 = vmatpush1.bf16.msra.mxu1 %v10415_v34  ;;  %v1771_v34 = vld [vmem:[#allocation15 + $0x3f8] sm:$0xff] }
 0x475   : > { %3483 = vmatpush1.bf16.msra.mxu0 %v10417_v35  ;;  %3402 = vmatprep.subr.bf16.mxu1 %v10424_v36  ;;  %v10471_v35 = vcombine.low %v1758_v28, %v1762_v29  ;;  %v10473_v36 = vcombine.low %v1759_v30, %v1763_v31  ;;  %v10482_v38 = vcombine.high %v1767_v32, %v1771_v34  ;;  %v1818_v28 = vld [vmem:[#allocation15 + $0x570] sm:$0xff]  ;;  %v1815_v29 = vld [vmem:[#allocation15 + $0x558] sm:$0xff] }
 0x476   : > { %3484 = vmatprep.subr.bf16.mxu0 %v10426_v37  ;;  %v10480_v37 = vcombine.high %v1766_v45, %v1770_v46  ;;  %v1819_v30 = vld [vmem:[#allocation15 + $0x578] sm:$0xff]  ;;  %v10519_v31 = vcombine.low %v1806_v15, %v1810_v16 }
 0x478   : > { %3403 = vmatpush1.bf16.msra.mxu1 %v10423_v53  ;;  %v1779_v53 = vld [vmem:[#allocation15 + $0x438] sm:$0xff] }
 0x479   : > { %3485 = vmatpush1.bf16.msra.mxu0 %v10425_v54  ;;  %3404 = vmatprep.subr.bf16.mxu1 %v10432_v55  ;;  %v10479_v54 = vcombine.low %v1766_v45, %v1770_v46  ;;  %v10481_v55 = vcombine.low %v1767_v32, %v1771_v34  ;;  %v10490_v59 = vcombine.high %v1775_v52, %v1779_v53  ;;  %v1826_v45 = vld [vmem:[#allocation15 + $0x5b0] sm:$0xff]  ;;  %v1823_v46 = vld [vmem:[#allocation15 + $0x598] sm:$0xff] }
 0x47a   : > { %3486 = vmatprep.subr.bf16.mxu0 %v10434_v56  ;;  %v10488_v56 = vcombine.high %v1774_v0, %v1778_v51  ;;  %v1827_v32 = vld [vmem:[#allocation15 + $0x5b8] sm:$0xff]  ;;  %v1834_v0 = vld [vmem:[#allocation15 + $0x5f0] sm:$0xff] }
 0x47b   : > { %v1831_v51 = vld [vmem:[#allocation15 + $0x5d8] sm:$0xff] }
 0x47c   : > { %3405 = vmatpush1.bf16.msra.mxu1 %v10431_v58  ;;  %v1783_v58 = vld [vmem:[#allocation15 + $0x458] sm:$0xff] }
 0x47d   : > { %3487 = vmatpush1.bf16.msra.mxu0 %v10433_v39  ;;  %3406 = vmatprep.subr.bf16.mxu1 %v10440_v61  ;;  %v1787_v39 = vld [vmem:[#allocation15 + $0x478] sm:$0xff]  ;;  %v10489_v61 = vcombine.low %v1775_v52, %v1779_v53 }
 0x47e   : > { %3488 = vmatprep.subr.bf16.mxu0 %v10442_v62  ;;  %v10496_v62 = vcombine.high %v1782_v60, %v1786_v63  ;;  %v10498_v43 = vcombine.high %v1783_v58, %v1787_v39  ;;  %v1835_v52 = vld [vmem:[#allocation15 + $0x5f8] sm:$0xff] }
 0x480   : > { %3407 = vmatpush1.bf16.msra.mxu1 %v10439_v3  ;;  %v1795_v3 = vld [vmem:[#allocation15 + $0x4b8] sm:$0xff] }
 0x481   : > { %3489 = vmatpush1.bf16.msra.mxu0 %v10441_v4  ;;  %3408 = vmatprep.subr.bf16.mxu1 %v10448_v5  ;;  %v10495_v4 = vcombine.low %v1782_v60, %v1786_v63  ;;  %v10497_v5 = vcombine.low %v1783_v58, %v1787_v39  ;;  %v10506_v6 = vcombine.high %v1791_v2, %v1795_v3  ;;  %v1842_v60 = vld [vmem:[#allocation15 + $0x630] sm:$0xff]  ;;  %v1839_v63 = vld [vmem:[#allocation15 + $0x618] sm:$0xff] }
 0x482   : > { %3490 = vmatprep.subr.bf16.mxu0 %v10450_v47  ;;  %v10504_v47 = vcombine.high %v1790_v1, %v1794_v10  ;;  %v10545_v39 = vcombine.low %v1831_v51, %v1835_v52 }
 0x484   : > { %3409 = vmatpush1.bf16.msra.mxu1 %v10447_v9  ;;  %v1803_v9 = vld [vmem:[#allocation15 + $0x4f8] sm:$0xff] }
 0x485   : > { %3491 = vmatpush1.bf16.msra.mxu0 %v10449_v11  ;;  %3410 = vmatprep.subr.bf16.mxu1 %v10456_v13  ;;  %v10503_v11 = vcombine.low %v1790_v1, %v1794_v10  ;;  %v10512_v13 = vcombine.high %v1798_v7, %v1802_v8  ;;  %v1846_v1 = vld [vmem:[#allocation15 + $0x650] sm:$0xff] }
 0x486   : > { %3492 = vmatprep.subr.bf16.mxu0 %v10458_v14  ;;  %v10514_v14 = vcombine.high %v1799_v49, %v1803_v9  ;;  %v1850_v10 = vld [vmem:[#allocation15 + $0x670] sm:$0xff] }
 0x488   : > { %3411 = vmatpush1.bf16.msra.mxu1 %v10455_v22  ;;  %v10513_v22 = vcombine.low %v1799_v49, %v1803_v9  ;;  %v1859_v49 = vld [vmem:[#allocation15 + $0x6b8] sm:$0xff]  ;;  %v10559_v9 = vcombine.low %v1846_v1, %v1850_v10 }
 0x489   : > { %3493 = vmatpush1.bf16.msra.mxu0 %v10457_v24  ;;  %3412 = vmatprep.subr.bf16.mxu1 %v10464_v25  ;;  %v10520_v24 = vcombine.high %v1806_v15, %v1810_v16  ;;  %v10522_v25 = vcombine.high %v1807_v17, %v1811_v18  ;;  %v1866_v15 = vld [vmem:[#allocation15 + $0x6f0] sm:$0xff]  ;;  %v1863_v16 = vld [vmem:[#allocation15 + $0x6d8] sm:$0xff] }
 0x48a   : > { %3494 = vmatprep.subr.bf16.mxu0 %v10466_v26  ;;  %v1814_v26 = vld [vmem:[#allocation15 + $0x550] sm:$0xff] }
 0x48b   : > { %v10527_v34 = vcombine.low %v1814_v26, %v1818_v28 }
 0x48c   : > { %3413 = vmatpush1.bf16.msra.mxu1 %v10463_v40  ;;  %v10521_v40 = vcombine.low %v1807_v17, %v1811_v18  ;;  %v1867_v17 = vld [vmem:[#allocation15 + $0x6f8] sm:$0xff] }
 0x48d   : > { %3495 = vmatpush1.bf16.msra.mxu0 %v10465_v41  ;;  %3414 = vmatprep.subr.bf16.mxu1 %v10472_v42  ;;  %v10528_v41 = vcombine.high %v1814_v26, %v1818_v28  ;;  %v10530_v42 = vcombine.high %v1815_v29, %v1819_v30  ;;  %v1874_v26 = vld [vmem:[#allocation15 + $0x730] sm:$0xff]  ;;  %v1871_v28 = vld [vmem:[#allocation15 + $0x718] sm:$0xff] }
 0x48e   : > { %3496 = vmatprep.subr.bf16.mxu0 %v10474_v44  ;;  %v1822_v44 = vld [vmem:[#allocation15 + $0x590] sm:$0xff] }
 0x48f   : > { %v10535_v53 = vcombine.low %v1822_v44, %v1826_v45 }
 0x490   : > { %3415 = vmatpush1.bf16.msra.mxu1 %v10471_v35  ;;  %v10529_v35 = vcombine.low %v1815_v29, %v1819_v30  ;;  %v1875_v29 = vld [vmem:[#allocation15 + $0x738] sm:$0xff] }
 0x491   : > { %3497 = vmatpush1.bf16.msra.mxu0 %v10473_v36  ;;  %3416 = vmatprep.subr.bf16.mxu1 %v10480_v37  ;;  %v10536_v36 = vcombine.high %v1822_v44, %v1826_v45  ;;  %v10538_v37 = vcombine.high %v1823_v46, %v1827_v32  ;;  %v1882_v44 = vld [vmem:[#allocation15 + $0x770] sm:$0xff]  ;;  %v1879_v45 = vld [vmem:[#allocation15 + $0x758] sm:$0xff] }
 0x492   : > { %3498 = vmatprep.subr.bf16.mxu0 %v10482_v38  ;;  %v1830_v38 = vld [vmem:[#allocation15 + $0x5d0] sm:$0xff] }
 0x493   : > { %v10543_v58 = vcombine.low %v1830_v38, %v1834_v0 }
 0x494   : > { %3417 = vmatpush1.bf16.msra.mxu1 %v10479_v54  ;;  %v10537_v54 = vcombine.low %v1823_v46, %v1827_v32  ;;  %v1883_v46 = vld [vmem:[#allocation15 + $0x778] sm:$0xff] }
 0x495   : > { %3499 = vmatpush1.bf16.msra.mxu0 %v10481_v55  ;;  %3427 = vmatprep.subr.bf16.mxu1 %v10488_v56  ;;  %v10544_v55 = vcombine.high %v1830_v38, %v1834_v0  ;;  %v10546_v56 = vcombine.high %v1831_v51, %v1835_v52  ;;  %v1890_v38 = vld [vmem:[#allocation15 + $0x7b0] sm:$0xff]  ;;  %v1887_v0 = vld [vmem:[#allocation15 + $0x798] sm:$0xff] }
 0x496   : > { %3509 = vmatprep.subr.bf16.mxu0 %v10490_v59  ;;  %v1838_v59 = vld [vmem:[#allocation15 + $0x610] sm:$0xff]  ;;  %v1891_v51 = vld [vmem:[#allocation15 + $0x7b8] sm:$0xff] }
 0x497   : > { %3419 = vmatmul.mubr.bf16.vlgmr.msra.gmra.mrb[8].mxu1 %v12349_v12 }
 0x498   : > { %3501 = vmatmul.mubr.bf16.vlgmr.msra.gmra.mrb[12].mxu0 %v12349_v12  ;;  %3428 = vmatpush1.bf16.msra.mxu1 %v10487_v57  ;;  %v10505_v12 = vcombine.low %v1791_v2, %v1795_v3  ;;  %v1843_v57 = vld [vmem:[#allocation15 + $0x638] sm:$0xff]  ;;  %v10551_v3 = vcombine.low %v1838_v59, %v1842_v60 }
 0x499   : > { %3459 = vmatprep.mubr.bf16.mxu1 %v12355_v19  ;;  %3510 = vmatpush1.bf16.msra.mxu0 %v10489_v61  ;;  %v10552_v61 = vcombine.high %v1838_v59, %v1842_v60  ;;  %v1851_v2 = vld [vmem:[#allocation15 + $0x678] sm:$0xff]  ;;  %v1898_v59 = vld [vmem:[#allocation15 + $0x7f0] sm:$0xff] }
 0x49a   : > { %3541 = vmatprep.mubr.bf16.mxu0 %v12355_v19  ;;  %3429 = vmatprep.subr.bf16.mxu1 %v10496_v62  ;;  %v10511_v19 = vcombine.low %v1798_v7, %v1802_v8  ;;  %v10554_v62 = vcombine.high %v1839_v63, %v1843_v57  ;;  %v1858_v7 = vld [vmem:[#allocation15 + $0x6b0] sm:$0xff]  ;;  %v1855_v8 = vld [vmem:[#allocation15 + $0x698] sm:$0xff] }
 0x49b   : > { %3511 = vmatprep.subr.bf16.mxu0 %v10498_v43  ;;  %v1847_v43 = vld [vmem:[#allocation15 + $0x658] sm:$0xff] }
 0x49c   : > { %3430 = vmatpush1.bf16.msra.mxu1 %v10495_v4  ;;  %v10553_v4 = vcombine.low %v1839_v63, %v1843_v57  ;;  %v1895_v60 = vld [vmem:[#allocation15 + $0x7d8] sm:$0xff] }
 0x49d   : > { %3512 = vmatpush1.bf16.msra.mxu0 %v10497_v5  ;;  %3431 = vmatprep.subr.bf16.mxu1 %v10504_v47  ;;  %v10560_v5 = vcombine.high %v1846_v1, %v1850_v10  ;;  %v10562_v47 = vcombine.high %v1847_v43, %v1851_v2  ;;  %v1899_v63 = vld [vmem:[#allocation15 + $0x7f8] sm:$0xff]  ;;  %v3853_v1 = vld [vmem:[%s12268_s12 + $0x18] sm:$0xff] }
 0x49e   : > { %3513 = vmatprep.subr.bf16.mxu0 %v10506_v6  ;;  %v1854_v6 = vld [vmem:[#allocation15 + $0x690] sm:$0xff] }
 0x49f   : > { %v10567_v18 = vcombine.low %v1854_v6, %v1858_v7 }
 0x4a0   : > { %3432 = vmatpush1.bf16.msra.mxu1 %v10503_v11  ;;  %v10561_v11 = vcombine.low %v1847_v43, %v1851_v2  ;;  %v10609_v43 = vcombine.low %v1895_v60, %v1899_v63 }
 0x4a1   : > { %3514 = vmatpush1.bf16.msra.mxu0 %v10505_v12  ;;  %3433 = vmatprep.subr.bf16.mxu1 %v10512_v13  ;;  %v10568_v12 = vcombine.high %v1854_v6, %v1858_v7  ;;  %v10570_v13 = vcombine.high %v1855_v8, %v1859_v49 }
 0x4a2   : > { %3515 = vmatprep.subr.bf16.mxu0 %v10514_v14  ;;  %v1862_v14 = vld [vmem:[#allocation15 + $0x6d0] sm:$0xff] }
 0x4a3   : > { %v10575_v30 = vcombine.low %v1862_v14, %v1866_v15 }
 0x4a4   : > { %3434 = vmatpush1.bf16.msra.mxu1 %v10511_v19  ;;  %v10569_v19 = vcombine.low %v1855_v8, %v1859_v49  ;;  %v4909_v8 = vunpack.c.h.s8.bf16 %v3853_v1  ;;  %v3883_v49 = vld [vmem:[%s12268_s12 + $0x108] sm:$0xff] }
 0x4a5   : > { %3516 = vmatpush1.bf16.msra.mxu0 %v10513_v22  ;;  %3435 = vmatprep.subr.bf16.mxu1 %v10520_v24  ;;  %v10576_v22 = vcombine.high %v1862_v14, %v1866_v15  ;;  %v10578_v24 = vcombine.high %v1863_v16, %v1867_v17  ;;  %v3882_v14 = vld [vmem:[%s12268_s12 + $0x100] sm:$0xff] }
 0x4a6   : > { %3517 = vmatprep.subr.bf16.mxu0 %v10522_v25  ;;  %v1870_v25 = vld [vmem:[#allocation15 + $0x710] sm:$0xff] }
 0x4a7   : > { %v10583_v32 = vcombine.low %v1870_v25, %v1874_v26 }
 0x4a8   : > { %3436 = vmatpush1.bf16.msra.mxu1 %v10519_v31  ;;  %v10577_v31 = vcombine.low %v1863_v16, %v1867_v17  ;;  %v3884_v16 = vld [vmem:[%s12268_s12 + $0x110] sm:$0xff]  ;;  %v4938_v17 = vunpack.c.l.s8.bf16 %v3882_v14 }
 0x4a9   : > { %3518 = vmatpush1.bf16.msra.mxu0 %v10521_v40  ;;  %3437 = vmatprep.subr.bf16.mxu1 %v10528_v41  ;;  %v10584_v40 = vcombine.high %v1870_v25, %v1874_v26  ;;  %v10586_v41 = vcombine.high %v1871_v28, %v1875_v29  ;;  %v4970_v25 = vunpack.c.h.s8.bf16 %v3882_v14  ;;  %v4972_v26 = vunpack.c.h.s8.bf16 %v3884_v16 }
 0x4aa   : > { %3519 = vmatprep.subr.bf16.mxu0 %v10530_v42  ;;  %v1878_v42 = vld [vmem:[#allocation15 + $0x750] sm:$0xff] }
 0x4ab   : > { %v10591_v52 = vcombine.low %v1878_v42, %v1882_v44 }
 0x4ac   : > { %3438 = vmatpush1.bf16.msra.mxu1 %v10527_v34  ;;  %v10585_v34 = vcombine.low %v1871_v28, %v1875_v29  ;;  %v3914_v29 = vld [vmem:[%s12268_s12 + $0x200] sm:$0xff] }
 0x4ad   : > { %3520 = vmatpush1.bf16.msra.mxu0 %v10529_v35  ;;  %3439 = vmatprep.subr.bf16.mxu1 %v10536_v36  ;;  %v10592_v35 = vcombine.high %v1878_v42, %v1882_v44  ;;  %v10594_v36 = vcombine.high %v1879_v45, %v1883_v46 }
 0x4ae   : > { %3521 = vmatprep.subr.bf16.mxu0 %v10538_v37  ;;  %v1886_v37 = vld [vmem:[#allocation15 + $0x790] sm:$0xff] }
 0x4af   : > { %v10599_v57 = vcombine.low %v1886_v37, %v1890_v38 }
 0x4b0   : > { %3440 = vmatpush1.bf16.msra.mxu1 %v10535_v53  ;;  %v10593_v53 = vcombine.low %v1879_v45, %v1883_v46  ;;  %v3947_v45 = vld [vmem:[%s12268_s12 + $0x308] sm:$0xff]  ;;  %v3949_v46 = vld [vmem:[%s12268_s12 + $0x318] sm:$0xff] }
 0x4b1   : > { %3522 = vmatpush1.bf16.msra.mxu0 %v10537_v54  ;;  %3441 = vmatprep.subr.bf16.mxu1 %v10544_v55  ;;  %v10600_v54 = vcombine.high %v1886_v37, %v1890_v38  ;;  %v10602_v55 = vcombine.high %v1887_v0, %v1891_v51  ;;  %v5069_v37 = vunpack.c.l.s8.bf16 %v3949_v46  ;;  %v3948_v38 = vld [vmem:[%s12268_s12 + $0x310] sm:$0xff] }
 0x4b2   : > { %3523 = vmatprep.subr.bf16.mxu0 %v10546_v56  ;;  %v1894_v56 = vld [vmem:[#allocation15 + $0x7d0] sm:$0xff] }
 0x4b3   : > { %v10607_v10 = vcombine.low %v1894_v56, %v1898_v59 }
 0x4b4   : > { %3442 = vmatpush1.bf16.msra.mxu1 %v10543_v58  ;;  %v10601_v58 = vcombine.low %v1887_v0, %v1891_v51  ;;  %v5068_v51 = vunpack.c.l.s8.bf16 %v3948_v38 }
 0x4b5   : > { %3524 = vmatpush1.bf16.msra.mxu0 %v10545_v39  ;;  %3443 = vmatprep.subr.bf16.mxu1 %v10552_v61  ;;  %v10608_v39 = vcombine.high %v1894_v56, %v1898_v59  ;;  %v10610_v61 = vcombine.high %v1895_v60, %v1899_v63  ;;  %v5100_v59 = vunpack.c.h.s8.bf16 %v3948_v38  ;;  %v3978_v63 = vld [vmem:[%s12268_s12 + $0x400] sm:$0xff] }
 0x4b6   : > { %3525 = vmatprep.subr.bf16.mxu0 %v10554_v62  ;;  %v3851_v62 = vld [vmem:[%s12268_s12 + $0x8] sm:$0xff] }
 0x4b7   : > { %v4875_v2 = vunpack.c.l.s8.bf16 %v3851_v62  ;;  %v4907_v7 = vunpack.c.h.s8.bf16 %v3851_v62 }
 0x4b8   : > { %3444 = vmatpush1.bf16.msra.mxu1 %v10551_v3  ;;  %v3850_v3 = vld [vmem:[%s12268_s12] sm:$0xff] }
 0x4b9   : > { %3526 = vmatpush1.bf16.msra.mxu0 %v10553_v4  ;;  %3445 = vmatprep.subr.bf16.mxu1 %v10560_v5  ;;  %v4877_v4 = vunpack.c.l.s8.bf16 %v3853_v1  ;;  %v3852_v5 = vld [vmem:[%s12268_s12 + $0x10] sm:$0xff] }
 0x4ba   : > { %3527 = vmatprep.subr.bf16.mxu0 %v10562_v47  ;;  %v4874_v47 = vunpack.c.l.s8.bf16 %v3850_v3  ;;  %v4876_v6 = vunpack.c.l.s8.bf16 %v3852_v5 }
 0x4bc   : > { %3446 = vmatpush1.bf16.msra.mxu1 %v10559_v9  ;;  %v3885_v9 = vld [vmem:[%s12268_s12 + $0x118] sm:$0xff] }
 0x4bd   : > { %3528 = vmatpush1.bf16.msra.mxu0 %v10561_v11  ;;  %3447 = vmatprep.subr.bf16.mxu1 %v10568_v12  ;;  %v4906_v11 = vunpack.c.h.s8.bf16 %v3850_v3  ;;  %v4908_v12 = vunpack.c.h.s8.bf16 %v3852_v5  ;;  %v4941_v15 = vunpack.c.l.s8.bf16 %v3885_v9  ;;  %v4010_v5 = vld [vmem:[%s12268_s12 + $0x500] sm:$0xff] }
 0x4be   : > { %3529 = vmatprep.subr.bf16.mxu0 %v10570_v13  ;;  %v4939_v13 = vunpack.c.l.s8.bf16 %v3883_v49 }
 0x4c0   : > { %3448 = vmatpush1.bf16.msra.mxu1 %v10567_v18  ;;  %v4940_v18 = vunpack.c.l.s8.bf16 %v3884_v16  ;;  %v4042_v16 = vld [vmem:[%s12268_s12 + $0x600] sm:$0xff] }
 0x4c1   : > { %3530 = vmatpush1.bf16.msra.mxu0 %v10569_v19  ;;  %3449 = vmatprep.subr.bf16.mxu1 %v10576_v22  ;;  %v4973_v19 = vunpack.c.h.s8.bf16 %v3885_v9  ;;  %v3915_v22 = vld [vmem:[%s12268_s12 + $0x208] sm:$0xff] }
 0x4c2   : > { %3531 = vmatprep.subr.bf16.mxu0 %v10578_v24  ;;  %v3917_v24 = vld [vmem:[%s12268_s12 + $0x218] sm:$0xff]  ;;  %v5003_v28 = vunpack.c.l.s8.bf16 %v3915_v22  ;;  %v5035_v42 = vunpack.c.h.s8.bf16 %v3915_v22 }
 0x4c3   : > { %v5037_v44 = vunpack.c.h.s8.bf16 %v3917_v24 }
 0x4c4   : > { %3450 = vmatpush1.bf16.msra.mxu1 %v10575_v30  ;;  %v5005_v30 = vunpack.c.l.s8.bf16 %v3917_v24 }
 0x4c5   : > { %3532 = vmatpush1.bf16.msra.mxu0 %v10577_v31  ;;  %3451 = vmatprep.subr.bf16.mxu1 %v10584_v40  ;;  %v3916_v31 = vld [vmem:[%s12268_s12 + $0x210] sm:$0xff]  ;;  %v5002_v40 = vunpack.c.l.s8.bf16 %v3914_v29 }
 0x4c6   : > { %3533 = vmatprep.subr.bf16.mxu0 %v10586_v41  ;;  %v5004_v41 = vunpack.c.l.s8.bf16 %v3916_v31 }
 0x4c8   : > { %3452 = vmatpush1.bf16.msra.mxu1 %v10583_v32  ;;  %v5034_v32 = vunpack.c.h.s8.bf16 %v3914_v29 }
 0x4c9   : > { %3534 = vmatpush1.bf16.msra.mxu0 %v10585_v34  ;;  %3453 = vmatprep.subr.bf16.mxu1 %v10592_v35  ;;  %v5036_v34 = vunpack.c.h.s8.bf16 %v3916_v31  ;;  %v5067_v35 = vunpack.c.l.s8.bf16 %v3947_v45  ;;  %v4074_v31 = vld [vmem:[%s12268_s12 + $0x700] sm:$0xff] }
 0x4ca   : > { %3535 = vmatprep.subr.bf16.mxu0 %v10594_v36  ;;  %v3946_v36 = vld [vmem:[%s12268_s12 + $0x300] sm:$0xff] }
 0x4cb   : > { %v5066_v0 = vunpack.c.l.s8.bf16 %v3946_v36  ;;  %v5098_v56 = vunpack.c.h.s8.bf16 %v3946_v36 }
 0x4cc   : > { %3454 = vmatpush1.bf16.msra.mxu1 %v10591_v52  ;;  %v5099_v52 = vunpack.c.h.s8.bf16 %v3947_v45 }
 0x4cd   : > { %3536 = vmatpush1.bf16.msra.mxu0 %v10593_v53  ;;  %3455 = vmatprep.subr.bf16.mxu1 %v10600_v54  ;;  %v5101_v53 = vunpack.c.h.s8.bf16 %v3949_v46  ;;  %v3979_v54 = vld [vmem:[%s12268_s12 + $0x408] sm:$0xff] }
 0x4ce   : > { %3537 = vmatprep.subr.bf16.mxu0 %v10602_v55  ;;  %v3981_v55 = vld [vmem:[%s12268_s12 + $0x418] sm:$0xff]  ;;  %v5131_v60 = vunpack.c.l.s8.bf16 %v3979_v54  ;;  %v5163_v62 = vunpack.c.h.s8.bf16 %v3979_v54 }
 0x4cf   : > { %v5165_v1 = vunpack.c.h.s8.bf16 %v3981_v55 }
 0x4d0   : > { %3456 = vmatpush1.bf16.msra.mxu1 %v10599_v57  ;;  %v5133_v57 = vunpack.c.l.s8.bf16 %v3981_v55 }
 0x4d1   : > { %3538 = vmatpush1.bf16.msra.mxu0 %v10601_v58  ;;  %3457 = vmatprep.subr.bf16.mxu1 %v10608_v39  ;;  %v3980_v58 = vld [vmem:[%s12268_s12 + $0x410] sm:$0xff]  ;;  %v5130_v39 = vunpack.c.l.s8.bf16 %v3978_v63 }
 0x4d2   : > { %3539 = vmatprep.subr.bf16.mxu0 %v10610_v61  ;;  %v5132_v61 = vunpack.c.l.s8.bf16 %v3980_v58  ;;  %v5164_v3 = vunpack.c.h.s8.bf16 %v3980_v58 }
 0x4d4   : > { %3458 = vmatpush1.bf16.msra.mxu1 %v10607_v10  ;;  %v4011_v10 = vld [vmem:[%s12268_s12 + $0x508] sm:$0xff] }
 0x4d5   : > { %3540 = vmatpush1.bf16.msra.mxu0 %v10609_v43  ;;  %6922 = vmatprep.subr.bf16.mxu1 %v4875_v2  ;;  %v4013_v43 = vld [vmem:[%s12268_s12 + $0x518] sm:$0xff]  ;;  %v5162_v2 = vunpack.c.h.s8.bf16 %v3978_v63 }
 0x4d6   : > { %7086 = vmatprep.subr.bf16.mxu0 %v4877_v4  ;;  %v5195_v4 = vunpack.c.l.s8.bf16 %v4011_v10  ;;  %v5229_v9 = vunpack.c.h.s8.bf16 %v4013_v43 }
 0x4d7   : > { %3460 = vmatmul.mubr.bf16.vlgmr.msra.gmra.mrb[8].mxu1 %v12368_v33 }
 0x4d8   : > { %3542 = vmatmul.mubr.bf16.vlgmr.msra.gmra.mrb[12].mxu0 %v12368_v33  ;;  %6923 = vmatpush1.bf16.msra.mxu1 %v4874_v47  ;;  %v4971_v33 = vunpack.c.h.s8.bf16 %v3883_v49  ;;  %v5197_v47 = vunpack.c.l.s8.bf16 %v4013_v43  ;;  %v5227_v49 = vunpack.c.h.s8.bf16 %v4011_v10 }
 0x4d9   : > { %7087 = vmatpush1.bf16.msra.mxu0 %v4876_v6  ;;  %6924 = vmatprep.subr.bf16.mxu1 %v4907_v7  ;;  %v4012_v6 = vld [vmem:[%s12268_s12 + $0x510] sm:$0xff]  ;;  %v5194_v7 = vunpack.c.l.s8.bf16 %v4010_v5 }
 0x4da   : > { %7088 = vmatprep.subr.bf16.mxu0 %v4909_v8  ;;  %v5196_v8 = vunpack.c.l.s8.bf16 %v4012_v6  ;;  %v5228_v14 = vunpack.c.h.s8.bf16 %v4012_v6 }
 0x4dc   : > { %6925 = vmatpush1.bf16.msra.mxu1 %v4906_v11  ;;  %v4043_v11 = vld [vmem:[%s12268_s12 + $0x608] sm:$0xff] }
 0x4dd   : > { %7089 = vmatpush1.bf16.msra.mxu0 %v4908_v12  ;;  %6926 = vmatprep.subr.bf16.mxu1 %v4939_v13  ;;  %v4045_v12 = vld [vmem:[%s12268_s12 + $0x618] sm:$0xff]  ;;  %v5226_v13 = vunpack.c.h.s8.bf16 %v4010_v5  ;;  %v5291_v22 = vunpack.c.h.s8.bf16 %v4043_v11 }
 0x4de   : > { %7090 = vmatprep.subr.bf16.mxu0 %v4941_v15  ;;  %v5259_v15 = vunpack.c.l.s8.bf16 %v4043_v11  ;;  %v5293_v24 = vunpack.c.h.s8.bf16 %v4045_v12 }
 0x4e0   : > { %6927 = vmatpush1.bf16.msra.mxu1 %v4938_v17  ;;  %v5261_v17 = vunpack.c.l.s8.bf16 %v4045_v12 }
 0x4e1   : > { %7091 = vmatpush1.bf16.msra.mxu0 %v4940_v18  ;;  %6928 = vmatprep.subr.bf16.mxu1 %v4971_v33  ;;  %v4044_v18 = vld [vmem:[%s12268_s12 + $0x610] sm:$0xff]  ;;  %v5258_v33 = vunpack.c.l.s8.bf16 %v4042_v16 }
 0x4e2   : > { %7092 = vmatprep.subr.bf16.mxu0 %v4973_v19  ;;  %v5260_v19 = vunpack.c.l.s8.bf16 %v4044_v18  ;;  %v5292_v29 = vunpack.c.h.s8.bf16 %v4044_v18 }
 0x4e4   : > { %6929 = vmatpush1.bf16.msra.mxu1 %v4970_v25  ;;  %v4075_v25 = vld [vmem:[%s12268_s12 + $0x708] sm:$0xff] }
 0x4e5   : > { %7093 = vmatpush1.bf16.msra.mxu0 %v4972_v26  ;;  %6930 = vmatprep.subr.bf16.mxu1 %v5003_v28  ;;  %v4077_v26 = vld [vmem:[%s12268_s12 + $0x718] sm:$0xff]  ;;  %v5290_v28 = vunpack.c.h.s8.bf16 %v4042_v16  ;;  %v5355_v45 = vunpack.c.h.s8.bf16 %v4075_v25 }
 0x4e6   : > { %7094 = vmatprep.subr.bf16.mxu0 %v5005_v30  ;;  %v5323_v30 = vunpack.c.l.s8.bf16 %v4075_v25  ;;  %v5357_v46 = vunpack.c.h.s8.bf16 %v4077_v26 }
 0x4e8   : > { %6931 = vmatpush1.bf16.msra.mxu1 %v5002_v40  ;;  %v5325_v40 = vunpack.c.l.s8.bf16 %v4077_v26 }
 0x4e9   : > { %7095 = vmatpush1.bf16.msra.mxu0 %v5004_v41  ;;  %6932 = vmatprep.subr.bf16.mxu1 %v5035_v42  ;;  %v4076_v41 = vld [vmem:[%s12268_s12 + $0x710] sm:$0xff]  ;;  %v5322_v42 = vunpack.c.l.s8.bf16 %v4074_v31 }
 0x4ea   : > { %7096 = vmatprep.subr.bf16.mxu0 %v5037_v44  ;;  %v5324_v44 = vunpack.c.l.s8.bf16 %v4076_v41  ;;  %v5356_v36 = vunpack.c.h.s8.bf16 %v4076_v41 }
 0x4ec   : > { %6933 = vmatpush1.bf16.msra.mxu1 %v5034_v32  ;;  %v12413_v32 = vld [vmem:[%s12268_s12 + $0x808] sm:$0xff] }
 0x4ed   : > { %7097 = vmatpush1.bf16.msra.mxu0 %v5036_v34  ;;  %6934 = vmatprep.subr.bf16.mxu1 %v5067_v35  ;;  %v12416_v34 = vld [vmem:[%s12268_s12 + $0x818] sm:$0xff]  ;;  %v5354_v35 = vunpack.c.h.s8.bf16 %v4074_v31 }
 0x4ee   : > { %7098 = vmatprep.subr.bf16.mxu0 %v5069_v37  ;;  %v5387_v37 = vunpack.c.l.s8.bf16 %v12413_v32  ;;  %v5389_v38 = vunpack.c.l.s8.bf16 %v12416_v34 }
 0x4f0   : > { %6935 = vmatpush1.bf16.msra.mxu1 %v5066_v0  ;;  %v12420_v0 = vld [vmem:[#allocation16] sm:$0xff] }
 0x4f1   : > { %7099 = vmatpush1.bf16.msra.mxu0 %v5068_v51  ;;  %6936 = vmatprep.subr.bf16.mxu1 %v5099_v52  ;;  %v1905_v51 = vrot.slane %v12420_v0, %v12280_v21  ;;  %v1909_v52 = vrot.slane %v12420_v0, %v12283_v23  ;;  %v1913_v11 = vrot.slane %v12420_v0, %v12315_v48 }
 0x4f2   : > { %7100 = vmatprep.subr.bf16.mxu0 %v5101_v53  ;;  %v1917_v53 = vrot.slane %v12420_v0, %v12318_v50 }
 0x4f4   : > { %6937 = vmatpush1.bf16.msra.mxu1 %v5098_v56 }
 0x4f5   : > { %7101 = vmatpush1.bf16.msra.mxu0 %v5100_v59  ;;  %6938 = vmatprep.subr.bf16.mxu1 %v5131_v60 }
 0x4f6   : > { %7102 = vmatprep.subr.bf16.mxu0 %v5133_v57 }
 0x4f8   : > { %6939 = vmatpush1.bf16.msra.mxu1 %v5130_v39 }
 0x4f9   : > { %7103 = vmatpush1.bf16.msra.mxu0 %v5132_v61  ;;  %6940 = vmatprep.subr.bf16.mxu1 %v5163_v62 }
 0x4fa   : > { %7104 = vmatprep.subr.bf16.mxu0 %v5165_v1 }
 0x4fc   : > { %6941 = vmatpush1.bf16.msra.mxu1 %v5162_v2 }
 0x4fd   : > { %7105 = vmatpush1.bf16.msra.mxu0 %v5164_v3  ;;  %6942 = vmatprep.subr.bf16.mxu1 %v5195_v4 }
 0x4fe   : > { %7106 = vmatprep.subr.bf16.mxu0 %v5197_v47 }
 0x500   : > { %6943 = vmatpush1.bf16.msra.mxu1 %v5194_v7 }
 0x501   : > { %7107 = vmatpush1.bf16.msra.mxu0 %v5196_v8  ;;  %6944 = vmatprep.subr.bf16.mxu1 %v5227_v49 }
 0x502   : > { %7108 = vmatprep.subr.bf16.mxu0 %v5229_v9 }
 0x504   : > { %6945 = vmatpush1.bf16.msra.mxu1 %v5226_v13 }
 0x505   : > { %7109 = vmatpush1.bf16.msra.mxu0 %v5228_v14  ;;  %6946 = vmatprep.subr.bf16.mxu1 %v5259_v15 }
 0x506   : > { %7110 = vmatprep.subr.bf16.mxu0 %v5261_v17 }
 0x508   : > { %6947 = vmatpush1.bf16.msra.mxu1 %v5258_v33 }
 0x509   : > { %7111 = vmatpush1.bf16.msra.mxu0 %v5260_v19  ;;  %6948 = vmatprep.subr.bf16.mxu1 %v5291_v22 }
 0x50a   : > { %7112 = vmatprep.subr.bf16.mxu0 %v5293_v24 }
 0x50c   : > { %6949 = vmatpush1.bf16.msra.mxu1 %v5290_v28 }
 0x50d   : > { %7113 = vmatpush1.bf16.msra.mxu0 %v5292_v29  ;;  %6950 = vmatprep.subr.bf16.mxu1 %v5323_v30 }
 0x50e   : > { %7114 = vmatprep.subr.bf16.mxu0 %v5325_v40 }
 0x510   : > { %6951 = vmatpush1.bf16.msra.mxu1 %v5322_v42 }
 0x511   : > { %7115 = vmatpush1.bf16.msra.mxu0 %v5324_v44  ;;  %6952 = vmatprep.subr.bf16.mxu1 %v5355_v45 }
 0x512   : > { %7116 = vmatprep.subr.bf16.mxu0 %v5357_v46 }
 0x514   : > { %6953 = vmatpush1.bf16.msra.mxu1 %v5354_v35 }
 0x515   : > { %7117 = vmatpush1.bf16.msra.mxu0 %v5356_v36  ;;  %6963 = vmatprep.subr.bf16.mxu1 %v5387_v37 }
 0x516   : > { %7127 = vmatprep.subr.bf16.mxu0 %v5389_v38 }
 0x52a   : > { %v3297_v54 = vpop.f32.mrb[4].mxu1  ;;  %v3379_v55 = vpop.f32.mrb[8].mxu0 }
 0x52b   : > { %v10616_v56 = vadd.f32 %v3297_v54, %v1905_v51  ;;  %v3299_v59 = vpop.f32.mrb[5].mxu1  ;;  %v3381_v60 = vpop.f32.mrb[9].mxu0  ;;  %v10618_v18 = vadd.f32 %v3379_v55, %v1913_v11  ;;  %v12439_v11 = vld [vmem:[#allocation19] sm:$0xff] }
 0x52c   : > { %v10617_v63 = vadd.f32 %v3299_v59, %v1909_v52  ;;  %v10619_v57 = vadd.f32 %v3381_v60, %v1917_v53  ;;  %v3301_v58 = vpop.f32.mrb[6].mxu1  ;;  %v3383_v39 = vpop.f32.mrb[10].mxu0 }
 0x52d   : > { %v3550_v61 = vmul.f32 %v10616_v56, %v12288_v27  ;;  %v3302_v62 = vpop.f32.mrb[7].mxu1  ;;  %v3384_v1 = vpop.f32.mrb[11].mxu0  ;;  %v3552_v28 = vmul.f32 %v10618_v18, %v12288_v27 }
 0x52e   : > { %v3551_v10 = vmul.f32 %v10617_v63, %v12288_v27  ;;  %v3553_v43 = vmul.f32 %v10619_v57, %v12288_v27 }
 0x52f   : > { %v3558_v2 = vrot.slane %v3550_v61, 4  ;;  %v3570_v44 = vrot.slane %v3552_v28, 4 }
 0x530   : > { %v3564_v3 = vrot.slane %v3551_v10, 4  ;;  %v3576_v4 = vrot.slane %v3553_v43, 4 }
 0x531   : > { %v3559_v5 = vadd.f32 %v3558_v2, %v3550_v61  ;;  %v3571_v51 = vadd.f32 %v3570_v44, %v3552_v28 }
 0x532   : > { %v3565_v47 = vadd.f32 %v3564_v3, %v3551_v10  ;;  %v3577_v6 = vadd.f32 %v3576_v4, %v3553_v43 }
 0x533   : > { %v3560_v7 = vrot.slane %v3559_v5, 2  ;;  %v3572_v60 = vrot.slane %v3571_v51, 2 }
 0x534   : > { %v3566_v8 = vrot.slane %v3565_v47, 2  ;;  %v3578_v49 = vrot.slane %v3577_v6, 2 }
 0x535   : > { %v3561_v9 = vadd.f32 %v3560_v7, %v3559_v5  ;;  %v3573_v1 = vadd.f32 %v3572_v60, %v3571_v51  ;;  %v5419_v60 = vunpack.c.h.s8.bf16 %v12413_v32 }
 0x536   : > { %v3567_v12 = vadd.f32 %v3566_v8, %v3565_v47  ;;  %v3579_v13 = vadd.f32 %v3578_v49, %v3577_v6  ;;  %v12437_v49 = vld [vmem:[#allocation18] sm:$0xff] }
 0x537   : > { %v3562_v14 = vrot.slane %v3561_v9, 1  ;;  %v3574_v47 = vrot.slane %v3573_v1, 1 }
 0x538   : > { %v3568_v15 = vrot.slane %v3567_v12, 1  ;;  %v3580_v16 = vrot.slane %v3579_v13, 1 }
 0x539   : > { %v3563_v17 = vadd.f32 %v3562_v14, %v3561_v9  ;;  %v3575_v8 = vadd.f32 %v3574_v47, %v3573_v1 }
 0x53a   : > { %v3569_v33 = vadd.f32 %v3568_v15, %v3567_v12  ;;  %v3581_v19 = vadd.f32 %v3580_v16, %v3579_v13  ;;  %v3723_v12 = vrot.slane %v12437_v49, %v12280_v21  ;;  %v3773_v15 = vrot.slane %v12439_v11, %v12280_v21 }
 0x53b   : > { %v3606_v22 = vmul.f32 0.25, %v3563_v17  ;;  %v3608_v9 = vmul.f32 0.25, %v3575_v8  ;;  %v3727_v17 = vrot.slane %v12437_v49, %v12283_v23 }
 0x53c   : > { %v3607_v24 = vmul.f32 0.25, %v3569_v33  ;;  %v3609_v25 = vmul.f32 0.25, %v3581_v19  ;;  %v3735_v19 = vrot.slane %v12437_v49, %v12318_v50 }
 0x53d   : > { %v3614_v26 = vsub.f32 %v10616_v56, %v3606_v22  ;;  %v12445_v16 = vsub.f32 %v10618_v18, %v3608_v9  ;;  %v3785_v18 = vrot.slane %v12439_v11, %v12318_v50 }
 0x53e   : > { %v3615_v29 = vsub.f32 %v10617_v63, %v3607_v24  ;;  %v3617_v30 = vsub.f32 %v10619_v57, %v3609_v25 }
 0x53f   : > { %v3622_v31 = vmul.f32 %v3614_v26, %v3614_v26 }
 0x540   : > { %v3623_v40 = vmul.f32 %v3615_v29, %v3615_v29  ;;  %v3625_v41 = vmul.f32 %v3617_v30, %v3617_v30 }
 0x541   : > { %v3630_v42 = vmul.f32 %v12288_v27, %v3622_v31 }
 0x542   : > { %v3631_v45 = vmul.f32 %v12288_v27, %v3623_v40  ;;  %v3633_v46 = vmul.f32 %v12288_v27, %v3625_v41  ;;  %v3624_v40 = vmul.f32 %v12445_v16, %v12445_v16 }
 0x543   : > { %v3638_v35 = vrot.slane %v3630_v42, 4 }
 0x544   : > { %v3644_v36 = vrot.slane %v3631_v45, 4  ;;  %v3656_v37 = vrot.slane %v3633_v46, 4 }
 0x545   : > { %v3639_v38 = vadd.f32 %v3638_v35, %v3630_v42 }
 0x546   : > { %v3645_v52 = vadd.f32 %v3644_v36, %v3631_v45  ;;  %v3657_v53 = vadd.f32 %v3656_v37, %v3633_v46  ;;  %v4106_v36 = vld [vmem:[%s12268_s12 + $0x800] sm:$0xff] }
 0x547   : > { %v3640_v54 = vrot.slane %v3639_v38, 2 }
 0x548   : > { %v3646_v55 = vrot.slane %v3645_v52, 2  ;;  %v3658_v56 = vrot.slane %v3657_v53, 2 }
 0x549   : > { %v3641_v59 = vadd.f32 %v3640_v54, %v3639_v38  ;;  %v5386_v54 = vunpack.c.l.s8.bf16 %v4106_v36 }
 0x54a   : > { %v3647_v63 = vadd.f32 %v3646_v55, %v3645_v52  ;;  %v3659_v57 = vadd.f32 %v3658_v56, %v3657_v53 }
 0x54b   : > { %v3642_v58 = vrot.slane %v3641_v59, 1 }
 0x54c   : > { %v3648_v39 = vrot.slane %v3647_v63, 1  ;;  %v3660_v61 = vrot.slane %v3659_v57, 1 }
 0x54d   : > { %v3643_v62 = vadd.f32 %v3642_v58, %v3641_v59  ;;  %v4141_v58 = vld [vmem:[%s12268_s12 + $0x918] sm:$0xff] }
 0x54e   : > { %v3649_v10 = vadd.f32 %v3648_v39, %v3647_v63  ;;  %v3661_v43 = vadd.f32 %v3660_v61, %v3659_v57  ;;  %v5421_v63 = vunpack.c.h.s8.bf16 %v12416_v34  ;;  %v4139_v57 = vld [vmem:[%s12268_s12 + $0x908] sm:$0xff]  ;;  %v5418_v61 = vunpack.c.h.s8.bf16 %v4106_v36 }
 0x54f   : > { %v3686_v2 = vmul.f32 0.25, %v3643_v62  ;;  %v5451_v32 = vunpack.c.l.s8.bf16 %v4139_v57  ;;  %v5453_v34 = vunpack.c.l.s8.bf16 %v4141_v58  ;;  %v5485_v47 = vunpack.c.h.s8.bf16 %v4141_v58 }
 0x550   : > { %v3687_v3 = vmul.f32 0.25, %v3649_v10  ;;  %v3689_v4 = vmul.f32 0.25, %v3661_v43  ;;  %v4138_v10 = vld [vmem:[%s12268_s12 + $0x900] sm:$0xff]  ;;  %v4140_v43 = vld [vmem:[%s12268_s12 + $0x910] sm:$0xff] }
 0x551   : > { %v3695_v5 = vadd.f32 1e-05, %v3686_v2  ;;  %v5450_v2 = vunpack.c.l.s8.bf16 %v4138_v10  ;;  %v5482_v8 = vunpack.c.h.s8.bf16 %v4138_v10  ;;  %v5484_v9 = vunpack.c.h.s8.bf16 %v4140_v43 }
 0x552   : > { %v3696_v6 = vadd.f32 1e-05, %v3687_v3  ;;  %v3698_v7 = vadd.f32 1e-05, %v3689_v4  ;;  %v5452_v3 = vunpack.c.l.s8.bf16 %v4140_v43 }
 0x553   : > { %11143 = vrsqrt.f32 %v3695_v5  ;;  %v5483_v5 = vunpack.c.h.s8.bf16 %v4139_v57 }
 0x554   : > { %11145 = vrsqrt.f32 %v3696_v6  ;;  %v4171_v6 = vld [vmem:[%s12268_s12 + $0xa08] sm:$0xff] }
 0x555   : > { %11147 = vrsqrt.f32 %v3698_v7  ;;  %v4173_v7 = vld [vmem:[%s12268_s12 + $0xa18] sm:$0xff] }
 0x55d   : > { %v11144_v13 = vpop.eup %11143 }
 0x55e   : > { %v3711_v14 = vmul.f32 %v11144_v13, %v3614_v26  ;;  %v11146_v33 = vpop.eup %11145  ;;  %v3777_v26 = vrot.slane %v12439_v11, %v12283_v23  ;;  %v5515_v13 = vunpack.c.l.s8.bf16 %v4171_v6 }
 0x55f   : > { %v11148_v22 = vpop.eup %11147  ;;  %v3712_v25 = vmul.f32 %v11146_v33, %v3615_v29  ;;  %v3632_v29 = vmul.f32 %v12288_v27, %v3624_v40 }
 0x560   : > { %v3760_v24 = vmul.f32 %v3723_v12, %v3711_v14  ;;  %v3714_v28 = vmul.f32 %v11148_v22, %v3617_v30  ;;  %v4108_v30 = vld [vmem:[%s12268_s12 + $0x810] sm:$0xff]  ;;  %v5517_v14 = vunpack.c.l.s8.bf16 %v4173_v7 }
 0x561   : > { %v3761_v41 = vmul.f32 %v3727_v17, %v3712_v25  ;;  %v5388_v55 = vunpack.c.l.s8.bf16 %v4108_v30  ;;  %v3650_v59 = vrot.slane %v3632_v29, 4  ;;  %v5420_v62 = vunpack.c.h.s8.bf16 %v4108_v30  ;;  %v4172_v17 = vld [vmem:[%s12268_s12 + $0xa10] sm:$0xff] }
 0x562   : > { %v3810_v31 = vadd.f32 %v3773_v15, %v3760_v24  ;;  %v3763_v42 = vmul.f32 %v3735_v19, %v3714_v28  ;;  %v4170_v15 = vld [vmem:[%s12268_s12 + $0xa00] sm:$0xff]  ;;  %v5516_v19 = vunpack.c.l.s8.bf16 %v4172_v17  ;;  %v5547_v24 = vunpack.c.h.s8.bf16 %v4171_v6  ;;  %v4205_v28 = vld [vmem:[%s12268_s12 + $0xb18] sm:$0xff] }
 0x563   : > { %v3811_v45 = vadd.f32 %v3777_v26, %v3761_v41  ;;  %v3651_v1 = vadd.f32 %v3650_v59, %v3632_v29  ;;  %v5514_v33 = vunpack.c.l.s8.bf16 %v4170_v15  ;;  %v5549_v25 = vunpack.c.h.s8.bf16 %v4173_v7  ;;  %v4203_v26 = vld [vmem:[%s12268_s12 + $0xb08] sm:$0xff] }
 0x564   : > { %vm3818_vm7 = vcmp.ge.f32.partialorder %v3810_v31, 0.0  ;;  %v3826_v44 = vmul.f32 0.2, %v3810_v31  ;;  %v3813_v46 = vadd.f32 %v3785_v18, %v3763_v42  ;;  %v5546_v18 = vunpack.c.h.s8.bf16 %v4170_v15 }
 0x565   : > { %vm3819_vm8 = vcmp.ge.f32.partialorder %v3811_v45, 0.0  ;;  %v3827_v35 = vmul.f32 0.2, %v3811_v45  ;;  %v3652_v4 = vrot.slane %v3651_v1, 2  ;;  %v5579_v41 = vunpack.c.l.s8.bf16 %v4203_v26 }
 0x566   : > { %v3834_v37 = vsel %vm3818_vm7, %v3810_v31, %v3826_v44  ;;  %vm3821_vm9 = vcmp.ge.f32.partialorder %v3813_v46, 0.0  ;;  %v3829_v38 = vmul.f32 0.2, %v3813_v46  ;;  %v5548_v31 = vunpack.c.h.s8.bf16 %v4172_v17  ;;  %v4202_v44 = vld [vmem:[%s12268_s12 + $0xb00] sm:$0xff] }
 0x567   : > { %v3835_v51 = vsel %vm3819_vm8, %v3811_v45, %v3827_v35  ;;  %v12462_v56 = vpack.c.bf16 %v3834_v37, %v3834_v37  ;;  %v3653_v12 = vadd.f32 %v3652_v4, %v3651_v1  ;;  %v5581_v42 = vunpack.c.l.s8.bf16 %v4205_v28  ;;  %v4204_v45 = vld [vmem:[%s12268_s12 + $0xb10] sm:$0xff]  ;;  %v4235_v37 = vld [vmem:[%s12268_s12 + $0xc08] sm:$0xff] }
 0x568   : > { %v12460_v52 = vpack.c.bf16 %v3835_v51, %v3835_v51  ;;  %v3837_v53 = vsel %vm3821_vm9, %v3813_v46, %v3829_v38  ;;  %v5578_v46 = vunpack.c.l.s8.bf16 %v4202_v44  ;;  %v5580_v29 = vunpack.c.l.s8.bf16 %v4204_v45  ;;  %v4237_v38 = vld [vmem:[%s12268_s12 + $0xc18] sm:$0xff]  ;;  %v4267_v1 = vld [vmem:[%s12268_s12 + $0xd08] sm:$0xff]  ;;  %v4268_v4 = vld [vmem:[%s12268_s12 + $0xd10] sm:$0xff] }
 0x569   : > { %v12470_v39 = vpack.c.bf16 %v3837_v53, %v3837_v53  ;;  %v3654_v22 = vrot.slane %v3653_v12, 1  ;;  %v5611_v36 = vunpack.c.h.s8.bf16 %v4203_v26  ;;  %v5613_v30 = vunpack.c.h.s8.bf16 %v4205_v28 }
 0x56a   : > { %6954 = vmatprep.mubr.bf16.mxu1 %v12460_v52  ;;  %7118 = vmatprep.mubr.bf16.mxu0 %v12460_v52  ;;  %v5610_v51 = vunpack.c.h.s8.bf16 %v4202_v44  ;;  %v5612_v53 = vunpack.c.h.s8.bf16 %v4204_v45  ;;  %v5645_v59 = vunpack.c.l.s8.bf16 %v4237_v38  ;;  %v5707_v43 = vunpack.c.l.s8.bf16 %v4267_v1 }
 0x56b   : > { %6955 = vmatmul.mubr.bf16.vlgmr.msra.gmra.mrb[12].mxu1 %v12462_v56  ;;  %7119 = vmatmul.mubr.bf16.vlgmr.msra.gmra.mrb[16].mxu0 %v12462_v56  ;;  %v3655_v40 = vadd.f32 %v3654_v22, %v3653_v12  ;;  %v5739_v6 = vunpack.c.h.s8.bf16 %v4267_v1  ;;  %v4362_v1 = vld [vmem:[%s12268_s12 + $0x1000] sm:$0xff] }
 0x56c   : > { %6964 = vmatpush1.bf16.msra.mxu1 %v5386_v54  ;;  %7128 = vmatpush1.bf16.msra.mxu0 %v5388_v55  ;;  %v5643_v55 = vunpack.c.l.s8.bf16 %v4235_v37 }
 0x56d   : > { %6995 = vmatprep.mubr.bf16.mxu1 %v12470_v39  ;;  %7159 = vmatprep.mubr.bf16.mxu0 %v12470_v39  ;;  %v3688_v35 = vmul.f32 0.25, %v3655_v40  ;;  %v3781_v40 = vrot.slane %v12439_v11, %v12315_v48 }
 0x56e   : > { %6965 = vmatprep.subr.bf16.mxu1 %v5419_v60  ;;  %7129 = vmatprep.subr.bf16.mxu0 %v5421_v63  ;;  %v4234_v60 = vld [vmem:[%s12268_s12 + $0xc00] sm:$0xff]  ;;  %v4236_v63 = vld [vmem:[%s12268_s12 + $0xc10] sm:$0xff] }
 0x56f   : > { %v3697_v54 = vadd.f32 1e-05, %v3688_v35  ;;  %v5642_v57 = vunpack.c.l.s8.bf16 %v4234_v60  ;;  %v5644_v58 = vunpack.c.l.s8.bf16 %v4236_v63  ;;  %v5676_v10 = vunpack.c.h.s8.bf16 %v4236_v63  ;;  %v4332_v35 = vld [vmem:[%s12268_s12 + $0xf10] sm:$0xff] }
 0x570   : > { %6966 = vmatpush1.bf16.msra.mxu1 %v5418_v61  ;;  %7130 = vmatpush1.bf16.msra.mxu0 %v5420_v62  ;;  %v5675_v61 = vunpack.c.h.s8.bf16 %v4235_v37  ;;  %v5677_v62 = vunpack.c.h.s8.bf16 %v4237_v38  ;;  %v5836_v37 = vunpack.c.l.s8.bf16 %v4332_v35 }
 0x571   : > { %6967 = vmatprep.subr.bf16.mxu1 %v5451_v32  ;;  %7131 = vmatprep.subr.bf16.mxu0 %v5453_v34  ;;  %11149 = vrsqrt.f32 %v3697_v54  ;;  %v4269_v32 = vld [vmem:[%s12268_s12 + $0xd18] sm:$0xff]  ;;  %v5674_v34 = vunpack.c.h.s8.bf16 %v4234_v60  ;;  %v12508_v54 = vsub.s32 4, %v12277_v20  ;;  %v12513_v60 = vsub.s32 5, %v12277_v20 }
 0x572   : > { %v5741_v7 = vunpack.c.h.s8.bf16 %v4269_v32 }
 0x574   : > { %6968 = vmatpush1.bf16.msra.mxu1 %v5450_v2  ;;  %7132 = vmatpush1.bf16.msra.mxu0 %v5452_v3  ;;  %v5709_v2 = vunpack.c.l.s8.bf16 %v4269_v32  ;;  %v4266_v3 = vld [vmem:[%s12268_s12 + $0xd00] sm:$0xff]  ;;  %v4364_v32 = vld [vmem:[%s12268_s12 + $0x1010] sm:$0xff] }
 0x575   : > { %6969 = vmatprep.subr.bf16.mxu1 %v5483_v5  ;;  %7133 = vmatprep.subr.bf16.mxu0 %v5485_v47  ;;  %v5706_v5 = vunpack.c.l.s8.bf16 %v4266_v3  ;;  %v5708_v47 = vunpack.c.l.s8.bf16 %v4268_v4 }
 0x578   : > { %6970 = vmatpush1.bf16.msra.mxu1 %v5482_v8  ;;  %7134 = vmatpush1.bf16.msra.mxu0 %v5484_v9  ;;  %v4299_v8 = vld [vmem:[%s12268_s12 + $0xe08] sm:$0xff]  ;;  %v4301_v9 = vld [vmem:[%s12268_s12 + $0xe18] sm:$0xff] }
 0x579   : > { %6971 = vmatprep.subr.bf16.mxu1 %v5515_v13  ;;  %7135 = vmatprep.subr.bf16.mxu0 %v5517_v14  ;;  %v5738_v13 = vunpack.c.h.s8.bf16 %v4266_v3  ;;  %v5740_v14 = vunpack.c.h.s8.bf16 %v4268_v4  ;;  %v5771_v15 = vunpack.c.l.s8.bf16 %v4299_v8  ;;  %v5773_v17 = vunpack.c.l.s8.bf16 %v4301_v9 }
 0x57a   : > { %v5803_v28 = vunpack.c.h.s8.bf16 %v4299_v8  ;;  %v5898_v3 = vunpack.c.l.s8.bf16 %v4362_v1  ;;  %v5900_v4 = vunpack.c.l.s8.bf16 %v4364_v32 }
 0x57b   : > { %v11150_v12 = vpop.eup %11149 }
 0x57c   : > { %6972 = vmatpush1.bf16.msra.mxu1 %v5514_v33  ;;  %7136 = vmatpush1.bf16.msra.mxu0 %v5516_v19  ;;  %v4298_v33 = vld [vmem:[%s12268_s12 + $0xe00] sm:$0xff]  ;;  %v4300_v19 = vld [vmem:[%s12268_s12 + $0xe10] sm:$0xff]  ;;  %v3713_v22 = vmul.f32 %v11150_v12, %v12445_v16 }
 0x57d   : > { %6973 = vmatprep.subr.bf16.mxu1 %v5547_v24  ;;  %7137 = vmatprep.subr.bf16.mxu0 %v5549_v25  ;;  %v3731_v24 = vrot.slane %v12437_v49, %v12315_v48  ;;  %v5770_v25 = vunpack.c.l.s8.bf16 %v4298_v33  ;;  %v5772_v26 = vunpack.c.l.s8.bf16 %v4300_v19  ;;  %v5802_v16 = vunpack.c.h.s8.bf16 %v4298_v33 }
 0x57e   : > { %v5804_v44 = vunpack.c.h.s8.bf16 %v4300_v19 }
 0x580   : > { %6974 = vmatpush1.bf16.msra.mxu1 %v5546_v18  ;;  %7138 = vmatpush1.bf16.msra.mxu0 %v5548_v31  ;;  %v5805_v18 = vunpack.c.h.s8.bf16 %v4301_v9  ;;  %v3762_v31 = vmul.f32 %v3731_v24, %v3713_v22 }
 0x581   : > { %6975 = vmatprep.subr.bf16.mxu1 %v5579_v41  ;;  %7139 = vmatprep.subr.bf16.mxu0 %v5581_v42  ;;  %v4331_v41 = vld [vmem:[%s12268_s12 + $0xf08] sm:$0xff]  ;;  %v4333_v42 = vld [vmem:[%s12268_s12 + $0xf18] sm:$0xff] }
 0x582   : > { %v5835_v45 = vunpack.c.l.s8.bf16 %v4331_v41  ;;  %v5867_v38 = vunpack.c.h.s8.bf16 %v4331_v41 }
 0x584   : > { %6976 = vmatpush1.bf16.msra.mxu1 %v5578_v46  ;;  %7140 = vmatpush1.bf16.msra.mxu0 %v5580_v29  ;;  %v5837_v46 = vunpack.c.l.s8.bf16 %v4333_v42  ;;  %v4330_v29 = vld [vmem:[%s12268_s12 + $0xf00] sm:$0xff] }
 0x585   : > { %6977 = vmatprep.subr.bf16.mxu1 %v5611_v36  ;;  %7141 = vmatprep.subr.bf16.mxu0 %v5613_v30  ;;  %v3812_v36 = vadd.f32 %v3781_v40, %v3762_v31  ;;  %v5834_v30 = vunpack.c.l.s8.bf16 %v4330_v29  ;;  %v5866_v63 = vunpack.c.h.s8.bf16 %v4330_v29 }
 0x587   : > { %vm3820_vm10 = vcmp.ge.f32.partialorder %v3812_v36, 0.0 }
 0x588   : > { %6978 = vmatpush1.bf16.msra.mxu1 %v5610_v51  ;;  %7142 = vmatpush1.bf16.msra.mxu0 %v5612_v53  ;;  %v5869_v51 = vunpack.c.h.s8.bf16 %v4333_v42  ;;  %v3828_v53 = vmul.f32 0.2, %v3812_v36  ;;  %v4394_v42 = vld [vmem:[%s12268_s12 + $0x1100] sm:$0xff] }
 0x589   : > { %6979 = vmatprep.subr.bf16.mxu1 %v5643_v55  ;;  %7143 = vmatprep.subr.bf16.mxu0 %v5645_v59  ;;  %v4363_v55 = vld [vmem:[%s12268_s12 + $0x1008] sm:$0xff]  ;;  %v4365_v59 = vld [vmem:[%s12268_s12 + $0x1018] sm:$0xff] }
 0x58c   : > { %6980 = vmatpush1.bf16.msra.mxu1 %v5642_v57  ;;  %7144 = vmatpush1.bf16.msra.mxu0 %v5644_v58  ;;  %v5868_v57 = vunpack.c.h.s8.bf16 %v4332_v35  ;;  %v12516_v58 = vsub.s32 7, %v12277_v20 }
 0x58d   : > { %6981 = vmatprep.subr.bf16.mxu1 %v5675_v61  ;;  %7145 = vmatprep.subr.bf16.mxu0 %v5677_v62  ;;  %v5899_v61 = vunpack.c.l.s8.bf16 %v4363_v55  ;;  %v5901_v62 = vunpack.c.l.s8.bf16 %v4365_v59 }
 0x590   : > { %6982 = vmatpush1.bf16.msra.mxu1 %v5674_v34  ;;  %7146 = vmatpush1.bf16.msra.mxu0 %v5676_v10  ;;  %v3836_v34 = vsel %vm3820_vm10, %v3812_v36, %v3828_v53  ;;  %v1921_v10 = vrot.slane %v12420_v0, %v12508_v54  ;;  %v5962_v36 = vunpack.c.l.s8.bf16 %v4394_v42 }
 0x591   : > { %6983 = vmatprep.subr.bf16.mxu1 %v5707_v43  ;;  %7147 = vmatprep.subr.bf16.mxu0 %v5709_v2  ;;  %v1925_v43 = vrot.slane %v12420_v0, %v12513_v60  ;;  %v1933_v2 = vrot.slane %v12420_v0, %v12516_v58 }
 0x594   : > { %6984 = vmatpush1.bf16.msra.mxu1 %v5706_v5  ;;  %7148 = vmatpush1.bf16.msra.mxu0 %v5708_v47  ;;  %v12526_v5 = vpack.c.bf16 %v3836_v34, %v3836_v34 }
 0x595   : > { %6985 = vmatprep.subr.bf16.mxu1 %v5739_v6  ;;  %7149 = vmatprep.subr.bf16.mxu0 %v5741_v7  ;;  %v5931_v6 = vunpack.c.h.s8.bf16 %v4363_v55  ;;  %v5933_v7 = vunpack.c.h.s8.bf16 %v4365_v59 }
 0x598   : > { %6986 = vmatpush1.bf16.msra.mxu1 %v5738_v13  ;;  %7150 = vmatpush1.bf16.msra.mxu0 %v5740_v14  ;;  %v4395_v13 = vld [vmem:[%s12268_s12 + $0x1108] sm:$0xff]  ;;  %v4397_v14 = vld [vmem:[%s12268_s12 + $0x1118] sm:$0xff] }
 0x599   : > { %6987 = vmatprep.subr.bf16.mxu1 %v5771_v15  ;;  %7151 = vmatprep.subr.bf16.mxu0 %v5773_v17  ;;  %v5963_v40 = vunpack.c.l.s8.bf16 %v4395_v13  ;;  %v5965_v41 = vunpack.c.l.s8.bf16 %v4397_v14  ;;  %v5997_v53 = vunpack.c.h.s8.bf16 %v4397_v14 }
 0x59c   : > { %6988 = vmatpush1.bf16.msra.mxu1 %v5770_v25  ;;  %7152 = vmatpush1.bf16.msra.mxu0 %v5772_v26  ;;  %v5930_v26 = vunpack.c.h.s8.bf16 %v4362_v1 }
 0x59d   : > { %6989 = vmatprep.subr.bf16.mxu1 %v5803_v28  ;;  %7153 = vmatprep.subr.bf16.mxu0 %v5805_v18  ;;  %v5932_v28 = vunpack.c.h.s8.bf16 %v4364_v32  ;;  %v5994_v32 = vunpack.c.h.s8.bf16 %v4394_v42 }
 0x5a0   : > { %6990 = vmatpush1.bf16.msra.mxu1 %v5802_v16  ;;  %7154 = vmatpush1.bf16.msra.mxu0 %v5804_v44  ;;  %v4396_v16 = vld [vmem:[%s12268_s12 + $0x1110] sm:$0xff] }
 0x5a1   : > { %6991 = vmatprep.subr.bf16.mxu1 %v5835_v45  ;;  %7155 = vmatprep.subr.bf16.mxu0 %v5837_v46  ;;  %v5996_v34 = vunpack.c.h.s8.bf16 %v4396_v16 }
 0x5a4   : > { %6992 = vmatpush1.bf16.msra.mxu1 %v5834_v30  ;;  %7156 = vmatpush1.bf16.msra.mxu0 %v5836_v37  ;;  %v5964_v30 = vunpack.c.l.s8.bf16 %v4396_v16  ;;  %v12549_v37 = vsub.s32 6, %v12277_v20 }
 0x5a5   : > { %6993 = vmatprep.subr.bf16.mxu1 %v5867_v38  ;;  %7157 = vmatprep.subr.bf16.mxu0 %v5869_v51  ;;  %v5995_v51 = vunpack.c.h.s8.bf16 %v4395_v13 }
 0x5a6   : > { %v1929_v20 = vrot.slane %v12420_v0, %v12549_v37 }
 0x5a8   : > { %6994 = vmatpush1.bf16.msra.mxu1 %v5866_v63  ;;  %7158 = vmatpush1.bf16.msra.mxu0 %v5868_v57  ;;  %v4427_v63 = vld [vmem:[%s12268_s12 + $0x1208] sm:$0xff]  ;;  %v4429_v57 = vld [vmem:[%s12268_s12 + $0x1218] sm:$0xff] }
 0x5a9   : > { %7004 = vmatprep.subr.bf16.mxu1 %v5899_v61  ;;  %7168 = vmatprep.subr.bf16.mxu0 %v5901_v62 }
 0x5aa   : > { %v3461_v47 = vpop.f32.mrb[8].mxu1 }
 0x5ab   : > { %v12528_v8 = vadd.f32 %v3461_v47, %v1921_v10  ;;  %v12530_v9 = vpop.f32.mrb[12].mxu0  ;;  %v3463_v12 = vpop.f32.mrb[9].mxu1  ;;  %6996 = vmatmul.mubr.bf16.vlgmr.msra.gmra.mrb[12].mxu1 %v12526_v5  ;;  %7160 = vmatmul.mubr.bf16.vlgmr.msra.gmra.mrb[16].mxu0 %v12526_v5 }
 0x5ac   : > { %v12536_v15 = vadd.f32 %v3463_v12, %v1925_v43  ;;  %v3545_v17 = vpop.f32.mrb[13].mxu0  ;;  %v3465_v33 = vpop.f32.mrb[10].mxu1  ;;  %7005 = vmatpush1.bf16.msra.mxu1 %v5898_v3  ;;  %7169 = vmatpush1.bf16.msra.mxu0 %v5900_v4  ;;  %v6027_v43 = vunpack.c.l.s8.bf16 %v4427_v63  ;;  %v4426_v3 = vld [vmem:[%s12268_s12 + $0x1200] sm:$0xff]  ;;  %v4428_v4 = vld [vmem:[%s12268_s12 + $0x1210] sm:$0xff]  ;;  %v12558_v0 = vadd.f32 %v12530_v9, %v1929_v20 }
 0x5ad   : > { %v3554_v19 = vmul.f32 %v12528_v8, %v12288_v27  ;;  %v12540_v22 = vadd.f32 %v3545_v17, %v1933_v2  ;;  %v3547_v24 = vpop.f32.mrb[14].mxu0  ;;  %v3466_v25 = vpop.f32.mrb[11].mxu1  ;;  %7006 = vmatprep.subr.bf16.mxu1 %v5931_v6  ;;  %7170 = vmatprep.subr.bf16.mxu0 %v5933_v7  ;;  %v6029_v2 = vunpack.c.l.s8.bf16 %v4429_v57  ;;  %v6026_v14 = vunpack.c.l.s8.bf16 %v4426_v3 }
 0x5ae   : > { %v3555_v18 = vmul.f32 %v12536_v15, %v12288_v27  ;;  %v3548_v31 = vpop.f32.mrb[15].mxu0  ;;  %v6028_v17 = vunpack.c.l.s8.bf16 %v4428_v4  ;;  %v6061_v24 = vunpack.c.h.s8.bf16 %v4429_v57  ;;  %v6058_v9 = vunpack.c.h.s8.bf16 %v4426_v3 }
 0x5af   : > { %v3582_v44 = vrot.slane %v3554_v19, 4  ;;  %v3557_v45 = vmul.f32 %v12540_v22, %v12288_v27  ;;  %v6060_v42 = vunpack.c.h.s8.bf16 %v4428_v4  ;;  %v3556_v16 = vmul.f32 %v12558_v0, %v12288_v27 }
 0x5b0   : > { %v3588_v46 = vrot.slane %v3555_v18, 4  ;;  %7007 = vmatpush1.bf16.msra.mxu1 %v5930_v26  ;;  %7171 = vmatpush1.bf16.msra.mxu0 %v5932_v28  ;;  %v4459_v28 = vld [vmem:[%s12268_s12 + $0x1308] sm:$0xff] }
 0x5b1   : > { %v3583_v29 = vadd.f32 %v3582_v44, %v3554_v19  ;;  %v3600_v35 = vrot.slane %v3557_v45, 4  ;;  %7008 = vmatprep.subr.bf16.mxu1 %v5963_v40  ;;  %7172 = vmatprep.subr.bf16.mxu0 %v5965_v41  ;;  %v6059_v19 = vunpack.c.h.s8.bf16 %v4427_v63 }
 0x5b2   : > { %v3589_v38 = vadd.f32 %v3588_v46, %v3555_v18  ;;  %v4461_v18 = vld [vmem:[%s12268_s12 + $0x1318] sm:$0xff] }
 0x5b3   : > { %v3584_v55 = vrot.slane %v3583_v29, 2  ;;  %v3601_v59 = vadd.f32 %v3600_v35, %v3557_v45  ;;  %v6091_v45 = vunpack.c.l.s8.bf16 %v4459_v28  ;;  %v6093_v46 = vunpack.c.l.s8.bf16 %v4461_v18  ;;  %v4460_v35 = vld [vmem:[%s12268_s12 + $0x1310] sm:$0xff] }
 0x5b4   : > { %v3590_v61 = vrot.slane %v3589_v38, 2  ;;  %7009 = vmatpush1.bf16.msra.mxu1 %v5962_v36  ;;  %7173 = vmatpush1.bf16.msra.mxu0 %v5964_v30  ;;  %v6125_v63 = vunpack.c.h.s8.bf16 %v4461_v18 }
 0x5b5   : > { %v3585_v62 = vadd.f32 %v3584_v55, %v3583_v29  ;;  %v3602_v1 = vrot.slane %v3601_v59, 2  ;;  %7010 = vmatprep.subr.bf16.mxu1 %v5995_v51  ;;  %7174 = vmatprep.subr.bf16.mxu0 %v5997_v53  ;;  %v4458_v29 = vld [vmem:[%s12268_s12 + $0x1300] sm:$0xff]  ;;  %v6092_v53 = vunpack.c.l.s8.bf16 %v4460_v35  ;;  %v3594_v55 = vrot.slane %v3556_v16, 4 }
 0x5b6   : > { %v3591_v10 = vadd.f32 %v3590_v61, %v3589_v38  ;;  %v6090_v51 = vunpack.c.l.s8.bf16 %v4458_v29 }
 0x5b7   : > { %v3586_v47 = vrot.slane %v3585_v62, 1  ;;  %v3603_v6 = vadd.f32 %v3602_v1, %v3601_v59  ;;  %v4493_v1 = vld [vmem:[%s12268_s12 + $0x1418] sm:$0xff] }
 0x5b8   : > { %v3592_v7 = vrot.slane %v3591_v10, 1  ;;  %7011 = vmatpush1.bf16.msra.mxu1 %v5994_v32  ;;  %7175 = vmatpush1.bf16.msra.mxu0 %v5996_v34  ;;  %v6189_v18 = vunpack.c.h.s8.bf16 %v4493_v1 }
 0x5b9   : > { %v3587_v12 = vadd.f32 %v3586_v47, %v3585_v62  ;;  %v3604_v13 = vrot.slane %v3603_v6, 1  ;;  %7012 = vmatprep.subr.bf16.mxu1 %v6027_v43  ;;  %7176 = vmatprep.subr.bf16.mxu0 %v6029_v2  ;;  %v4491_v62 = vld [vmem:[%s12268_s12 + $0x1408] sm:$0xff]  ;;  %v6124_v43 = vunpack.c.h.s8.bf16 %v4460_v35  ;;  %v3595_v2 = vadd.f32 %v3594_v55, %v3556_v16 }
 0x5ba   : > { %v3593_v33 = vadd.f32 %v3592_v7, %v3591_v10  ;;  %v6122_v10 = vunpack.c.h.s8.bf16 %v4458_v29  ;;  %v6155_v4 = vunpack.c.l.s8.bf16 %v4491_v62  ;;  %v6157_v47 = vunpack.c.l.s8.bf16 %v4493_v1  ;;  %v4492_v7 = vld [vmem:[%s12268_s12 + $0x1410] sm:$0xff] }
 0x5bb   : > { %v3610_v25 = vmul.f32 0.25, %v3587_v12  ;;  %v3605_v26 = vadd.f32 %v3604_v13, %v3603_v6  ;;  %v4490_v6 = vld [vmem:[%s12268_s12 + $0x1400] sm:$0xff]  ;;  %v6188_v35 = vunpack.c.h.s8.bf16 %v4492_v7 }
 0x5bc   : > { %v3611_v31 = vmul.f32 0.25, %v3593_v33  ;;  %7013 = vmatpush1.bf16.msra.mxu1 %v6026_v14  ;;  %7177 = vmatpush1.bf16.msra.mxu0 %v6028_v17  ;;  %v6186_v29 = vunpack.c.h.s8.bf16 %v4490_v6 }
 0x5bd   : > { %v12563_v40 = vsub.f32 %v12528_v8, %v3610_v25  ;;  %v3613_v41 = vmul.f32 0.25, %v3605_v26  ;;  %7014 = vmatprep.subr.bf16.mxu1 %v6059_v19  ;;  %7178 = vmatprep.subr.bf16.mxu0 %v6061_v24  ;;  %v6154_v19 = vunpack.c.l.s8.bf16 %v4490_v6  ;;  %v6156_v24 = vunpack.c.l.s8.bf16 %v4492_v7 }
 0x5be   : > { %v12568_v44 = vsub.f32 %v12536_v15, %v3611_v31  ;;  %v3596_v25 = vrot.slane %v3595_v2, 2 }
 0x5bf   : > { %v3626_v8 = vmul.f32 %v12563_v40, %v12563_v40  ;;  %v12575_v36 = vsub.f32 %v12540_v22, %v3613_v41  ;;  %v6123_v22 = vunpack.c.h.s8.bf16 %v4459_v28  ;;  %v6187_v28 = vunpack.c.h.s8.bf16 %v4491_v62 }
 0x5c0   : > { %v3627_v30 = vmul.f32 %v12568_v44, %v12568_v44  ;;  %7015 = vmatpush1.bf16.msra.mxu1 %v6058_v9  ;;  %7179 = vmatpush1.bf16.msra.mxu0 %v6060_v42  ;;  %v4523_v9 = vld [vmem:[%s12268_s12 + $0x1508] sm:$0xff]  ;;  %v4525_v42 = vld [vmem:[%s12268_s12 + $0x1518] sm:$0xff] }
 0x5c1   : > { %v3634_v15 = vmul.f32 %v12288_v27, %v3626_v8  ;;  %v3629_v38 = vmul.f32 %v12575_v36, %v12575_v36  ;;  %7016 = vmatprep.subr.bf16.mxu1 %v6091_v45  ;;  %7180 = vmatprep.subr.bf16.mxu0 %v6093_v46  ;;  %v3597_v8 = vadd.f32 %v3596_v25, %v3595_v2  ;;  %v4557_v2 = vld [vmem:[%s12268_s12 + $0x1618] sm:$0xff]  ;;  %v4587_v25 = vld [vmem:[%s12268_s12 + $0x1708] sm:$0xff] }
 0x5c2   : > { %v3635_v59 = vmul.f32 %v12288_v27, %v3627_v30  ;;  %v6285_v7 = vunpack.c.l.s8.bf16 %v4557_v2 }
 0x5c3   : > { %v3662_v57 = vrot.slane %v3634_v15, 4  ;;  %v3637_v61 = vmul.f32 %v12288_v27, %v3629_v38  ;;  %v6221_v38 = vunpack.c.l.s8.bf16 %v4525_v42  ;;  %v3598_v1 = vrot.slane %v3597_v8, 1 }
 0x5c4   : > { %v3668_v32 = vrot.slane %v3635_v59, 4  ;;  %7017 = vmatpush1.bf16.msra.mxu1 %v6090_v51  ;;  %7181 = vmatpush1.bf16.msra.mxu0 %v6092_v53  ;;  %v4522_v51 = vld [vmem:[%s12268_s12 + $0x1500] sm:$0xff]  ;;  %v4524_v53 = vld [vmem:[%s12268_s12 + $0x1510] sm:$0xff] }
 0x5c5   : > { %v3663_v34 = vadd.f32 %v3662_v57, %v3634_v15  ;;  %v3680_v20 = vrot.slane %v3637_v61, 4  ;;  %7018 = vmatprep.subr.bf16.mxu1 %v6123_v22  ;;  %7182 = vmatprep.subr.bf16.mxu0 %v6125_v63  ;;  %v6219_v15 = vunpack.c.l.s8.bf16 %v4523_v9  ;;  %v6220_v62 = vunpack.c.l.s8.bf16 %v4524_v53 }
 0x5c6   : > { %v3669_v3 = vadd.f32 %v3668_v32, %v3635_v59 }
 0x5c7   : > { %v3664_v12 = vrot.slane %v3663_v34, 2  ;;  %v3681_v13 = vadd.f32 %v3680_v20, %v3637_v61  ;;  %v6218_v61 = vunpack.c.l.s8.bf16 %v4522_v51  ;;  %v6253_v20 = vunpack.c.h.s8.bf16 %v4525_v42 }
 0x5c8   : > { %v3670_v14 = vrot.slane %v3669_v3, 2  ;;  %7019 = vmatpush1.bf16.msra.mxu1 %v6122_v10  ;;  %7183 = vmatpush1.bf16.msra.mxu0 %v6124_v43  ;;  %v4555_v43 = vld [vmem:[%s12268_s12 + $0x1608] sm:$0xff] }
 0x5c9   : > { %v3665_v17 = vadd.f32 %v3664_v12, %v3663_v34  ;;  %v3682_v33 = vrot.slane %v3681_v13, 2  ;;  %7020 = vmatprep.subr.bf16.mxu1 %v6155_v4  ;;  %7184 = vmatprep.subr.bf16.mxu0 %v6157_v47  ;;  %v6251_v34 = vunpack.c.h.s8.bf16 %v4523_v9  ;;  %v6252_v4 = vunpack.c.h.s8.bf16 %v4524_v53  ;;  %v4554_v12 = vld [vmem:[%s12268_s12 + $0x1600] sm:$0xff] }
 0x5ca   : > { %v3671_v26 = vadd.f32 %v3670_v14, %v3669_v3  ;;  %v6250_v3 = vunpack.c.h.s8.bf16 %v4522_v51  ;;  %v3599_v47 = vadd.f32 %v3598_v1, %v3597_v8  ;;  %v6283_v6 = vunpack.c.l.s8.bf16 %v4555_v43  ;;  %v4588_v8 = vld [vmem:[%s12268_s12 + $0x1710] sm:$0xff] }
 0x5cb   : > { %v3666_v31 = vrot.slane %v3665_v17, 1  ;;  %v3683_v41 = vadd.f32 %v3682_v33, %v3681_v13  ;;  %v4556_v13 = vld [vmem:[%s12268_s12 + $0x1610] sm:$0xff]  ;;  %v6282_v14 = vunpack.c.l.s8.bf16 %v4554_v12  ;;  %v6314_v9 = vunpack.c.h.s8.bf16 %v4554_v12 }
 0x5cc   : > { %v3672_v16 = vrot.slane %v3671_v26, 1  ;;  %7021 = vmatpush1.bf16.msra.mxu1 %v6154_v19  ;;  %7185 = vmatpush1.bf16.msra.mxu0 %v6156_v24  ;;  %v3612_v33 = vmul.f32 0.25, %v3599_v47  ;;  %v6315_v19 = vunpack.c.h.s8.bf16 %v4555_v43  ;;  %v6317_v24 = vunpack.c.h.s8.bf16 %v4557_v2  ;;  %v4618_v47 = vld [vmem:[%s12268_s12 + $0x1800] sm:$0xff] }
 0x5cd   : > { %v3667_v45 = vadd.f32 %v3666_v31, %v3665_v17  ;;  %v3684_v46 = vrot.slane %v3683_v41, 1  ;;  %7022 = vmatprep.subr.bf16.mxu1 %v6187_v28  ;;  %7186 = vmatprep.subr.bf16.mxu0 %v6189_v18  ;;  %v6284_v17 = vunpack.c.l.s8.bf16 %v4556_v13  ;;  %v3739_v28 = vrot.slane %v12437_v49, %v12508_v54 }
 0x5ce   : > { %v3673_v30 = vadd.f32 %v3672_v16, %v3671_v26  ;;  %v4589_v26 = vld [vmem:[%s12268_s12 + $0x1718] sm:$0xff]  ;;  %v3789_v31 = vrot.slane %v12439_v11, %v12508_v54  ;;  %v6316_v42 = vunpack.c.h.s8.bf16 %v4556_v13 }
 0x5cf   : > { %v3690_v55 = vmul.f32 0.25, %v3667_v45  ;;  %v3685_v59 = vadd.f32 %v3684_v46, %v3683_v41  ;;  %v3743_v41 = vrot.slane %v12437_v49, %v12513_v60  ;;  %v12606_v45 = vsub.f32 %v12558_v0, %v3612_v33 }
 0x5d0   : > { %v3691_v22 = vmul.f32 0.25, %v3673_v30  ;;  %7023 = vmatpush1.bf16.msra.mxu1 %v6186_v29  ;;  %7187 = vmatpush1.bf16.msra.mxu0 %v6188_v35  ;;  %v6347_v46 = vunpack.c.l.s8.bf16 %v4587_v25  ;;  %v6349_v29 = vunpack.c.l.s8.bf16 %v4589_v26  ;;  %v4586_v35 = vld [vmem:[%s12268_s12 + $0x1700] sm:$0xff]  ;;  %v3801_v0 = vrot.slane %v12439_v11, %v12516_v58 }
 0x5d1   : > { %v3699_v63 = vadd.f32 1e-05, %v3690_v55  ;;  %v3693_v57 = vmul.f32 0.25, %v3685_v59  ;;  %7024 = vmatprep.subr.bf16.mxu1 %v6219_v15  ;;  %7188 = vmatprep.subr.bf16.mxu0 %v6221_v38  ;;  %v3751_v15 = vrot.slane %v12437_v49, %v12516_v58  ;;  %v6346_v59 = vunpack.c.l.s8.bf16 %v4586_v35 }
 0x5d2   : > { %v3700_v32 = vadd.f32 1e-05, %v3691_v22  ;;  %v6348_v22 = vunpack.c.l.s8.bf16 %v4588_v8 }
 0x5d3   : > { %11151 = vrsqrt.f32 %v3699_v63  ;;  %v3702_v10 = vadd.f32 1e-05, %v3693_v57  ;;  %v6379_v63 = vunpack.c.h.s8.bf16 %v4587_v25  ;;  %v3628_v57 = vmul.f32 %v12606_v45, %v12606_v45 }
 0x5d4   : > { %11153 = vrsqrt.f32 %v3700_v32  ;;  %7025 = vmatpush1.bf16.msra.mxu1 %v6218_v61  ;;  %7189 = vmatpush1.bf16.msra.mxu0 %v6220_v62  ;;  %v4619_v62 = vld [vmem:[%s12268_s12 + $0x1808] sm:$0xff]  ;;  %v4621_v32 = vld [vmem:[%s12268_s12 + $0x1818] sm:$0xff] }
 0x5d5   : > { %11155 = vrsqrt.f32 %v3702_v10  ;;  %7026 = vmatprep.subr.bf16.mxu1 %v6251_v34  ;;  %7190 = vmatprep.subr.bf16.mxu0 %v6253_v20  ;;  %v6378_v20 = vunpack.c.h.s8.bf16 %v4586_v35  ;;  %v6380_v10 = vunpack.c.h.s8.bf16 %v4588_v8  ;;  %v6411_v43 = vunpack.c.l.s8.bf16 %v4619_v62  ;;  %v4652_v35 = vld [vmem:[%s12268_s12 + $0x1910] sm:$0xff] }
 0x5d6   : > { %v3636_v2 = vmul.f32 %v12288_v27, %v3628_v57  ;;  %v6410_v27 = vunpack.c.l.s8.bf16 %v4618_v47  ;;  %v6443_v25 = vunpack.c.h.s8.bf16 %v4619_v62  ;;  %v4684_v57 = vld [vmem:[%s12268_s12 + $0x1a10] sm:$0xff] }
 0x5d8   : > { %7027 = vmatpush1.bf16.msra.mxu1 %v6250_v3  ;;  %7191 = vmatpush1.bf16.msra.mxu0 %v6252_v4  ;;  %v6413_v4 = vunpack.c.l.s8.bf16 %v4621_v32 }
 0x5d9   : > { %7028 = vmatprep.subr.bf16.mxu1 %v6283_v6  ;;  %7192 = vmatprep.subr.bf16.mxu0 %v6285_v7  ;;  %v4620_v6 = vld [vmem:[%s12268_s12 + $0x1810] sm:$0xff] }
 0x5da   : > { %v6412_v33 = vunpack.c.l.s8.bf16 %v4620_v6 }
 0x5dc   : > { %7029 = vmatpush1.bf16.msra.mxu1 %v6282_v14  ;;  %7193 = vmatpush1.bf16.msra.mxu0 %v6284_v17 }
 0x5dd   : > { %v11152_v18 = vpop.eup %11151  ;;  %7030 = vmatprep.subr.bf16.mxu1 %v6315_v19  ;;  %7194 = vmatprep.subr.bf16.mxu0 %v6317_v24  ;;  %v3674_v24 = vrot.slane %v3636_v2, 4 }
 0x5de   : > { %v3715_v16 = vmul.f32 %v11152_v18, %v12563_v40  ;;  %v11154_v30 = vpop.eup %11153  ;;  %v3793_v40 = vrot.slane %v12439_v11, %v12513_v60  ;;  %v4653_v18 = vld [vmem:[%s12268_s12 + $0x1918] sm:$0xff] }
 0x5df   : > { %v11156_v38 = vpop.eup %11155  ;;  %v3716_v53 = vmul.f32 %v11154_v30, %v12568_v44  ;;  %v6381_v44 = vunpack.c.h.s8.bf16 %v4589_v26  ;;  %v6445_v26 = vunpack.c.h.s8.bf16 %v4621_v32  ;;  %v6476_v30 = vunpack.c.l.s8.bf16 %v4652_v35 }
 0x5e0   : > { %v3764_v51 = vmul.f32 %v3739_v28, %v3715_v16  ;;  %v3718_v55 = vmul.f32 %v11156_v38, %v12575_v36  ;;  %7031 = vmatpush1.bf16.msra.mxu1 %v6314_v9  ;;  %7195 = vmatpush1.bf16.msra.mxu0 %v6316_v42  ;;  %v4651_v28 = vld [vmem:[%s12268_s12 + $0x1908] sm:$0xff]  ;;  %v6444_v9 = vunpack.c.h.s8.bf16 %v4620_v6  ;;  %v3675_v42 = vadd.f32 %v3674_v24, %v3636_v2 }
 0x5e1   : > { %v3765_v61 = vmul.f32 %v3743_v41, %v3716_v53  ;;  %7032 = vmatprep.subr.bf16.mxu1 %v6347_v46  ;;  %7196 = vmatprep.subr.bf16.mxu0 %v6349_v29  ;;  %v6442_v41 = vunpack.c.h.s8.bf16 %v4618_v47  ;;  %v6475_v16 = vunpack.c.l.s8.bf16 %v4651_v28  ;;  %v6477_v46 = vunpack.c.l.s8.bf16 %v4653_v18  ;;  %v4650_v29 = vld [vmem:[%s12268_s12 + $0x1900] sm:$0xff]  ;;  %v4683_v53 = vld [vmem:[%s12268_s12 + $0x1a08] sm:$0xff] }
 0x5e2   : > { %v3814_v49 = vadd.f32 %v3789_v31, %v3764_v51  ;;  %v3767_v1 = vmul.f32 %v3751_v15, %v3718_v55  ;;  %v6474_v8 = vunpack.c.l.s8.bf16 %v4650_v29  ;;  %v3676_v15 = vrot.slane %v3675_v42, 2 }
 0x5e3   : > { %v3815_v36 = vadd.f32 %v3793_v40, %v3765_v61  ;;  %v6507_v38 = vunpack.c.h.s8.bf16 %v4651_v28  ;;  %v6509_v51 = vunpack.c.h.s8.bf16 %v4653_v18  ;;  %v4685_v40 = vld [vmem:[%s12268_s12 + $0x1a18] sm:$0xff]  ;;  %v6508_v55 = vunpack.c.h.s8.bf16 %v4652_v35  ;;  %v4746_v18 = vld [vmem:[%s12268_s12 + $0x1c00] sm:$0xff] }
 0x5e4   : > { %vm3822_vm11 = vcmp.ge.f32.partialorder %v3814_v49, 0.0  ;;  %v3830_v11 = vmul.f32 0.2, %v3814_v49  ;;  %v3817_v34 = vadd.f32 %v3801_v0, %v3767_v1  ;;  %7033 = vmatpush1.bf16.msra.mxu1 %v6346_v59  ;;  %7197 = vmatpush1.bf16.msra.mxu0 %v6348_v22  ;;  %v6506_v0 = vunpack.c.h.s8.bf16 %v4650_v29  ;;  %v4779_v29 = vld [vmem:[%s12268_s12 + $0x1d08] sm:$0xff]  ;;  %v4781_v35 = vld [vmem:[%s12268_s12 + $0x1d18] sm:$0xff] }
 0x5e5   : > { %vm3823_vm12 = vcmp.ge.f32.partialorder %v3815_v36, 0.0  ;;  %v3831_v3 = vmul.f32 0.2, %v3815_v36  ;;  %7034 = vmatprep.subr.bf16.mxu1 %v6379_v63  ;;  %7198 = vmatprep.subr.bf16.mxu0 %v6381_v44  ;;  %v3677_v59 = vadd.f32 %v3676_v15, %v3675_v42  ;;  %v6539_v22 = vunpack.c.l.s8.bf16 %v4683_v53 }
 0x5e6   : > { %v3838_v7 = vsel %vm3822_vm11, %v3814_v49, %v3830_v11  ;;  %vm3825_vm13 = vcmp.ge.f32.partialorder %v3817_v34, 0.0  ;;  %v3833_v12 = vmul.f32 0.2, %v3817_v34  ;;  %v6541_v63 = vunpack.c.l.s8.bf16 %v4685_v40  ;;  %v4682_v49 = vld [vmem:[%s12268_s12 + $0x1a00] sm:$0xff]  ;;  %v4715_v11 = vld [vmem:[%s12268_s12 + $0x1b08] sm:$0xff] }
 0x5e7   : > { %v3839_v13 = vsel %vm3823_vm12, %v3815_v36, %v3831_v3  ;;  %v12628_v19 = vpack.c.bf16 %v3838_v7, %v3838_v7  ;;  %v6538_v61 = vunpack.c.l.s8.bf16 %v4682_v49  ;;  %v6540_v44 = vunpack.c.l.s8.bf16 %v4684_v57  ;;  %v4717_v36 = vld [vmem:[%s12268_s12 + $0x1b18] sm:$0xff]  ;;  %v4714_v3 = vld [vmem:[%s12268_s12 + $0x1b00] sm:$0xff] }
 0x5e8   : > { %v12626_v14 = vpack.c.bf16 %v3839_v13, %v3839_v13  ;;  %v3841_v17 = vsel %vm3825_vm13, %v3817_v34, %v3833_v12  ;;  %7035 = vmatpush1.bf16.msra.mxu1 %v6378_v20  ;;  %7199 = vmatpush1.bf16.msra.mxu0 %v6380_v10  ;;  %v3678_v62 = vrot.slane %v3677_v59, 1  ;;  %v6571_v1 = vunpack.c.h.s8.bf16 %v4683_v53  ;;  %v4780_v53 = vld [vmem:[%s12268_s12 + $0x1d10] sm:$0xff] }
 0x5e9   : > { %7045 = vmatprep.subr.bf16.mxu1 %v6411_v43  ;;  %7209 = vmatprep.subr.bf16.mxu0 %v6413_v4  ;;  %v12634_v31 = vpack.c.bf16 %v3841_v17, %v3841_v17  ;;  %v6573_v32 = vunpack.c.h.s8.bf16 %v4685_v40  ;;  %v6570_v34 = vunpack.c.h.s8.bf16 %v4682_v49  ;;  %v6572_v20 = vunpack.c.h.s8.bf16 %v4684_v57  ;;  %v4716_v4 = vld [vmem:[%s12268_s12 + $0x1b10] sm:$0xff]  ;;  %v4747_v17 = vld [vmem:[%s12268_s12 + $0x1c08] sm:$0xff] }
 0x5ea   : > { %7036 = vmatprep.mubr.bf16.mxu1 %v12626_v14  ;;  %7200 = vmatprep.mubr.bf16.mxu0 %v12626_v14  ;;  %v3679_v10 = vadd.f32 %v3678_v62, %v3677_v59  ;;  %v6603_v43 = vunpack.c.l.s8.bf16 %v4715_v11  ;;  %v6605_v2 = vunpack.c.l.s8.bf16 %v4717_v36  ;;  %v6602_v47 = vunpack.c.l.s8.bf16 %v4714_v3 }
 0x5eb   : > { %7037 = vmatmul.mubr.bf16.vlgmr.msra.gmra.mrb[12].mxu1 %v12628_v19  ;;  %7201 = vmatmul.mubr.bf16.vlgmr.msra.gmra.mrb[16].mxu0 %v12628_v19  ;;  %v6604_v6 = vunpack.c.l.s8.bf16 %v4716_v4  ;;  %v6635_v12 = vunpack.c.h.s8.bf16 %v4715_v11  ;;  %v6637_v13 = vunpack.c.h.s8.bf16 %v4717_v36  ;;  %v6636_v24 = vunpack.c.h.s8.bf16 %v4716_v4  ;;  %v11223_v36 = vld [vmem:[#allocation18] sm:$0xff]  ;;  %v11224_v4 = vld [vmem:[#allocation19] sm:$0xff] }
 0x5ec   : > { %7046 = vmatpush1.bf16.msra.mxu1 %v6410_v27  ;;  %7210 = vmatpush1.bf16.msra.mxu0 %v6412_v33  ;;  %v3692_v7 = vmul.f32 0.25, %v3679_v10  ;;  %v4749_v27 = vld [vmem:[%s12268_s12 + $0x1c18] sm:$0xff]  ;;  %v6634_v33 = vunpack.c.h.s8.bf16 %v4714_v3  ;;  %v6731_v15 = vunpack.c.l.s8.bf16 %v4779_v29  ;;  %v6765_v59 = vunpack.c.h.s8.bf16 %v4781_v35 }
 0x5ed   : > { %7077 = vmatprep.mubr.bf16.mxu1 %v12634_v31  ;;  %7241 = vmatprep.mubr.bf16.mxu0 %v12634_v31  ;;  %v6669_v28 = vunpack.c.l.s8.bf16 %v4749_v27 }
 0x5ee   : > { %7047 = vmatprep.subr.bf16.mxu1 %v6443_v25  ;;  %7211 = vmatprep.subr.bf16.mxu0 %v6445_v26  ;;  %v3701_v25 = vadd.f32 1e-05, %v3692_v7  ;;  %v6667_v26 = vunpack.c.l.s8.bf16 %v4747_v17  ;;  %v4845_v7 = vld [vmem:[%s12268_s12 + $0x1f18] sm:$0xff] }
 0x5f0   : > { %7048 = vmatpush1.bf16.msra.mxu1 %v6442_v41  ;;  %7212 = vmatpush1.bf16.msra.mxu0 %v6444_v9  ;;  %v4748_v41 = vld [vmem:[%s12268_s12 + $0x1c10] sm:$0xff]  ;;  %v6666_v9 = vunpack.c.l.s8.bf16 %v4746_v18  ;;  %11157 = vrsqrt.f32 %v3701_v25 }
 0x5f1   : > { %7049 = vmatprep.subr.bf16.mxu1 %v6475_v16  ;;  %7213 = vmatprep.subr.bf16.mxu0 %v6477_v46  ;;  %v6668_v42 = vunpack.c.l.s8.bf16 %v4748_v41  ;;  %v6699_v16 = vunpack.c.h.s8.bf16 %v4747_v17  ;;  %v6701_v46 = vunpack.c.h.s8.bf16 %v4749_v27  ;;  %v6861_v17 = vunpack.c.l.s8.bf16 %v4845_v7  ;;  %v4842_v27 = vld [vmem:[%s12268_s12 + $0x1f00] sm:$0xff] }
 0x5f2   : > { %v6858_v25 = vunpack.c.l.s8.bf16 %v4842_v27 }
 0x5f4   : > { %7050 = vmatpush1.bf16.msra.mxu1 %v6474_v8  ;;  %7214 = vmatpush1.bf16.msra.mxu0 %v6476_v30  ;;  %v6698_v8 = vunpack.c.h.s8.bf16 %v4746_v18  ;;  %v6700_v30 = vunpack.c.h.s8.bf16 %v4748_v41  ;;  %v6893_v18 = vunpack.c.h.s8.bf16 %v4845_v7 }
 0x5f5   : > { %7051 = vmatprep.subr.bf16.mxu1 %v6507_v38  ;;  %7215 = vmatprep.subr.bf16.mxu0 %v6509_v51  ;;  %v6733_v38 = vunpack.c.l.s8.bf16 %v4781_v35  ;;  %v4778_v51 = vld [vmem:[%s12268_s12 + $0x1d00] sm:$0xff] }
 0x5f6   : > { %v6730_v40 = vunpack.c.l.s8.bf16 %v4778_v51  ;;  %v6762_v57 = vunpack.c.h.s8.bf16 %v4778_v51 }
 0x5f8   : > { %7052 = vmatpush1.bf16.msra.mxu1 %v6506_v0  ;;  %7216 = vmatpush1.bf16.msra.mxu0 %v6508_v55  ;;  %v6732_v0 = vunpack.c.l.s8.bf16 %v4780_v53  ;;  %v6763_v55 = vunpack.c.h.s8.bf16 %v4779_v29 }
 0x5f9   : > { %7053 = vmatprep.subr.bf16.mxu1 %v6539_v22  ;;  %7217 = vmatprep.subr.bf16.mxu0 %v6541_v63  ;;  %v4811_v22 = vld [vmem:[%s12268_s12 + $0x1e08] sm:$0xff]  ;;  %v4813_v63 = vld [vmem:[%s12268_s12 + $0x1e18] sm:$0xff] }
 0x5fa   : > { %v11158_v49 = vpop.eup %11157  ;;  %v6797_v62 = vunpack.c.l.s8.bf16 %v4813_v63 }
 0x5fb   : > { %v3717_v11 = vmul.f32 %v11158_v49, %v12606_v45 }
 0x5fc   : > { %7054 = vmatpush1.bf16.msra.mxu1 %v6538_v61  ;;  %7218 = vmatpush1.bf16.msra.mxu0 %v6540_v44  ;;  %v6764_v61 = vunpack.c.h.s8.bf16 %v4780_v53  ;;  %v6795_v44 = vunpack.c.l.s8.bf16 %v4811_v22 }
 0x5fd   : > { %7055 = vmatprep.subr.bf16.mxu1 %v6571_v1  ;;  %7219 = vmatprep.subr.bf16.mxu0 %v6573_v32  ;;  %v4810_v1 = vld [vmem:[%s12268_s12 + $0x1e00] sm:$0xff]  ;;  %v4812_v32 = vld [vmem:[%s12268_s12 + $0x1e10] sm:$0xff] }
 0x5fe   : > { %v6796_v10 = vunpack.c.l.s8.bf16 %v4812_v32  ;;  %v6826_v45 = vunpack.c.h.s8.bf16 %v4810_v1 }
 0x600   : > { %7056 = vmatpush1.bf16.msra.mxu1 %v6570_v34  ;;  %7220 = vmatpush1.bf16.msra.mxu0 %v6572_v20  ;;  %v3747_v34 = vrot.slane %v11223_v36, %v12549_v37  ;;  %v6794_v20 = vunpack.c.l.s8.bf16 %v4810_v1  ;;  %v3919_v36 = vld [vmem:[%s12268_s12 + $0x228] sm:$0xff] }
 0x601   : > { %7057 = vmatprep.subr.bf16.mxu1 %v6603_v43  ;;  %7221 = vmatprep.subr.bf16.mxu0 %v6605_v2  ;;  %v6827_v43 = vunpack.c.h.s8.bf16 %v4811_v22  ;;  %v6829_v2 = vunpack.c.h.s8.bf16 %v4813_v63  ;;  %v5039_v7 = vunpack.c.h.s8.bf16 %v3919_v36 }
 0x602   : > { %v3766_v3 = vmul.f32 %v3747_v34, %v3717_v11  ;;  %v3921_v34 = vld [vmem:[%s12268_s12 + $0x238] sm:$0xff] }
 0x604   : > { %7058 = vmatpush1.bf16.msra.mxu1 %v6602_v47  ;;  %7222 = vmatpush1.bf16.msra.mxu0 %v6604_v6  ;;  %v3797_v47 = vrot.slane %v11224_v4, %v12549_v37  ;;  %v4843_v6 = vld [vmem:[%s12268_s12 + $0x1f08] sm:$0xff]  ;;  %v3920_v4 = vld [vmem:[%s12268_s12 + $0x230] sm:$0xff] }
 0x605   : > { %7059 = vmatprep.subr.bf16.mxu1 %v6635_v12  ;;  %7223 = vmatprep.subr.bf16.mxu0 %v6637_v13  ;;  %v6828_v12 = vunpack.c.h.s8.bf16 %v4812_v32  ;;  %v6859_v13 = vunpack.c.l.s8.bf16 %v4843_v6 }
 0x608   : > { %7060 = vmatpush1.bf16.msra.mxu1 %v6634_v33  ;;  %7224 = vmatpush1.bf16.msra.mxu0 %v6636_v24  ;;  %v4844_v33 = vld [vmem:[%s12268_s12 + $0x1f10] sm:$0xff]  ;;  %v3816_v24 = vadd.f32 %v3797_v47, %v3766_v3  ;;  %v5009_v3 = vunpack.c.l.s8.bf16 %v3921_v34 }
 0x609   : > { %7061 = vmatprep.subr.bf16.mxu1 %v6667_v26  ;;  %7225 = vmatprep.subr.bf16.mxu0 %v6669_v28  ;;  %v6860_v26 = vunpack.c.l.s8.bf16 %v4844_v33  ;;  %v6891_v28 = vunpack.c.h.s8.bf16 %v4843_v6  ;;  %v5008_v6 = vunpack.c.l.s8.bf16 %v3920_v4 }
 0x60a   : > { %v3832_v41 = vmul.f32 0.2, %v3816_v24  ;;  %vm3824_vm14 = vcmp.ge.f32.partialorder %v3816_v24, 0.0 }
 0x60c   : > { %7062 = vmatpush1.bf16.msra.mxu1 %v6666_v9  ;;  %7226 = vmatpush1.bf16.msra.mxu0 %v6668_v42  ;;  %v3855_v9 = vld [vmem:[%s12268_s12 + $0x28] sm:$0xff]  ;;  %v3857_v42 = vld [vmem:[%s12268_s12 + $0x38] sm:$0xff] }
 0x60d   : > { %7063 = vmatprep.subr.bf16.mxu1 %v6699_v16  ;;  %7227 = vmatprep.subr.bf16.mxu0 %v6701_v46  ;;  %v6890_v16 = vunpack.c.h.s8.bf16 %v4842_v27  ;;  %v6892_v46 = vunpack.c.h.s8.bf16 %v4844_v33  ;;  %v4879_v29 = vunpack.c.l.s8.bf16 %v3855_v9  ;;  %v4881_v35 = vunpack.c.l.s8.bf16 %v3857_v42 }
 0x60e   : > { %v5040_v27 = vunpack.c.h.s8.bf16 %v3920_v4  ;;  %v4048_v4 = vld [vmem:[%s12268_s12 + $0x630] sm:$0xff] }
 0x610   : > { %7064 = vmatpush1.bf16.msra.mxu1 %v6698_v8  ;;  %7228 = vmatpush1.bf16.msra.mxu0 %v6700_v30  ;;  %v3854_v8 = vld [vmem:[%s12268_s12 + $0x20] sm:$0xff]  ;;  %v3840_v30 = vsel %vm3824_vm14, %v3816_v24, %v3832_v41 }
 0x611   : > { %7065 = vmatprep.subr.bf16.mxu1 %v6731_v15  ;;  %7229 = vmatprep.subr.bf16.mxu0 %v6733_v38  ;;  %v3856_v15 = vld [vmem:[%s12268_s12 + $0x30] sm:$0xff]  ;;  %v4878_v38 = vunpack.c.l.s8.bf16 %v3854_v8  ;;  %v12673_v51 = vpack.c.bf16 %v3840_v30, %v3840_v30  ;;  %v4910_v22 = vunpack.c.h.s8.bf16 %v3854_v8  ;;  %v3950_v24 = vld [vmem:[%s12268_s12 + $0x320] sm:$0xff] }
 0x612   : > { %v4880_v53 = vunpack.c.l.s8.bf16 %v3856_v15  ;;  %v4912_v63 = vunpack.c.h.s8.bf16 %v3856_v15  ;;  %v3982_v8 = vld [vmem:[%s12268_s12 + $0x420] sm:$0xff]  ;;  %v3984_v15 = vld [vmem:[%s12268_s12 + $0x430] sm:$0xff] }
 0x614   : > { %7066 = vmatpush1.bf16.msra.mxu1 %v6730_v40  ;;  %7230 = vmatpush1.bf16.msra.mxu0 %v6732_v0  ;;  %v4911_v40 = vunpack.c.h.s8.bf16 %v3855_v9  ;;  %v4913_v0 = vunpack.c.h.s8.bf16 %v3857_v42  ;;  %v3983_v42 = vld [vmem:[%s12268_s12 + $0x428] sm:$0xff] }
 0x615   : > { %7067 = vmatprep.subr.bf16.mxu1 %v6763_v55  ;;  %7231 = vmatprep.subr.bf16.mxu0 %v6765_v59  ;;  %v3887_v55 = vld [vmem:[%s12268_s12 + $0x128] sm:$0xff]  ;;  %v3889_v59 = vld [vmem:[%s12268_s12 + $0x138] sm:$0xff] }
 0x616   : > { %v4943_v49 = vunpack.c.l.s8.bf16 %v3887_v55  ;;  %v4975_v32 = vunpack.c.h.s8.bf16 %v3887_v55  ;;  %v4977_v11 = vunpack.c.h.s8.bf16 %v3889_v59  ;;  %v4015_v55 = vld [vmem:[%s12268_s12 + $0x528] sm:$0xff] }
 0x618   : > { %7068 = vmatpush1.bf16.msra.mxu1 %v6762_v57  ;;  %7232 = vmatpush1.bf16.msra.mxu0 %v6764_v61  ;;  %v3886_v57 = vld [vmem:[%s12268_s12 + $0x120] sm:$0xff]  ;;  %v4945_v61 = vunpack.c.l.s8.bf16 %v3889_v59  ;;  %v4017_v59 = vld [vmem:[%s12268_s12 + $0x538] sm:$0xff] }
 0x619   : > { %7069 = vmatprep.subr.bf16.mxu1 %v6795_v44  ;;  %7233 = vmatprep.subr.bf16.mxu0 %v6797_v62  ;;  %v3888_v44 = vld [vmem:[%s12268_s12 + $0x130] sm:$0xff]  ;;  %v4942_v62 = vunpack.c.l.s8.bf16 %v3886_v57 }
 0x61a   : > { %v4944_v1 = vunpack.c.l.s8.bf16 %v3888_v44 }
 0x61c   : > { %7070 = vmatpush1.bf16.msra.mxu1 %v6794_v20  ;;  %7234 = vmatpush1.bf16.msra.mxu0 %v6796_v10  ;;  %v4974_v20 = vunpack.c.h.s8.bf16 %v3886_v57  ;;  %v4976_v10 = vunpack.c.h.s8.bf16 %v3888_v44  ;;  %v4014_v57 = vld [vmem:[%s12268_s12 + $0x520] sm:$0xff]  ;;  %v4016_v44 = vld [vmem:[%s12268_s12 + $0x530] sm:$0xff] }
 0x61d   : > { %7071 = vmatprep.subr.bf16.mxu1 %v6827_v43  ;;  %7235 = vmatprep.subr.bf16.mxu0 %v6829_v2  ;;  %v5007_v43 = vunpack.c.l.s8.bf16 %v3919_v36  ;;  %v3918_v2 = vld [vmem:[%s12268_s12 + $0x220] sm:$0xff]  ;;  %v4047_v36 = vld [vmem:[%s12268_s12 + $0x628] sm:$0xff] }
 0x61e   : > { %v5006_v47 = vunpack.c.l.s8.bf16 %v3918_v2 }
 0x620   : > { %7072 = vmatpush1.bf16.msra.mxu1 %v6826_v45  ;;  %7236 = vmatpush1.bf16.msra.mxu0 %v6828_v12  ;;  %v5041_v45 = vunpack.c.h.s8.bf16 %v3921_v34  ;;  %v3951_v12 = vld [vmem:[%s12268_s12 + $0x328] sm:$0xff]  ;;  %v4049_v34 = vld [vmem:[%s12268_s12 + $0x638] sm:$0xff] }
 0x621   : > { %7073 = vmatprep.subr.bf16.mxu1 %v6859_v13  ;;  %7237 = vmatprep.subr.bf16.mxu0 %v6861_v17  ;;  %v3953_v13 = vld [vmem:[%s12268_s12 + $0x338] sm:$0xff]  ;;  %v5038_v17 = vunpack.c.h.s8.bf16 %v3918_v2  ;;  %v5071_v33 = vunpack.c.l.s8.bf16 %v3951_v12  ;;  %v5103_v41 = vunpack.c.h.s8.bf16 %v3951_v12  ;;  %v4046_v2 = vld [vmem:[%s12268_s12 + $0x620] sm:$0xff]  ;;  %v4079_v12 = vld [vmem:[%s12268_s12 + $0x728] sm:$0xff] }
 0x622   : > { %v5105_v9 = vunpack.c.h.s8.bf16 %v3953_v13 }
 0x624   : > { %7074 = vmatpush1.bf16.msra.mxu1 %v6858_v25  ;;  %7238 = vmatpush1.bf16.msra.mxu0 %v6860_v26  ;;  %v5073_v25 = vunpack.c.l.s8.bf16 %v3953_v13  ;;  %v3952_v26 = vld [vmem:[%s12268_s12 + $0x330] sm:$0xff]  ;;  %v4081_v13 = vld [vmem:[%s12268_s12 + $0x738] sm:$0xff] }
 0x625   : > { %7075 = vmatprep.subr.bf16.mxu1 %v6891_v28  ;;  %7239 = vmatprep.subr.bf16.mxu0 %v6893_v18  ;;  %v5070_v28 = vunpack.c.l.s8.bf16 %v3950_v24  ;;  %v5072_v18 = vunpack.c.l.s8.bf16 %v3952_v26 }
 0x628   : > { %7076 = vmatpush1.bf16.msra.mxu1 %v6890_v16  ;;  %7240 = vmatpush1.bf16.msra.mxu0 %v6892_v46  ;;  %v3985_v16 = vld [vmem:[%s12268_s12 + $0x438] sm:$0xff]  ;;  %v5102_v46 = vunpack.c.h.s8.bf16 %v3950_v24  ;;  %v4078_v24 = vld [vmem:[%s12268_s12 + $0x720] sm:$0xff] }
 0x629   : > { %7250 = vmatprep.subr.bf16.mxu1 %v4879_v29  ;;  %7414 = vmatprep.subr.bf16.mxu0 %v4881_v35  ;;  %v5104_v29 = vunpack.c.h.s8.bf16 %v3952_v26  ;;  %v5135_v35 = vunpack.c.l.s8.bf16 %v3983_v42  ;;  %v5137_v30 = vunpack.c.l.s8.bf16 %v3985_v16  ;;  %v4080_v26 = vld [vmem:[%s12268_s12 + $0x730] sm:$0xff] }
 0x62b   : > { %7078 = vmatmul.mubr.bf16.vlgmr.msra.gmra.mrb[12].mxu1 %v12673_v51  ;;  %7242 = vmatmul.mubr.bf16.vlgmr.msra.gmra.mrb[16].mxu0 %v12673_v51 }
 0x62c   : > { %7251 = vmatpush1.bf16.msra.mxu1 %v4878_v38  ;;  %7282 = vmatprep.mubr.bf16.mxu1 %v12460_v52  ;;  %v5134_v38 = vunpack.c.l.s8.bf16 %v3982_v8 }
 0x62d   : > { %7415 = vmatpush1.bf16.msra.mxu0 %v4880_v53  ;;  %7446 = vmatprep.mubr.bf16.mxu0 %v12460_v52  ;;  %v5136_v53 = vunpack.c.l.s8.bf16 %v3984_v15 }
 0x62e   : > { %7252 = vmatprep.subr.bf16.mxu1 %v4911_v40  ;;  %7416 = vmatprep.subr.bf16.mxu0 %v4913_v0  ;;  %v5167_v40 = vunpack.c.h.s8.bf16 %v3983_v42  ;;  %v5169_v0 = vunpack.c.h.s8.bf16 %v3985_v16  ;;  %v4111_v42 = vld [vmem:[%s12268_s12 + $0x828] sm:$0xff]  ;;  %v4113_v16 = vld [vmem:[%s12268_s12 + $0x838] sm:$0xff] }
 0x630   : > { %7253 = vmatpush1.bf16.msra.mxu1 %v4910_v22  ;;  %v5166_v22 = vunpack.c.h.s8.bf16 %v3982_v8  ;;  %v4110_v8 = vld [vmem:[%s12268_s12 + $0x820] sm:$0xff] }
 0x631   : > { %7417 = vmatpush1.bf16.msra.mxu0 %v4912_v63  ;;  %7254 = vmatprep.subr.bf16.mxu1 %v4943_v49  ;;  %v5168_v63 = vunpack.c.h.s8.bf16 %v3984_v15  ;;  %v5199_v49 = vunpack.c.l.s8.bf16 %v4015_v55  ;;  %v4112_v15 = vld [vmem:[%s12268_s12 + $0x830] sm:$0xff] }
 0x632   : > { %7418 = vmatprep.subr.bf16.mxu0 %v4945_v61  ;;  %v5201_v61 = vunpack.c.l.s8.bf16 %v4017_v59 }
 0x634   : > { %7255 = vmatpush1.bf16.msra.mxu1 %v4942_v62  ;;  %v5198_v62 = vunpack.c.l.s8.bf16 %v4014_v57 }
 0x635   : > { %7419 = vmatpush1.bf16.msra.mxu0 %v4944_v1  ;;  %7256 = vmatprep.subr.bf16.mxu1 %v4975_v32  ;;  %v5200_v1 = vunpack.c.l.s8.bf16 %v4016_v44  ;;  %v5231_v32 = vunpack.c.h.s8.bf16 %v4015_v55  ;;  %v5425_v55 = vunpack.c.h.s8.bf16 %v4113_v16 }
 0x636   : > { %7420 = vmatprep.subr.bf16.mxu0 %v4977_v11  ;;  %v5233_v11 = vunpack.c.h.s8.bf16 %v4017_v59  ;;  %v4145_v59 = vld [vmem:[%s12268_s12 + $0x938] sm:$0xff] }
 0x638   : > { %7257 = vmatpush1.bf16.msra.mxu1 %v4974_v20  ;;  %v5230_v20 = vunpack.c.h.s8.bf16 %v4014_v57  ;;  %v4142_v57 = vld [vmem:[%s12268_s12 + $0x920] sm:$0xff] }
 0x639   : > { %7421 = vmatpush1.bf16.msra.mxu0 %v4976_v10  ;;  %7258 = vmatprep.subr.bf16.mxu1 %v5007_v43  ;;  %v5232_v10 = vunpack.c.h.s8.bf16 %v4016_v44  ;;  %v5263_v43 = vunpack.c.l.s8.bf16 %v4047_v36  ;;  %v4144_v44 = vld [vmem:[%s12268_s12 + $0x930] sm:$0xff] }
 0x63a   : > { %7422 = vmatprep.subr.bf16.mxu0 %v5009_v3  ;;  %v5265_v3 = vunpack.c.l.s8.bf16 %v4049_v34 }
 0x63c   : > { %7259 = vmatpush1.bf16.msra.mxu1 %v5006_v47  ;;  %v5262_v47 = vunpack.c.l.s8.bf16 %v4046_v2 }
 0x63d   : > { %7423 = vmatpush1.bf16.msra.mxu0 %v5008_v6  ;;  %7260 = vmatprep.subr.bf16.mxu1 %v5039_v7  ;;  %v5264_v6 = vunpack.c.l.s8.bf16 %v4048_v4  ;;  %v5295_v7 = vunpack.c.h.s8.bf16 %v4047_v36  ;;  %v4175_v36 = vld [vmem:[%s12268_s12 + $0xa28] sm:$0xff] }
 0x63e   : > { %7424 = vmatprep.subr.bf16.mxu0 %v5041_v45  ;;  %v5297_v45 = vunpack.c.h.s8.bf16 %v4049_v34  ;;  %v4177_v34 = vld [vmem:[%s12268_s12 + $0xa38] sm:$0xff] }
 0x640   : > { %7261 = vmatpush1.bf16.msra.mxu1 %v5038_v17  ;;  %v5294_v17 = vunpack.c.h.s8.bf16 %v4046_v2  ;;  %v4174_v2 = vld [vmem:[%s12268_s12 + $0xa20] sm:$0xff] }
 0x641   : > { %7425 = vmatpush1.bf16.msra.mxu0 %v5040_v27  ;;  %7262 = vmatprep.subr.bf16.mxu1 %v5071_v33  ;;  %v5296_v27 = vunpack.c.h.s8.bf16 %v4048_v4  ;;  %v5327_v33 = vunpack.c.l.s8.bf16 %v4079_v12  ;;  %v4176_v4 = vld [vmem:[%s12268_s12 + $0xa30] sm:$0xff] }
 0x642   : > { %7426 = vmatprep.subr.bf16.mxu0 %v5073_v25  ;;  %v5329_v25 = vunpack.c.l.s8.bf16 %v4081_v13 }
 0x644   : > { %7263 = vmatpush1.bf16.msra.mxu1 %v5070_v28  ;;  %v5326_v28 = vunpack.c.l.s8.bf16 %v4078_v24 }
 0x645   : > { %7427 = vmatpush1.bf16.msra.mxu0 %v5072_v18  ;;  %7264 = vmatprep.subr.bf16.mxu1 %v5103_v41  ;;  %v5328_v18 = vunpack.c.l.s8.bf16 %v4080_v26  ;;  %v5359_v41 = vunpack.c.h.s8.bf16 %v4079_v12  ;;  %v4207_v12 = vld [vmem:[%s12268_s12 + $0xb28] sm:$0xff] }
 0x646   : > { %7428 = vmatprep.subr.bf16.mxu0 %v5105_v9  ;;  %v5361_v9 = vunpack.c.h.s8.bf16 %v4081_v13  ;;  %v4209_v13 = vld [vmem:[%s12268_s12 + $0xb38] sm:$0xff] }
 0x648   : > { %7265 = vmatpush1.bf16.msra.mxu1 %v5102_v46  ;;  %v5358_v46 = vunpack.c.h.s8.bf16 %v4078_v24  ;;  %v4206_v24 = vld [vmem:[%s12268_s12 + $0xb20] sm:$0xff] }
 0x649   : > { %7429 = vmatpush1.bf16.msra.mxu0 %v5104_v29  ;;  %7266 = vmatprep.subr.bf16.mxu1 %v5135_v35  ;;  %v5360_v29 = vunpack.c.h.s8.bf16 %v4080_v26  ;;  %v5391_v35 = vunpack.c.l.s8.bf16 %v4111_v42  ;;  %v4208_v26 = vld [vmem:[%s12268_s12 + $0xb30] sm:$0xff] }
 0x64a   : > { %7430 = vmatprep.subr.bf16.mxu0 %v5137_v30  ;;  %v5393_v30 = vunpack.c.l.s8.bf16 %v4113_v16  ;;  %v4241_v16 = vld [vmem:[%s12268_s12 + $0xc38] sm:$0xff] }
 0x64c   : > { %7267 = vmatpush1.bf16.msra.mxu1 %v5134_v38  ;;  %v5390_v38 = vunpack.c.l.s8.bf16 %v4110_v8 }
 0x64d   : > { %7431 = vmatpush1.bf16.msra.mxu0 %v5136_v53  ;;  %7268 = vmatprep.subr.bf16.mxu1 %v5167_v40  ;;  %v5392_v53 = vunpack.c.l.s8.bf16 %v4112_v15  ;;  %v5423_v40 = vunpack.c.h.s8.bf16 %v4111_v42  ;;  %v4239_v42 = vld [vmem:[%s12268_s12 + $0xc28] sm:$0xff] }
 0x64e   : > { %7432 = vmatprep.subr.bf16.mxu0 %v5169_v0  ;;  %v4143_v0 = vld [vmem:[%s12268_s12 + $0x928] sm:$0xff] }
 0x650   : > { %7269 = vmatpush1.bf16.msra.mxu1 %v5166_v22  ;;  %v5422_v22 = vunpack.c.h.s8.bf16 %v4110_v8  ;;  %v4238_v8 = vld [vmem:[%s12268_s12 + $0xc20] sm:$0xff] }
 0x651   : > { %7433 = vmatpush1.bf16.msra.mxu0 %v5168_v63  ;;  %7270 = vmatprep.subr.bf16.mxu1 %v5199_v49  ;;  %v5424_v63 = vunpack.c.h.s8.bf16 %v4112_v15  ;;  %v5455_v49 = vunpack.c.l.s8.bf16 %v4143_v0  ;;  %v4240_v15 = vld [vmem:[%s12268_s12 + $0xc30] sm:$0xff] }
 0x652   : > { %7434 = vmatprep.subr.bf16.mxu0 %v5201_v61  ;;  %v5457_v61 = vunpack.c.l.s8.bf16 %v4145_v59 }
 0x654   : > { %7271 = vmatpush1.bf16.msra.mxu1 %v5198_v62  ;;  %v5454_v62 = vunpack.c.l.s8.bf16 %v4142_v57 }
 0x655   : > { %7435 = vmatpush1.bf16.msra.mxu0 %v5200_v1  ;;  %7272 = vmatprep.subr.bf16.mxu1 %v5231_v32  ;;  %v5456_v1 = vunpack.c.l.s8.bf16 %v4144_v44  ;;  %v5487_v32 = vunpack.c.h.s8.bf16 %v4143_v0  ;;  %v5681_v0 = vunpack.c.h.s8.bf16 %v4241_v16 }
 0x656   : > { %7436 = vmatprep.subr.bf16.mxu0 %v5233_v11  ;;  %v5489_v11 = vunpack.c.h.s8.bf16 %v4145_v59  ;;  %v4273_v59 = vld [vmem:[%s12268_s12 + $0xd38] sm:$0xff] }
 0x658   : > { %7273 = vmatpush1.bf16.msra.mxu1 %v5230_v20  ;;  %v5486_v20 = vunpack.c.h.s8.bf16 %v4142_v57  ;;  %v4270_v57 = vld [vmem:[%s12268_s12 + $0xd20] sm:$0xff] }
 0x659   : > { %7437 = vmatpush1.bf16.msra.mxu0 %v5232_v10  ;;  %7274 = vmatprep.subr.bf16.mxu1 %v5263_v43  ;;  %v5488_v10 = vunpack.c.h.s8.bf16 %v4144_v44  ;;  %v5519_v43 = vunpack.c.l.s8.bf16 %v4175_v36  ;;  %v4272_v44 = vld [vmem:[%s12268_s12 + $0xd30] sm:$0xff] }
 0x65a   : > { %7438 = vmatprep.subr.bf16.mxu0 %v5265_v3  ;;  %v5521_v3 = vunpack.c.l.s8.bf16 %v4177_v34 }
 0x65c   : > { %7275 = vmatpush1.bf16.msra.mxu1 %v5262_v47  ;;  %v5518_v47 = vunpack.c.l.s8.bf16 %v4174_v2 }
 0x65d   : > { %7439 = vmatpush1.bf16.msra.mxu0 %v5264_v6  ;;  %7276 = vmatprep.subr.bf16.mxu1 %v5295_v7  ;;  %v5520_v6 = vunpack.c.l.s8.bf16 %v4176_v4  ;;  %v5551_v7 = vunpack.c.h.s8.bf16 %v4175_v36  ;;  %v4303_v36 = vld [vmem:[%s12268_s12 + $0xe28] sm:$0xff] }
 0x65e   : > { %7440 = vmatprep.subr.bf16.mxu0 %v5297_v45  ;;  %v5553_v45 = vunpack.c.h.s8.bf16 %v4177_v34  ;;  %v4305_v34 = vld [vmem:[%s12268_s12 + $0xe38] sm:$0xff] }
 0x660   : > { %7277 = vmatpush1.bf16.msra.mxu1 %v5294_v17  ;;  %v5550_v17 = vunpack.c.h.s8.bf16 %v4174_v2  ;;  %v4302_v2 = vld [vmem:[%s12268_s12 + $0xe20] sm:$0xff] }
 0x661   : > { %7441 = vmatpush1.bf16.msra.mxu0 %v5296_v27  ;;  %7278 = vmatprep.subr.bf16.mxu1 %v5327_v33  ;;  %v5552_v27 = vunpack.c.h.s8.bf16 %v4176_v4  ;;  %v5583_v33 = vunpack.c.l.s8.bf16 %v4207_v12  ;;  %v4304_v4 = vld [vmem:[%s12268_s12 + $0xe30] sm:$0xff] }
 0x662   : > { %7442 = vmatprep.subr.bf16.mxu0 %v5329_v25  ;;  %v5585_v25 = vunpack.c.l.s8.bf16 %v4209_v13 }
 0x664   : > { %7279 = vmatpush1.bf16.msra.mxu1 %v5326_v28  ;;  %v5582_v28 = vunpack.c.l.s8.bf16 %v4206_v24 }
 0x665   : > { %7443 = vmatpush1.bf16.msra.mxu0 %v5328_v18  ;;  %7280 = vmatprep.subr.bf16.mxu1 %v5359_v41  ;;  %v5584_v18 = vunpack.c.l.s8.bf16 %v4208_v26  ;;  %v5615_v41 = vunpack.c.h.s8.bf16 %v4207_v12  ;;  %v4335_v12 = vld [vmem:[%s12268_s12 + $0xf28] sm:$0xff] }
 0x666   : > { %7444 = vmatprep.subr.bf16.mxu0 %v5361_v9  ;;  %v5617_v9 = vunpack.c.h.s8.bf16 %v4209_v13  ;;  %v4337_v13 = vld [vmem:[%s12268_s12 + $0xf38] sm:$0xff] }
 0x668   : > { %7281 = vmatpush1.bf16.msra.mxu1 %v5358_v46  ;;  %v5614_v46 = vunpack.c.h.s8.bf16 %v4206_v24  ;;  %v4334_v24 = vld [vmem:[%s12268_s12 + $0xf20] sm:$0xff] }
 0x669   : > { %7445 = vmatpush1.bf16.msra.mxu0 %v5360_v29  ;;  %7291 = vmatprep.subr.bf16.mxu1 %v5391_v35  ;;  %v5616_v29 = vunpack.c.h.s8.bf16 %v4208_v26  ;;  %v5647_v35 = vunpack.c.l.s8.bf16 %v4239_v42  ;;  %v4336_v26 = vld [vmem:[%s12268_s12 + $0xf30] sm:$0xff] }
 0x66a   : > { %7455 = vmatprep.subr.bf16.mxu0 %v5393_v30  ;;  %v5649_v30 = vunpack.c.l.s8.bf16 %v4241_v16  ;;  %v4369_v16 = vld [vmem:[%s12268_s12 + $0x1038] sm:$0xff] }
 0x66b   : > { %7283 = vmatmul.mubr.bf16.vlgmr.msra.gmra.mrb[16].mxu1 %v12462_v56 }
 0x66c   : > { %7447 = vmatmul.mubr.bf16.vlgmr.msra.gmra.mrb[20].mxu0 %v12462_v56  ;;  %7292 = vmatpush1.bf16.msra.mxu1 %v5390_v38  ;;  %v5646_v38 = vunpack.c.l.s8.bf16 %v4238_v8 }
 0x66d   : > { %7323 = vmatprep.mubr.bf16.mxu1 %v12470_v39  ;;  %7456 = vmatpush1.bf16.msra.mxu0 %v5392_v53  ;;  %v5648_v53 = vunpack.c.l.s8.bf16 %v4240_v15 }
 0x66e   : > { %7487 = vmatprep.mubr.bf16.mxu0 %v12470_v39  ;;  %7293 = vmatprep.subr.bf16.mxu1 %v5423_v40  ;;  %v5679_v40 = vunpack.c.h.s8.bf16 %v4239_v42  ;;  %v4367_v42 = vld [vmem:[%s12268_s12 + $0x1028] sm:$0xff] }
 0x66f   : > { %7457 = vmatprep.subr.bf16.mxu0 %v5425_v55  ;;  %v4271_v55 = vld [vmem:[%s12268_s12 + $0xd28] sm:$0xff] }
 0x670   : > { %7294 = vmatpush1.bf16.msra.mxu1 %v5422_v22  ;;  %v5678_v22 = vunpack.c.h.s8.bf16 %v4238_v8  ;;  %v4366_v8 = vld [vmem:[%s12268_s12 + $0x1020] sm:$0xff] }
 0x671   : > { %7458 = vmatpush1.bf16.msra.mxu0 %v5424_v63  ;;  %7295 = vmatprep.subr.bf16.mxu1 %v5455_v49  ;;  %v5680_v63 = vunpack.c.h.s8.bf16 %v4240_v15  ;;  %v5711_v49 = vunpack.c.l.s8.bf16 %v4271_v55  ;;  %v4368_v15 = vld [vmem:[%s12268_s12 + $0x1030] sm:$0xff] }
 0x672   : > { %7459 = vmatprep.subr.bf16.mxu0 %v5457_v61  ;;  %v5713_v61 = vunpack.c.l.s8.bf16 %v4273_v59 }
 0x674   : > { %7296 = vmatpush1.bf16.msra.mxu1 %v5454_v62  ;;  %v5710_v62 = vunpack.c.l.s8.bf16 %v4270_v57 }
 0x675   : > { %7460 = vmatpush1.bf16.msra.mxu0 %v5456_v1  ;;  %7297 = vmatprep.subr.bf16.mxu1 %v5487_v32  ;;  %v5712_v1 = vunpack.c.l.s8.bf16 %v4272_v44  ;;  %v5743_v32 = vunpack.c.h.s8.bf16 %v4271_v55  ;;  %v5937_v55 = vunpack.c.h.s8.bf16 %v4369_v16 }
 0x676   : > { %7461 = vmatprep.subr.bf16.mxu0 %v5489_v11  ;;  %v5745_v11 = vunpack.c.h.s8.bf16 %v4273_v59  ;;  %v4401_v59 = vld [vmem:[%s12268_s12 + $0x1138] sm:$0xff] }
 0x678   : > { %7298 = vmatpush1.bf16.msra.mxu1 %v5486_v20  ;;  %v5742_v20 = vunpack.c.h.s8.bf16 %v4270_v57  ;;  %v4398_v57 = vld [vmem:[%s12268_s12 + $0x1120] sm:$0xff] }
 0x679   : > { %7462 = vmatpush1.bf16.msra.mxu0 %v5488_v10  ;;  %7299 = vmatprep.subr.bf16.mxu1 %v5519_v43  ;;  %v5744_v10 = vunpack.c.h.s8.bf16 %v4272_v44  ;;  %v5775_v43 = vunpack.c.l.s8.bf16 %v4303_v36  ;;  %v4400_v44 = vld [vmem:[%s12268_s12 + $0x1130] sm:$0xff] }
 0x67a   : > { %7463 = vmatprep.subr.bf16.mxu0 %v5521_v3  ;;  %v5777_v3 = vunpack.c.l.s8.bf16 %v4305_v34 }
 0x67c   : > { %7300 = vmatpush1.bf16.msra.mxu1 %v5518_v47  ;;  %v5774_v47 = vunpack.c.l.s8.bf16 %v4302_v2 }
 0x67d   : > { %7464 = vmatpush1.bf16.msra.mxu0 %v5520_v6  ;;  %7301 = vmatprep.subr.bf16.mxu1 %v5551_v7  ;;  %v5776_v6 = vunpack.c.l.s8.bf16 %v4304_v4  ;;  %v5807_v7 = vunpack.c.h.s8.bf16 %v4303_v36  ;;  %v4431_v36 = vld [vmem:[%s12268_s12 + $0x1228] sm:$0xff] }
 0x67e   : > { %7465 = vmatprep.subr.bf16.mxu0 %v5553_v45  ;;  %v5809_v45 = vunpack.c.h.s8.bf16 %v4305_v34  ;;  %v4433_v34 = vld [vmem:[%s12268_s12 + $0x1238] sm:$0xff] }
 0x680   : > { %7302 = vmatpush1.bf16.msra.mxu1 %v5550_v17  ;;  %v5806_v17 = vunpack.c.h.s8.bf16 %v4302_v2  ;;  %v4430_v2 = vld [vmem:[%s12268_s12 + $0x1220] sm:$0xff] }
 0x681   : > { %7466 = vmatpush1.bf16.msra.mxu0 %v5552_v27  ;;  %7303 = vmatprep.subr.bf16.mxu1 %v5583_v33  ;;  %v5808_v27 = vunpack.c.h.s8.bf16 %v4304_v4  ;;  %v5839_v33 = vunpack.c.l.s8.bf16 %v4335_v12  ;;  %v4432_v4 = vld [vmem:[%s12268_s12 + $0x1230] sm:$0xff] }
 0x682   : > { %7467 = vmatprep.subr.bf16.mxu0 %v5585_v25  ;;  %v5841_v25 = vunpack.c.l.s8.bf16 %v4337_v13 }
 0x684   : > { %7304 = vmatpush1.bf16.msra.mxu1 %v5582_v28  ;;  %v5838_v28 = vunpack.c.l.s8.bf16 %v4334_v24 }
 0x685   : > { %7468 = vmatpush1.bf16.msra.mxu0 %v5584_v18  ;;  %7305 = vmatprep.subr.bf16.mxu1 %v5615_v41  ;;  %v5840_v18 = vunpack.c.l.s8.bf16 %v4336_v26  ;;  %v5871_v41 = vunpack.c.h.s8.bf16 %v4335_v12  ;;  %v4463_v12 = vld [vmem:[%s12268_s12 + $0x1328] sm:$0xff] }
 0x686   : > { %7469 = vmatprep.subr.bf16.mxu0 %v5617_v9  ;;  %v5873_v9 = vunpack.c.h.s8.bf16 %v4337_v13  ;;  %v4465_v13 = vld [vmem:[%s12268_s12 + $0x1338] sm:$0xff] }
 0x688   : > { %7306 = vmatpush1.bf16.msra.mxu1 %v5614_v46  ;;  %v5870_v46 = vunpack.c.h.s8.bf16 %v4334_v24  ;;  %v4462_v24 = vld [vmem:[%s12268_s12 + $0x1320] sm:$0xff] }
 0x689   : > { %7470 = vmatpush1.bf16.msra.mxu0 %v5616_v29  ;;  %7307 = vmatprep.subr.bf16.mxu1 %v5647_v35  ;;  %v5872_v29 = vunpack.c.h.s8.bf16 %v4336_v26  ;;  %v5903_v35 = vunpack.c.l.s8.bf16 %v4367_v42  ;;  %v4464_v26 = vld [vmem:[%s12268_s12 + $0x1330] sm:$0xff] }
 0x68a   : > { %7471 = vmatprep.subr.bf16.mxu0 %v5649_v30  ;;  %v5905_v30 = vunpack.c.l.s8.bf16 %v4369_v16  ;;  %v4497_v16 = vld [vmem:[%s12268_s12 + $0x1438] sm:$0xff] }
 0x68c   : > { %7308 = vmatpush1.bf16.msra.mxu1 %v5646_v38  ;;  %v5902_v38 = vunpack.c.l.s8.bf16 %v4366_v8 }
 0x68d   : > { %7472 = vmatpush1.bf16.msra.mxu0 %v5648_v53  ;;  %7309 = vmatprep.subr.bf16.mxu1 %v5679_v40  ;;  %v5904_v53 = vunpack.c.l.s8.bf16 %v4368_v15  ;;  %v5935_v40 = vunpack.c.h.s8.bf16 %v4367_v42  ;;  %v4495_v42 = vld [vmem:[%s12268_s12 + $0x1428] sm:$0xff] }
 0x68e   : > { %7473 = vmatprep.subr.bf16.mxu0 %v5681_v0  ;;  %v4399_v0 = vld [vmem:[%s12268_s12 + $0x1128] sm:$0xff] }
 0x690   : > { %7310 = vmatpush1.bf16.msra.mxu1 %v5678_v22  ;;  %v5934_v22 = vunpack.c.h.s8.bf16 %v4366_v8  ;;  %v4494_v8 = vld [vmem:[%s12268_s12 + $0x1420] sm:$0xff] }
 0x691   : > { %7474 = vmatpush1.bf16.msra.mxu0 %v5680_v63  ;;  %7311 = vmatprep.subr.bf16.mxu1 %v5711_v49  ;;  %v5936_v63 = vunpack.c.h.s8.bf16 %v4368_v15  ;;  %v5967_v49 = vunpack.c.l.s8.bf16 %v4399_v0  ;;  %v4496_v15 = vld [vmem:[%s12268_s12 + $0x1430] sm:$0xff] }
 0x692   : > { %7475 = vmatprep.subr.bf16.mxu0 %v5713_v61  ;;  %v5969_v61 = vunpack.c.l.s8.bf16 %v4401_v59 }
 0x694   : > { %7312 = vmatpush1.bf16.msra.mxu1 %v5710_v62  ;;  %v5966_v62 = vunpack.c.l.s8.bf16 %v4398_v57 }
 0x695   : > { %7476 = vmatpush1.bf16.msra.mxu0 %v5712_v1  ;;  %7313 = vmatprep.subr.bf16.mxu1 %v5743_v32  ;;  %v5968_v1 = vunpack.c.l.s8.bf16 %v4400_v44  ;;  %v5999_v32 = vunpack.c.h.s8.bf16 %v4399_v0  ;;  %v6193_v0 = vunpack.c.h.s8.bf16 %v4497_v16 }
 0x696   : > { %7477 = vmatprep.subr.bf16.mxu0 %v5745_v11  ;;  %v6001_v11 = vunpack.c.h.s8.bf16 %v4401_v59  ;;  %v4529_v59 = vld [vmem:[%s12268_s12 + $0x1538] sm:$0xff] }
 0x698   : > { %7314 = vmatpush1.bf16.msra.mxu1 %v5742_v20  ;;  %v5998_v20 = vunpack.c.h.s8.bf16 %v4398_v57  ;;  %v4526_v57 = vld [vmem:[%s12268_s12 + $0x1520] sm:$0xff] }
 0x699   : > { %7478 = vmatpush1.bf16.msra.mxu0 %v5744_v10  ;;  %7315 = vmatprep.subr.bf16.mxu1 %v5775_v43  ;;  %v6000_v10 = vunpack.c.h.s8.bf16 %v4400_v44  ;;  %v6031_v43 = vunpack.c.l.s8.bf16 %v4431_v36  ;;  %v4528_v44 = vld [vmem:[%s12268_s12 + $0x1530] sm:$0xff] }
 0x69a   : > { %7479 = vmatprep.subr.bf16.mxu0 %v5777_v3  ;;  %v6033_v3 = vunpack.c.l.s8.bf16 %v4433_v34 }
 0x69c   : > { %7316 = vmatpush1.bf16.msra.mxu1 %v5774_v47  ;;  %v6030_v47 = vunpack.c.l.s8.bf16 %v4430_v2 }
 0x69d   : > { %7480 = vmatpush1.bf16.msra.mxu0 %v5776_v6  ;;  %7317 = vmatprep.subr.bf16.mxu1 %v5807_v7  ;;  %v6032_v6 = vunpack.c.l.s8.bf16 %v4432_v4  ;;  %v6063_v7 = vunpack.c.h.s8.bf16 %v4431_v36  ;;  %v4559_v36 = vld [vmem:[%s12268_s12 + $0x1628] sm:$0xff] }
 0x69e   : > { %7481 = vmatprep.subr.bf16.mxu0 %v5809_v45  ;;  %v6065_v45 = vunpack.c.h.s8.bf16 %v4433_v34  ;;  %v4561_v34 = vld [vmem:[%s12268_s12 + $0x1638] sm:$0xff] }
 0x6a0   : > { %7318 = vmatpush1.bf16.msra.mxu1 %v5806_v17  ;;  %v6062_v17 = vunpack.c.h.s8.bf16 %v4430_v2  ;;  %v4558_v2 = vld [vmem:[%s12268_s12 + $0x1620] sm:$0xff] }
 0x6a1   : > { %7482 = vmatpush1.bf16.msra.mxu0 %v5808_v27  ;;  %7319 = vmatprep.subr.bf16.mxu1 %v5839_v33  ;;  %v6064_v27 = vunpack.c.h.s8.bf16 %v4432_v4  ;;  %v6095_v33 = vunpack.c.l.s8.bf16 %v4463_v12  ;;  %v4560_v4 = vld [vmem:[%s12268_s12 + $0x1630] sm:$0xff] }
 0x6a2   : > { %7483 = vmatprep.subr.bf16.mxu0 %v5841_v25  ;;  %v6097_v25 = vunpack.c.l.s8.bf16 %v4465_v13 }
 0x6a4   : > { %7320 = vmatpush1.bf16.msra.mxu1 %v5838_v28  ;;  %v6094_v28 = vunpack.c.l.s8.bf16 %v4462_v24 }
 0x6a5   : > { %7484 = vmatpush1.bf16.msra.mxu0 %v5840_v18  ;;  %7321 = vmatprep.subr.bf16.mxu1 %v5871_v41  ;;  %v6096_v18 = vunpack.c.l.s8.bf16 %v4464_v26  ;;  %v6127_v41 = vunpack.c.h.s8.bf16 %v4463_v12  ;;  %v4591_v12 = vld [vmem:[%s12268_s12 + $0x1728] sm:$0xff] }
 0x6a6   : > { %7485 = vmatprep.subr.bf16.mxu0 %v5873_v9  ;;  %v6129_v9 = vunpack.c.h.s8.bf16 %v4465_v13  ;;  %v4593_v13 = vld [vmem:[%s12268_s12 + $0x1738] sm:$0xff] }
 0x6a8   : > { %7322 = vmatpush1.bf16.msra.mxu1 %v5870_v46  ;;  %v6126_v46 = vunpack.c.h.s8.bf16 %v4462_v24  ;;  %v4590_v24 = vld [vmem:[%s12268_s12 + $0x1720] sm:$0xff] }
 0x6a9   : > { %7486 = vmatpush1.bf16.msra.mxu0 %v5872_v29  ;;  %7332 = vmatprep.subr.bf16.mxu1 %v5903_v35  ;;  %v6128_v29 = vunpack.c.h.s8.bf16 %v4464_v26  ;;  %v6159_v35 = vunpack.c.l.s8.bf16 %v4495_v42  ;;  %v4592_v26 = vld [vmem:[%s12268_s12 + $0x1730] sm:$0xff] }
 0x6aa   : > { %7496 = vmatprep.subr.bf16.mxu0 %v5905_v30  ;;  %v6161_v30 = vunpack.c.l.s8.bf16 %v4497_v16  ;;  %v4625_v16 = vld [vmem:[%s12268_s12 + $0x1838] sm:$0xff] }
 0x6ab   : > { %7324 = vmatmul.mubr.bf16.vlgmr.msra.gmra.mrb[16].mxu1 %v12526_v5 }
 0x6ac   : > { %7488 = vmatmul.mubr.bf16.vlgmr.msra.gmra.mrb[20].mxu0 %v12526_v5  ;;  %7333 = vmatpush1.bf16.msra.mxu1 %v5902_v38  ;;  %v6158_v38 = vunpack.c.l.s8.bf16 %v4494_v8 }
 0x6ad   : > { %7364 = vmatprep.mubr.bf16.mxu1 %v12626_v14  ;;  %7497 = vmatpush1.bf16.msra.mxu0 %v5904_v53  ;;  %v6160_v53 = vunpack.c.l.s8.bf16 %v4496_v15 }
 0x6ae   : > { %7528 = vmatprep.mubr.bf16.mxu0 %v12626_v14  ;;  %7334 = vmatprep.subr.bf16.mxu1 %v5935_v40  ;;  %v6191_v40 = vunpack.c.h.s8.bf16 %v4495_v42  ;;  %v4623_v42 = vld [vmem:[%s12268_s12 + $0x1828] sm:$0xff] }
 0x6af   : > { %7498 = vmatprep.subr.bf16.mxu0 %v5937_v55  ;;  %v4527_v55 = vld [vmem:[%s12268_s12 + $0x1528] sm:$0xff] }
 0x6b0   : > { %7335 = vmatpush1.bf16.msra.mxu1 %v5934_v22  ;;  %v6190_v22 = vunpack.c.h.s8.bf16 %v4494_v8  ;;  %v4622_v8 = vld [vmem:[%s12268_s12 + $0x1820] sm:$0xff] }
 0x6b1   : > { %7499 = vmatpush1.bf16.msra.mxu0 %v5936_v63  ;;  %7336 = vmatprep.subr.bf16.mxu1 %v5967_v49  ;;  %v6192_v63 = vunpack.c.h.s8.bf16 %v4496_v15  ;;  %v6223_v49 = vunpack.c.l.s8.bf16 %v4527_v55  ;;  %v4624_v15 = vld [vmem:[%s12268_s12 + $0x1830] sm:$0xff] }
 0x6b2   : > { %7500 = vmatprep.subr.bf16.mxu0 %v5969_v61  ;;  %v6225_v61 = vunpack.c.l.s8.bf16 %v4529_v59 }
 0x6b4   : > { %7337 = vmatpush1.bf16.msra.mxu1 %v5966_v62  ;;  %v6222_v62 = vunpack.c.l.s8.bf16 %v4526_v57 }
 0x6b5   : > { %7501 = vmatpush1.bf16.msra.mxu0 %v5968_v1  ;;  %7338 = vmatprep.subr.bf16.mxu1 %v5999_v32  ;;  %v6224_v1 = vunpack.c.l.s8.bf16 %v4528_v44  ;;  %v6255_v32 = vunpack.c.h.s8.bf16 %v4527_v55  ;;  %v6449_v55 = vunpack.c.h.s8.bf16 %v4625_v16 }
 0x6b6   : > { %7502 = vmatprep.subr.bf16.mxu0 %v6001_v11  ;;  %v6257_v11 = vunpack.c.h.s8.bf16 %v4529_v59  ;;  %v4657_v59 = vld [vmem:[%s12268_s12 + $0x1938] sm:$0xff] }
 0x6b8   : > { %7339 = vmatpush1.bf16.msra.mxu1 %v5998_v20  ;;  %v6254_v20 = vunpack.c.h.s8.bf16 %v4526_v57  ;;  %v4654_v57 = vld [vmem:[%s12268_s12 + $0x1920] sm:$0xff] }
 0x6b9   : > { %7503 = vmatpush1.bf16.msra.mxu0 %v6000_v10  ;;  %7340 = vmatprep.subr.bf16.mxu1 %v6031_v43  ;;  %v6256_v10 = vunpack.c.h.s8.bf16 %v4528_v44  ;;  %v6287_v43 = vunpack.c.l.s8.bf16 %v4559_v36  ;;  %v4656_v44 = vld [vmem:[%s12268_s12 + $0x1930] sm:$0xff] }
 0x6ba   : > { %7504 = vmatprep.subr.bf16.mxu0 %v6033_v3  ;;  %v6289_v3 = vunpack.c.l.s8.bf16 %v4561_v34 }
 0x6bc   : > { %7341 = vmatpush1.bf16.msra.mxu1 %v6030_v47  ;;  %v6286_v47 = vunpack.c.l.s8.bf16 %v4558_v2 }
 0x6bd   : > { %7505 = vmatpush1.bf16.msra.mxu0 %v6032_v6  ;;  %7342 = vmatprep.subr.bf16.mxu1 %v6063_v7  ;;  %v6288_v6 = vunpack.c.l.s8.bf16 %v4560_v4  ;;  %v6319_v7 = vunpack.c.h.s8.bf16 %v4559_v36  ;;  %v4687_v36 = vld [vmem:[%s12268_s12 + $0x1a28] sm:$0xff] }
 0x6be   : > { %7506 = vmatprep.subr.bf16.mxu0 %v6065_v45  ;;  %v6321_v45 = vunpack.c.h.s8.bf16 %v4561_v34  ;;  %v4689_v34 = vld [vmem:[%s12268_s12 + $0x1a38] sm:$0xff] }
 0x6c0   : > { %7343 = vmatpush1.bf16.msra.mxu1 %v6062_v17  ;;  %v6318_v17 = vunpack.c.h.s8.bf16 %v4558_v2  ;;  %v4686_v2 = vld [vmem:[%s12268_s12 + $0x1a20] sm:$0xff] }
 0x6c1   : > { %7507 = vmatpush1.bf16.msra.mxu0 %v6064_v27  ;;  %7344 = vmatprep.subr.bf16.mxu1 %v6095_v33  ;;  %v6320_v27 = vunpack.c.h.s8.bf16 %v4560_v4  ;;  %v6351_v33 = vunpack.c.l.s8.bf16 %v4591_v12  ;;  %v4688_v4 = vld [vmem:[%s12268_s12 + $0x1a30] sm:$0xff] }
 0x6c2   : > { %7508 = vmatprep.subr.bf16.mxu0 %v6097_v25  ;;  %v6353_v25 = vunpack.c.l.s8.bf16 %v4593_v13 }
 0x6c4   : > { %7345 = vmatpush1.bf16.msra.mxu1 %v6094_v28  ;;  %v6350_v28 = vunpack.c.l.s8.bf16 %v4590_v24 }
 0x6c5   : > { %7509 = vmatpush1.bf16.msra.mxu0 %v6096_v18  ;;  %7346 = vmatprep.subr.bf16.mxu1 %v6127_v41  ;;  %v6352_v18 = vunpack.c.l.s8.bf16 %v4592_v26  ;;  %v6383_v41 = vunpack.c.h.s8.bf16 %v4591_v12  ;;  %v9746_v12 = vld [vmem:[%s12800_s21] sm:$0xff] }
 0x6c6   : > { %7510 = vmatprep.subr.bf16.mxu0 %v6129_v9  ;;  %v6385_v9 = vunpack.c.h.s8.bf16 %v4593_v13  ;;  %v6577_v13 = vunpack.c.h.s8.bf16 %v4689_v34 }
 0x6c8   : > { %7347 = vmatpush1.bf16.msra.mxu1 %v6126_v46  ;;  %v6382_v46 = vunpack.c.h.s8.bf16 %v4590_v24  ;;  %v4721_v24 = vld [vmem:[%s12268_s12 + $0x1b38] sm:$0xff] }
 0x6c9   : > { %7511 = vmatpush1.bf16.msra.mxu0 %v6128_v29  ;;  %7348 = vmatprep.subr.bf16.mxu1 %v6159_v35  ;;  %v6384_v29 = vunpack.c.h.s8.bf16 %v4592_v26  ;;  %v6415_v35 = vunpack.c.l.s8.bf16 %v4623_v42 }
 0x6ca   : > { %7512 = vmatprep.subr.bf16.mxu0 %v6161_v30  ;;  %v6417_v30 = vunpack.c.l.s8.bf16 %v4625_v16  ;;  %v4718_v16 = vld [vmem:[%s12268_s12 + $0x1b20] sm:$0xff] }
 0x6cc   : > { %7349 = vmatpush1.bf16.msra.mxu1 %v6158_v38  ;;  %v6414_v38 = vunpack.c.l.s8.bf16 %v4622_v8 }
 0x6cd   : > { %7513 = vmatpush1.bf16.msra.mxu0 %v6160_v53  ;;  %7350 = vmatprep.subr.bf16.mxu1 %v6191_v40  ;;  %v6416_v53 = vunpack.c.l.s8.bf16 %v4624_v15  ;;  %v6447_v40 = vunpack.c.h.s8.bf16 %v4623_v42 }
 0x6ce   : > { %7514 = vmatprep.subr.bf16.mxu0 %v6193_v0  ;;  %v4655_v0 = vld [vmem:[%s12268_s12 + $0x1928] sm:$0xff] }
 0x6d0   : > { %7351 = vmatpush1.bf16.msra.mxu1 %v6190_v22  ;;  %v6446_v22 = vunpack.c.h.s8.bf16 %v4622_v8  ;;  %v9769_v8 = vrot.slane %v9746_v12, %v12318_v50 }
 0x6d1   : > { %7515 = vmatpush1.bf16.msra.mxu0 %v6192_v63  ;;  %7352 = vmatprep.subr.bf16.mxu1 %v6223_v49  ;;  %v6448_v63 = vunpack.c.h.s8.bf16 %v4624_v15  ;;  %v6479_v49 = vunpack.c.l.s8.bf16 %v4655_v0  ;;  %v4720_v15 = vld [vmem:[%s12268_s12 + $0x1b30] sm:$0xff] }
 0x6d2   : > { %7516 = vmatprep.subr.bf16.mxu0 %v6225_v61  ;;  %v6481_v61 = vunpack.c.l.s8.bf16 %v4657_v59 }
 0x6d4   : > { %7353 = vmatpush1.bf16.msra.mxu1 %v6222_v62  ;;  %v6478_v62 = vunpack.c.l.s8.bf16 %v4654_v57 }
 0x6d5   : > { %7517 = vmatpush1.bf16.msra.mxu0 %v6224_v1  ;;  %7354 = vmatprep.subr.bf16.mxu1 %v6255_v32  ;;  %v6480_v1 = vunpack.c.l.s8.bf16 %v4656_v44  ;;  %v6511_v32 = vunpack.c.h.s8.bf16 %v4655_v0 }
 0x6d6   : > { %7518 = vmatprep.subr.bf16.mxu0 %v6257_v11  ;;  %v6513_v11 = vunpack.c.h.s8.bf16 %v4657_v59 }
 0x6d8   : > { %7355 = vmatpush1.bf16.msra.mxu1 %v6254_v20  ;;  %v6510_v20 = vunpack.c.h.s8.bf16 %v4654_v57 }
 0x6d9   : > { %7519 = vmatpush1.bf16.msra.mxu0 %v6256_v10  ;;  %7356 = vmatprep.subr.bf16.mxu1 %v6287_v43  ;;  %v6512_v10 = vunpack.c.h.s8.bf16 %v4656_v44  ;;  %v6543_v43 = vunpack.c.l.s8.bf16 %v4687_v36 }
 0x6da   : > { %7520 = vmatprep.subr.bf16.mxu0 %v6289_v3  ;;  %v6545_v3 = vunpack.c.l.s8.bf16 %v4689_v34  ;;  %v6641_v34 = vunpack.c.h.s8.bf16 %v4721_v24 }
 0x6dc   : > { %7357 = vmatpush1.bf16.msra.mxu1 %v6286_v47  ;;  %v6542_v47 = vunpack.c.l.s8.bf16 %v4686_v2 }
 0x6dd   : > { %7521 = vmatpush1.bf16.msra.mxu0 %v6288_v6  ;;  %7358 = vmatprep.subr.bf16.mxu1 %v6319_v7  ;;  %v9546_v6 = vld [vmem:[%s12797_s24] sm:$0xff]  ;;  %v6544_v7 = vunpack.c.l.s8.bf16 %v4688_v4 }
 0x6de   : > { %7522 = vmatprep.subr.bf16.mxu0 %v6321_v45  ;;  %v6575_v45 = vunpack.c.h.s8.bf16 %v4687_v36  ;;  %v9569_v26 = vrot.slane %v9546_v6, %v12318_v50 }
 0x6e0   : > { %7359 = vmatpush1.bf16.msra.mxu1 %v6318_v17  ;;  %v4719_v17 = vld [vmem:[%s12268_s12 + $0x1b28] sm:$0xff] }
 0x6e1   : > { %7523 = vmatpush1.bf16.msra.mxu0 %v6320_v27  ;;  %7360 = vmatprep.subr.bf16.mxu1 %v6351_v33  ;;  %v9557_v27 = vrot.slane %v9546_v6, %v12280_v21  ;;  %v9565_v33 = vrot.slane %v9546_v6, %v12315_v48  ;;  %v6607_v42 = vunpack.c.l.s8.bf16 %v4719_v17 }
 0x6e2   : > { %7524 = vmatprep.subr.bf16.mxu0 %v6353_v25  ;;  %v9561_v25 = vrot.slane %v9546_v6, %v12283_v23  ;;  %v4752_v6 = vld [vmem:[%s12268_s12 + $0x1c30] sm:$0xff] }
 0x6e4   : > { %7361 = vmatpush1.bf16.msra.mxu1 %v6350_v28  ;;  %v6574_v28 = vunpack.c.h.s8.bf16 %v4686_v2  ;;  %v6640_v2 = vunpack.c.h.s8.bf16 %v4720_v15 }
 0x6e5   : > { %7525 = vmatpush1.bf16.msra.mxu0 %v6352_v18  ;;  %7362 = vmatprep.subr.bf16.mxu1 %v6383_v41  ;;  %v9757_v18 = vrot.slane %v9746_v12, %v12280_v21  ;;  %v9765_v41 = vrot.slane %v9746_v12, %v12315_v48 }
 0x6e6   : > { %7526 = vmatprep.subr.bf16.mxu0 %v6385_v9  ;;  %v6576_v9 = vunpack.c.h.s8.bf16 %v4688_v4  ;;  %v4750_v4 = vld [vmem:[%s12268_s12 + $0x1c20] sm:$0xff] }
 0x6e8   : > { %7363 = vmatpush1.bf16.msra.mxu1 %v6382_v46 }
 0x6e9   : > { %7527 = vmatpush1.bf16.msra.mxu0 %v6384_v29  ;;  %7373 = vmatprep.subr.bf16.mxu1 %v6415_v35  ;;  %v9761_v35 = vrot.slane %v9746_v12, %v12283_v23 }
 0x6ea   : > { %7537 = vmatprep.subr.bf16.mxu0 %v6417_v30  ;;  %v6609_v30 = vunpack.c.l.s8.bf16 %v4721_v24 }
 0x6eb   : > { %7365 = vmatmul.mubr.bf16.vlgmr.msra.gmra.mrb[16].mxu1 %v12628_v19 }
 0x6ec   : > { %7529 = vmatmul.mubr.bf16.vlgmr.msra.gmra.mrb[20].mxu0 %v12628_v19  ;;  %7374 = vmatpush1.bf16.msra.mxu1 %v6414_v38 }
 0x6ed   : > { %7405 = vmatprep.mubr.bf16.mxu1 %v12634_v31  ;;  %7538 = vmatpush1.bf16.msra.mxu0 %v6416_v53 }
 0x6ee   : > { %7569 = vmatprep.mubr.bf16.mxu0 %v12634_v31  ;;  %7375 = vmatprep.subr.bf16.mxu1 %v6447_v40 }
 0x6ef   : > { %7539 = vmatprep.subr.bf16.mxu0 %v6449_v55 }
 0x6f0   : > { %7376 = vmatpush1.bf16.msra.mxu1 %v6446_v22 }
 0x6f1   : > { %7540 = vmatpush1.bf16.msra.mxu0 %v6448_v63  ;;  %7377 = vmatprep.subr.bf16.mxu1 %v6479_v49  ;;  %v6606_v49 = vunpack.c.l.s8.bf16 %v4718_v16 }
 0x6f2   : > { %7541 = vmatprep.subr.bf16.mxu0 %v6481_v61 }
 0x6f4   : > { %7378 = vmatpush1.bf16.msra.mxu1 %v6478_v62 }
 0x6f5   : > { %7542 = vmatpush1.bf16.msra.mxu0 %v6480_v1  ;;  %7379 = vmatprep.subr.bf16.mxu1 %v6511_v32  ;;  %v6608_v1 = vunpack.c.l.s8.bf16 %v4720_v15  ;;  %v6639_v32 = vunpack.c.h.s8.bf16 %v4719_v17  ;;  %v4783_v17 = vld [vmem:[%s12268_s12 + $0x1d28] sm:$0xff]  ;;  %v4817_v15 = vld [vmem:[%s12268_s12 + $0x1e38] sm:$0xff] }
 0x6f6   : > { %7543 = vmatprep.subr.bf16.mxu0 %v6513_v11 }
 0x6f8   : > { %7380 = vmatpush1.bf16.msra.mxu1 %v6510_v20  ;;  %v4751_v20 = vld [vmem:[%s12268_s12 + $0x1c28] sm:$0xff] }
 0x6f9   : > { %7544 = vmatpush1.bf16.msra.mxu0 %v6512_v10  ;;  %7381 = vmatprep.subr.bf16.mxu1 %v6543_v43  ;;  %v4753_v10 = vld [vmem:[%s12268_s12 + $0x1c38] sm:$0xff]  ;;  %v6638_v43 = vunpack.c.h.s8.bf16 %v4718_v16  ;;  %v6703_v12 = vunpack.c.h.s8.bf16 %v4751_v20 }
 0x6fa   : > { %7545 = vmatprep.subr.bf16.mxu0 %v6545_v3  ;;  %v6671_v3 = vunpack.c.l.s8.bf16 %v4751_v20 }
 0x6fc   : > { %7382 = vmatpush1.bf16.msra.mxu1 %v6542_v47  ;;  %v6673_v47 = vunpack.c.l.s8.bf16 %v4753_v10 }
 0x6fd   : > { %7546 = vmatpush1.bf16.msra.mxu0 %v6544_v7  ;;  %7383 = vmatprep.subr.bf16.mxu1 %v6575_v45  ;;  %v6670_v7 = vunpack.c.l.s8.bf16 %v4750_v4  ;;  %v6672_v45 = vunpack.c.l.s8.bf16 %v4752_v6 }
 0x6fe   : > { %v7079_v46 = vpop.f32.mrb[12].mxu1  ;;  %v7243_v29 = vpop.f32.mrb[16].mxu0  ;;  %7547 = vmatprep.subr.bf16.mxu0 %v6577_v13  ;;  %v6705_v13 = vunpack.c.h.s8.bf16 %v4753_v10 }
 0x6ff   : > { %v9714_v38 = vmul.f32 %v9557_v27, %v7079_v46  ;;  %v9716_v53 = vmul.f32 %v9565_v33, %v7243_v29  ;;  %v7081_v40 = vpop.f32.mrb[13].mxu1  ;;  %v7245_v0 = vpop.f32.mrb[17].mxu0  ;;  %v4785_v27 = vld [vmem:[%s12268_s12 + $0x1d38] sm:$0xff]  ;;  %v6702_v33 = vunpack.c.h.s8.bf16 %v4750_v4 }
 0x700   : > { %v9715_v55 = vmul.f32 %v9561_v25, %v7081_v40  ;;  %v9717_v59 = vmul.f32 %v9569_v26, %v7245_v0  ;;  %v7083_v22 = vpop.f32.mrb[14].mxu1  ;;  %v7247_v63 = vpop.f32.mrb[18].mxu0  ;;  %7384 = vmatpush1.bf16.msra.mxu1 %v6574_v28  ;;  %v6704_v25 = vunpack.c.h.s8.bf16 %v4752_v6  ;;  %v6735_v26 = vunpack.c.l.s8.bf16 %v4783_v17  ;;  %v4782_v28 = vld [vmem:[%s12268_s12 + $0x1d20] sm:$0xff]  ;;  %v3861_v4 = vld [vmem:[%s12268_s12 + $0x58] sm:$0xff] }
 0x701   : > { %v9914_v57 = vadd.f32 %v9757_v18, %v9714_v38  ;;  %v9916_v61 = vadd.f32 %v9765_v41, %v9716_v53  ;;  %7548 = vmatpush1.bf16.msra.mxu0 %v6576_v9  ;;  %v7084_v44 = vpop.f32.mrb[15].mxu1  ;;  %v7248_v62 = vpop.f32.mrb[19].mxu0  ;;  %7385 = vmatprep.subr.bf16.mxu1 %v6607_v42  ;;  %v6737_v41 = vunpack.c.l.s8.bf16 %v4785_v27  ;;  %v4784_v9 = vld [vmem:[%s12268_s12 + $0x1d30] sm:$0xff]  ;;  %v6734_v46 = vunpack.c.l.s8.bf16 %v4782_v28  ;;  %v4814_v0 = vld [vmem:[%s12268_s12 + $0x1e20] sm:$0xff] }
 0x702   : > { %v9915_v11 = vadd.f32 %v9761_v35, %v9715_v55  ;;  %v9917_v36 = vadd.f32 %v9769_v8, %v9717_v59  ;;  %7549 = vmatprep.subr.bf16.mxu0 %v6609_v30  ;;  %v6736_v29 = vunpack.c.l.s8.bf16 %v4784_v9  ;;  %v6767_v35 = vunpack.c.h.s8.bf16 %v4783_v17  ;;  %v4815_v30 = vld [vmem:[%s12268_s12 + $0x1e28] sm:$0xff]  ;;  %v4816_v59 = vld [vmem:[%s12268_s12 + $0x1e30] sm:$0xff]  ;;  %v4849_v44 = vld [vmem:[%s12268_s12 + $0x1f38] sm:$0xff] }
 0x703   : > { %11159 = vtanh.f32 %v9914_v57  ;;  %v6769_v8 = vunpack.c.h.s8.bf16 %v4785_v27  ;;  %v6766_v38 = vunpack.c.h.s8.bf16 %v4782_v28  ;;  %v6768_v53 = vunpack.c.h.s8.bf16 %v4784_v9  ;;  %v3890_v9 = vld [vmem:[%s12268_s12 + $0x140] sm:$0xff] }
 0x704   : > { %11161 = vtanh.f32 %v9916_v61  ;;  %7386 = vmatpush1.bf16.msra.mxu1 %v6606_v49  ;;  %v6799_v40 = vunpack.c.l.s8.bf16 %v4815_v30  ;;  %v6801_v55 = vunpack.c.l.s8.bf16 %v4817_v15  ;;  %v6798_v22 = vunpack.c.l.s8.bf16 %v4814_v0  ;;  %v4847_v61 = vld [vmem:[%s12268_s12 + $0x1f28] sm:$0xff] }
 0x705   : > { %11163 = vtanh.f32 %v9915_v11  ;;  %7550 = vmatpush1.bf16.msra.mxu0 %v6608_v1  ;;  %7387 = vmatprep.subr.bf16.mxu1 %v6639_v32  ;;  %v6800_v63 = vunpack.c.l.s8.bf16 %v4816_v59  ;;  %v6831_v49 = vunpack.c.h.s8.bf16 %v4815_v30  ;;  %v6833_v57 = vunpack.c.h.s8.bf16 %v4817_v15  ;;  %v4846_v11 = vld [vmem:[%s12268_s12 + $0x1f20] sm:$0xff]  ;;  %v3923_v30 = vld [vmem:[%s12268_s12 + $0x248] sm:$0xff]  ;;  %v3925_v15 = vld [vmem:[%s12268_s12 + $0x258] sm:$0xff] }
 0x706   : > { %11165 = vtanh.f32 %v9917_v36  ;;  %7551 = vmatprep.subr.bf16.mxu0 %v6641_v34  ;;  %v6830_v62 = vunpack.c.h.s8.bf16 %v4814_v0  ;;  %v6832_v1 = vunpack.c.h.s8.bf16 %v4816_v59  ;;  %v6863_v32 = vunpack.c.l.s8.bf16 %v4847_v61  ;;  %v4848_v34 = vld [vmem:[%s12268_s12 + $0x1f30] sm:$0xff]  ;;  %v3922_v0 = vld [vmem:[%s12268_s12 + $0x240] sm:$0xff] }
 0x707   : > { %v6865_v36 = vunpack.c.l.s8.bf16 %v4849_v44  ;;  %v6862_v20 = vunpack.c.l.s8.bf16 %v4846_v11  ;;  %v6864_v10 = vunpack.c.l.s8.bf16 %v4848_v34  ;;  %v6896_v6 = vunpack.c.h.s8.bf16 %v4848_v34  ;;  %v3924_v59 = vld [vmem:[%s12268_s12 + $0x250] sm:$0xff] }
 0x708   : > { %7388 = vmatpush1.bf16.msra.mxu1 %v6638_v43  ;;  %v6895_v43 = vunpack.c.h.s8.bf16 %v4847_v61  ;;  %v3955_v61 = vld [vmem:[%s12268_s12 + $0x348] sm:$0xff]  ;;  %v3956_v34 = vld [vmem:[%s12268_s12 + $0x350] sm:$0xff] }
 0x709   : > { %7552 = vmatpush1.bf16.msra.mxu0 %v6640_v2  ;;  %7389 = vmatprep.subr.bf16.mxu1 %v6671_v3  ;;  %v6897_v2 = vunpack.c.h.s8.bf16 %v4849_v44  ;;  %v3859_v3 = vld [vmem:[%s12268_s12 + $0x48] sm:$0xff]  ;;  %v3957_v44 = vld [vmem:[%s12268_s12 + $0x358] sm:$0xff] }
 0x70a   : > { %7553 = vmatprep.subr.bf16.mxu0 %v6673_v47  ;;  %v6894_v47 = vunpack.c.h.s8.bf16 %v4846_v11  ;;  %v3954_v11 = vld [vmem:[%s12268_s12 + $0x340] sm:$0xff] }
 0x70c   : > { %7390 = vmatpush1.bf16.msra.mxu1 %v6670_v7  ;;  %v4883_v7 = vunpack.c.l.s8.bf16 %v3859_v3 }
 0x70d   : > { %v11160_v24 = vpop.eup %11159  ;;  %7554 = vmatpush1.bf16.msra.mxu0 %v6672_v45  ;;  %7391 = vmatprep.subr.bf16.mxu1 %v6703_v12  ;;  %v3858_v45 = vld [vmem:[%s12268_s12 + $0x40] sm:$0xff]  ;;  %v4885_v12 = vunpack.c.l.s8.bf16 %v3861_v4 }
 0x70e   : > { %v11162_v18 = vpop.eup %11161  ;;  %9978 = vst [vmem:[%s12834_s4] sm:$0xff] %v11160_v24  ;;  %7555 = vmatprep.subr.bf16.mxu0 %v6705_v13  ;;  %v3860_v13 = vld [vmem:[%s12268_s12 + $0x50] sm:$0xff]  ;;  %v4882_v17 = vunpack.c.l.s8.bf16 %v3858_v45  ;;  %v3891_v24 = vld [vmem:[%s12268_s12 + $0x148] sm:$0xff]  ;;  %v4914_v28 = vunpack.c.h.s8.bf16 %v3858_v45  ;;  %v3986_v45 = vld [vmem:[%s12268_s12 + $0x440] sm:$0xff] }
 0x70f   : > { %v11164_v42 = vpop.eup %11163  ;;  %9980 = vst [vmem:[%s12834_s4 + $0x10] sm:$0xff] %v11162_v18  ;;  %v4884_v27 = vunpack.c.l.s8.bf16 %v3860_v13  ;;  %v4916_v18 = vunpack.c.h.s8.bf16 %v3860_v13  ;;  %v3988_v13 = vld [vmem:[%s12268_s12 + $0x450] sm:$0xff] }
 0x710   : > { %v11166_v16 = vpop.eup %11165  ;;  %9979 = vst [vmem:[%s12834_s4 + $0x8] sm:$0xff] %v11164_v42  ;;  %7392 = vmatpush1.bf16.msra.mxu1 %v6702_v33  ;;  %v4915_v33 = vunpack.c.h.s8.bf16 %v3859_v3  ;;  %v3987_v3 = vld [vmem:[%s12268_s12 + $0x448] sm:$0xff] }
 0x711   : > { %9981 = vst [vmem:[%s12834_s4 + $0x18] sm:$0xff] %v11166_v16  ;;  %7556 = vmatpush1.bf16.msra.mxu0 %v6704_v25  ;;  %7393 = vmatprep.subr.bf16.mxu1 %v6735_v26  ;;  %v4917_v25 = vunpack.c.h.s8.bf16 %v3861_v4  ;;  %v3893_v26 = vld [vmem:[%s12268_s12 + $0x158] sm:$0xff]  ;;  %v3892_v16 = vld [vmem:[%s12268_s12 + $0x150] sm:$0xff] }
 0x712   : > { %7557 = vmatprep.subr.bf16.mxu0 %v6737_v41  ;;  %v4947_v41 = vunpack.c.l.s8.bf16 %v3891_v24  ;;  %v4949_v42 = vunpack.c.l.s8.bf16 %v3893_v26  ;;  %v3989_v4 = vld [vmem:[%s12268_s12 + $0x458] sm:$0xff] }
 0x714   : > { %7394 = vmatpush1.bf16.msra.mxu1 %v6734_v46  ;;  %v4946_v46 = vunpack.c.l.s8.bf16 %v3890_v9 }
 0x715   : > { %7558 = vmatpush1.bf16.msra.mxu0 %v6736_v29  ;;  %7395 = vmatprep.subr.bf16.mxu1 %v6767_v35  ;;  %v4948_v29 = vunpack.c.l.s8.bf16 %v3892_v16  ;;  %v4979_v35 = vunpack.c.h.s8.bf16 %v3891_v24  ;;  %v5173_v24 = vunpack.c.h.s8.bf16 %v3989_v4 }
 0x716   : > { %7559 = vmatprep.subr.bf16.mxu0 %v6769_v8  ;;  %v4981_v8 = vunpack.c.h.s8.bf16 %v3893_v26  ;;  %v4021_v26 = vld [vmem:[%s12268_s12 + $0x558] sm:$0xff] }
 0x718   : > { %7396 = vmatpush1.bf16.msra.mxu1 %v6766_v38  ;;  %v4978_v38 = vunpack.c.h.s8.bf16 %v3890_v9  ;;  %v4018_v9 = vld [vmem:[%s12268_s12 + $0x540] sm:$0xff] }
 0x719   : > { %7560 = vmatpush1.bf16.msra.mxu0 %v6768_v53  ;;  %7397 = vmatprep.subr.bf16.mxu1 %v6799_v40  ;;  %v4980_v53 = vunpack.c.h.s8.bf16 %v3892_v16  ;;  %v5011_v40 = vunpack.c.l.s8.bf16 %v3923_v30  ;;  %v4020_v16 = vld [vmem:[%s12268_s12 + $0x550] sm:$0xff] }
 0x71a   : > { %7561 = vmatprep.subr.bf16.mxu0 %v6801_v55  ;;  %v5013_v55 = vunpack.c.l.s8.bf16 %v3925_v15 }
 0x71c   : > { %7398 = vmatpush1.bf16.msra.mxu1 %v6798_v22  ;;  %v5010_v22 = vunpack.c.l.s8.bf16 %v3922_v0 }
 0x71d   : > { %7562 = vmatpush1.bf16.msra.mxu0 %v6800_v63  ;;  %7399 = vmatprep.subr.bf16.mxu1 %v6831_v49  ;;  %v5012_v63 = vunpack.c.l.s8.bf16 %v3924_v59  ;;  %v5043_v49 = vunpack.c.h.s8.bf16 %v3923_v30  ;;  %v4051_v30 = vld [vmem:[%s12268_s12 + $0x648] sm:$0xff] }
 0x71e   : > { %7563 = vmatprep.subr.bf16.mxu0 %v6833_v57  ;;  %v5045_v57 = vunpack.c.h.s8.bf16 %v3925_v15  ;;  %v4053_v15 = vld [vmem:[%s12268_s12 + $0x658] sm:$0xff] }
 0x720   : > { %7400 = vmatpush1.bf16.msra.mxu1 %v6830_v62  ;;  %v5042_v62 = vunpack.c.h.s8.bf16 %v3922_v0  ;;  %v4050_v0 = vld [vmem:[%s12268_s12 + $0x640] sm:$0xff] }
 0x721   : > { %7564 = vmatpush1.bf16.msra.mxu0 %v6832_v1  ;;  %7401 = vmatprep.subr.bf16.mxu1 %v6863_v32  ;;  %v5044_v1 = vunpack.c.h.s8.bf16 %v3924_v59  ;;  %v5075_v32 = vunpack.c.l.s8.bf16 %v3955_v61  ;;  %v4052_v59 = vld [vmem:[%s12268_s12 + $0x650] sm:$0xff] }
 0x722   : > { %7565 = vmatprep.subr.bf16.mxu0 %v6865_v36  ;;  %v5077_v36 = vunpack.c.l.s8.bf16 %v3957_v44 }
 0x724   : > { %7402 = vmatpush1.bf16.msra.mxu1 %v6862_v20  ;;  %v5074_v20 = vunpack.c.l.s8.bf16 %v3954_v11 }
 0x725   : > { %7566 = vmatpush1.bf16.msra.mxu0 %v6864_v10  ;;  %7403 = vmatprep.subr.bf16.mxu1 %v6895_v43  ;;  %v5076_v10 = vunpack.c.l.s8.bf16 %v3956_v34  ;;  %v5107_v43 = vunpack.c.h.s8.bf16 %v3955_v61  ;;  %v4083_v61 = vld [vmem:[%s12268_s12 + $0x748] sm:$0xff] }
 0x726   : > { %7567 = vmatprep.subr.bf16.mxu0 %v6897_v2  ;;  %v5109_v2 = vunpack.c.h.s8.bf16 %v3957_v44  ;;  %v4085_v44 = vld [vmem:[%s12268_s12 + $0x758] sm:$0xff] }
 0x728   : > { %7404 = vmatpush1.bf16.msra.mxu1 %v6894_v47  ;;  %v5106_v47 = vunpack.c.h.s8.bf16 %v3954_v11  ;;  %v4082_v11 = vld [vmem:[%s12268_s12 + $0x740] sm:$0xff] }
 0x729   : > { %7568 = vmatpush1.bf16.msra.mxu0 %v6896_v6  ;;  %7578 = vmatprep.subr.bf16.mxu1 %v4883_v7  ;;  %v5108_v6 = vunpack.c.h.s8.bf16 %v3956_v34  ;;  %v5139_v7 = vunpack.c.l.s8.bf16 %v3987_v3  ;;  %v4084_v34 = vld [vmem:[%s12268_s12 + $0x750] sm:$0xff] }
 0x72a   : > { %7742 = vmatprep.subr.bf16.mxu0 %v4885_v12  ;;  %v5141_v12 = vunpack.c.l.s8.bf16 %v3989_v4  ;;  %v4117_v4 = vld [vmem:[%s12268_s12 + $0x858] sm:$0xff] }
 0x72b   : > { %7406 = vmatmul.mubr.bf16.vlgmr.msra.gmra.mrb[16].mxu1 %v12673_v51 }
 0x72c   : > { %7570 = vmatmul.mubr.bf16.vlgmr.msra.gmra.mrb[20].mxu0 %v12673_v51  ;;  %7579 = vmatpush1.bf16.msra.mxu1 %v4882_v17  ;;  %v5138_v17 = vunpack.c.l.s8.bf16 %v3986_v45 }
 0x72d   : > { %7610 = vmatprep.mubr.bf16.mxu1 %v12460_v52  ;;  %7743 = vmatpush1.bf16.msra.mxu0 %v4884_v27  ;;  %v5140_v27 = vunpack.c.l.s8.bf16 %v3988_v13 }
 0x72e   : > { %7774 = vmatprep.mubr.bf16.mxu0 %v12460_v52  ;;  %7580 = vmatprep.subr.bf16.mxu1 %v4915_v33  ;;  %v5171_v33 = vunpack.c.h.s8.bf16 %v3987_v3  ;;  %v4115_v3 = vld [vmem:[%s12268_s12 + $0x848] sm:$0xff] }
 0x72f   : > { %7744 = vmatprep.subr.bf16.mxu0 %v4917_v25  ;;  %v4019_v25 = vld [vmem:[%s12268_s12 + $0x548] sm:$0xff] }
 0x730   : > { %7581 = vmatpush1.bf16.msra.mxu1 %v4914_v28  ;;  %v5170_v28 = vunpack.c.h.s8.bf16 %v3986_v45  ;;  %v4114_v45 = vld [vmem:[%s12268_s12 + $0x840] sm:$0xff] }
 0x731   : > { %7745 = vmatpush1.bf16.msra.mxu0 %v4916_v18  ;;  %7582 = vmatprep.subr.bf16.mxu1 %v4947_v41  ;;  %v5172_v18 = vunpack.c.h.s8.bf16 %v3988_v13  ;;  %v5203_v41 = vunpack.c.l.s8.bf16 %v4019_v25  ;;  %v4116_v13 = vld [vmem:[%s12268_s12 + $0x850] sm:$0xff] }
 0x732   : > { %7746 = vmatprep.subr.bf16.mxu0 %v4949_v42  ;;  %v5205_v42 = vunpack.c.l.s8.bf16 %v4021_v26 }
 0x734   : > { %7583 = vmatpush1.bf16.msra.mxu1 %v4946_v46  ;;  %v5202_v46 = vunpack.c.l.s8.bf16 %v4018_v9 }
 0x735   : > { %7747 = vmatpush1.bf16.msra.mxu0 %v4948_v29  ;;  %7584 = vmatprep.subr.bf16.mxu1 %v4979_v35  ;;  %v5204_v29 = vunpack.c.l.s8.bf16 %v4020_v16  ;;  %v5235_v35 = vunpack.c.h.s8.bf16 %v4019_v25  ;;  %v5429_v25 = vunpack.c.h.s8.bf16 %v4117_v4 }
 0x736   : > { %7748 = vmatprep.subr.bf16.mxu0 %v4981_v8  ;;  %v5237_v8 = vunpack.c.h.s8.bf16 %v4021_v26  ;;  %v4149_v26 = vld [vmem:[%s12268_s12 + $0x958] sm:$0xff] }
 0x738   : > { %7585 = vmatpush1.bf16.msra.mxu1 %v4978_v38  ;;  %v5234_v38 = vunpack.c.h.s8.bf16 %v4018_v9  ;;  %v4146_v9 = vld [vmem:[%s12268_s12 + $0x940] sm:$0xff] }
 0x739   : > { %7749 = vmatpush1.bf16.msra.mxu0 %v4980_v53  ;;  %7586 = vmatprep.subr.bf16.mxu1 %v5011_v40  ;;  %v5236_v53 = vunpack.c.h.s8.bf16 %v4020_v16  ;;  %v5267_v40 = vunpack.c.l.s8.bf16 %v4051_v30  ;;  %v4148_v16 = vld [vmem:[%s12268_s12 + $0x950] sm:$0xff] }
 0x73a   : > { %7750 = vmatprep.subr.bf16.mxu0 %v5013_v55  ;;  %v5269_v55 = vunpack.c.l.s8.bf16 %v4053_v15 }
 0x73c   : > { %7587 = vmatpush1.bf16.msra.mxu1 %v5010_v22  ;;  %v5266_v22 = vunpack.c.l.s8.bf16 %v4050_v0 }
 0x73d   : > { %7751 = vmatpush1.bf16.msra.mxu0 %v5012_v63  ;;  %7588 = vmatprep.subr.bf16.mxu1 %v5043_v49  ;;  %v5268_v63 = vunpack.c.l.s8.bf16 %v4052_v59  ;;  %v5299_v49 = vunpack.c.h.s8.bf16 %v4051_v30  ;;  %v4179_v30 = vld [vmem:[%s12268_s12 + $0xa48] sm:$0xff] }
 0x73e   : > { %7752 = vmatprep.subr.bf16.mxu0 %v5045_v57  ;;  %v5301_v57 = vunpack.c.h.s8.bf16 %v4053_v15  ;;  %v4181_v15 = vld [vmem:[%s12268_s12 + $0xa58] sm:$0xff] }
 0x740   : > { %7589 = vmatpush1.bf16.msra.mxu1 %v5042_v62  ;;  %v5298_v62 = vunpack.c.h.s8.bf16 %v4050_v0  ;;  %v4178_v0 = vld [vmem:[%s12268_s12 + $0xa40] sm:$0xff] }
 0x741   : > { %7753 = vmatpush1.bf16.msra.mxu0 %v5044_v1  ;;  %7590 = vmatprep.subr.bf16.mxu1 %v5075_v32  ;;  %v5300_v1 = vunpack.c.h.s8.bf16 %v4052_v59  ;;  %v5331_v32 = vunpack.c.l.s8.bf16 %v4083_v61  ;;  %v4180_v59 = vld [vmem:[%s12268_s12 + $0xa50] sm:$0xff] }
 0x742   : > { %7754 = vmatprep.subr.bf16.mxu0 %v5077_v36  ;;  %v5333_v36 = vunpack.c.l.s8.bf16 %v4085_v44 }
 0x744   : > { %7591 = vmatpush1.bf16.msra.mxu1 %v5074_v20  ;;  %v5330_v20 = vunpack.c.l.s8.bf16 %v4082_v11 }
 0x745   : > { %7755 = vmatpush1.bf16.msra.mxu0 %v5076_v10  ;;  %7592 = vmatprep.subr.bf16.mxu1 %v5107_v43  ;;  %v5332_v10 = vunpack.c.l.s8.bf16 %v4084_v34  ;;  %v5363_v43 = vunpack.c.h.s8.bf16 %v4083_v61  ;;  %v4211_v61 = vld [vmem:[%s12268_s12 + $0xb48] sm:$0xff] }
 0x746   : > { %7756 = vmatprep.subr.bf16.mxu0 %v5109_v2  ;;  %v5365_v2 = vunpack.c.h.s8.bf16 %v4085_v44  ;;  %v4213_v44 = vld [vmem:[%s12268_s12 + $0xb58] sm:$0xff] }
 0x748   : > { %7593 = vmatpush1.bf16.msra.mxu1 %v5106_v47  ;;  %v5362_v47 = vunpack.c.h.s8.bf16 %v4082_v11  ;;  %v4210_v11 = vld [vmem:[%s12268_s12 + $0xb40] sm:$0xff] }
 0x749   : > { %7757 = vmatpush1.bf16.msra.mxu0 %v5108_v6  ;;  %7594 = vmatprep.subr.bf16.mxu1 %v5139_v7  ;;  %v5364_v6 = vunpack.c.h.s8.bf16 %v4084_v34  ;;  %v5395_v7 = vunpack.c.l.s8.bf16 %v4115_v3  ;;  %v4212_v34 = vld [vmem:[%s12268_s12 + $0xb50] sm:$0xff] }
 0x74a   : > { %7758 = vmatprep.subr.bf16.mxu0 %v5141_v12  ;;  %v5397_v12 = vunpack.c.l.s8.bf16 %v4117_v4  ;;  %v4245_v4 = vld [vmem:[%s12268_s12 + $0xc58] sm:$0xff] }
 0x74c   : > { %7595 = vmatpush1.bf16.msra.mxu1 %v5138_v17  ;;  %v5394_v17 = vunpack.c.l.s8.bf16 %v4114_v45 }
 0x74d   : > { %7759 = vmatpush1.bf16.msra.mxu0 %v5140_v27  ;;  %7596 = vmatprep.subr.bf16.mxu1 %v5171_v33  ;;  %v5396_v27 = vunpack.c.l.s8.bf16 %v4116_v13  ;;  %v5427_v33 = vunpack.c.h.s8.bf16 %v4115_v3  ;;  %v4243_v3 = vld [vmem:[%s12268_s12 + $0xc48] sm:$0xff] }
 0x74e   : > { %7760 = vmatprep.subr.bf16.mxu0 %v5173_v24  ;;  %v4147_v24 = vld [vmem:[%s12268_s12 + $0x948] sm:$0xff] }
 0x750   : > { %7597 = vmatpush1.bf16.msra.mxu1 %v5170_v28  ;;  %v5426_v28 = vunpack.c.h.s8.bf16 %v4114_v45  ;;  %v4242_v45 = vld [vmem:[%s12268_s12 + $0xc40] sm:$0xff] }
 0x751   : > { %7761 = vmatpush1.bf16.msra.mxu0 %v5172_v18  ;;  %7598 = vmatprep.subr.bf16.mxu1 %v5203_v41  ;;  %v5428_v18 = vunpack.c.h.s8.bf16 %v4116_v13  ;;  %v5459_v41 = vunpack.c.l.s8.bf16 %v4147_v24  ;;  %v4244_v13 = vld [vmem:[%s12268_s12 + $0xc50] sm:$0xff] }
 0x752   : > { %7762 = vmatprep.subr.bf16.mxu0 %v5205_v42  ;;  %v5461_v42 = vunpack.c.l.s8.bf16 %v4149_v26 }
 0x754   : > { %7599 = vmatpush1.bf16.msra.mxu1 %v5202_v46  ;;  %v5458_v46 = vunpack.c.l.s8.bf16 %v4146_v9 }
 0x755   : > { %7763 = vmatpush1.bf16.msra.mxu0 %v5204_v29  ;;  %7600 = vmatprep.subr.bf16.mxu1 %v5235_v35  ;;  %v5460_v29 = vunpack.c.l.s8.bf16 %v4148_v16  ;;  %v5491_v35 = vunpack.c.h.s8.bf16 %v4147_v24  ;;  %v5685_v24 = vunpack.c.h.s8.bf16 %v4245_v4 }
 0x756   : > { %7764 = vmatprep.subr.bf16.mxu0 %v5237_v8  ;;  %v5493_v8 = vunpack.c.h.s8.bf16 %v4149_v26  ;;  %v4277_v26 = vld [vmem:[%s12268_s12 + $0xd58] sm:$0xff] }
 0x758   : > { %7601 = vmatpush1.bf16.msra.mxu1 %v5234_v38  ;;  %v5490_v38 = vunpack.c.h.s8.bf16 %v4146_v9  ;;  %v4274_v9 = vld [vmem:[%s12268_s12 + $0xd40] sm:$0xff] }
 0x759   : > { %7765 = vmatpush1.bf16.msra.mxu0 %v5236_v53  ;;  %7602 = vmatprep.subr.bf16.mxu1 %v5267_v40  ;;  %v5492_v53 = vunpack.c.h.s8.bf16 %v4148_v16  ;;  %v5523_v40 = vunpack.c.l.s8.bf16 %v4179_v30  ;;  %v4276_v16 = vld [vmem:[%s12268_s12 + $0xd50] sm:$0xff] }
 0x75a   : > { %7766 = vmatprep.subr.bf16.mxu0 %v5269_v55  ;;  %v5525_v55 = vunpack.c.l.s8.bf16 %v4181_v15 }
 0x75c   : > { %7603 = vmatpush1.bf16.msra.mxu1 %v5266_v22  ;;  %v5522_v22 = vunpack.c.l.s8.bf16 %v4178_v0 }
 0x75d   : > { %7767 = vmatpush1.bf16.msra.mxu0 %v5268_v63  ;;  %7604 = vmatprep.subr.bf16.mxu1 %v5299_v49  ;;  %v5524_v63 = vunpack.c.l.s8.bf16 %v4180_v59  ;;  %v5555_v49 = vunpack.c.h.s8.bf16 %v4179_v30  ;;  %v4307_v30 = vld [vmem:[%s12268_s12 + $0xe48] sm:$0xff] }
 0x75e   : > { %7768 = vmatprep.subr.bf16.mxu0 %v5301_v57  ;;  %v5557_v57 = vunpack.c.h.s8.bf16 %v4181_v15  ;;  %v4309_v15 = vld [vmem:[%s12268_s12 + $0xe58] sm:$0xff] }
 0x760   : > { %7605 = vmatpush1.bf16.msra.mxu1 %v5298_v62  ;;  %v5554_v62 = vunpack.c.h.s8.bf16 %v4178_v0  ;;  %v4306_v0 = vld [vmem:[%s12268_s12 + $0xe40] sm:$0xff] }
 0x761   : > { %7769 = vmatpush1.bf16.msra.mxu0 %v5300_v1  ;;  %7606 = vmatprep.subr.bf16.mxu1 %v5331_v32  ;;  %v5556_v1 = vunpack.c.h.s8.bf16 %v4180_v59  ;;  %v5587_v32 = vunpack.c.l.s8.bf16 %v4211_v61  ;;  %v4308_v59 = vld [vmem:[%s12268_s12 + $0xe50] sm:$0xff] }
 0x762   : > { %7770 = vmatprep.subr.bf16.mxu0 %v5333_v36  ;;  %v5589_v36 = vunpack.c.l.s8.bf16 %v4213_v44 }
 0x764   : > { %7607 = vmatpush1.bf16.msra.mxu1 %v5330_v20  ;;  %v5586_v20 = vunpack.c.l.s8.bf16 %v4210_v11 }
 0x765   : > { %7771 = vmatpush1.bf16.msra.mxu0 %v5332_v10  ;;  %7608 = vmatprep.subr.bf16.mxu1 %v5363_v43  ;;  %v5588_v10 = vunpack.c.l.s8.bf16 %v4212_v34  ;;  %v5619_v43 = vunpack.c.h.s8.bf16 %v4211_v61  ;;  %v4339_v61 = vld [vmem:[%s12268_s12 + $0xf48] sm:$0xff] }
 0x766   : > { %7772 = vmatprep.subr.bf16.mxu0 %v5365_v2  ;;  %v5621_v2 = vunpack.c.h.s8.bf16 %v4213_v44  ;;  %v4341_v44 = vld [vmem:[%s12268_s12 + $0xf58] sm:$0xff] }
 0x768   : > { %7609 = vmatpush1.bf16.msra.mxu1 %v5362_v47  ;;  %v5618_v47 = vunpack.c.h.s8.bf16 %v4210_v11  ;;  %v4338_v11 = vld [vmem:[%s12268_s12 + $0xf40] sm:$0xff] }
 0x769   : > { %7773 = vmatpush1.bf16.msra.mxu0 %v5364_v6  ;;  %7619 = vmatprep.subr.bf16.mxu1 %v5395_v7  ;;  %v5620_v6 = vunpack.c.h.s8.bf16 %v4212_v34  ;;  %v5651_v7 = vunpack.c.l.s8.bf16 %v4243_v3  ;;  %v4340_v34 = vld [vmem:[%s12268_s12 + $0xf50] sm:$0xff] }
 0x76a   : > { %7783 = vmatprep.subr.bf16.mxu0 %v5397_v12  ;;  %v5653_v12 = vunpack.c.l.s8.bf16 %v4245_v4  ;;  %v4373_v4 = vld [vmem:[%s12268_s12 + $0x1058] sm:$0xff] }
 0x76b   : > { %7611 = vmatmul.mubr.bf16.vlgmr.msra.gmra.mrb[20].mxu1 %v12462_v56 }
 0x76c   : > { %7775 = vmatmul.mubr.bf16.vlgmr.msra.gmra.mrb[24].mxu0 %v12462_v56  ;;  %7620 = vmatpush1.bf16.msra.mxu1 %v5394_v17  ;;  %v5650_v17 = vunpack.c.l.s8.bf16 %v4242_v45 }
 0x76d   : > { %7651 = vmatprep.mubr.bf16.mxu1 %v12470_v39  ;;  %7784 = vmatpush1.bf16.msra.mxu0 %v5396_v27  ;;  %v5652_v27 = vunpack.c.l.s8.bf16 %v4244_v13 }
 0x76e   : > { %7815 = vmatprep.mubr.bf16.mxu0 %v12470_v39  ;;  %7621 = vmatprep.subr.bf16.mxu1 %v5427_v33  ;;  %v5683_v33 = vunpack.c.h.s8.bf16 %v4243_v3  ;;  %v4371_v3 = vld [vmem:[%s12268_s12 + $0x1048] sm:$0xff] }
 0x76f   : > { %7785 = vmatprep.subr.bf16.mxu0 %v5429_v25  ;;  %v4275_v25 = vld [vmem:[%s12268_s12 + $0xd48] sm:$0xff] }
 0x770   : > { %7622 = vmatpush1.bf16.msra.mxu1 %v5426_v28  ;;  %v5682_v28 = vunpack.c.h.s8.bf16 %v4242_v45  ;;  %v4370_v45 = vld [vmem:[%s12268_s12 + $0x1040] sm:$0xff] }
 0x771   : > { %7786 = vmatpush1.bf16.msra.mxu0 %v5428_v18  ;;  %7623 = vmatprep.subr.bf16.mxu1 %v5459_v41  ;;  %v5684_v18 = vunpack.c.h.s8.bf16 %v4244_v13  ;;  %v5715_v41 = vunpack.c.l.s8.bf16 %v4275_v25  ;;  %v4372_v13 = vld [vmem:[%s12268_s12 + $0x1050] sm:$0xff] }
 0x772   : > { %7787 = vmatprep.subr.bf16.mxu0 %v5461_v42  ;;  %v5717_v42 = vunpack.c.l.s8.bf16 %v4277_v26 }
 0x774   : > { %7624 = vmatpush1.bf16.msra.mxu1 %v5458_v46  ;;  %v5714_v46 = vunpack.c.l.s8.bf16 %v4274_v9 }
 0x775   : > { %7788 = vmatpush1.bf16.msra.mxu0 %v5460_v29  ;;  %7625 = vmatprep.subr.bf16.mxu1 %v5491_v35  ;;  %v5716_v29 = vunpack.c.l.s8.bf16 %v4276_v16  ;;  %v5747_v35 = vunpack.c.h.s8.bf16 %v4275_v25  ;;  %v5941_v25 = vunpack.c.h.s8.bf16 %v4373_v4 }
 0x776   : > { %7789 = vmatprep.subr.bf16.mxu0 %v5493_v8  ;;  %v5749_v8 = vunpack.c.h.s8.bf16 %v4277_v26  ;;  %v4405_v26 = vld [vmem:[%s12268_s12 + $0x1158] sm:$0xff] }
 0x778   : > { %7626 = vmatpush1.bf16.msra.mxu1 %v5490_v38  ;;  %v5746_v38 = vunpack.c.h.s8.bf16 %v4274_v9  ;;  %v4402_v9 = vld [vmem:[%s12268_s12 + $0x1140] sm:$0xff] }
 0x779   : > { %7790 = vmatpush1.bf16.msra.mxu0 %v5492_v53  ;;  %7627 = vmatprep.subr.bf16.mxu1 %v5523_v40  ;;  %v5748_v53 = vunpack.c.h.s8.bf16 %v4276_v16  ;;  %v5779_v40 = vunpack.c.l.s8.bf16 %v4307_v30  ;;  %v4404_v16 = vld [vmem:[%s12268_s12 + $0x1150] sm:$0xff] }
 0x77a   : > { %7791 = vmatprep.subr.bf16.mxu0 %v5525_v55  ;;  %v5781_v55 = vunpack.c.l.s8.bf16 %v4309_v15 }
 0x77c   : > { %7628 = vmatpush1.bf16.msra.mxu1 %v5522_v22  ;;  %v5778_v22 = vunpack.c.l.s8.bf16 %v4306_v0 }
 0x77d   : > { %7792 = vmatpush1.bf16.msra.mxu0 %v5524_v63  ;;  %7629 = vmatprep.subr.bf16.mxu1 %v5555_v49  ;;  %v5780_v63 = vunpack.c.l.s8.bf16 %v4308_v59  ;;  %v5811_v49 = vunpack.c.h.s8.bf16 %v4307_v30  ;;  %v4435_v30 = vld [vmem:[%s12268_s12 + $0x1248] sm:$0xff] }
 0x77e   : > { %7793 = vmatprep.subr.bf16.mxu0 %v5557_v57  ;;  %v5813_v57 = vunpack.c.h.s8.bf16 %v4309_v15  ;;  %v4437_v15 = vld [vmem:[%s12268_s12 + $0x1258] sm:$0xff] }
 0x780   : > { %7630 = vmatpush1.bf16.msra.mxu1 %v5554_v62  ;;  %v5810_v62 = vunpack.c.h.s8.bf16 %v4306_v0  ;;  %v4434_v0 = vld [vmem:[%s12268_s12 + $0x1240] sm:$0xff] }
 0x781   : > { %7794 = vmatpush1.bf16.msra.mxu0 %v5556_v1  ;;  %7631 = vmatprep.subr.bf16.mxu1 %v5587_v32  ;;  %v5812_v1 = vunpack.c.h.s8.bf16 %v4308_v59  ;;  %v5843_v32 = vunpack.c.l.s8.bf16 %v4339_v61  ;;  %v4436_v59 = vld [vmem:[%s12268_s12 + $0x1250] sm:$0xff] }
 0x782   : > { %7795 = vmatprep.subr.bf16.mxu0 %v5589_v36  ;;  %v5845_v36 = vunpack.c.l.s8.bf16 %v4341_v44 }
 0x784   : > { %7632 = vmatpush1.bf16.msra.mxu1 %v5586_v20  ;;  %v5842_v20 = vunpack.c.l.s8.bf16 %v4338_v11 }
 0x785   : > { %7796 = vmatpush1.bf16.msra.mxu0 %v5588_v10  ;;  %7633 = vmatprep.subr.bf16.mxu1 %v5619_v43  ;;  %v5844_v10 = vunpack.c.l.s8.bf16 %v4340_v34  ;;  %v5875_v43 = vunpack.c.h.s8.bf16 %v4339_v61  ;;  %v4467_v61 = vld [vmem:[%s12268_s12 + $0x1348] sm:$0xff] }
 0x786   : > { %7797 = vmatprep.subr.bf16.mxu0 %v5621_v2  ;;  %v5877_v2 = vunpack.c.h.s8.bf16 %v4341_v44  ;;  %v4469_v44 = vld [vmem:[%s12268_s12 + $0x1358] sm:$0xff] }
 0x788   : > { %7634 = vmatpush1.bf16.msra.mxu1 %v5618_v47  ;;  %v5874_v47 = vunpack.c.h.s8.bf16 %v4338_v11  ;;  %v4466_v11 = vld [vmem:[%s12268_s12 + $0x1340] sm:$0xff] }
 0x789   : > { %7798 = vmatpush1.bf16.msra.mxu0 %v5620_v6  ;;  %7635 = vmatprep.subr.bf16.mxu1 %v5651_v7  ;;  %v5876_v6 = vunpack.c.h.s8.bf16 %v4340_v34  ;;  %v5907_v7 = vunpack.c.l.s8.bf16 %v4371_v3  ;;  %v4468_v34 = vld [vmem:[%s12268_s12 + $0x1350] sm:$0xff] }
 0x78a   : > { %7799 = vmatprep.subr.bf16.mxu0 %v5653_v12  ;;  %v5909_v12 = vunpack.c.l.s8.bf16 %v4373_v4  ;;  %v4501_v4 = vld [vmem:[%s12268_s12 + $0x1458] sm:$0xff] }
 0x78c   : > { %7636 = vmatpush1.bf16.msra.mxu1 %v5650_v17  ;;  %v5906_v17 = vunpack.c.l.s8.bf16 %v4370_v45 }
 0x78d   : > { %7800 = vmatpush1.bf16.msra.mxu0 %v5652_v27  ;;  %7637 = vmatprep.subr.bf16.mxu1 %v5683_v33  ;;  %v5908_v27 = vunpack.c.l.s8.bf16 %v4372_v13  ;;  %v5939_v33 = vunpack.c.h.s8.bf16 %v4371_v3  ;;  %v4499_v3 = vld [vmem:[%s12268_s12 + $0x1448] sm:$0xff] }
 0x78e   : > { %7801 = vmatprep.subr.bf16.mxu0 %v5685_v24  ;;  %v4403_v24 = vld [vmem:[%s12268_s12 + $0x1148] sm:$0xff] }
 0x790   : > { %7638 = vmatpush1.bf16.msra.mxu1 %v5682_v28  ;;  %v5938_v28 = vunpack.c.h.s8.bf16 %v4370_v45  ;;  %v4498_v45 = vld [vmem:[%s12268_s12 + $0x1440] sm:$0xff] }
 0x791   : > { %7802 = vmatpush1.bf16.msra.mxu0 %v5684_v18  ;;  %7639 = vmatprep.subr.bf16.mxu1 %v5715_v41  ;;  %v5940_v18 = vunpack.c.h.s8.bf16 %v4372_v13  ;;  %v5971_v41 = vunpack.c.l.s8.bf16 %v4403_v24  ;;  %v4500_v13 = vld [vmem:[%s12268_s12 + $0x1450] sm:$0xff] }
 0x792   : > { %7803 = vmatprep.subr.bf16.mxu0 %v5717_v42  ;;  %v5973_v42 = vunpack.c.l.s8.bf16 %v4405_v26 }
 0x794   : > { %7640 = vmatpush1.bf16.msra.mxu1 %v5714_v46  ;;  %v5970_v46 = vunpack.c.l.s8.bf16 %v4402_v9 }
 0x795   : > { %7804 = vmatpush1.bf16.msra.mxu0 %v5716_v29  ;;  %7641 = vmatprep.subr.bf16.mxu1 %v5747_v35  ;;  %v5972_v29 = vunpack.c.l.s8.bf16 %v4404_v16  ;;  %v6003_v35 = vunpack.c.h.s8.bf16 %v4403_v24  ;;  %v6197_v24 = vunpack.c.h.s8.bf16 %v4501_v4 }
 0x796   : > { %7805 = vmatprep.subr.bf16.mxu0 %v5749_v8  ;;  %v6005_v8 = vunpack.c.h.s8.bf16 %v4405_v26  ;;  %v4533_v26 = vld [vmem:[%s12268_s12 + $0x1558] sm:$0xff] }
 0x798   : > { %7642 = vmatpush1.bf16.msra.mxu1 %v5746_v38  ;;  %v6002_v38 = vunpack.c.h.s8.bf16 %v4402_v9  ;;  %v4530_v9 = vld [vmem:[%s12268_s12 + $0x1540] sm:$0xff] }
 0x799   : > { %7806 = vmatpush1.bf16.msra.mxu0 %v5748_v53  ;;  %7643 = vmatprep.subr.bf16.mxu1 %v5779_v40  ;;  %v6004_v53 = vunpack.c.h.s8.bf16 %v4404_v16  ;;  %v6035_v40 = vunpack.c.l.s8.bf16 %v4435_v30  ;;  %v4532_v16 = vld [vmem:[%s12268_s12 + $0x1550] sm:$0xff] }
 0x79a   : > { %7807 = vmatprep.subr.bf16.mxu0 %v5781_v55  ;;  %v6037_v55 = vunpack.c.l.s8.bf16 %v4437_v15 }
 0x79c   : > { %7644 = vmatpush1.bf16.msra.mxu1 %v5778_v22  ;;  %v6034_v22 = vunpack.c.l.s8.bf16 %v4434_v0 }
 0x79d   : > { %7808 = vmatpush1.bf16.msra.mxu0 %v5780_v63  ;;  %7645 = vmatprep.subr.bf16.mxu1 %v5811_v49  ;;  %v6036_v63 = vunpack.c.l.s8.bf16 %v4436_v59  ;;  %v6067_v49 = vunpack.c.h.s8.bf16 %v4435_v30  ;;  %v4563_v30 = vld [vmem:[%s12268_s12 + $0x1648] sm:$0xff] }
 0x79e   : > { %7809 = vmatprep.subr.bf16.mxu0 %v5813_v57  ;;  %v6069_v57 = vunpack.c.h.s8.bf16 %v4437_v15  ;;  %v4565_v15 = vld [vmem:[%s12268_s12 + $0x1658] sm:$0xff] }
 0x7a0   : > { %7646 = vmatpush1.bf16.msra.mxu1 %v5810_v62  ;;  %v6066_v62 = vunpack.c.h.s8.bf16 %v4434_v0  ;;  %v4562_v0 = vld [vmem:[%s12268_s12 + $0x1640] sm:$0xff] }
 0x7a1   : > { %7810 = vmatpush1.bf16.msra.mxu0 %v5812_v1  ;;  %7647 = vmatprep.subr.bf16.mxu1 %v5843_v32  ;;  %v6068_v1 = vunpack.c.h.s8.bf16 %v4436_v59  ;;  %v6099_v32 = vunpack.c.l.s8.bf16 %v4467_v61  ;;  %v4564_v59 = vld [vmem:[%s12268_s12 + $0x1650] sm:$0xff] }
 0x7a2   : > { %7811 = vmatprep.subr.bf16.mxu0 %v5845_v36  ;;  %v6101_v36 = vunpack.c.l.s8.bf16 %v4469_v44 }
 0x7a4   : > { %7648 = vmatpush1.bf16.msra.mxu1 %v5842_v20  ;;  %v6098_v20 = vunpack.c.l.s8.bf16 %v4466_v11 }
 0x7a5   : > { %7812 = vmatpush1.bf16.msra.mxu0 %v5844_v10  ;;  %7649 = vmatprep.subr.bf16.mxu1 %v5875_v43  ;;  %v6100_v10 = vunpack.c.l.s8.bf16 %v4468_v34  ;;  %v6131_v43 = vunpack.c.h.s8.bf16 %v4467_v61  ;;  %v4595_v61 = vld [vmem:[%s12268_s12 + $0x1748] sm:$0xff] }
 0x7a6   : > { %7813 = vmatprep.subr.bf16.mxu0 %v5877_v2  ;;  %v6133_v2 = vunpack.c.h.s8.bf16 %v4469_v44  ;;  %v4597_v44 = vld [vmem:[%s12268_s12 + $0x1758] sm:$0xff] }
 0x7a8   : > { %7650 = vmatpush1.bf16.msra.mxu1 %v5874_v47  ;;  %v6130_v47 = vunpack.c.h.s8.bf16 %v4466_v11  ;;  %v4594_v11 = vld [vmem:[%s12268_s12 + $0x1740] sm:$0xff] }
 0x7a9   : > { %7814 = vmatpush1.bf16.msra.mxu0 %v5876_v6  ;;  %7660 = vmatprep.subr.bf16.mxu1 %v5907_v7  ;;  %v6132_v6 = vunpack.c.h.s8.bf16 %v4468_v34  ;;  %v6163_v7 = vunpack.c.l.s8.bf16 %v4499_v3  ;;  %v4596_v34 = vld [vmem:[%s12268_s12 + $0x1750] sm:$0xff] }
 0x7aa   : > { %7824 = vmatprep.subr.bf16.mxu0 %v5909_v12  ;;  %v6165_v12 = vunpack.c.l.s8.bf16 %v4501_v4  ;;  %v4629_v4 = vld [vmem:[%s12268_s12 + $0x1858] sm:$0xff] }
 0x7ab   : > { %7652 = vmatmul.mubr.bf16.vlgmr.msra.gmra.mrb[20].mxu1 %v12526_v5 }
 0x7ac   : > { %7816 = vmatmul.mubr.bf16.vlgmr.msra.gmra.mrb[24].mxu0 %v12526_v5  ;;  %7661 = vmatpush1.bf16.msra.mxu1 %v5906_v17  ;;  %v6162_v17 = vunpack.c.l.s8.bf16 %v4498_v45 }
 0x7ad   : > { %7692 = vmatprep.mubr.bf16.mxu1 %v12626_v14  ;;  %7825 = vmatpush1.bf16.msra.mxu0 %v5908_v27  ;;  %v6164_v27 = vunpack.c.l.s8.bf16 %v4500_v13 }
 0x7ae   : > { %7856 = vmatprep.mubr.bf16.mxu0 %v12626_v14  ;;  %7662 = vmatprep.subr.bf16.mxu1 %v5939_v33  ;;  %v6195_v33 = vunpack.c.h.s8.bf16 %v4499_v3  ;;  %v4627_v3 = vld [vmem:[%s12268_s12 + $0x1848] sm:$0xff] }
 0x7af   : > { %7826 = vmatprep.subr.bf16.mxu0 %v5941_v25  ;;  %v4531_v25 = vld [vmem:[%s12268_s12 + $0x1548] sm:$0xff] }
 0x7b0   : > { %7663 = vmatpush1.bf16.msra.mxu1 %v5938_v28  ;;  %v6194_v28 = vunpack.c.h.s8.bf16 %v4498_v45  ;;  %v4626_v45 = vld [vmem:[%s12268_s12 + $0x1840] sm:$0xff] }
 0x7b1   : > { %7827 = vmatpush1.bf16.msra.mxu0 %v5940_v18  ;;  %7664 = vmatprep.subr.bf16.mxu1 %v5971_v41  ;;  %v6196_v18 = vunpack.c.h.s8.bf16 %v4500_v13  ;;  %v6227_v41 = vunpack.c.l.s8.bf16 %v4531_v25  ;;  %v4628_v13 = vld [vmem:[%s12268_s12 + $0x1850] sm:$0xff] }
 0x7b2   : > { %7828 = vmatprep.subr.bf16.mxu0 %v5973_v42  ;;  %v6229_v42 = vunpack.c.l.s8.bf16 %v4533_v26 }
 0x7b4   : > { %7665 = vmatpush1.bf16.msra.mxu1 %v5970_v46  ;;  %v6226_v46 = vunpack.c.l.s8.bf16 %v4530_v9 }
 0x7b5   : > { %7829 = vmatpush1.bf16.msra.mxu0 %v5972_v29  ;;  %7666 = vmatprep.subr.bf16.mxu1 %v6003_v35  ;;  %v6228_v29 = vunpack.c.l.s8.bf16 %v4532_v16  ;;  %v6259_v35 = vunpack.c.h.s8.bf16 %v4531_v25  ;;  %v6453_v25 = vunpack.c.h.s8.bf16 %v4629_v4 }
 0x7b6   : > { %7830 = vmatprep.subr.bf16.mxu0 %v6005_v8  ;;  %v6261_v8 = vunpack.c.h.s8.bf16 %v4533_v26  ;;  %v4661_v26 = vld [vmem:[%s12268_s12 + $0x1958] sm:$0xff] }
 0x7b8   : > { %7667 = vmatpush1.bf16.msra.mxu1 %v6002_v38  ;;  %v6258_v38 = vunpack.c.h.s8.bf16 %v4530_v9  ;;  %v4658_v9 = vld [vmem:[%s12268_s12 + $0x1940] sm:$0xff] }
 0x7b9   : > { %7831 = vmatpush1.bf16.msra.mxu0 %v6004_v53  ;;  %7668 = vmatprep.subr.bf16.mxu1 %v6035_v40  ;;  %v6260_v53 = vunpack.c.h.s8.bf16 %v4532_v16  ;;  %v6291_v40 = vunpack.c.l.s8.bf16 %v4563_v30  ;;  %v4660_v16 = vld [vmem:[%s12268_s12 + $0x1950] sm:$0xff] }
 0x7ba   : > { %7832 = vmatprep.subr.bf16.mxu0 %v6037_v55  ;;  %v6293_v55 = vunpack.c.l.s8.bf16 %v4565_v15 }
 0x7bc   : > { %7669 = vmatpush1.bf16.msra.mxu1 %v6034_v22  ;;  %v6290_v22 = vunpack.c.l.s8.bf16 %v4562_v0 }
 0x7bd   : > { %7833 = vmatpush1.bf16.msra.mxu0 %v6036_v63  ;;  %7670 = vmatprep.subr.bf16.mxu1 %v6067_v49  ;;  %v6292_v63 = vunpack.c.l.s8.bf16 %v4564_v59  ;;  %v6323_v49 = vunpack.c.h.s8.bf16 %v4563_v30  ;;  %v4691_v30 = vld [vmem:[%s12268_s12 + $0x1a48] sm:$0xff] }
 0x7be   : > { %7834 = vmatprep.subr.bf16.mxu0 %v6069_v57  ;;  %v6325_v57 = vunpack.c.h.s8.bf16 %v4565_v15  ;;  %v4693_v15 = vld [vmem:[%s12268_s12 + $0x1a58] sm:$0xff] }
 0x7c0   : > { %7671 = vmatpush1.bf16.msra.mxu1 %v6066_v62  ;;  %v6322_v62 = vunpack.c.h.s8.bf16 %v4562_v0  ;;  %v4690_v0 = vld [vmem:[%s12268_s12 + $0x1a40] sm:$0xff] }
 0x7c1   : > { %7835 = vmatpush1.bf16.msra.mxu0 %v6068_v1  ;;  %7672 = vmatprep.subr.bf16.mxu1 %v6099_v32  ;;  %v6324_v1 = vunpack.c.h.s8.bf16 %v4564_v59  ;;  %v6355_v32 = vunpack.c.l.s8.bf16 %v4595_v61  ;;  %v4692_v59 = vld [vmem:[%s12268_s12 + $0x1a50] sm:$0xff] }
 0x7c2   : > { %7836 = vmatprep.subr.bf16.mxu0 %v6101_v36  ;;  %v6357_v36 = vunpack.c.l.s8.bf16 %v4597_v44 }
 0x7c4   : > { %7673 = vmatpush1.bf16.msra.mxu1 %v6098_v20  ;;  %v6354_v20 = vunpack.c.l.s8.bf16 %v4594_v11 }
 0x7c5   : > { %7837 = vmatpush1.bf16.msra.mxu0 %v6100_v10  ;;  %7674 = vmatprep.subr.bf16.mxu1 %v6131_v43  ;;  %v6356_v10 = vunpack.c.l.s8.bf16 %v4596_v34  ;;  %v6387_v43 = vunpack.c.h.s8.bf16 %v4595_v61  ;;  %v4723_v61 = vld [vmem:[%s12268_s12 + $0x1b48] sm:$0xff] }
 0x7c6   : > { %7838 = vmatprep.subr.bf16.mxu0 %v6133_v2  ;;  %v6389_v2 = vunpack.c.h.s8.bf16 %v4597_v44  ;;  %v11225_v44 = vld [vmem:[%s12797_s24] sm:$0xff] }
 0x7c8   : > { %7675 = vmatpush1.bf16.msra.mxu1 %v6130_v47  ;;  %v6386_v47 = vunpack.c.h.s8.bf16 %v4594_v11  ;;  %v9577_v11 = vrot.slane %v11225_v44, %v12513_v60 }
 0x7c9   : > { %7839 = vmatpush1.bf16.msra.mxu0 %v6132_v6  ;;  %7676 = vmatprep.subr.bf16.mxu1 %v6163_v7  ;;  %v6388_v6 = vunpack.c.h.s8.bf16 %v4596_v34  ;;  %v6419_v7 = vunpack.c.l.s8.bf16 %v4627_v3  ;;  %v11226_v34 = vld [vmem:[%s12800_s21] sm:$0xff] }
 0x7ca   : > { %7840 = vmatprep.subr.bf16.mxu0 %v6165_v12  ;;  %v6421_v12 = vunpack.c.l.s8.bf16 %v4629_v4 }
 0x7cc   : > { %7677 = vmatpush1.bf16.msra.mxu1 %v6162_v17  ;;  %v6418_v17 = vunpack.c.l.s8.bf16 %v4626_v45 }
 0x7cd   : > { %7841 = vmatpush1.bf16.msra.mxu0 %v6164_v27  ;;  %7678 = vmatprep.subr.bf16.mxu1 %v6195_v33  ;;  %v6420_v27 = vunpack.c.l.s8.bf16 %v4628_v13  ;;  %v6451_v33 = vunpack.c.h.s8.bf16 %v4627_v3  ;;  %v4722_v3 = vld [vmem:[%s12268_s12 + $0x1b40] sm:$0xff] }
 0x7ce   : > { %7842 = vmatprep.subr.bf16.mxu0 %v6197_v24  ;;  %v4659_v24 = vld [vmem:[%s12268_s12 + $0x1948] sm:$0xff] }
 0x7d0   : > { %7679 = vmatpush1.bf16.msra.mxu1 %v6194_v28  ;;  %v6450_v28 = vunpack.c.h.s8.bf16 %v4626_v45  ;;  %v4724_v45 = vld [vmem:[%s12268_s12 + $0x1b50] sm:$0xff] }
 0x7d1   : > { %7843 = vmatpush1.bf16.msra.mxu0 %v6196_v18  ;;  %7680 = vmatprep.subr.bf16.mxu1 %v6227_v41  ;;  %v6452_v18 = vunpack.c.h.s8.bf16 %v4628_v13  ;;  %v6483_v41 = vunpack.c.l.s8.bf16 %v4659_v24 }
 0x7d2   : > { %7844 = vmatprep.subr.bf16.mxu0 %v6229_v42  ;;  %v6485_v42 = vunpack.c.l.s8.bf16 %v4661_v26 }
 0x7d4   : > { %7681 = vmatpush1.bf16.msra.mxu1 %v6226_v46  ;;  %v6482_v46 = vunpack.c.l.s8.bf16 %v4658_v9 }
 0x7d5   : > { %7845 = vmatpush1.bf16.msra.mxu0 %v6228_v29  ;;  %7682 = vmatprep.subr.bf16.mxu1 %v6259_v35  ;;  %v6484_v29 = vunpack.c.l.s8.bf16 %v4660_v16  ;;  %v6515_v35 = vunpack.c.h.s8.bf16 %v4659_v24 }
 0x7d6   : > { %7846 = vmatprep.subr.bf16.mxu0 %v6261_v8  ;;  %v6517_v8 = vunpack.c.h.s8.bf16 %v4661_v26 }
 0x7d8   : > { %7683 = vmatpush1.bf16.msra.mxu1 %v6258_v38  ;;  %v6514_v38 = vunpack.c.h.s8.bf16 %v4658_v9 }
 0x7d9   : > { %7847 = vmatpush1.bf16.msra.mxu0 %v6260_v53  ;;  %7684 = vmatprep.subr.bf16.mxu1 %v6291_v40  ;;  %v6516_v53 = vunpack.c.h.s8.bf16 %v4660_v16  ;;  %v6547_v40 = vunpack.c.l.s8.bf16 %v4691_v30  ;;  %v6612_v16 = vunpack.c.l.s8.bf16 %v4724_v45 }
 0x7da   : > { %7848 = vmatprep.subr.bf16.mxu0 %v6293_v55  ;;  %v6549_v55 = vunpack.c.l.s8.bf16 %v4693_v15 }
 0x7dc   : > { %7685 = vmatpush1.bf16.msra.mxu1 %v6290_v22  ;;  %v6546_v22 = vunpack.c.l.s8.bf16 %v4690_v0 }
 0x7dd   : > { %7849 = vmatpush1.bf16.msra.mxu0 %v6292_v63  ;;  %7686 = vmatprep.subr.bf16.mxu1 %v6323_v49  ;;  %v6548_v63 = vunpack.c.l.s8.bf16 %v4692_v59  ;;  %v6579_v49 = vunpack.c.h.s8.bf16 %v4691_v30 }
 0x7de   : > { %7850 = vmatprep.subr.bf16.mxu0 %v6325_v57  ;;  %v6581_v57 = vunpack.c.h.s8.bf16 %v4693_v15  ;;  %v4755_v15 = vld [vmem:[%s12268_s12 + $0x1c48] sm:$0xff] }
 0x7e0   : > { %7687 = vmatpush1.bf16.msra.mxu1 %v6322_v62  ;;  %v9573_v62 = vrot.slane %v11225_v44, %v12508_v54 }
 0x7e1   : > { %7851 = vmatpush1.bf16.msra.mxu0 %v6324_v1  ;;  %7688 = vmatprep.subr.bf16.mxu1 %v6355_v32  ;;  %v4725_v1 = vld [vmem:[%s12268_s12 + $0x1b58] sm:$0xff]  ;;  %v9581_v32 = vrot.slane %v11225_v44, %v12549_v37 }
 0x7e2   : > { %7852 = vmatprep.subr.bf16.mxu0 %v6357_v36  ;;  %v6578_v36 = vunpack.c.h.s8.bf16 %v4690_v0  ;;  %v6645_v30 = vunpack.c.h.s8.bf16 %v4725_v1  ;;  %v6644_v0 = vunpack.c.h.s8.bf16 %v4724_v45 }
 0x7e4   : > { %7689 = vmatpush1.bf16.msra.mxu1 %v6354_v20  ;;  %v9773_v20 = vrot.slane %v11226_v34, %v12508_v54 }
 0x7e5   : > { %7853 = vmatpush1.bf16.msra.mxu0 %v6356_v10  ;;  %7690 = vmatprep.subr.bf16.mxu1 %v6387_v43  ;;  %v9585_v10 = vrot.slane %v11225_v44, %v12516_v58  ;;  %v6580_v43 = vunpack.c.h.s8.bf16 %v4692_v59  ;;  %v4754_v59 = vld [vmem:[%s12268_s12 + $0x1c40] sm:$0xff] }
 0x7e6   : > { %7854 = vmatprep.subr.bf16.mxu0 %v6389_v2  ;;  %v6611_v2 = vunpack.c.l.s8.bf16 %v4723_v61 }
 0x7e8   : > { %7691 = vmatpush1.bf16.msra.mxu1 %v6386_v47  ;;  %v9781_v47 = vrot.slane %v11226_v34, %v12549_v37 }
 0x7e9   : > { %7855 = vmatpush1.bf16.msra.mxu0 %v6388_v6  ;;  %7701 = vmatprep.subr.bf16.mxu1 %v6419_v7  ;;  %v9777_v6 = vrot.slane %v11226_v34, %v12513_v60  ;;  %v6613_v7 = vunpack.c.l.s8.bf16 %v4725_v1  ;;  %v4789_v1 = vld [vmem:[%s12268_s12 + $0x1d58] sm:$0xff] }
 0x7ea   : > { %7865 = vmatprep.subr.bf16.mxu0 %v6421_v12  ;;  %v6773_v45 = vunpack.c.h.s8.bf16 %v4789_v1 }
 0x7eb   : > { %7693 = vmatmul.mubr.bf16.vlgmr.msra.gmra.mrb[20].mxu1 %v12628_v19 }
 0x7ec   : > { %7857 = vmatmul.mubr.bf16.vlgmr.msra.gmra.mrb[24].mxu0 %v12628_v19  ;;  %7702 = vmatpush1.bf16.msra.mxu1 %v6418_v17 }
 0x7ed   : > { %7733 = vmatprep.mubr.bf16.mxu1 %v12634_v31  ;;  %7866 = vmatpush1.bf16.msra.mxu0 %v6420_v27  ;;  %v9785_v27 = vrot.slane %v11226_v34, %v12516_v58 }
 0x7ee   : > { %7897 = vmatprep.mubr.bf16.mxu0 %v12634_v31  ;;  %7703 = vmatprep.subr.bf16.mxu1 %v6451_v33 }
 0x7ef   : > { %7867 = vmatprep.subr.bf16.mxu0 %v6453_v25 }
 0x7f0   : > { %7704 = vmatpush1.bf16.msra.mxu1 %v6450_v28  ;;  %v6610_v28 = vunpack.c.l.s8.bf16 %v4722_v3 }
 0x7f1   : > { %7868 = vmatpush1.bf16.msra.mxu0 %v6452_v18  ;;  %7705 = vmatprep.subr.bf16.mxu1 %v6483_v41 }
 0x7f2   : > { %7869 = vmatprep.subr.bf16.mxu0 %v6485_v42 }
 0x7f4   : > { %7706 = vmatpush1.bf16.msra.mxu1 %v6482_v46  ;;  %v6643_v46 = vunpack.c.h.s8.bf16 %v4723_v61  ;;  %v6707_v61 = vunpack.c.h.s8.bf16 %v4755_v15 }
 0x7f5   : > { %7870 = vmatpush1.bf16.msra.mxu0 %v6484_v29  ;;  %7707 = vmatprep.subr.bf16.mxu1 %v6515_v35 }
 0x7f6   : > { %7871 = vmatprep.subr.bf16.mxu0 %v6517_v8 }
 0x7f8   : > { %7708 = vmatpush1.bf16.msra.mxu1 %v6514_v38 }
 0x7f9   : > { %7872 = vmatpush1.bf16.msra.mxu0 %v6516_v53  ;;  %7709 = vmatprep.subr.bf16.mxu1 %v6547_v40  ;;  %v4757_v53 = vld [vmem:[%s12268_s12 + $0x1c58] sm:$0xff]  ;;  %v6642_v40 = vunpack.c.h.s8.bf16 %v4722_v3 }
 0x7fa   : > { %7873 = vmatprep.subr.bf16.mxu0 %v6549_v55  ;;  %v6675_v55 = vunpack.c.l.s8.bf16 %v4755_v15  ;;  %v6709_v44 = vunpack.c.h.s8.bf16 %v4757_v53  ;;  %v4852_v15 = vld [vmem:[%s12268_s12 + $0x1f50] sm:$0xff] }
 0x7fc   : > { %7710 = vmatpush1.bf16.msra.mxu1 %v6546_v22  ;;  %v6677_v22 = vunpack.c.l.s8.bf16 %v4757_v53  ;;  %v6868_v53 = vunpack.c.l.s8.bf16 %v4852_v15 }
 0x7fd   : > { %7874 = vmatpush1.bf16.msra.mxu0 %v6548_v63  ;;  %7711 = vmatprep.subr.bf16.mxu1 %v6579_v49  ;;  %v4756_v63 = vld [vmem:[%s12268_s12 + $0x1c50] sm:$0xff]  ;;  %v6674_v49 = vunpack.c.l.s8.bf16 %v4754_v59 }
 0x7fe   : > { %v7407_v4 = vpop.f32.mrb[16].mxu1  ;;  %7875 = vmatprep.subr.bf16.mxu0 %v6581_v57  ;;  %v6676_v57 = vunpack.c.l.s8.bf16 %v4756_v63 }
 0x7ff   : > { %v9718_v12 = vmul.f32 %v9573_v62, %v7407_v4  ;;  %v7571_v13 = vpop.f32.mrb[20].mxu0  ;;  %v7409_v17 = vpop.f32.mrb[17].mxu1  ;;  %v4787_v62 = vld [vmem:[%s12268_s12 + $0x1d48] sm:$0xff] }
 0x800   : > { %v9720_v33 = vmul.f32 %v9581_v32, %v7571_v13  ;;  %v9719_v24 = vmul.f32 %v9577_v11, %v7409_v17  ;;  %v7573_v25 = vpop.f32.mrb[21].mxu0  ;;  %v7411_v26 = vpop.f32.mrb[18].mxu1  ;;  %7712 = vmatpush1.bf16.msra.mxu1 %v6578_v36  ;;  %v6706_v32 = vunpack.c.h.s8.bf16 %v4754_v59  ;;  %v6708_v36 = vunpack.c.h.s8.bf16 %v4756_v63  ;;  %v4821_v13 = vld [vmem:[%s12268_s12 + $0x1e58] sm:$0xff] }
 0x801   : > { %v9918_v18 = vadd.f32 %v9773_v20, %v9718_v12  ;;  %v9721_v41 = vmul.f32 %v9585_v10, %v7573_v25  ;;  %v7575_v9 = vpop.f32.mrb[22].mxu0  ;;  %7876 = vmatpush1.bf16.msra.mxu0 %v6580_v43  ;;  %v7412_v42 = vpop.f32.mrb[19].mxu1  ;;  %7713 = vmatprep.subr.bf16.mxu1 %v6611_v2  ;;  %v6739_v34 = vunpack.c.l.s8.bf16 %v4787_v62  ;;  %v4786_v20 = vld [vmem:[%s12268_s12 + $0x1d40] sm:$0xff]  ;;  %v6741_v43 = vunpack.c.l.s8.bf16 %v4789_v1  ;;  %v4788_v2 = vld [vmem:[%s12268_s12 + $0x1d50] sm:$0xff]  ;;  %v4819_v12 = vld [vmem:[%s12268_s12 + $0x1e48] sm:$0xff] }
 0x802   : > { %v9920_v29 = vadd.f32 %v9781_v47, %v9720_v33  ;;  %v9919_v35 = vadd.f32 %v9777_v6, %v9719_v24  ;;  %v7576_v8 = vpop.f32.mrb[23].mxu0  ;;  %7877 = vmatprep.subr.bf16.mxu0 %v6613_v7  ;;  %v6738_v47 = vunpack.c.l.s8.bf16 %v4786_v20  ;;  %v6740_v6 = vunpack.c.l.s8.bf16 %v4788_v2  ;;  %v4818_v24 = vld [vmem:[%s12268_s12 + $0x1e40] sm:$0xff]  ;;  %v4820_v26 = vld [vmem:[%s12268_s12 + $0x1e50] sm:$0xff]  ;;  %v4851_v42 = vld [vmem:[%s12268_s12 + $0x1f48] sm:$0xff] }
 0x803   : > { %11167 = vtanh.f32 %v9918_v18  ;;  %v9921_v38 = vadd.f32 %v9785_v27, %v9721_v41  ;;  %v6771_v7 = vunpack.c.h.s8.bf16 %v4787_v62  ;;  %v6770_v17 = vunpack.c.h.s8.bf16 %v4786_v20  ;;  %v4850_v8 = vld [vmem:[%s12268_s12 + $0x1f40] sm:$0xff]  ;;  %v3865_v59 = vld [vmem:[%s12268_s12 + $0x78] sm:$0xff] }
 0x804   : > { %11169 = vtanh.f32 %v9920_v29  ;;  %7714 = vmatpush1.bf16.msra.mxu1 %v6610_v28  ;;  %v6772_v27 = vunpack.c.h.s8.bf16 %v4788_v2  ;;  %v6803_v33 = vunpack.c.l.s8.bf16 %v4819_v12  ;;  %v6805_v25 = vunpack.c.l.s8.bf16 %v4821_v13  ;;  %v3894_v2 = vld [vmem:[%s12268_s12 + $0x160] sm:$0xff] }
 0x805   : > { %11171 = vtanh.f32 %v9919_v35  ;;  %7878 = vmatpush1.bf16.msra.mxu0 %v6612_v16  ;;  %7715 = vmatprep.subr.bf16.mxu1 %v6643_v46  ;;  %v6802_v28 = vunpack.c.l.s8.bf16 %v4818_v24  ;;  %v6804_v18 = vunpack.c.l.s8.bf16 %v4820_v26  ;;  %v6835_v41 = vunpack.c.h.s8.bf16 %v4819_v12  ;;  %v4853_v16 = vld [vmem:[%s12268_s12 + $0x1f58] sm:$0xff]  ;;  %v3927_v12 = vld [vmem:[%s12268_s12 + $0x268] sm:$0xff] }
 0x806   : > { %11173 = vtanh.f32 %v9921_v38  ;;  %7879 = vmatprep.subr.bf16.mxu0 %v6645_v30  ;;  %v6837_v9 = vunpack.c.h.s8.bf16 %v4821_v13  ;;  %v6834_v46 = vunpack.c.h.s8.bf16 %v4818_v24  ;;  %v6836_v29 = vunpack.c.h.s8.bf16 %v4820_v26  ;;  %v3929_v13 = vld [vmem:[%s12268_s12 + $0x278] sm:$0xff]  ;;  %v3926_v24 = vld [vmem:[%s12268_s12 + $0x260] sm:$0xff]  ;;  %v3928_v26 = vld [vmem:[%s12268_s12 + $0x270] sm:$0xff] }
 0x807   : > { %v6867_v35 = vunpack.c.l.s8.bf16 %v4851_v42  ;;  %v6869_v30 = vunpack.c.l.s8.bf16 %v4853_v16  ;;  %v6866_v38 = vunpack.c.l.s8.bf16 %v4850_v8  ;;  %v6900_v63 = vunpack.c.h.s8.bf16 %v4852_v15  ;;  %v3960_v15 = vld [vmem:[%s12268_s12 + $0x370] sm:$0xff] }
 0x808   : > { %7716 = vmatpush1.bf16.msra.mxu1 %v6642_v40  ;;  %v6899_v40 = vunpack.c.h.s8.bf16 %v4851_v42  ;;  %v3959_v42 = vld [vmem:[%s12268_s12 + $0x368] sm:$0xff] }
 0x809   : > { %7880 = vmatpush1.bf16.msra.mxu0 %v6644_v0  ;;  %7717 = vmatprep.subr.bf16.mxu1 %v6675_v55  ;;  %v6901_v0 = vunpack.c.h.s8.bf16 %v4853_v16  ;;  %v3863_v55 = vld [vmem:[%s12268_s12 + $0x68] sm:$0xff]  ;;  %v3961_v16 = vld [vmem:[%s12268_s12 + $0x378] sm:$0xff] }
 0x80a   : > { %7881 = vmatprep.subr.bf16.mxu0 %v6677_v22  ;;  %v6898_v22 = vunpack.c.h.s8.bf16 %v4850_v8  ;;  %v3958_v8 = vld [vmem:[%s12268_s12 + $0x360] sm:$0xff] }
 0x80c   : > { %7718 = vmatpush1.bf16.msra.mxu1 %v6674_v49  ;;  %v4887_v49 = vunpack.c.l.s8.bf16 %v3863_v55 }
 0x80d   : > { %v11168_v11 = vpop.eup %11167  ;;  %7882 = vmatpush1.bf16.msra.mxu0 %v6676_v57  ;;  %7719 = vmatprep.subr.bf16.mxu1 %v6707_v61  ;;  %v3862_v57 = vld [vmem:[%s12268_s12 + $0x60] sm:$0xff]  ;;  %v4889_v61 = vunpack.c.l.s8.bf16 %v3865_v59 }
 0x80e   : > { %v11170_v10 = vpop.eup %11169  ;;  %9982 = vst [vmem:[%s12834_s4 + $0x20] sm:$0xff] %v11168_v11  ;;  %7883 = vmatprep.subr.bf16.mxu0 %v6709_v44  ;;  %v3864_v44 = vld [vmem:[%s12268_s12 + $0x70] sm:$0xff]  ;;  %v4886_v62 = vunpack.c.l.s8.bf16 %v3862_v57  ;;  %v3895_v11 = vld [vmem:[%s12268_s12 + $0x168] sm:$0xff]  ;;  %v4918_v20 = vunpack.c.h.s8.bf16 %v3862_v57  ;;  %v3990_v57 = vld [vmem:[%s12268_s12 + $0x460] sm:$0xff] }
 0x80f   : > { %v11172_v3 = vpop.eup %11171  ;;  %9984 = vst [vmem:[%s12834_s4 + $0x30] sm:$0xff] %v11170_v10  ;;  %v4888_v1 = vunpack.c.l.s8.bf16 %v3864_v44  ;;  %v4920_v10 = vunpack.c.h.s8.bf16 %v3864_v44  ;;  %v3992_v44 = vld [vmem:[%s12268_s12 + $0x470] sm:$0xff] }
 0x810   : > { %v11174_v4 = vpop.eup %11173  ;;  %9983 = vst [vmem:[%s12834_s4 + $0x28] sm:$0xff] %v11172_v3  ;;  %7720 = vmatpush1.bf16.msra.mxu1 %v6706_v32  ;;  %v4919_v32 = vunpack.c.h.s8.bf16 %v3863_v55  ;;  %v3991_v55 = vld [vmem:[%s12268_s12 + $0x468] sm:$0xff] }
 0x811   : > { %9985 = vst [vmem:[%s12834_s4 + $0x38] sm:$0xff] %v11174_v4  ;;  %7884 = vmatpush1.bf16.msra.mxu0 %v6708_v36  ;;  %7721 = vmatprep.subr.bf16.mxu1 %v6739_v34  ;;  %v4921_v36 = vunpack.c.h.s8.bf16 %v3865_v59  ;;  %v3897_v34 = vld [vmem:[%s12268_s12 + $0x178] sm:$0xff]  ;;  %v3896_v4 = vld [vmem:[%s12268_s12 + $0x170] sm:$0xff] }
 0x812   : > { %7885 = vmatprep.subr.bf16.mxu0 %v6741_v43  ;;  %v4951_v43 = vunpack.c.l.s8.bf16 %v3895_v11  ;;  %v4953_v3 = vunpack.c.l.s8.bf16 %v3897_v34  ;;  %v3993_v59 = vld [vmem:[%s12268_s12 + $0x478] sm:$0xff] }
 0x814   : > { %7722 = vmatpush1.bf16.msra.mxu1 %v6738_v47  ;;  %v4950_v47 = vunpack.c.l.s8.bf16 %v3894_v2 }
 0x815   : > { %7886 = vmatpush1.bf16.msra.mxu0 %v6740_v6  ;;  %7723 = vmatprep.subr.bf16.mxu1 %v6771_v7  ;;  %v4952_v6 = vunpack.c.l.s8.bf16 %v3896_v4  ;;  %v4983_v7 = vunpack.c.h.s8.bf16 %v3895_v11  ;;  %v5177_v11 = vunpack.c.h.s8.bf16 %v3993_v59 }
 0x816   : > { %7887 = vmatprep.subr.bf16.mxu0 %v6773_v45  ;;  %v4985_v45 = vunpack.c.h.s8.bf16 %v3897_v34  ;;  %v4025_v34 = vld [vmem:[%s12268_s12 + $0x578] sm:$0xff] }
 0x818   : > { %7724 = vmatpush1.bf16.msra.mxu1 %v6770_v17  ;;  %v4982_v17 = vunpack.c.h.s8.bf16 %v3894_v2  ;;  %v4022_v2 = vld [vmem:[%s12268_s12 + $0x560] sm:$0xff] }
 0x819   : > { %7888 = vmatpush1.bf16.msra.mxu0 %v6772_v27  ;;  %7725 = vmatprep.subr.bf16.mxu1 %v6803_v33  ;;  %v4984_v27 = vunpack.c.h.s8.bf16 %v3896_v4  ;;  %v5015_v33 = vunpack.c.l.s8.bf16 %v3927_v12  ;;  %v4024_v4 = vld [vmem:[%s12268_s12 + $0x570] sm:$0xff] }
 0x81a   : > { %7889 = vmatprep.subr.bf16.mxu0 %v6805_v25  ;;  %v5017_v25 = vunpack.c.l.s8.bf16 %v3929_v13 }
 0x81c   : > { %7726 = vmatpush1.bf16.msra.mxu1 %v6802_v28  ;;  %v5014_v28 = vunpack.c.l.s8.bf16 %v3926_v24 }
 0x81d   : > { %7890 = vmatpush1.bf16.msra.mxu0 %v6804_v18  ;;  %7727 = vmatprep.subr.bf16.mxu1 %v6835_v41  ;;  %v5016_v18 = vunpack.c.l.s8.bf16 %v3928_v26  ;;  %v5047_v41 = vunpack.c.h.s8.bf16 %v3927_v12  ;;  %v4055_v12 = vld [vmem:[%s12268_s12 + $0x668] sm:$0xff] }
 0x81e   : > { %7891 = vmatprep.subr.bf16.mxu0 %v6837_v9  ;;  %v5049_v9 = vunpack.c.h.s8.bf16 %v3929_v13  ;;  %v4057_v13 = vld [vmem:[%s12268_s12 + $0x678] sm:$0xff] }
 0x820   : > { %7728 = vmatpush1.bf16.msra.mxu1 %v6834_v46  ;;  %v5046_v46 = vunpack.c.h.s8.bf16 %v3926_v24  ;;  %v4054_v24 = vld [vmem:[%s12268_s12 + $0x660] sm:$0xff] }
 0x821   : > { %7892 = vmatpush1.bf16.msra.mxu0 %v6836_v29  ;;  %7729 = vmatprep.subr.bf16.mxu1 %v6867_v35  ;;  %v5048_v29 = vunpack.c.h.s8.bf16 %v3928_v26  ;;  %v5079_v35 = vunpack.c.l.s8.bf16 %v3959_v42  ;;  %v4056_v26 = vld [vmem:[%s12268_s12 + $0x670] sm:$0xff] }
 0x822   : > { %7893 = vmatprep.subr.bf16.mxu0 %v6869_v30  ;;  %v5081_v30 = vunpack.c.l.s8.bf16 %v3961_v16 }
 0x824   : > { %7730 = vmatpush1.bf16.msra.mxu1 %v6866_v38  ;;  %v5078_v38 = vunpack.c.l.s8.bf16 %v3958_v8 }
 0x825   : > { %7894 = vmatpush1.bf16.msra.mxu0 %v6868_v53  ;;  %7731 = vmatprep.subr.bf16.mxu1 %v6899_v40  ;;  %v5080_v53 = vunpack.c.l.s8.bf16 %v3960_v15  ;;  %v5111_v40 = vunpack.c.h.s8.bf16 %v3959_v42  ;;  %v4087_v42 = vld [vmem:[%s12268_s12 + $0x768] sm:$0xff] }
 0x826   : > { %7895 = vmatprep.subr.bf16.mxu0 %v6901_v0  ;;  %v5113_v0 = vunpack.c.h.s8.bf16 %v3961_v16  ;;  %v4089_v16 = vld [vmem:[%s12268_s12 + $0x778] sm:$0xff] }
 0x828   : > { %7732 = vmatpush1.bf16.msra.mxu1 %v6898_v22  ;;  %v5110_v22 = vunpack.c.h.s8.bf16 %v3958_v8  ;;  %v4086_v8 = vld [vmem:[%s12268_s12 + $0x760] sm:$0xff] }
 0x829   : > { %7896 = vmatpush1.bf16.msra.mxu0 %v6900_v63  ;;  %7906 = vmatprep.subr.bf16.mxu1 %v4887_v49  ;;  %v5112_v63 = vunpack.c.h.s8.bf16 %v3960_v15  ;;  %v5143_v49 = vunpack.c.l.s8.bf16 %v3991_v55  ;;  %v4088_v15 = vld [vmem:[%s12268_s12 + $0x770] sm:$0xff] }
 0x82a   : > { %8070 = vmatprep.subr.bf16.mxu0 %v4889_v61  ;;  %v5145_v61 = vunpack.c.l.s8.bf16 %v3993_v59  ;;  %v4121_v59 = vld [vmem:[%s12268_s12 + $0x878] sm:$0xff] }
 0x82b   : > { %7734 = vmatmul.mubr.bf16.vlgmr.msra.gmra.mrb[20].mxu1 %v12673_v51 }
 0x82c   : > { %7898 = vmatmul.mubr.bf16.vlgmr.msra.gmra.mrb[24].mxu0 %v12673_v51  ;;  %7907 = vmatpush1.bf16.msra.mxu1 %v4886_v62  ;;  %v5142_v62 = vunpack.c.l.s8.bf16 %v3990_v57 }
 0x82d   : > { %7938 = vmatprep.mubr.bf16.mxu1 %v12460_v52  ;;  %8071 = vmatpush1.bf16.msra.mxu0 %v4888_v1  ;;  %v5144_v1 = vunpack.c.l.s8.bf16 %v3992_v44 }
 0x82e   : > { %8102 = vmatprep.mubr.bf16.mxu0 %v12460_v52  ;;  %7908 = vmatprep.subr.bf16.mxu1 %v4919_v32  ;;  %v5175_v32 = vunpack.c.h.s8.bf16 %v3991_v55  ;;  %v4119_v55 = vld [vmem:[%s12268_s12 + $0x868] sm:$0xff] }
 0x82f   : > { %8072 = vmatprep.subr.bf16.mxu0 %v4921_v36  ;;  %v4023_v36 = vld [vmem:[%s12268_s12 + $0x568] sm:$0xff] }
 0x830   : > { %7909 = vmatpush1.bf16.msra.mxu1 %v4918_v20  ;;  %v5174_v20 = vunpack.c.h.s8.bf16 %v3990_v57  ;;  %v4118_v57 = vld [vmem:[%s12268_s12 + $0x860] sm:$0xff] }
 0x831   : > { %8073 = vmatpush1.bf16.msra.mxu0 %v4920_v10  ;;  %7910 = vmatprep.subr.bf16.mxu1 %v4951_v43  ;;  %v5176_v10 = vunpack.c.h.s8.bf16 %v3992_v44  ;;  %v5207_v43 = vunpack.c.l.s8.bf16 %v4023_v36  ;;  %v4120_v44 = vld [vmem:[%s12268_s12 + $0x870] sm:$0xff] }
 0x832   : > { %8074 = vmatprep.subr.bf16.mxu0 %v4953_v3  ;;  %v5209_v3 = vunpack.c.l.s8.bf16 %v4025_v34 }
 0x834   : > { %7911 = vmatpush1.bf16.msra.mxu1 %v4950_v47  ;;  %v5206_v47 = vunpack.c.l.s8.bf16 %v4022_v2 }
 0x835   : > { %8075 = vmatpush1.bf16.msra.mxu0 %v4952_v6  ;;  %7912 = vmatprep.subr.bf16.mxu1 %v4983_v7  ;;  %v5208_v6 = vunpack.c.l.s8.bf16 %v4024_v4  ;;  %v5239_v7 = vunpack.c.h.s8.bf16 %v4023_v36  ;;  %v5433_v36 = vunpack.c.h.s8.bf16 %v4121_v59 }
 0x836   : > { %8076 = vmatprep.subr.bf16.mxu0 %v4985_v45  ;;  %v5241_v45 = vunpack.c.h.s8.bf16 %v4025_v34  ;;  %v4153_v34 = vld [vmem:[%s12268_s12 + $0x978] sm:$0xff] }
 0x838   : > { %7913 = vmatpush1.bf16.msra.mxu1 %v4982_v17  ;;  %v5238_v17 = vunpack.c.h.s8.bf16 %v4022_v2  ;;  %v4150_v2 = vld [vmem:[%s12268_s12 + $0x960] sm:$0xff] }
 0x839   : > { %8077 = vmatpush1.bf16.msra.mxu0 %v4984_v27  ;;  %7914 = vmatprep.subr.bf16.mxu1 %v5015_v33  ;;  %v5240_v27 = vunpack.c.h.s8.bf16 %v4024_v4  ;;  %v5271_v33 = vunpack.c.l.s8.bf16 %v4055_v12  ;;  %v4152_v4 = vld [vmem:[%s12268_s12 + $0x970] sm:$0xff] }
 0x83a   : > { %8078 = vmatprep.subr.bf16.mxu0 %v5017_v25  ;;  %v5273_v25 = vunpack.c.l.s8.bf16 %v4057_v13 }
 0x83c   : > { %7915 = vmatpush1.bf16.msra.mxu1 %v5014_v28  ;;  %v5270_v28 = vunpack.c.l.s8.bf16 %v4054_v24 }
 0x83d   : > { %8079 = vmatpush1.bf16.msra.mxu0 %v5016_v18  ;;  %7916 = vmatprep.subr.bf16.mxu1 %v5047_v41  ;;  %v5272_v18 = vunpack.c.l.s8.bf16 %v4056_v26  ;;  %v5303_v41 = vunpack.c.h.s8.bf16 %v4055_v12  ;;  %v4183_v12 = vld [vmem:[%s12268_s12 + $0xa68] sm:$0xff] }
 0x83e   : > { %8080 = vmatprep.subr.bf16.mxu0 %v5049_v9  ;;  %v5305_v9 = vunpack.c.h.s8.bf16 %v4057_v13  ;;  %v4185_v13 = vld [vmem:[%s12268_s12 + $0xa78] sm:$0xff] }
 0x840   : > { %7917 = vmatpush1.bf16.msra.mxu1 %v5046_v46  ;;  %v5302_v46 = vunpack.c.h.s8.bf16 %v4054_v24  ;;  %v4182_v24 = vld [vmem:[%s12268_s12 + $0xa60] sm:$0xff] }
 0x841   : > { %8081 = vmatpush1.bf16.msra.mxu0 %v5048_v29  ;;  %7918 = vmatprep.subr.bf16.mxu1 %v5079_v35  ;;  %v5304_v29 = vunpack.c.h.s8.bf16 %v4056_v26  ;;  %v5335_v35 = vunpack.c.l.s8.bf16 %v4087_v42  ;;  %v4184_v26 = vld [vmem:[%s12268_s12 + $0xa70] sm:$0xff] }
 0x842   : > { %8082 = vmatprep.subr.bf16.mxu0 %v5081_v30  ;;  %v5337_v30 = vunpack.c.l.s8.bf16 %v4089_v16 }
 0x844   : > { %7919 = vmatpush1.bf16.msra.mxu1 %v5078_v38  ;;  %v5334_v38 = vunpack.c.l.s8.bf16 %v4086_v8 }
 0x845   : > { %8083 = vmatpush1.bf16.msra.mxu0 %v5080_v53  ;;  %7920 = vmatprep.subr.bf16.mxu1 %v5111_v40  ;;  %v5336_v53 = vunpack.c.l.s8.bf16 %v4088_v15  ;;  %v5367_v40 = vunpack.c.h.s8.bf16 %v4087_v42  ;;  %v4215_v42 = vld [vmem:[%s12268_s12 + $0xb68] sm:$0xff] }
 0x846   : > { %8084 = vmatprep.subr.bf16.mxu0 %v5113_v0  ;;  %v5369_v0 = vunpack.c.h.s8.bf16 %v4089_v16  ;;  %v4217_v16 = vld [vmem:[%s12268_s12 + $0xb78] sm:$0xff] }
 0x848   : > { %7921 = vmatpush1.bf16.msra.mxu1 %v5110_v22  ;;  %v5366_v22 = vunpack.c.h.s8.bf16 %v4086_v8  ;;  %v4214_v8 = vld [vmem:[%s12268_s12 + $0xb60] sm:$0xff] }
 0x849   : > { %8085 = vmatpush1.bf16.msra.mxu0 %v5112_v63  ;;  %7922 = vmatprep.subr.bf16.mxu1 %v5143_v49  ;;  %v5368_v63 = vunpack.c.h.s8.bf16 %v4088_v15  ;;  %v5399_v49 = vunpack.c.l.s8.bf16 %v4119_v55  ;;  %v4216_v15 = vld [vmem:[%s12268_s12 + $0xb70] sm:$0xff] }
 0x84a   : > { %8086 = vmatprep.subr.bf16.mxu0 %v5145_v61  ;;  %v5401_v61 = vunpack.c.l.s8.bf16 %v4121_v59  ;;  %v4249_v59 = vld [vmem:[%s12268_s12 + $0xc78] sm:$0xff] }
 0x84c   : > { %7923 = vmatpush1.bf16.msra.mxu1 %v5142_v62  ;;  %v5398_v62 = vunpack.c.l.s8.bf16 %v4118_v57 }
 0x84d   : > { %8087 = vmatpush1.bf16.msra.mxu0 %v5144_v1  ;;  %7924 = vmatprep.subr.bf16.mxu1 %v5175_v32  ;;  %v5400_v1 = vunpack.c.l.s8.bf16 %v4120_v44  ;;  %v5431_v32 = vunpack.c.h.s8.bf16 %v4119_v55  ;;  %v4247_v55 = vld [vmem:[%s12268_s12 + $0xc68] sm:$0xff] }
 0x84e   : > { %8088 = vmatprep.subr.bf16.mxu0 %v5177_v11  ;;  %v4151_v11 = vld [vmem:[%s12268_s12 + $0x968] sm:$0xff] }
 0x850   : > { %7925 = vmatpush1.bf16.msra.mxu1 %v5174_v20  ;;  %v5430_v20 = vunpack.c.h.s8.bf16 %v4118_v57  ;;  %v4246_v57 = vld [vmem:[%s12268_s12 + $0xc60] sm:$0xff] }
 0x851   : > { %8089 = vmatpush1.bf16.msra.mxu0 %v5176_v10  ;;  %7926 = vmatprep.subr.bf16.mxu1 %v5207_v43  ;;  %v5432_v10 = vunpack.c.h.s8.bf16 %v4120_v44  ;;  %v5463_v43 = vunpack.c.l.s8.bf16 %v4151_v11  ;;  %v4248_v44 = vld [vmem:[%s12268_s12 + $0xc70] sm:$0xff] }
 0x852   : > { %8090 = vmatprep.subr.bf16.mxu0 %v5209_v3  ;;  %v5465_v3 = vunpack.c.l.s8.bf16 %v4153_v34 }
 0x854   : > { %7927 = vmatpush1.bf16.msra.mxu1 %v5206_v47  ;;  %v5462_v47 = vunpack.c.l.s8.bf16 %v4150_v2 }
 0x855   : > { %8091 = vmatpush1.bf16.msra.mxu0 %v5208_v6  ;;  %7928 = vmatprep.subr.bf16.mxu1 %v5239_v7  ;;  %v5464_v6 = vunpack.c.l.s8.bf16 %v4152_v4  ;;  %v5495_v7 = vunpack.c.h.s8.bf16 %v4151_v11  ;;  %v5689_v11 = vunpack.c.h.s8.bf16 %v4249_v59 }
 0x856   : > { %8092 = vmatprep.subr.bf16.mxu0 %v5241_v45  ;;  %v5497_v45 = vunpack.c.h.s8.bf16 %v4153_v34  ;;  %v4281_v34 = vld [vmem:[%s12268_s12 + $0xd78] sm:$0xff] }
 0x858   : > { %7929 = vmatpush1.bf16.msra.mxu1 %v5238_v17  ;;  %v5494_v17 = vunpack.c.h.s8.bf16 %v4150_v2  ;;  %v4278_v2 = vld [vmem:[%s12268_s12 + $0xd60] sm:$0xff] }
 0x859   : > { %8093 = vmatpush1.bf16.msra.mxu0 %v5240_v27  ;;  %7930 = vmatprep.subr.bf16.mxu1 %v5271_v33  ;;  %v5496_v27 = vunpack.c.h.s8.bf16 %v4152_v4  ;;  %v5527_v33 = vunpack.c.l.s8.bf16 %v4183_v12  ;;  %v4280_v4 = vld [vmem:[%s12268_s12 + $0xd70] sm:$0xff] }
 0x85a   : > { %8094 = vmatprep.subr.bf16.mxu0 %v5273_v25  ;;  %v5529_v25 = vunpack.c.l.s8.bf16 %v4185_v13 }
 0x85c   : > { %7931 = vmatpush1.bf16.msra.mxu1 %v5270_v28  ;;  %v5526_v28 = vunpack.c.l.s8.bf16 %v4182_v24 }
 0x85d   : > { %8095 = vmatpush1.bf16.msra.mxu0 %v5272_v18  ;;  %7932 = vmatprep.subr.bf16.mxu1 %v5303_v41  ;;  %v5528_v18 = vunpack.c.l.s8.bf16 %v4184_v26  ;;  %v5559_v41 = vunpack.c.h.s8.bf16 %v4183_v12  ;;  %v4311_v12 = vld [vmem:[%s12268_s12 + $0xe68] sm:$0xff] }
 0x85e   : > { %8096 = vmatprep.subr.bf16.mxu0 %v5305_v9  ;;  %v5561_v9 = vunpack.c.h.s8.bf16 %v4185_v13  ;;  %v4313_v13 = vld [vmem:[%s12268_s12 + $0xe78] sm:$0xff] }
 0x860   : > { %7933 = vmatpush1.bf16.msra.mxu1 %v5302_v46  ;;  %v5558_v46 = vunpack.c.h.s8.bf16 %v4182_v24  ;;  %v4310_v24 = vld [vmem:[%s12268_s12 + $0xe60] sm:$0xff] }
 0x861   : > { %8097 = vmatpush1.bf16.msra.mxu0 %v5304_v29  ;;  %7934 = vmatprep.subr.bf16.mxu1 %v5335_v35  ;;  %v5560_v29 = vunpack.c.h.s8.bf16 %v4184_v26  ;;  %v5591_v35 = vunpack.c.l.s8.bf16 %v4215_v42  ;;  %v4312_v26 = vld [vmem:[%s12268_s12 + $0xe70] sm:$0xff] }
 0x862   : > { %8098 = vmatprep.subr.bf16.mxu0 %v5337_v30  ;;  %v5593_v30 = vunpack.c.l.s8.bf16 %v4217_v16 }
 0x864   : > { %7935 = vmatpush1.bf16.msra.mxu1 %v5334_v38  ;;  %v5590_v38 = vunpack.c.l.s8.bf16 %v4214_v8 }
 0x865   : > { %8099 = vmatpush1.bf16.msra.mxu0 %v5336_v53  ;;  %7936 = vmatprep.subr.bf16.mxu1 %v5367_v40  ;;  %v5592_v53 = vunpack.c.l.s8.bf16 %v4216_v15  ;;  %v5623_v40 = vunpack.c.h.s8.bf16 %v4215_v42  ;;  %v4343_v42 = vld [vmem:[%s12268_s12 + $0xf68] sm:$0xff] }
 0x866   : > { %8100 = vmatprep.subr.bf16.mxu0 %v5369_v0  ;;  %v5625_v0 = vunpack.c.h.s8.bf16 %v4217_v16  ;;  %v4345_v16 = vld [vmem:[%s12268_s12 + $0xf78] sm:$0xff] }
 0x868   : > { %7937 = vmatpush1.bf16.msra.mxu1 %v5366_v22  ;;  %v5622_v22 = vunpack.c.h.s8.bf16 %v4214_v8  ;;  %v4342_v8 = vld [vmem:[%s12268_s12 + $0xf60] sm:$0xff] }
 0x869   : > { %8101 = vmatpush1.bf16.msra.mxu0 %v5368_v63  ;;  %7947 = vmatprep.subr.bf16.mxu1 %v5399_v49  ;;  %v5624_v63 = vunpack.c.h.s8.bf16 %v4216_v15  ;;  %v5655_v49 = vunpack.c.l.s8.bf16 %v4247_v55  ;;  %v4344_v15 = vld [vmem:[%s12268_s12 + $0xf70] sm:$0xff] }
 0x86a   : > { %8111 = vmatprep.subr.bf16.mxu0 %v5401_v61  ;;  %v5657_v61 = vunpack.c.l.s8.bf16 %v4249_v59  ;;  %v4377_v59 = vld [vmem:[%s12268_s12 + $0x1078] sm:$0xff] }
 0x86b   : > { %7939 = vmatmul.mubr.bf16.vlgmr.msra.gmra.mrb[24].mxu1 %v12462_v56 }
 0x86c   : > { %8103 = vmatmul.mubr.bf16.vlgmr.msra.gmra.mrb[28].mxu0 %v12462_v56  ;;  %7948 = vmatpush1.bf16.msra.mxu1 %v5398_v62  ;;  %v5654_v62 = vunpack.c.l.s8.bf16 %v4246_v57 }
 0x86d   : > { %7979 = vmatprep.mubr.bf16.mxu1 %v12470_v39  ;;  %8112 = vmatpush1.bf16.msra.mxu0 %v5400_v1  ;;  %v5656_v1 = vunpack.c.l.s8.bf16 %v4248_v44 }
 0x86e   : > { %8143 = vmatprep.mubr.bf16.mxu0 %v12470_v39  ;;  %7949 = vmatprep.subr.bf16.mxu1 %v5431_v32  ;;  %v5687_v32 = vunpack.c.h.s8.bf16 %v4247_v55  ;;  %v4375_v55 = vld [vmem:[%s12268_s12 + $0x1068] sm:$0xff] }
 0x86f   : > { %8113 = vmatprep.subr.bf16.mxu0 %v5433_v36  ;;  %v4279_v36 = vld [vmem:[%s12268_s12 + $0xd68] sm:$0xff] }
 0x870   : > { %7950 = vmatpush1.bf16.msra.mxu1 %v5430_v20  ;;  %v5686_v20 = vunpack.c.h.s8.bf16 %v4246_v57  ;;  %v4374_v57 = vld [vmem:[%s12268_s12 + $0x1060] sm:$0xff] }
 0x871   : > { %8114 = vmatpush1.bf16.msra.mxu0 %v5432_v10  ;;  %7951 = vmatprep.subr.bf16.mxu1 %v5463_v43  ;;  %v5688_v10 = vunpack.c.h.s8.bf16 %v4248_v44  ;;  %v5719_v43 = vunpack.c.l.s8.bf16 %v4279_v36  ;;  %v4376_v44 = vld [vmem:[%s12268_s12 + $0x1070] sm:$0xff] }
 0x872   : > { %8115 = vmatprep.subr.bf16.mxu0 %v5465_v3  ;;  %v5721_v3 = vunpack.c.l.s8.bf16 %v4281_v34 }
 0x874   : > { %7952 = vmatpush1.bf16.msra.mxu1 %v5462_v47  ;;  %v5718_v47 = vunpack.c.l.s8.bf16 %v4278_v2 }
 0x875   : > { %8116 = vmatpush1.bf16.msra.mxu0 %v5464_v6  ;;  %7953 = vmatprep.subr.bf16.mxu1 %v5495_v7  ;;  %v5720_v6 = vunpack.c.l.s8.bf16 %v4280_v4  ;;  %v5751_v7 = vunpack.c.h.s8.bf16 %v4279_v36  ;;  %v5945_v36 = vunpack.c.h.s8.bf16 %v4377_v59 }
 0x876   : > { %8117 = vmatprep.subr.bf16.mxu0 %v5497_v45  ;;  %v5753_v45 = vunpack.c.h.s8.bf16 %v4281_v34  ;;  %v4409_v34 = vld [vmem:[%s12268_s12 + $0x1178] sm:$0xff] }
 0x878   : > { %7954 = vmatpush1.bf16.msra.mxu1 %v5494_v17  ;;  %v5750_v17 = vunpack.c.h.s8.bf16 %v4278_v2  ;;  %v4406_v2 = vld [vmem:[%s12268_s12 + $0x1160] sm:$0xff] }
 0x879   : > { %8118 = vmatpush1.bf16.msra.mxu0 %v5496_v27  ;;  %7955 = vmatprep.subr.bf16.mxu1 %v5527_v33  ;;  %v5752_v27 = vunpack.c.h.s8.bf16 %v4280_v4  ;;  %v5783_v33 = vunpack.c.l.s8.bf16 %v4311_v12  ;;  %v4408_v4 = vld [vmem:[%s12268_s12 + $0x1170] sm:$0xff] }
 0x87a   : > { %8119 = vmatprep.subr.bf16.mxu0 %v5529_v25  ;;  %v5785_v25 = vunpack.c.l.s8.bf16 %v4313_v13 }
 0x87c   : > { %7956 = vmatpush1.bf16.msra.mxu1 %v5526_v28  ;;  %v5782_v28 = vunpack.c.l.s8.bf16 %v4310_v24 }
 0x87d   : > { %8120 = vmatpush1.bf16.msra.mxu0 %v5528_v18  ;;  %7957 = vmatprep.subr.bf16.mxu1 %v5559_v41  ;;  %v5784_v18 = vunpack.c.l.s8.bf16 %v4312_v26  ;;  %v5815_v41 = vunpack.c.h.s8.bf16 %v4311_v12  ;;  %v4439_v12 = vld [vmem:[%s12268_s12 + $0x1268] sm:$0xff] }
 0x87e   : > { %8121 = vmatprep.subr.bf16.mxu0 %v5561_v9  ;;  %v5817_v9 = vunpack.c.h.s8.bf16 %v4313_v13  ;;  %v4441_v13 = vld [vmem:[%s12268_s12 + $0x1278] sm:$0xff] }
 0x880   : > { %7958 = vmatpush1.bf16.msra.mxu1 %v5558_v46  ;;  %v5814_v46 = vunpack.c.h.s8.bf16 %v4310_v24  ;;  %v4438_v24 = vld [vmem:[%s12268_s12 + $0x1260] sm:$0xff] }
 0x881   : > { %8122 = vmatpush1.bf16.msra.mxu0 %v5560_v29  ;;  %7959 = vmatprep.subr.bf16.mxu1 %v5591_v35  ;;  %v5816_v29 = vunpack.c.h.s8.bf16 %v4312_v26  ;;  %v5847_v35 = vunpack.c.l.s8.bf16 %v4343_v42  ;;  %v4440_v26 = vld [vmem:[%s12268_s12 + $0x1270] sm:$0xff] }
 0x882   : > { %8123 = vmatprep.subr.bf16.mxu0 %v5593_v30  ;;  %v5849_v30 = vunpack.c.l.s8.bf16 %v4345_v16 }
 0x884   : > { %7960 = vmatpush1.bf16.msra.mxu1 %v5590_v38  ;;  %v5846_v38 = vunpack.c.l.s8.bf16 %v4342_v8 }
 0x885   : > { %8124 = vmatpush1.bf16.msra.mxu0 %v5592_v53  ;;  %7961 = vmatprep.subr.bf16.mxu1 %v5623_v40  ;;  %v5848_v53 = vunpack.c.l.s8.bf16 %v4344_v15  ;;  %v5879_v40 = vunpack.c.h.s8.bf16 %v4343_v42  ;;  %v4471_v42 = vld [vmem:[%s12268_s12 + $0x1368] sm:$0xff] }
 0x886   : > { %8125 = vmatprep.subr.bf16.mxu0 %v5625_v0  ;;  %v5881_v0 = vunpack.c.h.s8.bf16 %v4345_v16  ;;  %v4473_v16 = vld [vmem:[%s12268_s12 + $0x1378] sm:$0xff] }
 0x888   : > { %7962 = vmatpush1.bf16.msra.mxu1 %v5622_v22  ;;  %v5878_v22 = vunpack.c.h.s8.bf16 %v4342_v8  ;;  %v4470_v8 = vld [vmem:[%s12268_s12 + $0x1360] sm:$0xff] }
 0x889   : > { %8126 = vmatpush1.bf16.msra.mxu0 %v5624_v63  ;;  %7963 = vmatprep.subr.bf16.mxu1 %v5655_v49  ;;  %v5880_v63 = vunpack.c.h.s8.bf16 %v4344_v15  ;;  %v5911_v49 = vunpack.c.l.s8.bf16 %v4375_v55  ;;  %v4472_v15 = vld [vmem:[%s12268_s12 + $0x1370] sm:$0xff] }
 0x88a   : > { %8127 = vmatprep.subr.bf16.mxu0 %v5657_v61  ;;  %v5913_v61 = vunpack.c.l.s8.bf16 %v4377_v59  ;;  %v4505_v59 = vld [vmem:[%s12268_s12 + $0x1478] sm:$0xff] }
 0x88c   : > { %7964 = vmatpush1.bf16.msra.mxu1 %v5654_v62  ;;  %v5910_v62 = vunpack.c.l.s8.bf16 %v4374_v57 }
 0x88d   : > { %8128 = vmatpush1.bf16.msra.mxu0 %v5656_v1  ;;  %7965 = vmatprep.subr.bf16.mxu1 %v5687_v32  ;;  %v5912_v1 = vunpack.c.l.s8.bf16 %v4376_v44  ;;  %v5943_v32 = vunpack.c.h.s8.bf16 %v4375_v55  ;;  %v4503_v55 = vld [vmem:[%s12268_s12 + $0x1468] sm:$0xff] }
 0x88e   : > { %8129 = vmatprep.subr.bf16.mxu0 %v5689_v11  ;;  %v4407_v11 = vld [vmem:[%s12268_s12 + $0x1168] sm:$0xff] }
 0x890   : > { %7966 = vmatpush1.bf16.msra.mxu1 %v5686_v20  ;;  %v5942_v20 = vunpack.c.h.s8.bf16 %v4374_v57  ;;  %v4502_v57 = vld [vmem:[%s12268_s12 + $0x1460] sm:$0xff] }
 0x891   : > { %8130 = vmatpush1.bf16.msra.mxu0 %v5688_v10  ;;  %7967 = vmatprep.subr.bf16.mxu1 %v5719_v43  ;;  %v5944_v10 = vunpack.c.h.s8.bf16 %v4376_v44  ;;  %v5975_v43 = vunpack.c.l.s8.bf16 %v4407_v11  ;;  %v4504_v44 = vld [vmem:[%s12268_s12 + $0x1470] sm:$0xff] }
 0x892   : > { %8131 = vmatprep.subr.bf16.mxu0 %v5721_v3  ;;  %v5977_v3 = vunpack.c.l.s8.bf16 %v4409_v34 }
 0x894   : > { %7968 = vmatpush1.bf16.msra.mxu1 %v5718_v47  ;;  %v5974_v47 = vunpack.c.l.s8.bf16 %v4406_v2 }
 0x895   : > { %8132 = vmatpush1.bf16.msra.mxu0 %v5720_v6  ;;  %7969 = vmatprep.subr.bf16.mxu1 %v5751_v7  ;;  %v5976_v6 = vunpack.c.l.s8.bf16 %v4408_v4  ;;  %v6007_v7 = vunpack.c.h.s8.bf16 %v4407_v11  ;;  %v6201_v11 = vunpack.c.h.s8.bf16 %v4505_v59 }
 0x896   : > { %8133 = vmatprep.subr.bf16.mxu0 %v5753_v45  ;;  %v6009_v45 = vunpack.c.h.s8.bf16 %v4409_v34  ;;  %v4537_v34 = vld [vmem:[%s12268_s12 + $0x1578] sm:$0xff] }
 0x898   : > { %7970 = vmatpush1.bf16.msra.mxu1 %v5750_v17  ;;  %v6006_v17 = vunpack.c.h.s8.bf16 %v4406_v2  ;;  %v4534_v2 = vld [vmem:[%s12268_s12 + $0x1560] sm:$0xff] }
 0x899   : > { %8134 = vmatpush1.bf16.msra.mxu0 %v5752_v27  ;;  %7971 = vmatprep.subr.bf16.mxu1 %v5783_v33  ;;  %v6008_v27 = vunpack.c.h.s8.bf16 %v4408_v4  ;;  %v6039_v33 = vunpack.c.l.s8.bf16 %v4439_v12  ;;  %v4536_v4 = vld [vmem:[%s12268_s12 + $0x1570] sm:$0xff] }
 0x89a   : > { %8135 = vmatprep.subr.bf16.mxu0 %v5785_v25  ;;  %v6041_v25 = vunpack.c.l.s8.bf16 %v4441_v13 }
 0x89c   : > { %7972 = vmatpush1.bf16.msra.mxu1 %v5782_v28  ;;  %v6038_v28 = vunpack.c.l.s8.bf16 %v4438_v24 }
 0x89d   : > { %8136 = vmatpush1.bf16.msra.mxu0 %v5784_v18  ;;  %7973 = vmatprep.subr.bf16.mxu1 %v5815_v41  ;;  %v6040_v18 = vunpack.c.l.s8.bf16 %v4440_v26  ;;  %v6071_v41 = vunpack.c.h.s8.bf16 %v4439_v12  ;;  %v4567_v12 = vld [vmem:[%s12268_s12 + $0x1668] sm:$0xff] }
 0x89e   : > { %8137 = vmatprep.subr.bf16.mxu0 %v5817_v9  ;;  %v6073_v9 = vunpack.c.h.s8.bf16 %v4441_v13  ;;  %v4569_v13 = vld [vmem:[%s12268_s12 + $0x1678] sm:$0xff] }
 0x8a0   : > { %7974 = vmatpush1.bf16.msra.mxu1 %v5814_v46  ;;  %v6070_v46 = vunpack.c.h.s8.bf16 %v4438_v24  ;;  %v4566_v24 = vld [vmem:[%s12268_s12 + $0x1660] sm:$0xff] }
 0x8a1   : > { %8138 = vmatpush1.bf16.msra.mxu0 %v5816_v29  ;;  %7975 = vmatprep.subr.bf16.mxu1 %v5847_v35  ;;  %v6072_v29 = vunpack.c.h.s8.bf16 %v4440_v26  ;;  %v6103_v35 = vunpack.c.l.s8.bf16 %v4471_v42  ;;  %v4568_v26 = vld [vmem:[%s12268_s12 + $0x1670] sm:$0xff] }
 0x8a2   : > { %8139 = vmatprep.subr.bf16.mxu0 %v5849_v30  ;;  %v6105_v30 = vunpack.c.l.s8.bf16 %v4473_v16 }
 0x8a4   : > { %7976 = vmatpush1.bf16.msra.mxu1 %v5846_v38  ;;  %v6102_v38 = vunpack.c.l.s8.bf16 %v4470_v8 }
 0x8a5   : > { %8140 = vmatpush1.bf16.msra.mxu0 %v5848_v53  ;;  %7977 = vmatprep.subr.bf16.mxu1 %v5879_v40  ;;  %v6104_v53 = vunpack.c.l.s8.bf16 %v4472_v15  ;;  %v6135_v40 = vunpack.c.h.s8.bf16 %v4471_v42  ;;  %v4599_v42 = vld [vmem:[%s12268_s12 + $0x1768] sm:$0xff] }
 0x8a6   : > { %8141 = vmatprep.subr.bf16.mxu0 %v5881_v0  ;;  %v6137_v0 = vunpack.c.h.s8.bf16 %v4473_v16  ;;  %v4601_v16 = vld [vmem:[%s12268_s12 + $0x1778] sm:$0xff] }
 0x8a8   : > { %7978 = vmatpush1.bf16.msra.mxu1 %v5878_v22  ;;  %v6134_v22 = vunpack.c.h.s8.bf16 %v4470_v8  ;;  %v4598_v8 = vld [vmem:[%s12268_s12 + $0x1760] sm:$0xff] }
 0x8a9   : > { %8142 = vmatpush1.bf16.msra.mxu0 %v5880_v63  ;;  %7988 = vmatprep.subr.bf16.mxu1 %v5911_v49  ;;  %v6136_v63 = vunpack.c.h.s8.bf16 %v4472_v15  ;;  %v6167_v49 = vunpack.c.l.s8.bf16 %v4503_v55  ;;  %v4600_v15 = vld [vmem:[%s12268_s12 + $0x1770] sm:$0xff] }
 0x8aa   : > { %8152 = vmatprep.subr.bf16.mxu0 %v5913_v61  ;;  %v6169_v61 = vunpack.c.l.s8.bf16 %v4505_v59  ;;  %v4633_v59 = vld [vmem:[%s12268_s12 + $0x1878] sm:$0xff] }
 0x8ab   : > { %7980 = vmatmul.mubr.bf16.vlgmr.msra.gmra.mrb[24].mxu1 %v12526_v5 }
 0x8ac   : > { %8144 = vmatmul.mubr.bf16.vlgmr.msra.gmra.mrb[28].mxu0 %v12526_v5  ;;  %7989 = vmatpush1.bf16.msra.mxu1 %v5910_v62  ;;  %v6166_v62 = vunpack.c.l.s8.bf16 %v4502_v57 }
 0x8ad   : > { %8020 = vmatprep.mubr.bf16.mxu1 %v12626_v14  ;;  %8153 = vmatpush1.bf16.msra.mxu0 %v5912_v1  ;;  %v6168_v1 = vunpack.c.l.s8.bf16 %v4504_v44 }
 0x8ae   : > { %8184 = vmatprep.mubr.bf16.mxu0 %v12626_v14  ;;  %7990 = vmatprep.subr.bf16.mxu1 %v5943_v32  ;;  %v6199_v32 = vunpack.c.h.s8.bf16 %v4503_v55  ;;  %v4631_v55 = vld [vmem:[%s12268_s12 + $0x1868] sm:$0xff] }
 0x8af   : > { %8154 = vmatprep.subr.bf16.mxu0 %v5945_v36  ;;  %v4535_v36 = vld [vmem:[%s12268_s12 + $0x1568] sm:$0xff] }
 0x8b0   : > { %7991 = vmatpush1.bf16.msra.mxu1 %v5942_v20  ;;  %v6198_v20 = vunpack.c.h.s8.bf16 %v4502_v57  ;;  %v4630_v57 = vld [vmem:[%s12268_s12 + $0x1860] sm:$0xff] }
 0x8b1   : > { %8155 = vmatpush1.bf16.msra.mxu0 %v5944_v10  ;;  %7992 = vmatprep.subr.bf16.mxu1 %v5975_v43  ;;  %v6200_v10 = vunpack.c.h.s8.bf16 %v4504_v44  ;;  %v6231_v43 = vunpack.c.l.s8.bf16 %v4535_v36  ;;  %v4632_v44 = vld [vmem:[%s12268_s12 + $0x1870] sm:$0xff] }
 0x8b2   : > { %8156 = vmatprep.subr.bf16.mxu0 %v5977_v3  ;;  %v6233_v3 = vunpack.c.l.s8.bf16 %v4537_v34 }
 0x8b4   : > { %7993 = vmatpush1.bf16.msra.mxu1 %v5974_v47  ;;  %v6230_v47 = vunpack.c.l.s8.bf16 %v4534_v2 }
 0x8b5   : > { %8157 = vmatpush1.bf16.msra.mxu0 %v5976_v6  ;;  %7994 = vmatprep.subr.bf16.mxu1 %v6007_v7  ;;  %v6232_v6 = vunpack.c.l.s8.bf16 %v4536_v4  ;;  %v6263_v7 = vunpack.c.h.s8.bf16 %v4535_v36  ;;  %v6457_v36 = vunpack.c.h.s8.bf16 %v4633_v59 }
 0x8b6   : > { %8158 = vmatprep.subr.bf16.mxu0 %v6009_v45  ;;  %v6265_v45 = vunpack.c.h.s8.bf16 %v4537_v34  ;;  %v4665_v34 = vld [vmem:[%s12268_s12 + $0x1978] sm:$0xff] }
 0x8b8   : > { %7995 = vmatpush1.bf16.msra.mxu1 %v6006_v17  ;;  %v6262_v17 = vunpack.c.h.s8.bf16 %v4534_v2  ;;  %v4662_v2 = vld [vmem:[%s12268_s12 + $0x1960] sm:$0xff] }
 0x8b9   : > { %8159 = vmatpush1.bf16.msra.mxu0 %v6008_v27  ;;  %7996 = vmatprep.subr.bf16.mxu1 %v6039_v33  ;;  %v6264_v27 = vunpack.c.h.s8.bf16 %v4536_v4  ;;  %v6295_v33 = vunpack.c.l.s8.bf16 %v4567_v12  ;;  %v4664_v4 = vld [vmem:[%s12268_s12 + $0x1970] sm:$0xff] }
 0x8ba   : > { %8160 = vmatprep.subr.bf16.mxu0 %v6041_v25  ;;  %v6297_v25 = vunpack.c.l.s8.bf16 %v4569_v13 }
 0x8bc   : > { %7997 = vmatpush1.bf16.msra.mxu1 %v6038_v28  ;;  %v6294_v28 = vunpack.c.l.s8.bf16 %v4566_v24 }
 0x8bd   : > { %8161 = vmatpush1.bf16.msra.mxu0 %v6040_v18  ;;  %7998 = vmatprep.subr.bf16.mxu1 %v6071_v41  ;;  %v6296_v18 = vunpack.c.l.s8.bf16 %v4568_v26  ;;  %v6327_v41 = vunpack.c.h.s8.bf16 %v4567_v12  ;;  %v4695_v12 = vld [vmem:[%s12268_s12 + $0x1a68] sm:$0xff] }
 0x8be   : > { %8162 = vmatprep.subr.bf16.mxu0 %v6073_v9  ;;  %v6329_v9 = vunpack.c.h.s8.bf16 %v4569_v13  ;;  %v4697_v13 = vld [vmem:[%s12268_s12 + $0x1a78] sm:$0xff] }
 0x8c0   : > { %7999 = vmatpush1.bf16.msra.mxu1 %v6070_v46  ;;  %v6326_v46 = vunpack.c.h.s8.bf16 %v4566_v24  ;;  %v4694_v24 = vld [vmem:[%s12268_s12 + $0x1a60] sm:$0xff] }
 0x8c1   : > { %8163 = vmatpush1.bf16.msra.mxu0 %v6072_v29  ;;  %8000 = vmatprep.subr.bf16.mxu1 %v6103_v35  ;;  %v6328_v29 = vunpack.c.h.s8.bf16 %v4568_v26  ;;  %v6359_v35 = vunpack.c.l.s8.bf16 %v4599_v42  ;;  %v4696_v26 = vld [vmem:[%s12268_s12 + $0x1a70] sm:$0xff] }
 0x8c2   : > { %8164 = vmatprep.subr.bf16.mxu0 %v6105_v30  ;;  %v6361_v30 = vunpack.c.l.s8.bf16 %v4601_v16 }
 0x8c4   : > { %8001 = vmatpush1.bf16.msra.mxu1 %v6102_v38  ;;  %v6358_v38 = vunpack.c.l.s8.bf16 %v4598_v8 }
 0x8c5   : > { %8165 = vmatpush1.bf16.msra.mxu0 %v6104_v53  ;;  %8002 = vmatprep.subr.bf16.mxu1 %v6135_v40  ;;  %v6360_v53 = vunpack.c.l.s8.bf16 %v4600_v15  ;;  %v6391_v40 = vunpack.c.h.s8.bf16 %v4599_v42  ;;  %v9747_v42 = vld [vmem:[%s12800_s21 + $0x8] sm:$0xff] }
 0x8c6   : > { %8166 = vmatprep.subr.bf16.mxu0 %v6137_v0  ;;  %v6393_v0 = vunpack.c.h.s8.bf16 %v4601_v16  ;;  %v6585_v16 = vunpack.c.h.s8.bf16 %v4697_v13 }
 0x8c8   : > { %8003 = vmatpush1.bf16.msra.mxu1 %v6134_v22  ;;  %v6390_v22 = vunpack.c.h.s8.bf16 %v4598_v8 }
 0x8c9   : > { %8167 = vmatpush1.bf16.msra.mxu0 %v6136_v63  ;;  %8004 = vmatprep.subr.bf16.mxu1 %v6167_v49  ;;  %v6392_v63 = vunpack.c.h.s8.bf16 %v4600_v15  ;;  %v6423_v49 = vunpack.c.l.s8.bf16 %v4631_v55  ;;  %v6582_v15 = vunpack.c.h.s8.bf16 %v4694_v24 }
 0x8ca   : > { %8168 = vmatprep.subr.bf16.mxu0 %v6169_v61  ;;  %v6425_v61 = vunpack.c.l.s8.bf16 %v4633_v59 }
 0x8cc   : > { %8005 = vmatpush1.bf16.msra.mxu1 %v6166_v62  ;;  %v6422_v62 = vunpack.c.l.s8.bf16 %v4630_v57 }
 0x8cd   : > { %8169 = vmatpush1.bf16.msra.mxu0 %v6168_v1  ;;  %8006 = vmatprep.subr.bf16.mxu1 %v6199_v32  ;;  %v6424_v1 = vunpack.c.l.s8.bf16 %v4632_v44  ;;  %v6455_v32 = vunpack.c.h.s8.bf16 %v4631_v55  ;;  %v4726_v55 = vld [vmem:[%s12268_s12 + $0x1b60] sm:$0xff] }
 0x8ce   : > { %8170 = vmatprep.subr.bf16.mxu0 %v6201_v11  ;;  %v4663_v11 = vld [vmem:[%s12268_s12 + $0x1968] sm:$0xff] }
 0x8d0   : > { %8007 = vmatpush1.bf16.msra.mxu1 %v6198_v20  ;;  %v6454_v20 = vunpack.c.h.s8.bf16 %v4630_v57  ;;  %v4728_v57 = vld [vmem:[%s12268_s12 + $0x1b70] sm:$0xff] }
 0x8d1   : > { %8171 = vmatpush1.bf16.msra.mxu0 %v6200_v10  ;;  %8008 = vmatprep.subr.bf16.mxu1 %v6231_v43  ;;  %v6456_v10 = vunpack.c.h.s8.bf16 %v4632_v44  ;;  %v6487_v43 = vunpack.c.l.s8.bf16 %v4663_v11 }
 0x8d2   : > { %8172 = vmatprep.subr.bf16.mxu0 %v6233_v3  ;;  %v6489_v3 = vunpack.c.l.s8.bf16 %v4665_v34 }
 0x8d4   : > { %8009 = vmatpush1.bf16.msra.mxu1 %v6230_v47  ;;  %v6486_v47 = vunpack.c.l.s8.bf16 %v4662_v2 }
 0x8d5   : > { %8173 = vmatpush1.bf16.msra.mxu0 %v6232_v6  ;;  %8010 = vmatprep.subr.bf16.mxu1 %v6263_v7  ;;  %v6488_v6 = vunpack.c.l.s8.bf16 %v4664_v4  ;;  %v6519_v7 = vunpack.c.h.s8.bf16 %v4663_v11 }
 0x8d6   : > { %8174 = vmatprep.subr.bf16.mxu0 %v6265_v45  ;;  %v6521_v45 = vunpack.c.h.s8.bf16 %v4665_v34 }
 0x8d8   : > { %8011 = vmatpush1.bf16.msra.mxu1 %v6262_v17  ;;  %v6518_v17 = vunpack.c.h.s8.bf16 %v4662_v2 }
 0x8d9   : > { %8175 = vmatpush1.bf16.msra.mxu0 %v6264_v27  ;;  %8012 = vmatprep.subr.bf16.mxu1 %v6295_v33  ;;  %v6520_v27 = vunpack.c.h.s8.bf16 %v4664_v4  ;;  %v6551_v33 = vunpack.c.l.s8.bf16 %v4695_v12  ;;  %v6616_v4 = vunpack.c.l.s8.bf16 %v4728_v57 }
 0x8da   : > { %8176 = vmatprep.subr.bf16.mxu0 %v6297_v25  ;;  %v6553_v25 = vunpack.c.l.s8.bf16 %v4697_v13  ;;  %v4759_v13 = vld [vmem:[%s12268_s12 + $0x1c68] sm:$0xff] }
 0x8dc   : > { %8013 = vmatpush1.bf16.msra.mxu1 %v6294_v28  ;;  %v6550_v28 = vunpack.c.l.s8.bf16 %v4694_v24  ;;  %v6648_v24 = vunpack.c.h.s8.bf16 %v4728_v57 }
 0x8dd   : > { %8177 = vmatpush1.bf16.msra.mxu0 %v6296_v18  ;;  %8014 = vmatprep.subr.bf16.mxu1 %v6327_v41  ;;  %v9547_v18 = vld [vmem:[%s12797_s24 + $0x8] sm:$0xff]  ;;  %v6552_v41 = vunpack.c.l.s8.bf16 %v4696_v26 }
 0x8de   : > { %8178 = vmatprep.subr.bf16.mxu0 %v6329_v9  ;;  %v6583_v9 = vunpack.c.h.s8.bf16 %v4695_v12  ;;  %v9597_v8 = vrot.slane %v9547_v18, %v12315_v48 }
 0x8e0   : > { %8015 = vmatpush1.bf16.msra.mxu1 %v6326_v46  ;;  %v4727_v46 = vld [vmem:[%s12268_s12 + $0x1b68] sm:$0xff] }
 0x8e1   : > { %8179 = vmatpush1.bf16.msra.mxu0 %v6328_v29  ;;  %8016 = vmatprep.subr.bf16.mxu1 %v6359_v35  ;;  %v9589_v29 = vrot.slane %v9547_v18, %v12280_v21  ;;  %v4729_v35 = vld [vmem:[%s12268_s12 + $0x1b78] sm:$0xff] }
 0x8e2   : > { %8180 = vmatprep.subr.bf16.mxu0 %v6361_v30  ;;  %v9593_v30 = vrot.slane %v9547_v18, %v12283_v23  ;;  %v6649_v12 = vunpack.c.h.s8.bf16 %v4729_v35 }
 0x8e4   : > { %8017 = vmatpush1.bf16.msra.mxu1 %v6358_v38  ;;  %v9789_v38 = vrot.slane %v9747_v42, %v12280_v21 }
 0x8e5   : > { %8181 = vmatpush1.bf16.msra.mxu0 %v6360_v53  ;;  %8018 = vmatprep.subr.bf16.mxu1 %v6391_v40  ;;  %v9601_v53 = vrot.slane %v9547_v18, %v12318_v50  ;;  %v6584_v40 = vunpack.c.h.s8.bf16 %v4696_v26  ;;  %v4758_v26 = vld [vmem:[%s12268_s12 + $0x1c60] sm:$0xff]  ;;  %v4760_v18 = vld [vmem:[%s12268_s12 + $0x1c70] sm:$0xff] }
 0x8e6   : > { %8182 = vmatprep.subr.bf16.mxu0 %v6393_v0  ;;  %v6615_v0 = vunpack.c.l.s8.bf16 %v4727_v46 }
 0x8e8   : > { %8019 = vmatpush1.bf16.msra.mxu1 %v6390_v22  ;;  %v9797_v22 = vrot.slane %v9747_v42, %v12315_v48 }
 0x8e9   : > { %8183 = vmatpush1.bf16.msra.mxu0 %v6392_v63  ;;  %8029 = vmatprep.subr.bf16.mxu1 %v6423_v49  ;;  %v9793_v63 = vrot.slane %v9747_v42, %v12283_v23  ;;  %v6617_v49 = vunpack.c.l.s8.bf16 %v4729_v35  ;;  %v6710_v35 = vunpack.c.h.s8.bf16 %v4758_v26 }
 0x8ea   : > { %8193 = vmatprep.subr.bf16.mxu0 %v6425_v61 }
 0x8eb   : > { %8021 = vmatmul.mubr.bf16.vlgmr.msra.gmra.mrb[24].mxu1 %v12628_v19 }
 0x8ec   : > { %8185 = vmatmul.mubr.bf16.vlgmr.msra.gmra.mrb[28].mxu0 %v12628_v19  ;;  %8030 = vmatpush1.bf16.msra.mxu1 %v6422_v62 }
 0x8ed   : > { %8061 = vmatprep.mubr.bf16.mxu1 %v12634_v31  ;;  %8194 = vmatpush1.bf16.msra.mxu0 %v6424_v1  ;;  %v9801_v1 = vrot.slane %v9747_v42, %v12318_v50  ;;  %v6711_v42 = vunpack.c.h.s8.bf16 %v4759_v13 }
 0x8ee   : > { %8225 = vmatprep.mubr.bf16.mxu0 %v12634_v31  ;;  %8031 = vmatprep.subr.bf16.mxu1 %v6455_v32 }
 0x8ef   : > { %8195 = vmatprep.subr.bf16.mxu0 %v6457_v36 }
 0x8f0   : > { %8032 = vmatpush1.bf16.msra.mxu1 %v6454_v20  ;;  %v6614_v20 = vunpack.c.l.s8.bf16 %v4726_v55 }
 0x8f1   : > { %8196 = vmatpush1.bf16.msra.mxu0 %v6456_v10  ;;  %8033 = vmatprep.subr.bf16.mxu1 %v6487_v43 }
 0x8f2   : > { %8197 = vmatprep.subr.bf16.mxu0 %v6489_v3 }
 0x8f4   : > { %8034 = vmatpush1.bf16.msra.mxu1 %v6486_v47  ;;  %v6647_v47 = vunpack.c.h.s8.bf16 %v4727_v46  ;;  %v4791_v46 = vld [vmem:[%s12268_s12 + $0x1d68] sm:$0xff] }
 0x8f5   : > { %8198 = vmatpush1.bf16.msra.mxu0 %v6488_v6  ;;  %8035 = vmatprep.subr.bf16.mxu1 %v6519_v7 }
 0x8f6   : > { %8199 = vmatprep.subr.bf16.mxu0 %v6521_v45 }
 0x8f8   : > { %8036 = vmatpush1.bf16.msra.mxu1 %v6518_v17 }
 0x8f9   : > { %8200 = vmatpush1.bf16.msra.mxu0 %v6520_v27  ;;  %8037 = vmatprep.subr.bf16.mxu1 %v6551_v33  ;;  %v4761_v27 = vld [vmem:[%s12268_s12 + $0x1c78] sm:$0xff]  ;;  %v6646_v33 = vunpack.c.h.s8.bf16 %v4726_v55 }
 0x8fa   : > { %8201 = vmatprep.subr.bf16.mxu0 %v6553_v25  ;;  %v6679_v25 = vunpack.c.l.s8.bf16 %v4759_v13  ;;  %v4856_v13 = vld [vmem:[%s12268_s12 + $0x1f70] sm:$0xff] }
 0x8fc   : > { %8038 = vmatpush1.bf16.msra.mxu1 %v6550_v28  ;;  %v6681_v28 = vunpack.c.l.s8.bf16 %v4761_v27 }
 0x8fd   : > { %8202 = vmatpush1.bf16.msra.mxu0 %v6552_v41  ;;  %8039 = vmatprep.subr.bf16.mxu1 %v6583_v9  ;;  %v6678_v41 = vunpack.c.l.s8.bf16 %v4758_v26  ;;  %v6680_v9 = vunpack.c.l.s8.bf16 %v4760_v18  ;;  %v3869_v26 = vld [vmem:[%s12268_s12 + $0x98] sm:$0xff] }
 0x8fe   : > { %v7735_v59 = vpop.f32.mrb[20].mxu1  ;;  %8203 = vmatprep.subr.bf16.mxu0 %v6585_v16  ;;  %v6713_v16 = vunpack.c.h.s8.bf16 %v4761_v27  ;;  %v6872_v27 = vunpack.c.l.s8.bf16 %v4856_v13 }
 0x8ff   : > { %v9722_v61 = vmul.f32 %v9589_v29, %v7735_v59  ;;  %v7899_v44 = vpop.f32.mrb[24].mxu0  ;;  %v7737_v62 = vpop.f32.mrb[21].mxu1  ;;  %v4793_v29 = vld [vmem:[%s12268_s12 + $0x1d78] sm:$0xff] }
 0x900   : > { %v9724_v32 = vmul.f32 %v9597_v8, %v7899_v44  ;;  %v9723_v11 = vmul.f32 %v9593_v30, %v7737_v62  ;;  %v7901_v36 = vpop.f32.mrb[25].mxu0  ;;  %v7739_v34 = vpop.f32.mrb[22].mxu1  ;;  %8040 = vmatpush1.bf16.msra.mxu1 %v6582_v15  ;;  %v6712_v30 = vunpack.c.h.s8.bf16 %v4760_v18  ;;  %v6743_v15 = vunpack.c.l.s8.bf16 %v4791_v46  ;;  %v4825_v44 = vld [vmem:[%s12268_s12 + $0x1e78] sm:$0xff] }
 0x901   : > { %v9922_v10 = vadd.f32 %v9789_v38, %v9722_v61  ;;  %v9725_v43 = vmul.f32 %v9601_v53, %v7901_v36  ;;  %v7903_v2 = vpop.f32.mrb[26].mxu0  ;;  %8204 = vmatpush1.bf16.msra.mxu0 %v6584_v40  ;;  %v7740_v3 = vpop.f32.mrb[23].mxu1  ;;  %8041 = vmatprep.subr.bf16.mxu1 %v6615_v0  ;;  %v4790_v38 = vld [vmem:[%s12268_s12 + $0x1d60] sm:$0xff]  ;;  %v6745_v40 = vunpack.c.l.s8.bf16 %v4793_v29  ;;  %v4792_v0 = vld [vmem:[%s12268_s12 + $0x1d70] sm:$0xff]  ;;  %v6777_v57 = vunpack.c.h.s8.bf16 %v4793_v29  ;;  %v4823_v61 = vld [vmem:[%s12268_s12 + $0x1e68] sm:$0xff] }
 0x902   : > { %v9924_v6 = vadd.f32 %v9797_v22, %v9724_v32  ;;  %v9923_v7 = vadd.f32 %v9793_v63, %v9723_v11  ;;  %v7904_v45 = vpop.f32.mrb[27].mxu0  ;;  %8205 = vmatprep.subr.bf16.mxu0 %v6617_v49  ;;  %v6742_v22 = vunpack.c.l.s8.bf16 %v4790_v38  ;;  %v6744_v63 = vunpack.c.l.s8.bf16 %v4792_v0  ;;  %v4822_v11 = vld [vmem:[%s12268_s12 + $0x1e60] sm:$0xff]  ;;  %v4824_v34 = vld [vmem:[%s12268_s12 + $0x1e70] sm:$0xff]  ;;  %v4855_v3 = vld [vmem:[%s12268_s12 + $0x1f68] sm:$0xff] }
 0x903   : > { %11175 = vtanh.f32 %v9922_v10  ;;  %v9925_v17 = vadd.f32 %v9801_v1, %v9725_v43  ;;  %v6775_v49 = vunpack.c.h.s8.bf16 %v4791_v46  ;;  %v6774_v62 = vunpack.c.h.s8.bf16 %v4790_v38  ;;  %v4854_v45 = vld [vmem:[%s12268_s12 + $0x1f60] sm:$0xff] }
 0x904   : > { %11177 = vtanh.f32 %v9924_v6  ;;  %8042 = vmatpush1.bf16.msra.mxu1 %v6614_v20  ;;  %v6776_v1 = vunpack.c.h.s8.bf16 %v4792_v0  ;;  %v6807_v32 = vunpack.c.l.s8.bf16 %v4823_v61  ;;  %v6809_v36 = vunpack.c.l.s8.bf16 %v4825_v44  ;;  %v3898_v0 = vld [vmem:[%s12268_s12 + $0x180] sm:$0xff] }
 0x905   : > { %11179 = vtanh.f32 %v9923_v7  ;;  %8206 = vmatpush1.bf16.msra.mxu0 %v6616_v4  ;;  %8043 = vmatprep.subr.bf16.mxu1 %v6647_v47  ;;  %v6806_v20 = vunpack.c.l.s8.bf16 %v4822_v11  ;;  %v6808_v10 = vunpack.c.l.s8.bf16 %v4824_v34  ;;  %v6839_v43 = vunpack.c.h.s8.bf16 %v4823_v61  ;;  %v4857_v4 = vld [vmem:[%s12268_s12 + $0x1f78] sm:$0xff]  ;;  %v3931_v61 = vld [vmem:[%s12268_s12 + $0x288] sm:$0xff] }
 0x906   : > { %11181 = vtanh.f32 %v9925_v17  ;;  %8207 = vmatprep.subr.bf16.mxu0 %v6649_v12  ;;  %v6841_v2 = vunpack.c.h.s8.bf16 %v4825_v44  ;;  %v6838_v47 = vunpack.c.h.s8.bf16 %v4822_v11  ;;  %v6840_v6 = vunpack.c.h.s8.bf16 %v4824_v34  ;;  %v3933_v44 = vld [vmem:[%s12268_s12 + $0x298] sm:$0xff]  ;;  %v3930_v11 = vld [vmem:[%s12268_s12 + $0x280] sm:$0xff]  ;;  %v3932_v34 = vld [vmem:[%s12268_s12 + $0x290] sm:$0xff] }
 0x907   : > { %v6871_v7 = vunpack.c.l.s8.bf16 %v4855_v3  ;;  %v6873_v12 = vunpack.c.l.s8.bf16 %v4857_v4  ;;  %v6870_v17 = vunpack.c.l.s8.bf16 %v4854_v45  ;;  %v6904_v18 = vunpack.c.h.s8.bf16 %v4856_v13  ;;  %v3964_v13 = vld [vmem:[%s12268_s12 + $0x390] sm:$0xff] }
 0x908   : > { %8044 = vmatpush1.bf16.msra.mxu1 %v6646_v33  ;;  %v6903_v33 = vunpack.c.h.s8.bf16 %v4855_v3  ;;  %v3963_v3 = vld [vmem:[%s12268_s12 + $0x388] sm:$0xff] }
 0x909   : > { %8208 = vmatpush1.bf16.msra.mxu0 %v6648_v24  ;;  %8045 = vmatprep.subr.bf16.mxu1 %v6679_v25  ;;  %v6905_v24 = vunpack.c.h.s8.bf16 %v4857_v4  ;;  %v3867_v25 = vld [vmem:[%s12268_s12 + $0x88] sm:$0xff]  ;;  %v3965_v4 = vld [vmem:[%s12268_s12 + $0x398] sm:$0xff] }
 0x90a   : > { %8209 = vmatprep.subr.bf16.mxu0 %v6681_v28  ;;  %v6902_v28 = vunpack.c.h.s8.bf16 %v4854_v45  ;;  %v3962_v45 = vld [vmem:[%s12268_s12 + $0x380] sm:$0xff] }
 0x90c   : > { %8046 = vmatpush1.bf16.msra.mxu1 %v6678_v41  ;;  %v4891_v41 = vunpack.c.l.s8.bf16 %v3867_v25 }
 0x90d   : > { %v11176_v8 = vpop.eup %11175  ;;  %8210 = vmatpush1.bf16.msra.mxu0 %v6680_v9  ;;  %8047 = vmatprep.subr.bf16.mxu1 %v6711_v42  ;;  %v3866_v9 = vld [vmem:[%s12268_s12 + $0x80] sm:$0xff]  ;;  %v4893_v42 = vunpack.c.l.s8.bf16 %v3869_v26 }
 0x90e   : > { %v11178_v53 = vpop.eup %11177  ;;  %9986 = vst [vmem:[%s12834_s4 + $0x40] sm:$0xff] %v11176_v8  ;;  %8211 = vmatprep.subr.bf16.mxu0 %v6713_v16  ;;  %v3868_v16 = vld [vmem:[%s12268_s12 + $0x90] sm:$0xff]  ;;  %v4890_v46 = vunpack.c.l.s8.bf16 %v3866_v9  ;;  %v3899_v8 = vld [vmem:[%s12268_s12 + $0x188] sm:$0xff]  ;;  %v4922_v38 = vunpack.c.h.s8.bf16 %v3866_v9  ;;  %v3994_v9 = vld [vmem:[%s12268_s12 + $0x480] sm:$0xff] }
 0x90f   : > { %v11180_v55 = vpop.eup %11179  ;;  %9988 = vst [vmem:[%s12834_s4 + $0x50] sm:$0xff] %v11178_v53  ;;  %v4892_v29 = vunpack.c.l.s8.bf16 %v3868_v16  ;;  %v4924_v53 = vunpack.c.h.s8.bf16 %v3868_v16  ;;  %v3996_v16 = vld [vmem:[%s12268_s12 + $0x490] sm:$0xff] }
 0x910   : > { %v11182_v59 = vpop.eup %11181  ;;  %9987 = vst [vmem:[%s12834_s4 + $0x48] sm:$0xff] %v11180_v55  ;;  %8048 = vmatpush1.bf16.msra.mxu1 %v6710_v35  ;;  %v4923_v35 = vunpack.c.h.s8.bf16 %v3867_v25  ;;  %v3995_v25 = vld [vmem:[%s12268_s12 + $0x488] sm:$0xff] }
 0x911   : > { %9989 = vst [vmem:[%s12834_s4 + $0x58] sm:$0xff] %v11182_v59  ;;  %8212 = vmatpush1.bf16.msra.mxu0 %v6712_v30  ;;  %8049 = vmatprep.subr.bf16.mxu1 %v6743_v15  ;;  %v4925_v30 = vunpack.c.h.s8.bf16 %v3869_v26  ;;  %v3901_v15 = vld [vmem:[%s12268_s12 + $0x198] sm:$0xff]  ;;  %v3900_v59 = vld [vmem:[%s12268_s12 + $0x190] sm:$0xff] }
 0x912   : > { %8213 = vmatprep.subr.bf16.mxu0 %v6745_v40  ;;  %v4955_v40 = vunpack.c.l.s8.bf16 %v3899_v8  ;;  %v4957_v55 = vunpack.c.l.s8.bf16 %v3901_v15  ;;  %v3997_v26 = vld [vmem:[%s12268_s12 + $0x498] sm:$0xff] }
 0x914   : > { %8050 = vmatpush1.bf16.msra.mxu1 %v6742_v22  ;;  %v4954_v22 = vunpack.c.l.s8.bf16 %v3898_v0 }
 0x915   : > { %8214 = vmatpush1.bf16.msra.mxu0 %v6744_v63  ;;  %8051 = vmatprep.subr.bf16.mxu1 %v6775_v49  ;;  %v4956_v63 = vunpack.c.l.s8.bf16 %v3900_v59  ;;  %v4987_v49 = vunpack.c.h.s8.bf16 %v3899_v8  ;;  %v5181_v8 = vunpack.c.h.s8.bf16 %v3997_v26 }
 0x916   : > { %8215 = vmatprep.subr.bf16.mxu0 %v6777_v57  ;;  %v4989_v57 = vunpack.c.h.s8.bf16 %v3901_v15  ;;  %v4029_v15 = vld [vmem:[%s12268_s12 + $0x598] sm:$0xff] }
 0x918   : > { %8052 = vmatpush1.bf16.msra.mxu1 %v6774_v62  ;;  %v4986_v62 = vunpack.c.h.s8.bf16 %v3898_v0  ;;  %v4026_v0 = vld [vmem:[%s12268_s12 + $0x580] sm:$0xff] }
 0x919   : > { %8216 = vmatpush1.bf16.msra.mxu0 %v6776_v1  ;;  %8053 = vmatprep.subr.bf16.mxu1 %v6807_v32  ;;  %v4988_v1 = vunpack.c.h.s8.bf16 %v3900_v59  ;;  %v5019_v32 = vunpack.c.l.s8.bf16 %v3931_v61  ;;  %v4028_v59 = vld [vmem:[%s12268_s12 + $0x590] sm:$0xff] }
 0x91a   : > { %8217 = vmatprep.subr.bf16.mxu0 %v6809_v36  ;;  %v5021_v36 = vunpack.c.l.s8.bf16 %v3933_v44 }
 0x91c   : > { %8054 = vmatpush1.bf16.msra.mxu1 %v6806_v20  ;;  %v5018_v20 = vunpack.c.l.s8.bf16 %v3930_v11 }
 0x91d   : > { %8218 = vmatpush1.bf16.msra.mxu0 %v6808_v10  ;;  %8055 = vmatprep.subr.bf16.mxu1 %v6839_v43  ;;  %v5020_v10 = vunpack.c.l.s8.bf16 %v3932_v34  ;;  %v5051_v43 = vunpack.c.h.s8.bf16 %v3931_v61  ;;  %v4059_v61 = vld [vmem:[%s12268_s12 + $0x688] sm:$0xff] }
 0x91e   : > { %8219 = vmatprep.subr.bf16.mxu0 %v6841_v2  ;;  %v5053_v2 = vunpack.c.h.s8.bf16 %v3933_v44  ;;  %v4061_v44 = vld [vmem:[%s12268_s12 + $0x698] sm:$0xff] }
 0x920   : > { %8056 = vmatpush1.bf16.msra.mxu1 %v6838_v47  ;;  %v5050_v47 = vunpack.c.h.s8.bf16 %v3930_v11  ;;  %v4058_v11 = vld [vmem:[%s12268_s12 + $0x680] sm:$0xff] }
 0x921   : > { %8220 = vmatpush1.bf16.msra.mxu0 %v6840_v6  ;;  %8057 = vmatprep.subr.bf16.mxu1 %v6871_v7  ;;  %v5052_v6 = vunpack.c.h.s8.bf16 %v3932_v34  ;;  %v5083_v7 = vunpack.c.l.s8.bf16 %v3963_v3  ;;  %v4060_v34 = vld [vmem:[%s12268_s12 + $0x690] sm:$0xff] }
 0x922   : > { %8221 = vmatprep.subr.bf16.mxu0 %v6873_v12  ;;  %v5085_v12 = vunpack.c.l.s8.bf16 %v3965_v4 }
 0x924   : > { %8058 = vmatpush1.bf16.msra.mxu1 %v6870_v17  ;;  %v5082_v17 = vunpack.c.l.s8.bf16 %v3962_v45 }
 0x925   : > { %8222 = vmatpush1.bf16.msra.mxu0 %v6872_v27  ;;  %8059 = vmatprep.subr.bf16.mxu1 %v6903_v33  ;;  %v5084_v27 = vunpack.c.l.s8.bf16 %v3964_v13  ;;  %v5115_v33 = vunpack.c.h.s8.bf16 %v3963_v3  ;;  %v4091_v3 = vld [vmem:[%s12268_s12 + $0x788] sm:$0xff] }
 0x926   : > { %8223 = vmatprep.subr.bf16.mxu0 %v6905_v24  ;;  %v5117_v24 = vunpack.c.h.s8.bf16 %v3965_v4  ;;  %v4093_v4 = vld [vmem:[%s12268_s12 + $0x798] sm:$0xff] }
 0x928   : > { %8060 = vmatpush1.bf16.msra.mxu1 %v6902_v28  ;;  %v5114_v28 = vunpack.c.h.s8.bf16 %v3962_v45  ;;  %v4090_v45 = vld [vmem:[%s12268_s12 + $0x780] sm:$0xff] }
 0x929   : > { %8224 = vmatpush1.bf16.msra.mxu0 %v6904_v18  ;;  %8234 = vmatprep.subr.bf16.mxu1 %v4891_v41  ;;  %v5116_v18 = vunpack.c.h.s8.bf16 %v3964_v13  ;;  %v5147_v41 = vunpack.c.l.s8.bf16 %v3995_v25  ;;  %v4092_v13 = vld [vmem:[%s12268_s12 + $0x790] sm:$0xff] }
 0x92a   : > { %8398 = vmatprep.subr.bf16.mxu0 %v4893_v42  ;;  %v5149_v42 = vunpack.c.l.s8.bf16 %v3997_v26  ;;  %v4125_v26 = vld [vmem:[%s12268_s12 + $0x898] sm:$0xff] }
 0x92b   : > { %8062 = vmatmul.mubr.bf16.vlgmr.msra.gmra.mrb[24].mxu1 %v12673_v51 }
 0x92c   : > { %8226 = vmatmul.mubr.bf16.vlgmr.msra.gmra.mrb[28].mxu0 %v12673_v51  ;;  %8235 = vmatpush1.bf16.msra.mxu1 %v4890_v46  ;;  %v5146_v46 = vunpack.c.l.s8.bf16 %v3994_v9 }
 0x92d   : > { %8266 = vmatprep.mubr.bf16.mxu1 %v12460_v52  ;;  %8399 = vmatpush1.bf16.msra.mxu0 %v4892_v29  ;;  %v5148_v29 = vunpack.c.l.s8.bf16 %v3996_v16 }
 0x92e   : > { %8430 = vmatprep.mubr.bf16.mxu0 %v12460_v52  ;;  %8236 = vmatprep.subr.bf16.mxu1 %v4923_v35  ;;  %v5179_v35 = vunpack.c.h.s8.bf16 %v3995_v25  ;;  %v4123_v25 = vld [vmem:[%s12268_s12 + $0x888] sm:$0xff] }
 0x92f   : > { %8400 = vmatprep.subr.bf16.mxu0 %v4925_v30  ;;  %v4027_v30 = vld [vmem:[%s12268_s12 + $0x588] sm:$0xff] }
 0x930   : > { %8237 = vmatpush1.bf16.msra.mxu1 %v4922_v38  ;;  %v5178_v38 = vunpack.c.h.s8.bf16 %v3994_v9  ;;  %v4122_v9 = vld [vmem:[%s12268_s12 + $0x880] sm:$0xff] }
 0x931   : > { %8401 = vmatpush1.bf16.msra.mxu0 %v4924_v53  ;;  %8238 = vmatprep.subr.bf16.mxu1 %v4955_v40  ;;  %v5180_v53 = vunpack.c.h.s8.bf16 %v3996_v16  ;;  %v5211_v40 = vunpack.c.l.s8.bf16 %v4027_v30  ;;  %v4124_v16 = vld [vmem:[%s12268_s12 + $0x890] sm:$0xff] }
 0x932   : > { %8402 = vmatprep.subr.bf16.mxu0 %v4957_v55  ;;  %v5213_v55 = vunpack.c.l.s8.bf16 %v4029_v15 }
 0x934   : > { %8239 = vmatpush1.bf16.msra.mxu1 %v4954_v22  ;;  %v5210_v22 = vunpack.c.l.s8.bf16 %v4026_v0 }
 0x935   : > { %8403 = vmatpush1.bf16.msra.mxu0 %v4956_v63  ;;  %8240 = vmatprep.subr.bf16.mxu1 %v4987_v49  ;;  %v5212_v63 = vunpack.c.l.s8.bf16 %v4028_v59  ;;  %v5243_v49 = vunpack.c.h.s8.bf16 %v4027_v30  ;;  %v5437_v30 = vunpack.c.h.s8.bf16 %v4125_v26 }
 0x936   : > { %8404 = vmatprep.subr.bf16.mxu0 %v4989_v57  ;;  %v5245_v57 = vunpack.c.h.s8.bf16 %v4029_v15  ;;  %v4157_v15 = vld [vmem:[%s12268_s12 + $0x998] sm:$0xff] }
 0x938   : > { %8241 = vmatpush1.bf16.msra.mxu1 %v4986_v62  ;;  %v5242_v62 = vunpack.c.h.s8.bf16 %v4026_v0  ;;  %v4154_v0 = vld [vmem:[%s12268_s12 + $0x980] sm:$0xff] }
 0x939   : > { %8405 = vmatpush1.bf16.msra.mxu0 %v4988_v1  ;;  %8242 = vmatprep.subr.bf16.mxu1 %v5019_v32  ;;  %v5244_v1 = vunpack.c.h.s8.bf16 %v4028_v59  ;;  %v5275_v32 = vunpack.c.l.s8.bf16 %v4059_v61  ;;  %v4156_v59 = vld [vmem:[%s12268_s12 + $0x990] sm:$0xff] }
 0x93a   : > { %8406 = vmatprep.subr.bf16.mxu0 %v5021_v36  ;;  %v5277_v36 = vunpack.c.l.s8.bf16 %v4061_v44 }
 0x93c   : > { %8243 = vmatpush1.bf16.msra.mxu1 %v5018_v20  ;;  %v5274_v20 = vunpack.c.l.s8.bf16 %v4058_v11 }
 0x93d   : > { %8407 = vmatpush1.bf16.msra.mxu0 %v5020_v10  ;;  %8244 = vmatprep.subr.bf16.mxu1 %v5051_v43  ;;  %v5276_v10 = vunpack.c.l.s8.bf16 %v4060_v34  ;;  %v5307_v43 = vunpack.c.h.s8.bf16 %v4059_v61  ;;  %v4187_v61 = vld [vmem:[%s12268_s12 + $0xa88] sm:$0xff] }
 0x93e   : > { %8408 = vmatprep.subr.bf16.mxu0 %v5053_v2  ;;  %v5309_v2 = vunpack.c.h.s8.bf16 %v4061_v44  ;;  %v4189_v44 = vld [vmem:[%s12268_s12 + $0xa98] sm:$0xff] }
 0x940   : > { %8245 = vmatpush1.bf16.msra.mxu1 %v5050_v47  ;;  %v5306_v47 = vunpack.c.h.s8.bf16 %v4058_v11  ;;  %v4186_v11 = vld [vmem:[%s12268_s12 + $0xa80] sm:$0xff] }
 0x941   : > { %8409 = vmatpush1.bf16.msra.mxu0 %v5052_v6  ;;  %8246 = vmatprep.subr.bf16.mxu1 %v5083_v7  ;;  %v5308_v6 = vunpack.c.h.s8.bf16 %v4060_v34  ;;  %v5339_v7 = vunpack.c.l.s8.bf16 %v4091_v3  ;;  %v4188_v34 = vld [vmem:[%s12268_s12 + $0xa90] sm:$0xff] }
 0x942   : > { %8410 = vmatprep.subr.bf16.mxu0 %v5085_v12  ;;  %v5341_v12 = vunpack.c.l.s8.bf16 %v4093_v4 }
 0x944   : > { %8247 = vmatpush1.bf16.msra.mxu1 %v5082_v17  ;;  %v5338_v17 = vunpack.c.l.s8.bf16 %v4090_v45 }
 0x945   : > { %8411 = vmatpush1.bf16.msra.mxu0 %v5084_v27  ;;  %8248 = vmatprep.subr.bf16.mxu1 %v5115_v33  ;;  %v5340_v27 = vunpack.c.l.s8.bf16 %v4092_v13  ;;  %v5371_v33 = vunpack.c.h.s8.bf16 %v4091_v3  ;;  %v4219_v3 = vld [vmem:[%s12268_s12 + $0xb88] sm:$0xff] }
 0x946   : > { %8412 = vmatprep.subr.bf16.mxu0 %v5117_v24  ;;  %v5373_v24 = vunpack.c.h.s8.bf16 %v4093_v4  ;;  %v4221_v4 = vld [vmem:[%s12268_s12 + $0xb98] sm:$0xff] }
 0x948   : > { %8249 = vmatpush1.bf16.msra.mxu1 %v5114_v28  ;;  %v5370_v28 = vunpack.c.h.s8.bf16 %v4090_v45  ;;  %v4218_v45 = vld [vmem:[%s12268_s12 + $0xb80] sm:$0xff] }
 0x949   : > { %8413 = vmatpush1.bf16.msra.mxu0 %v5116_v18  ;;  %8250 = vmatprep.subr.bf16.mxu1 %v5147_v41  ;;  %v5372_v18 = vunpack.c.h.s8.bf16 %v4092_v13  ;;  %v5403_v41 = vunpack.c.l.s8.bf16 %v4123_v25  ;;  %v4220_v13 = vld [vmem:[%s12268_s12 + $0xb90] sm:$0xff] }
 0x94a   : > { %8414 = vmatprep.subr.bf16.mxu0 %v5149_v42  ;;  %v5405_v42 = vunpack.c.l.s8.bf16 %v4125_v26  ;;  %v4253_v26 = vld [vmem:[%s12268_s12 + $0xc98] sm:$0xff] }
 0x94c   : > { %8251 = vmatpush1.bf16.msra.mxu1 %v5146_v46  ;;  %v5402_v46 = vunpack.c.l.s8.bf16 %v4122_v9 }
 0x94d   : > { %8415 = vmatpush1.bf16.msra.mxu0 %v5148_v29  ;;  %8252 = vmatprep.subr.bf16.mxu1 %v5179_v35  ;;  %v5404_v29 = vunpack.c.l.s8.bf16 %v4124_v16  ;;  %v5435_v35 = vunpack.c.h.s8.bf16 %v4123_v25  ;;  %v4251_v25 = vld [vmem:[%s12268_s12 + $0xc88] sm:$0xff] }
 0x94e   : > { %8416 = vmatprep.subr.bf16.mxu0 %v5181_v8  ;;  %v4155_v8 = vld [vmem:[%s12268_s12 + $0x988] sm:$0xff] }
 0x950   : > { %8253 = vmatpush1.bf16.msra.mxu1 %v5178_v38  ;;  %v5434_v38 = vunpack.c.h.s8.bf16 %v4122_v9  ;;  %v4250_v9 = vld [vmem:[%s12268_s12 + $0xc80] sm:$0xff] }
 0x951   : > { %8417 = vmatpush1.bf16.msra.mxu0 %v5180_v53  ;;  %8254 = vmatprep.subr.bf16.mxu1 %v5211_v40  ;;  %v5436_v53 = vunpack.c.h.s8.bf16 %v4124_v16  ;;  %v5467_v40 = vunpack.c.l.s8.bf16 %v4155_v8  ;;  %v4252_v16 = vld [vmem:[%s12268_s12 + $0xc90] sm:$0xff] }
 0x952   : > { %8418 = vmatprep.subr.bf16.mxu0 %v5213_v55  ;;  %v5469_v55 = vunpack.c.l.s8.bf16 %v4157_v15 }
 0x954   : > { %8255 = vmatpush1.bf16.msra.mxu1 %v5210_v22  ;;  %v5466_v22 = vunpack.c.l.s8.bf16 %v4154_v0 }
 0x955   : > { %8419 = vmatpush1.bf16.msra.mxu0 %v5212_v63  ;;  %8256 = vmatprep.subr.bf16.mxu1 %v5243_v49  ;;  %v5468_v63 = vunpack.c.l.s8.bf16 %v4156_v59  ;;  %v5499_v49 = vunpack.c.h.s8.bf16 %v4155_v8  ;;  %v5693_v8 = vunpack.c.h.s8.bf16 %v4253_v26 }
 0x956   : > { %8420 = vmatprep.subr.bf16.mxu0 %v5245_v57  ;;  %v5501_v57 = vunpack.c.h.s8.bf16 %v4157_v15  ;;  %v4285_v15 = vld [vmem:[%s12268_s12 + $0xd98] sm:$0xff] }
 0x958   : > { %8257 = vmatpush1.bf16.msra.mxu1 %v5242_v62  ;;  %v5498_v62 = vunpack.c.h.s8.bf16 %v4154_v0  ;;  %v4282_v0 = vld [vmem:[%s12268_s12 + $0xd80] sm:$0xff] }
 0x959   : > { %8421 = vmatpush1.bf16.msra.mxu0 %v5244_v1  ;;  %8258 = vmatprep.subr.bf16.mxu1 %v5275_v32  ;;  %v5500_v1 = vunpack.c.h.s8.bf16 %v4156_v59  ;;  %v5531_v32 = vunpack.c.l.s8.bf16 %v4187_v61  ;;  %v4284_v59 = vld [vmem:[%s12268_s12 + $0xd90] sm:$0xff] }
 0x95a   : > { %8422 = vmatprep.subr.bf16.mxu0 %v5277_v36  ;;  %v5533_v36 = vunpack.c.l.s8.bf16 %v4189_v44 }
 0x95c   : > { %8259 = vmatpush1.bf16.msra.mxu1 %v5274_v20  ;;  %v5530_v20 = vunpack.c.l.s8.bf16 %v4186_v11 }
 0x95d   : > { %8423 = vmatpush1.bf16.msra.mxu0 %v5276_v10  ;;  %8260 = vmatprep.subr.bf16.mxu1 %v5307_v43  ;;  %v5532_v10 = vunpack.c.l.s8.bf16 %v4188_v34  ;;  %v5563_v43 = vunpack.c.h.s8.bf16 %v4187_v61  ;;  %v4315_v61 = vld [vmem:[%s12268_s12 + $0xe88] sm:$0xff] }
 0x95e   : > { %8424 = vmatprep.subr.bf16.mxu0 %v5309_v2  ;;  %v5565_v2 = vunpack.c.h.s8.bf16 %v4189_v44  ;;  %v4317_v44 = vld [vmem:[%s12268_s12 + $0xe98] sm:$0xff] }
 0x960   : > { %8261 = vmatpush1.bf16.msra.mxu1 %v5306_v47  ;;  %v5562_v47 = vunpack.c.h.s8.bf16 %v4186_v11  ;;  %v4314_v11 = vld [vmem:[%s12268_s12 + $0xe80] sm:$0xff] }
 0x961   : > { %8425 = vmatpush1.bf16.msra.mxu0 %v5308_v6  ;;  %8262 = vmatprep.subr.bf16.mxu1 %v5339_v7  ;;  %v5564_v6 = vunpack.c.h.s8.bf16 %v4188_v34  ;;  %v5595_v7 = vunpack.c.l.s8.bf16 %v4219_v3  ;;  %v4316_v34 = vld [vmem:[%s12268_s12 + $0xe90] sm:$0xff] }
 0x962   : > { %8426 = vmatprep.subr.bf16.mxu0 %v5341_v12  ;;  %v5597_v12 = vunpack.c.l.s8.bf16 %v4221_v4 }
 0x964   : > { %8263 = vmatpush1.bf16.msra.mxu1 %v5338_v17  ;;  %v5594_v17 = vunpack.c.l.s8.bf16 %v4218_v45 }
 0x965   : > { %8427 = vmatpush1.bf16.msra.mxu0 %v5340_v27  ;;  %8264 = vmatprep.subr.bf16.mxu1 %v5371_v33  ;;  %v5596_v27 = vunpack.c.l.s8.bf16 %v4220_v13  ;;  %v5627_v33 = vunpack.c.h.s8.bf16 %v4219_v3  ;;  %v4347_v3 = vld [vmem:[%s12268_s12 + $0xf88] sm:$0xff] }
 0x966   : > { %8428 = vmatprep.subr.bf16.mxu0 %v5373_v24  ;;  %v5629_v24 = vunpack.c.h.s8.bf16 %v4221_v4  ;;  %v4349_v4 = vld [vmem:[%s12268_s12 + $0xf98] sm:$0xff] }
 0x968   : > { %8265 = vmatpush1.bf16.msra.mxu1 %v5370_v28  ;;  %v5626_v28 = vunpack.c.h.s8.bf16 %v4218_v45  ;;  %v4346_v45 = vld [vmem:[%s12268_s12 + $0xf80] sm:$0xff] }
 0x969   : > { %8429 = vmatpush1.bf16.msra.mxu0 %v5372_v18  ;;  %8275 = vmatprep.subr.bf16.mxu1 %v5403_v41  ;;  %v5628_v18 = vunpack.c.h.s8.bf16 %v4220_v13  ;;  %v5659_v41 = vunpack.c.l.s8.bf16 %v4251_v25  ;;  %v4348_v13 = vld [vmem:[%s12268_s12 + $0xf90] sm:$0xff] }
 0x96a   : > { %8439 = vmatprep.subr.bf16.mxu0 %v5405_v42  ;;  %v5661_v42 = vunpack.c.l.s8.bf16 %v4253_v26  ;;  %v4381_v26 = vld [vmem:[%s12268_s12 + $0x1098] sm:$0xff] }
 0x96b   : > { %8267 = vmatmul.mubr.bf16.vlgmr.msra.gmra.mrb[28].mxu1 %v12462_v56 }
 0x96c   : > { %8431 = vmatmul.mubr.bf16.vlgmr.msra.gmra.mrb[32].mxu0 %v12462_v56  ;;  %8276 = vmatpush1.bf16.msra.mxu1 %v5402_v46  ;;  %v5658_v46 = vunpack.c.l.s8.bf16 %v4250_v9 }
 0x96d   : > { %8307 = vmatprep.mubr.bf16.mxu1 %v12470_v39  ;;  %8440 = vmatpush1.bf16.msra.mxu0 %v5404_v29  ;;  %v5660_v29 = vunpack.c.l.s8.bf16 %v4252_v16 }
 0x96e   : > { %8471 = vmatprep.mubr.bf16.mxu0 %v12470_v39  ;;  %8277 = vmatprep.subr.bf16.mxu1 %v5435_v35  ;;  %v5691_v35 = vunpack.c.h.s8.bf16 %v4251_v25  ;;  %v4379_v25 = vld [vmem:[%s12268_s12 + $0x1088] sm:$0xff] }
 0x96f   : > { %8441 = vmatprep.subr.bf16.mxu0 %v5437_v30  ;;  %v4283_v30 = vld [vmem:[%s12268_s12 + $0xd88] sm:$0xff] }
 0x970   : > { %8278 = vmatpush1.bf16.msra.mxu1 %v5434_v38  ;;  %v5690_v38 = vunpack.c.h.s8.bf16 %v4250_v9  ;;  %v4378_v9 = vld [vmem:[%s12268_s12 + $0x1080] sm:$0xff] }
 0x971   : > { %8442 = vmatpush1.bf16.msra.mxu0 %v5436_v53  ;;  %8279 = vmatprep.subr.bf16.mxu1 %v5467_v40  ;;  %v5692_v53 = vunpack.c.h.s8.bf16 %v4252_v16  ;;  %v5723_v40 = vunpack.c.l.s8.bf16 %v4283_v30  ;;  %v4380_v16 = vld [vmem:[%s12268_s12 + $0x1090] sm:$0xff] }
 0x972   : > { %8443 = vmatprep.subr.bf16.mxu0 %v5469_v55  ;;  %v5725_v55 = vunpack.c.l.s8.bf16 %v4285_v15 }
 0x974   : > { %8280 = vmatpush1.bf16.msra.mxu1 %v5466_v22  ;;  %v5722_v22 = vunpack.c.l.s8.bf16 %v4282_v0 }
 0x975   : > { %8444 = vmatpush1.bf16.msra.mxu0 %v5468_v63  ;;  %8281 = vmatprep.subr.bf16.mxu1 %v5499_v49  ;;  %v5724_v63 = vunpack.c.l.s8.bf16 %v4284_v59  ;;  %v5755_v49 = vunpack.c.h.s8.bf16 %v4283_v30  ;;  %v5949_v30 = vunpack.c.h.s8.bf16 %v4381_v26 }
 0x976   : > { %8445 = vmatprep.subr.bf16.mxu0 %v5501_v57  ;;  %v5757_v57 = vunpack.c.h.s8.bf16 %v4285_v15  ;;  %v4413_v15 = vld [vmem:[%s12268_s12 + $0x1198] sm:$0xff] }
 0x978   : > { %8282 = vmatpush1.bf16.msra.mxu1 %v5498_v62  ;;  %v5754_v62 = vunpack.c.h.s8.bf16 %v4282_v0  ;;  %v4410_v0 = vld [vmem:[%s12268_s12 + $0x1180] sm:$0xff] }
 0x979   : > { %8446 = vmatpush1.bf16.msra.mxu0 %v5500_v1  ;;  %8283 = vmatprep.subr.bf16.mxu1 %v5531_v32  ;;  %v5756_v1 = vunpack.c.h.s8.bf16 %v4284_v59  ;;  %v5787_v32 = vunpack.c.l.s8.bf16 %v4315_v61  ;;  %v4412_v59 = vld [vmem:[%s12268_s12 + $0x1190] sm:$0xff] }
 0x97a   : > { %8447 = vmatprep.subr.bf16.mxu0 %v5533_v36  ;;  %v5789_v36 = vunpack.c.l.s8.bf16 %v4317_v44 }
 0x97c   : > { %8284 = vmatpush1.bf16.msra.mxu1 %v5530_v20  ;;  %v5786_v20 = vunpack.c.l.s8.bf16 %v4314_v11 }
 0x97d   : > { %8448 = vmatpush1.bf16.msra.mxu0 %v5532_v10  ;;  %8285 = vmatprep.subr.bf16.mxu1 %v5563_v43  ;;  %v5788_v10 = vunpack.c.l.s8.bf16 %v4316_v34  ;;  %v5819_v43 = vunpack.c.h.s8.bf16 %v4315_v61  ;;  %v4443_v61 = vld [vmem:[%s12268_s12 + $0x1288] sm:$0xff] }
 0x97e   : > { %8449 = vmatprep.subr.bf16.mxu0 %v5565_v2  ;;  %v5821_v2 = vunpack.c.h.s8.bf16 %v4317_v44  ;;  %v4445_v44 = vld [vmem:[%s12268_s12 + $0x1298] sm:$0xff] }
 0x980   : > { %8286 = vmatpush1.bf16.msra.mxu1 %v5562_v47  ;;  %v5818_v47 = vunpack.c.h.s8.bf16 %v4314_v11  ;;  %v4442_v11 = vld [vmem:[%s12268_s12 + $0x1280] sm:$0xff] }
 0x981   : > { %8450 = vmatpush1.bf16.msra.mxu0 %v5564_v6  ;;  %8287 = vmatprep.subr.bf16.mxu1 %v5595_v7  ;;  %v5820_v6 = vunpack.c.h.s8.bf16 %v4316_v34  ;;  %v5851_v7 = vunpack.c.l.s8.bf16 %v4347_v3  ;;  %v4444_v34 = vld [vmem:[%s12268_s12 + $0x1290] sm:$0xff] }
 0x982   : > { %8451 = vmatprep.subr.bf16.mxu0 %v5597_v12  ;;  %v5853_v12 = vunpack.c.l.s8.bf16 %v4349_v4 }
 0x984   : > { %8288 = vmatpush1.bf16.msra.mxu1 %v5594_v17  ;;  %v5850_v17 = vunpack.c.l.s8.bf16 %v4346_v45 }
 0x985   : > { %8452 = vmatpush1.bf16.msra.mxu0 %v5596_v27  ;;  %8289 = vmatprep.subr.bf16.mxu1 %v5627_v33  ;;  %v5852_v27 = vunpack.c.l.s8.bf16 %v4348_v13  ;;  %v5883_v33 = vunpack.c.h.s8.bf16 %v4347_v3  ;;  %v4475_v3 = vld [vmem:[%s12268_s12 + $0x1388] sm:$0xff] }
 0x986   : > { %8453 = vmatprep.subr.bf16.mxu0 %v5629_v24  ;;  %v5885_v24 = vunpack.c.h.s8.bf16 %v4349_v4  ;;  %v4477_v4 = vld [vmem:[%s12268_s12 + $0x1398] sm:$0xff] }
 0x988   : > { %8290 = vmatpush1.bf16.msra.mxu1 %v5626_v28  ;;  %v5882_v28 = vunpack.c.h.s8.bf16 %v4346_v45  ;;  %v4474_v45 = vld [vmem:[%s12268_s12 + $0x1380] sm:$0xff] }
 0x989   : > { %8454 = vmatpush1.bf16.msra.mxu0 %v5628_v18  ;;  %8291 = vmatprep.subr.bf16.mxu1 %v5659_v41  ;;  %v5884_v18 = vunpack.c.h.s8.bf16 %v4348_v13  ;;  %v5915_v41 = vunpack.c.l.s8.bf16 %v4379_v25  ;;  %v4476_v13 = vld [vmem:[%s12268_s12 + $0x1390] sm:$0xff] }
 0x98a   : > { %8455 = vmatprep.subr.bf16.mxu0 %v5661_v42  ;;  %v5917_v42 = vunpack.c.l.s8.bf16 %v4381_v26  ;;  %v4509_v26 = vld [vmem:[%s12268_s12 + $0x1498] sm:$0xff] }
 0x98c   : > { %8292 = vmatpush1.bf16.msra.mxu1 %v5658_v46  ;;  %v5914_v46 = vunpack.c.l.s8.bf16 %v4378_v9 }
 0x98d   : > { %8456 = vmatpush1.bf16.msra.mxu0 %v5660_v29  ;;  %8293 = vmatprep.subr.bf16.mxu1 %v5691_v35  ;;  %v5916_v29 = vunpack.c.l.s8.bf16 %v4380_v16  ;;  %v5947_v35 = vunpack.c.h.s8.bf16 %v4379_v25  ;;  %v4507_v25 = vld [vmem:[%s12268_s12 + $0x1488] sm:$0xff] }
 0x98e   : > { %8457 = vmatprep.subr.bf16.mxu0 %v5693_v8  ;;  %v4411_v8 = vld [vmem:[%s12268_s12 + $0x1188] sm:$0xff] }
 0x990   : > { %8294 = vmatpush1.bf16.msra.mxu1 %v5690_v38  ;;  %v5946_v38 = vunpack.c.h.s8.bf16 %v4378_v9  ;;  %v4506_v9 = vld [vmem:[%s12268_s12 + $0x1480] sm:$0xff] }
 0x991   : > { %8458 = vmatpush1.bf16.msra.mxu0 %v5692_v53  ;;  %8295 = vmatprep.subr.bf16.mxu1 %v5723_v40  ;;  %v5948_v53 = vunpack.c.h.s8.bf16 %v4380_v16  ;;  %v5979_v40 = vunpack.c.l.s8.bf16 %v4411_v8  ;;  %v4508_v16 = vld [vmem:[%s12268_s12 + $0x1490] sm:$0xff] }
 0x992   : > { %8459 = vmatprep.subr.bf16.mxu0 %v5725_v55  ;;  %v5981_v55 = vunpack.c.l.s8.bf16 %v4413_v15 }
 0x994   : > { %8296 = vmatpush1.bf16.msra.mxu1 %v5722_v22  ;;  %v5978_v22 = vunpack.c.l.s8.bf16 %v4410_v0 }
 0x995   : > { %8460 = vmatpush1.bf16.msra.mxu0 %v5724_v63  ;;  %8297 = vmatprep.subr.bf16.mxu1 %v5755_v49  ;;  %v5980_v63 = vunpack.c.l.s8.bf16 %v4412_v59  ;;  %v6011_v49 = vunpack.c.h.s8.bf16 %v4411_v8  ;;  %v6205_v8 = vunpack.c.h.s8.bf16 %v4509_v26 }
 0x996   : > { %8461 = vmatprep.subr.bf16.mxu0 %v5757_v57  ;;  %v6013_v57 = vunpack.c.h.s8.bf16 %v4413_v15  ;;  %v4541_v15 = vld [vmem:[%s12268_s12 + $0x1598] sm:$0xff] }
 0x998   : > { %8298 = vmatpush1.bf16.msra.mxu1 %v5754_v62  ;;  %v6010_v62 = vunpack.c.h.s8.bf16 %v4410_v0  ;;  %v4538_v0 = vld [vmem:[%s12268_s12 + $0x1580] sm:$0xff] }
 0x999   : > { %8462 = vmatpush1.bf16.msra.mxu0 %v5756_v1  ;;  %8299 = vmatprep.subr.bf16.mxu1 %v5787_v32  ;;  %v6012_v1 = vunpack.c.h.s8.bf16 %v4412_v59  ;;  %v6043_v32 = vunpack.c.l.s8.bf16 %v4443_v61  ;;  %v4540_v59 = vld [vmem:[%s12268_s12 + $0x1590] sm:$0xff] }
 0x99a   : > { %8463 = vmatprep.subr.bf16.mxu0 %v5789_v36  ;;  %v6045_v36 = vunpack.c.l.s8.bf16 %v4445_v44 }
 0x99c   : > { %8300 = vmatpush1.bf16.msra.mxu1 %v5786_v20  ;;  %v6042_v20 = vunpack.c.l.s8.bf16 %v4442_v11 }
 0x99d   : > { %8464 = vmatpush1.bf16.msra.mxu0 %v5788_v10  ;;  %8301 = vmatprep.subr.bf16.mxu1 %v5819_v43  ;;  %v6044_v10 = vunpack.c.l.s8.bf16 %v4444_v34  ;;  %v6075_v43 = vunpack.c.h.s8.bf16 %v4443_v61  ;;  %v4571_v61 = vld [vmem:[%s12268_s12 + $0x1688] sm:$0xff] }
 0x99e   : > { %8465 = vmatprep.subr.bf16.mxu0 %v5821_v2  ;;  %v6077_v2 = vunpack.c.h.s8.bf16 %v4445_v44  ;;  %v4573_v44 = vld [vmem:[%s12268_s12 + $0x1698] sm:$0xff] }
 0x9a0   : > { %8302 = vmatpush1.bf16.msra.mxu1 %v5818_v47  ;;  %v6074_v47 = vunpack.c.h.s8.bf16 %v4442_v11  ;;  %v4570_v11 = vld [vmem:[%s12268_s12 + $0x1680] sm:$0xff] }
 0x9a1   : > { %8466 = vmatpush1.bf16.msra.mxu0 %v5820_v6  ;;  %8303 = vmatprep.subr.bf16.mxu1 %v5851_v7  ;;  %v6076_v6 = vunpack.c.h.s8.bf16 %v4444_v34  ;;  %v6107_v7 = vunpack.c.l.s8.bf16 %v4475_v3  ;;  %v4572_v34 = vld [vmem:[%s12268_s12 + $0x1690] sm:$0xff] }
 0x9a2   : > { %8467 = vmatprep.subr.bf16.mxu0 %v5853_v12  ;;  %v6109_v12 = vunpack.c.l.s8.bf16 %v4477_v4 }
 0x9a4   : > { %8304 = vmatpush1.bf16.msra.mxu1 %v5850_v17  ;;  %v6106_v17 = vunpack.c.l.s8.bf16 %v4474_v45 }
 0x9a5   : > { %8468 = vmatpush1.bf16.msra.mxu0 %v5852_v27  ;;  %8305 = vmatprep.subr.bf16.mxu1 %v5883_v33  ;;  %v6108_v27 = vunpack.c.l.s8.bf16 %v4476_v13  ;;  %v6139_v33 = vunpack.c.h.s8.bf16 %v4475_v3  ;;  %v4603_v3 = vld [vmem:[%s12268_s12 + $0x1788] sm:$0xff] }
 0x9a6   : > { %8469 = vmatprep.subr.bf16.mxu0 %v5885_v24  ;;  %v6141_v24 = vunpack.c.h.s8.bf16 %v4477_v4  ;;  %v4605_v4 = vld [vmem:[%s12268_s12 + $0x1798] sm:$0xff] }
 0x9a8   : > { %8306 = vmatpush1.bf16.msra.mxu1 %v5882_v28  ;;  %v6138_v28 = vunpack.c.h.s8.bf16 %v4474_v45  ;;  %v4602_v45 = vld [vmem:[%s12268_s12 + $0x1780] sm:$0xff] }
 0x9a9   : > { %8470 = vmatpush1.bf16.msra.mxu0 %v5884_v18  ;;  %8316 = vmatprep.subr.bf16.mxu1 %v5915_v41  ;;  %v6140_v18 = vunpack.c.h.s8.bf16 %v4476_v13  ;;  %v6171_v41 = vunpack.c.l.s8.bf16 %v4507_v25  ;;  %v4604_v13 = vld [vmem:[%s12268_s12 + $0x1790] sm:$0xff] }
 0x9aa   : > { %8480 = vmatprep.subr.bf16.mxu0 %v5917_v42  ;;  %v6173_v42 = vunpack.c.l.s8.bf16 %v4509_v26  ;;  %v4637_v26 = vld [vmem:[%s12268_s12 + $0x1898] sm:$0xff] }
 0x9ab   : > { %8308 = vmatmul.mubr.bf16.vlgmr.msra.gmra.mrb[28].mxu1 %v12526_v5 }
 0x9ac   : > { %8472 = vmatmul.mubr.bf16.vlgmr.msra.gmra.mrb[32].mxu0 %v12526_v5  ;;  %8317 = vmatpush1.bf16.msra.mxu1 %v5914_v46  ;;  %v6170_v46 = vunpack.c.l.s8.bf16 %v4506_v9 }
 0x9ad   : > { %8348 = vmatprep.mubr.bf16.mxu1 %v12626_v14  ;;  %8481 = vmatpush1.bf16.msra.mxu0 %v5916_v29  ;;  %v6172_v29 = vunpack.c.l.s8.bf16 %v4508_v16 }
 0x9ae   : > { %8512 = vmatprep.mubr.bf16.mxu0 %v12626_v14  ;;  %8318 = vmatprep.subr.bf16.mxu1 %v5947_v35  ;;  %v6203_v35 = vunpack.c.h.s8.bf16 %v4507_v25  ;;  %v4635_v25 = vld [vmem:[%s12268_s12 + $0x1888] sm:$0xff] }
 0x9af   : > { %8482 = vmatprep.subr.bf16.mxu0 %v5949_v30  ;;  %v4539_v30 = vld [vmem:[%s12268_s12 + $0x1588] sm:$0xff] }
 0x9b0   : > { %8319 = vmatpush1.bf16.msra.mxu1 %v5946_v38  ;;  %v6202_v38 = vunpack.c.h.s8.bf16 %v4506_v9  ;;  %v4634_v9 = vld [vmem:[%s12268_s12 + $0x1880] sm:$0xff] }
 0x9b1   : > { %8483 = vmatpush1.bf16.msra.mxu0 %v5948_v53  ;;  %8320 = vmatprep.subr.bf16.mxu1 %v5979_v40  ;;  %v6204_v53 = vunpack.c.h.s8.bf16 %v4508_v16  ;;  %v6235_v40 = vunpack.c.l.s8.bf16 %v4539_v30  ;;  %v4636_v16 = vld [vmem:[%s12268_s12 + $0x1890] sm:$0xff] }
 0x9b2   : > { %8484 = vmatprep.subr.bf16.mxu0 %v5981_v55  ;;  %v6237_v55 = vunpack.c.l.s8.bf16 %v4541_v15 }
 0x9b4   : > { %8321 = vmatpush1.bf16.msra.mxu1 %v5978_v22  ;;  %v6234_v22 = vunpack.c.l.s8.bf16 %v4538_v0 }
 0x9b5   : > { %8485 = vmatpush1.bf16.msra.mxu0 %v5980_v63  ;;  %8322 = vmatprep.subr.bf16.mxu1 %v6011_v49  ;;  %v6236_v63 = vunpack.c.l.s8.bf16 %v4540_v59  ;;  %v6267_v49 = vunpack.c.h.s8.bf16 %v4539_v30  ;;  %v6461_v30 = vunpack.c.h.s8.bf16 %v4637_v26 }
 0x9b6   : > { %8486 = vmatprep.subr.bf16.mxu0 %v6013_v57  ;;  %v6269_v57 = vunpack.c.h.s8.bf16 %v4541_v15  ;;  %v4669_v15 = vld [vmem:[%s12268_s12 + $0x1998] sm:$0xff] }
 0x9b8   : > { %8323 = vmatpush1.bf16.msra.mxu1 %v6010_v62  ;;  %v6266_v62 = vunpack.c.h.s8.bf16 %v4538_v0  ;;  %v4666_v0 = vld [vmem:[%s12268_s12 + $0x1980] sm:$0xff] }
 0x9b9   : > { %8487 = vmatpush1.bf16.msra.mxu0 %v6012_v1  ;;  %8324 = vmatprep.subr.bf16.mxu1 %v6043_v32  ;;  %v6268_v1 = vunpack.c.h.s8.bf16 %v4540_v59  ;;  %v6299_v32 = vunpack.c.l.s8.bf16 %v4571_v61  ;;  %v4668_v59 = vld [vmem:[%s12268_s12 + $0x1990] sm:$0xff] }
 0x9ba   : > { %8488 = vmatprep.subr.bf16.mxu0 %v6045_v36  ;;  %v6301_v36 = vunpack.c.l.s8.bf16 %v4573_v44 }
 0x9bc   : > { %8325 = vmatpush1.bf16.msra.mxu1 %v6042_v20  ;;  %v6298_v20 = vunpack.c.l.s8.bf16 %v4570_v11 }
 0x9bd   : > { %8489 = vmatpush1.bf16.msra.mxu0 %v6044_v10  ;;  %8326 = vmatprep.subr.bf16.mxu1 %v6075_v43  ;;  %v6300_v10 = vunpack.c.l.s8.bf16 %v4572_v34  ;;  %v6331_v43 = vunpack.c.h.s8.bf16 %v4571_v61  ;;  %v4699_v61 = vld [vmem:[%s12268_s12 + $0x1a88] sm:$0xff] }
 0x9be   : > { %8490 = vmatprep.subr.bf16.mxu0 %v6077_v2  ;;  %v6333_v2 = vunpack.c.h.s8.bf16 %v4573_v44  ;;  %v4701_v44 = vld [vmem:[%s12268_s12 + $0x1a98] sm:$0xff] }
 0x9c0   : > { %8327 = vmatpush1.bf16.msra.mxu1 %v6074_v47  ;;  %v6330_v47 = vunpack.c.h.s8.bf16 %v4570_v11  ;;  %v4698_v11 = vld [vmem:[%s12268_s12 + $0x1a80] sm:$0xff] }
 0x9c1   : > { %8491 = vmatpush1.bf16.msra.mxu0 %v6076_v6  ;;  %8328 = vmatprep.subr.bf16.mxu1 %v6107_v7  ;;  %v6332_v6 = vunpack.c.h.s8.bf16 %v4572_v34  ;;  %v6363_v7 = vunpack.c.l.s8.bf16 %v4603_v3  ;;  %v4700_v34 = vld [vmem:[%s12268_s12 + $0x1a90] sm:$0xff] }
 0x9c2   : > { %8492 = vmatprep.subr.bf16.mxu0 %v6109_v12  ;;  %v6365_v12 = vunpack.c.l.s8.bf16 %v4605_v4 }
 0x9c4   : > { %8329 = vmatpush1.bf16.msra.mxu1 %v6106_v17  ;;  %v6362_v17 = vunpack.c.l.s8.bf16 %v4602_v45 }
 0x9c5   : > { %8493 = vmatpush1.bf16.msra.mxu0 %v6108_v27  ;;  %8330 = vmatprep.subr.bf16.mxu1 %v6139_v33  ;;  %v6364_v27 = vunpack.c.l.s8.bf16 %v4604_v13  ;;  %v6395_v33 = vunpack.c.h.s8.bf16 %v4603_v3  ;;  %v4731_v3 = vld [vmem:[%s12268_s12 + $0x1b88] sm:$0xff] }
 0x9c6   : > { %8494 = vmatprep.subr.bf16.mxu0 %v6141_v24  ;;  %v6397_v24 = vunpack.c.h.s8.bf16 %v4605_v4  ;;  %v11227_v4 = vld [vmem:[%s12797_s24 + $0x8] sm:$0xff] }
 0x9c8   : > { %8331 = vmatpush1.bf16.msra.mxu1 %v6138_v28  ;;  %v6394_v28 = vunpack.c.h.s8.bf16 %v4602_v45  ;;  %v9609_v45 = vrot.slane %v11227_v4, %v12513_v60 }
 0x9c9   : > { %8495 = vmatpush1.bf16.msra.mxu0 %v6140_v18  ;;  %8332 = vmatprep.subr.bf16.mxu1 %v6171_v41  ;;  %v6396_v18 = vunpack.c.h.s8.bf16 %v4604_v13  ;;  %v6427_v41 = vunpack.c.l.s8.bf16 %v4635_v25  ;;  %v11228_v13 = vld [vmem:[%s12800_s21 + $0x8] sm:$0xff] }
 0x9ca   : > { %8496 = vmatprep.subr.bf16.mxu0 %v6173_v42  ;;  %v6429_v42 = vunpack.c.l.s8.bf16 %v4637_v26 }
 0x9cc   : > { %8333 = vmatpush1.bf16.msra.mxu1 %v6170_v46  ;;  %v6426_v46 = vunpack.c.l.s8.bf16 %v4634_v9 }
 0x9cd   : > { %8497 = vmatpush1.bf16.msra.mxu0 %v6172_v29  ;;  %8334 = vmatprep.subr.bf16.mxu1 %v6203_v35  ;;  %v6428_v29 = vunpack.c.l.s8.bf16 %v4636_v16  ;;  %v6459_v35 = vunpack.c.h.s8.bf16 %v4635_v25  ;;  %v4730_v25 = vld [vmem:[%s12268_s12 + $0x1b80] sm:$0xff] }
 0x9ce   : > { %8498 = vmatprep.subr.bf16.mxu0 %v6205_v8  ;;  %v4667_v8 = vld [vmem:[%s12268_s12 + $0x1988] sm:$0xff] }
 0x9d0   : > { %8335 = vmatpush1.bf16.msra.mxu1 %v6202_v38  ;;  %v6458_v38 = vunpack.c.h.s8.bf16 %v4634_v9  ;;  %v4732_v9 = vld [vmem:[%s12268_s12 + $0x1b90] sm:$0xff] }
 0x9d1   : > { %8499 = vmatpush1.bf16.msra.mxu0 %v6204_v53  ;;  %8336 = vmatprep.subr.bf16.mxu1 %v6235_v40  ;;  %v6460_v53 = vunpack.c.h.s8.bf16 %v4636_v16  ;;  %v6491_v40 = vunpack.c.l.s8.bf16 %v4667_v8 }
 0x9d2   : > { %8500 = vmatprep.subr.bf16.mxu0 %v6237_v55  ;;  %v6493_v55 = vunpack.c.l.s8.bf16 %v4669_v15 }
 0x9d4   : > { %8337 = vmatpush1.bf16.msra.mxu1 %v6234_v22  ;;  %v6490_v22 = vunpack.c.l.s8.bf16 %v4666_v0 }
 0x9d5   : > { %8501 = vmatpush1.bf16.msra.mxu0 %v6236_v63  ;;  %8338 = vmatprep.subr.bf16.mxu1 %v6267_v49  ;;  %v6492_v63 = vunpack.c.l.s8.bf16 %v4668_v59  ;;  %v6523_v49 = vunpack.c.h.s8.bf16 %v4667_v8 }
 0x9d6   : > { %8502 = vmatprep.subr.bf16.mxu0 %v6269_v57  ;;  %v6525_v57 = vunpack.c.h.s8.bf16 %v4669_v15 }
 0x9d8   : > { %8339 = vmatpush1.bf16.msra.mxu1 %v6266_v62  ;;  %v6522_v62 = vunpack.c.h.s8.bf16 %v4666_v0 }
 0x9d9   : > { %8503 = vmatpush1.bf16.msra.mxu0 %v6268_v1  ;;  %8340 = vmatprep.subr.bf16.mxu1 %v6299_v32  ;;  %v6524_v1 = vunpack.c.h.s8.bf16 %v4668_v59  ;;  %v6555_v32 = vunpack.c.l.s8.bf16 %v4699_v61  ;;  %v6620_v59 = vunpack.c.l.s8.bf16 %v4732_v9 }
 0x9da   : > { %8504 = vmatprep.subr.bf16.mxu0 %v6301_v36  ;;  %v6557_v36 = vunpack.c.l.s8.bf16 %v4701_v44 }
 0x9dc   : > { %8341 = vmatpush1.bf16.msra.mxu1 %v6298_v20  ;;  %v6554_v20 = vunpack.c.l.s8.bf16 %v4698_v11 }
 0x9dd   : > { %8505 = vmatpush1.bf16.msra.mxu0 %v6300_v10  ;;  %8342 = vmatprep.subr.bf16.mxu1 %v6331_v43  ;;  %v6556_v10 = vunpack.c.l.s8.bf16 %v4700_v34  ;;  %v6587_v43 = vunpack.c.h.s8.bf16 %v4699_v61 }
 0x9de   : > { %8506 = vmatprep.subr.bf16.mxu0 %v6333_v2  ;;  %v6589_v2 = vunpack.c.h.s8.bf16 %v4701_v44  ;;  %v4763_v44 = vld [vmem:[%s12268_s12 + $0x1c88] sm:$0xff] }
 0x9e0   : > { %8343 = vmatpush1.bf16.msra.mxu1 %v6330_v47  ;;  %v9605_v47 = vrot.slane %v11227_v4, %v12508_v54 }
 0x9e1   : > { %8507 = vmatpush1.bf16.msra.mxu0 %v6332_v6  ;;  %8344 = vmatprep.subr.bf16.mxu1 %v6363_v7  ;;  %v4733_v6 = vld [vmem:[%s12268_s12 + $0x1b98] sm:$0xff]  ;;  %v9613_v7 = vrot.slane %v11227_v4, %v12549_v37 }
 0x9e2   : > { %8508 = vmatprep.subr.bf16.mxu0 %v6365_v12  ;;  %v6586_v12 = vunpack.c.h.s8.bf16 %v4698_v11  ;;  %v6653_v61 = vunpack.c.h.s8.bf16 %v4733_v6  ;;  %v6652_v11 = vunpack.c.h.s8.bf16 %v4732_v9 }
 0x9e4   : > { %8345 = vmatpush1.bf16.msra.mxu1 %v6362_v17  ;;  %v9805_v17 = vrot.slane %v11228_v13, %v12508_v54 }
 0x9e5   : > { %8509 = vmatpush1.bf16.msra.mxu0 %v6364_v27  ;;  %8346 = vmatprep.subr.bf16.mxu1 %v6395_v33  ;;  %v9617_v27 = vrot.slane %v11227_v4, %v12516_v58  ;;  %v6588_v33 = vunpack.c.h.s8.bf16 %v4700_v34  ;;  %v4762_v34 = vld [vmem:[%s12268_s12 + $0x1c80] sm:$0xff] }
 0x9e6   : > { %8510 = vmatprep.subr.bf16.mxu0 %v6397_v24  ;;  %v6619_v24 = vunpack.c.l.s8.bf16 %v4731_v3 }
 0x9e8   : > { %8347 = vmatpush1.bf16.msra.mxu1 %v6394_v28  ;;  %v9813_v28 = vrot.slane %v11228_v13, %v12549_v37 }
 0x9e9   : > { %8511 = vmatpush1.bf16.msra.mxu0 %v6396_v18  ;;  %8357 = vmatprep.subr.bf16.mxu1 %v6427_v41  ;;  %v9809_v18 = vrot.slane %v11228_v13, %v12513_v60  ;;  %v6621_v41 = vunpack.c.l.s8.bf16 %v4733_v6  ;;  %v4797_v6 = vld [vmem:[%s12268_s12 + $0x1d98] sm:$0xff] }
 0x9ea   : > { %8521 = vmatprep.subr.bf16.mxu0 %v6429_v42  ;;  %v6781_v9 = vunpack.c.h.s8.bf16 %v4797_v6 }
 0x9eb   : > { %8349 = vmatmul.mubr.bf16.vlgmr.msra.gmra.mrb[28].mxu1 %v12628_v19 }
 0x9ec   : > { %8513 = vmatmul.mubr.bf16.vlgmr.msra.gmra.mrb[32].mxu0 %v12628_v19  ;;  %8358 = vmatpush1.bf16.msra.mxu1 %v6426_v46 }
 0x9ed   : > { %8389 = vmatprep.mubr.bf16.mxu1 %v12634_v31  ;;  %8522 = vmatpush1.bf16.msra.mxu0 %v6428_v29  ;;  %v9817_v29 = vrot.slane %v11228_v13, %v12516_v58 }
 0x9ee   : > { %8553 = vmatprep.mubr.bf16.mxu0 %v12634_v31  ;;  %8359 = vmatprep.subr.bf16.mxu1 %v6459_v35 }
 0x9ef   : > { %8523 = vmatprep.subr.bf16.mxu0 %v6461_v30 }
 0x9f0   : > { %8360 = vmatpush1.bf16.msra.mxu1 %v6458_v38  ;;  %v6618_v38 = vunpack.c.l.s8.bf16 %v4730_v25 }
 0x9f1   : > { %8524 = vmatpush1.bf16.msra.mxu0 %v6460_v53  ;;  %8361 = vmatprep.subr.bf16.mxu1 %v6491_v40 }
 0x9f2   : > { %8525 = vmatprep.subr.bf16.mxu0 %v6493_v55 }
 0x9f4   : > { %8362 = vmatpush1.bf16.msra.mxu1 %v6490_v22  ;;  %v6651_v22 = vunpack.c.h.s8.bf16 %v4731_v3  ;;  %v6715_v3 = vunpack.c.h.s8.bf16 %v4763_v44 }
 0x9f5   : > { %8526 = vmatpush1.bf16.msra.mxu0 %v6492_v63  ;;  %8363 = vmatprep.subr.bf16.mxu1 %v6523_v49 }
 0x9f6   : > { %8527 = vmatprep.subr.bf16.mxu0 %v6525_v57 }
 0x9f8   : > { %8364 = vmatpush1.bf16.msra.mxu1 %v6522_v62 }
 0x9f9   : > { %8528 = vmatpush1.bf16.msra.mxu0 %v6524_v1  ;;  %8365 = vmatprep.subr.bf16.mxu1 %v6555_v32  ;;  %v4765_v1 = vld [vmem:[%s12268_s12 + $0x1c98] sm:$0xff]  ;;  %v6650_v32 = vunpack.c.h.s8.bf16 %v4730_v25 }
 0x9fa   : > { %8529 = vmatprep.subr.bf16.mxu0 %v6557_v36  ;;  %v6683_v36 = vunpack.c.l.s8.bf16 %v4763_v44  ;;  %v6717_v4 = vunpack.c.h.s8.bf16 %v4765_v1  ;;  %v4860_v44 = vld [vmem:[%s12268_s12 + $0x1f90] sm:$0xff] }
 0x9fc   : > { %8366 = vmatpush1.bf16.msra.mxu1 %v6554_v20  ;;  %v6685_v20 = vunpack.c.l.s8.bf16 %v4765_v1  ;;  %v6876_v1 = vunpack.c.l.s8.bf16 %v4860_v44 }
 0x9fd   : > { %8530 = vmatpush1.bf16.msra.mxu0 %v6556_v10  ;;  %8367 = vmatprep.subr.bf16.mxu1 %v6587_v43  ;;  %v4764_v10 = vld [vmem:[%s12268_s12 + $0x1c90] sm:$0xff]  ;;  %v6682_v43 = vunpack.c.l.s8.bf16 %v4762_v34 }
 0x9fe   : > { %v8063_v26 = vpop.f32.mrb[24].mxu1  ;;  %8531 = vmatprep.subr.bf16.mxu0 %v6589_v2  ;;  %v6684_v2 = vunpack.c.l.s8.bf16 %v4764_v10 }
 0x9ff   : > { %v9726_v42 = vmul.f32 %v9605_v47, %v8063_v26  ;;  %v8227_v16 = vpop.f32.mrb[28].mxu0  ;;  %v8065_v46 = vpop.f32.mrb[25].mxu1  ;;  %v4795_v47 = vld [vmem:[%s12268_s12 + $0x1d88] sm:$0xff] }
 0xa00   : > { %v9728_v35 = vmul.f32 %v9613_v7, %v8227_v16  ;;  %v9727_v8 = vmul.f32 %v9609_v45, %v8065_v46  ;;  %v8229_v30 = vpop.f32.mrb[29].mxu0  ;;  %v8067_v15 = vpop.f32.mrb[26].mxu1  ;;  %8368 = vmatpush1.bf16.msra.mxu1 %v6586_v12  ;;  %v6714_v7 = vunpack.c.h.s8.bf16 %v4762_v34  ;;  %v6716_v12 = vunpack.c.h.s8.bf16 %v4764_v10  ;;  %v4829_v16 = vld [vmem:[%s12268_s12 + $0x1e98] sm:$0xff] }
 0xa01   : > { %v9926_v53 = vadd.f32 %v9805_v17, %v9726_v42  ;;  %v9729_v40 = vmul.f32 %v9617_v27, %v8229_v30  ;;  %v8231_v0 = vpop.f32.mrb[30].mxu0  ;;  %8532 = vmatpush1.bf16.msra.mxu0 %v6588_v33  ;;  %v8068_v55 = vpop.f32.mrb[27].mxu1  ;;  %8369 = vmatprep.subr.bf16.mxu1 %v6619_v24  ;;  %v6747_v13 = vunpack.c.l.s8.bf16 %v4795_v47  ;;  %v4794_v17 = vld [vmem:[%s12268_s12 + $0x1d80] sm:$0xff]  ;;  %v6749_v33 = vunpack.c.l.s8.bf16 %v4797_v6  ;;  %v4796_v24 = vld [vmem:[%s12268_s12 + $0x1d90] sm:$0xff]  ;;  %v4827_v42 = vld [vmem:[%s12268_s12 + $0x1e88] sm:$0xff] }
 0xa02   : > { %v9928_v63 = vadd.f32 %v9813_v28, %v9728_v35  ;;  %v9927_v49 = vadd.f32 %v9809_v18, %v9727_v8  ;;  %v8232_v57 = vpop.f32.mrb[31].mxu0  ;;  %8533 = vmatprep.subr.bf16.mxu0 %v6621_v41  ;;  %v6746_v28 = vunpack.c.l.s8.bf16 %v4794_v17  ;;  %v6748_v18 = vunpack.c.l.s8.bf16 %v4796_v24  ;;  %v4826_v8 = vld [vmem:[%s12268_s12 + $0x1e80] sm:$0xff]  ;;  %v4828_v15 = vld [vmem:[%s12268_s12 + $0x1e90] sm:$0xff]  ;;  %v4859_v55 = vld [vmem:[%s12268_s12 + $0x1f88] sm:$0xff] }
 0xa03   : > { %11183 = vtanh.f32 %v9926_v53  ;;  %v9929_v62 = vadd.f32 %v9817_v29, %v9729_v40  ;;  %v6779_v41 = vunpack.c.h.s8.bf16 %v4795_v47  ;;  %v6778_v46 = vunpack.c.h.s8.bf16 %v4794_v17  ;;  %v4858_v57 = vld [vmem:[%s12268_s12 + $0x1f80] sm:$0xff]  ;;  %v3873_v34 = vld [vmem:[%s12268_s12 + $0xb8] sm:$0xff] }
 0xa04   : > { %11185 = vtanh.f32 %v9928_v63  ;;  %8370 = vmatpush1.bf16.msra.mxu1 %v6618_v38  ;;  %v6780_v29 = vunpack.c.h.s8.bf16 %v4796_v24  ;;  %v6811_v35 = vunpack.c.l.s8.bf16 %v4827_v42  ;;  %v6813_v30 = vunpack.c.l.s8.bf16 %v4829_v16  ;;  %v3902_v24 = vld [vmem:[%s12268_s12 + $0x1a0] sm:$0xff] }
 0xa05   : > { %11187 = vtanh.f32 %v9927_v49  ;;  %8534 = vmatpush1.bf16.msra.mxu0 %v6620_v59  ;;  %8371 = vmatprep.subr.bf16.mxu1 %v6651_v22  ;;  %v6810_v38 = vunpack.c.l.s8.bf16 %v4826_v8  ;;  %v6812_v53 = vunpack.c.l.s8.bf16 %v4828_v15  ;;  %v6843_v40 = vunpack.c.h.s8.bf16 %v4827_v42  ;;  %v4861_v59 = vld [vmem:[%s12268_s12 + $0x1f98] sm:$0xff]  ;;  %v3935_v42 = vld [vmem:[%s12268_s12 + $0x2a8] sm:$0xff] }
 0xa06   : > { %11189 = vtanh.f32 %v9929_v62  ;;  %8535 = vmatprep.subr.bf16.mxu0 %v6653_v61  ;;  %v6845_v0 = vunpack.c.h.s8.bf16 %v4829_v16  ;;  %v6842_v22 = vunpack.c.h.s8.bf16 %v4826_v8  ;;  %v6844_v63 = vunpack.c.h.s8.bf16 %v4828_v15  ;;  %v3937_v16 = vld [vmem:[%s12268_s12 + $0x2b8] sm:$0xff]  ;;  %v3934_v8 = vld [vmem:[%s12268_s12 + $0x2a0] sm:$0xff]  ;;  %v3936_v15 = vld [vmem:[%s12268_s12 + $0x2b0] sm:$0xff] }
 0xa07   : > { %v6875_v49 = vunpack.c.l.s8.bf16 %v4859_v55  ;;  %v6877_v61 = vunpack.c.l.s8.bf16 %v4861_v59  ;;  %v6874_v62 = vunpack.c.l.s8.bf16 %v4858_v57  ;;  %v6908_v10 = vunpack.c.h.s8.bf16 %v4860_v44  ;;  %v3968_v44 = vld [vmem:[%s12268_s12 + $0x3b0] sm:$0xff] }
 0xa08   : > { %8372 = vmatpush1.bf16.msra.mxu1 %v6650_v32  ;;  %v6907_v32 = vunpack.c.h.s8.bf16 %v4859_v55  ;;  %v3967_v55 = vld [vmem:[%s12268_s12 + $0x3a8] sm:$0xff] }
 0xa09   : > { %8536 = vmatpush1.bf16.msra.mxu0 %v6652_v11  ;;  %8373 = vmatprep.subr.bf16.mxu1 %v6683_v36  ;;  %v6909_v11 = vunpack.c.h.s8.bf16 %v4861_v59  ;;  %v3871_v36 = vld [vmem:[%s12268_s12 + $0xa8] sm:$0xff]  ;;  %v3969_v59 = vld [vmem:[%s12268_s12 + $0x3b8] sm:$0xff] }
 0xa0a   : > { %8537 = vmatprep.subr.bf16.mxu0 %v6685_v20  ;;  %v6906_v20 = vunpack.c.h.s8.bf16 %v4858_v57  ;;  %v3966_v57 = vld [vmem:[%s12268_s12 + $0x3a0] sm:$0xff] }
 0xa0c   : > { %8374 = vmatpush1.bf16.msra.mxu1 %v6682_v43  ;;  %v4895_v43 = vunpack.c.l.s8.bf16 %v3871_v36 }
 0xa0d   : > { %v11184_v45 = vpop.eup %11183  ;;  %8538 = vmatpush1.bf16.msra.mxu0 %v6684_v2  ;;  %8375 = vmatprep.subr.bf16.mxu1 %v6715_v3  ;;  %v3870_v2 = vld [vmem:[%s12268_s12 + $0xa0] sm:$0xff]  ;;  %v4897_v3 = vunpack.c.l.s8.bf16 %v3873_v34 }
 0xa0e   : > { %v11186_v27 = vpop.eup %11185  ;;  %9990 = vst [vmem:[%s12834_s4 + $0x60] sm:$0xff] %v11184_v45  ;;  %8539 = vmatprep.subr.bf16.mxu0 %v6717_v4  ;;  %v3872_v4 = vld [vmem:[%s12268_s12 + $0xb0] sm:$0xff]  ;;  %v4894_v47 = vunpack.c.l.s8.bf16 %v3870_v2  ;;  %v3903_v45 = vld [vmem:[%s12268_s12 + $0x1a8] sm:$0xff]  ;;  %v4926_v17 = vunpack.c.h.s8.bf16 %v3870_v2  ;;  %v3998_v2 = vld [vmem:[%s12268_s12 + $0x4a0] sm:$0xff] }
 0xa0f   : > { %v11188_v25 = vpop.eup %11187  ;;  %9992 = vst [vmem:[%s12834_s4 + $0x70] sm:$0xff] %v11186_v27  ;;  %v4896_v6 = vunpack.c.l.s8.bf16 %v3872_v4  ;;  %v4928_v27 = vunpack.c.h.s8.bf16 %v3872_v4  ;;  %v4000_v4 = vld [vmem:[%s12268_s12 + $0x4b0] sm:$0xff] }
 0xa10   : > { %v11190_v26 = vpop.eup %11189  ;;  %9991 = vst [vmem:[%s12834_s4 + $0x68] sm:$0xff] %v11188_v25  ;;  %8376 = vmatpush1.bf16.msra.mxu1 %v6714_v7  ;;  %v4927_v7 = vunpack.c.h.s8.bf16 %v3871_v36  ;;  %v3999_v36 = vld [vmem:[%s12268_s12 + $0x4a8] sm:$0xff] }
 0xa11   : > { %9993 = vst [vmem:[%s12834_s4 + $0x78] sm:$0xff] %v11190_v26  ;;  %8540 = vmatpush1.bf16.msra.mxu0 %v6716_v12  ;;  %8377 = vmatprep.subr.bf16.mxu1 %v6747_v13  ;;  %v4929_v12 = vunpack.c.h.s8.bf16 %v3873_v34  ;;  %v3905_v13 = vld [vmem:[%s12268_s12 + $0x1b8] sm:$0xff]  ;;  %v3904_v26 = vld [vmem:[%s12268_s12 + $0x1b0] sm:$0xff] }
 0xa12   : > { %8541 = vmatprep.subr.bf16.mxu0 %v6749_v33  ;;  %v4959_v33 = vunpack.c.l.s8.bf16 %v3903_v45  ;;  %v4961_v25 = vunpack.c.l.s8.bf16 %v3905_v13  ;;  %v4001_v34 = vld [vmem:[%s12268_s12 + $0x4b8] sm:$0xff] }
 0xa14   : > { %8378 = vmatpush1.bf16.msra.mxu1 %v6746_v28  ;;  %v4958_v28 = vunpack.c.l.s8.bf16 %v3902_v24 }
 0xa15   : > { %8542 = vmatpush1.bf16.msra.mxu0 %v6748_v18  ;;  %8379 = vmatprep.subr.bf16.mxu1 %v6779_v41  ;;  %v4960_v18 = vunpack.c.l.s8.bf16 %v3904_v26  ;;  %v4991_v41 = vunpack.c.h.s8.bf16 %v3903_v45  ;;  %v5185_v45 = vunpack.c.h.s8.bf16 %v4001_v34 }
 0xa16   : > { %8543 = vmatprep.subr.bf16.mxu0 %v6781_v9  ;;  %v4993_v9 = vunpack.c.h.s8.bf16 %v3905_v13  ;;  %v4033_v13 = vld [vmem:[%s12268_s12 + $0x5b8] sm:$0xff] }
 0xa18   : > { %8380 = vmatpush1.bf16.msra.mxu1 %v6778_v46  ;;  %v4990_v46 = vunpack.c.h.s8.bf16 %v3902_v24  ;;  %v4030_v24 = vld [vmem:[%s12268_s12 + $0x5a0] sm:$0xff] }
 0xa19   : > { %8544 = vmatpush1.bf16.msra.mxu0 %v6780_v29  ;;  %8381 = vmatprep.subr.bf16.mxu1 %v6811_v35  ;;  %v4992_v29 = vunpack.c.h.s8.bf16 %v3904_v26  ;;  %v5023_v35 = vunpack.c.l.s8.bf16 %v3935_v42  ;;  %v4032_v26 = vld [vmem:[%s12268_s12 + $0x5b0] sm:$0xff] }
 0xa1a   : > { %8545 = vmatprep.subr.bf16.mxu0 %v6813_v30  ;;  %v5025_v30 = vunpack.c.l.s8.bf16 %v3937_v16 }
 0xa1c   : > { %8382 = vmatpush1.bf16.msra.mxu1 %v6810_v38  ;;  %v5022_v38 = vunpack.c.l.s8.bf16 %v3934_v8 }
 0xa1d   : > { %8546 = vmatpush1.bf16.msra.mxu0 %v6812_v53  ;;  %8383 = vmatprep.subr.bf16.mxu1 %v6843_v40  ;;  %v5024_v53 = vunpack.c.l.s8.bf16 %v3936_v15  ;;  %v5055_v40 = vunpack.c.h.s8.bf16 %v3935_v42  ;;  %v4063_v42 = vld [vmem:[%s12268_s12 + $0x6a8] sm:$0xff] }
 0xa1e   : > { %8547 = vmatprep.subr.bf16.mxu0 %v6845_v0  ;;  %v5057_v0 = vunpack.c.h.s8.bf16 %v3937_v16  ;;  %v4065_v16 = vld [vmem:[%s12268_s12 + $0x6b8] sm:$0xff] }
 0xa20   : > { %8384 = vmatpush1.bf16.msra.mxu1 %v6842_v22  ;;  %v5054_v22 = vunpack.c.h.s8.bf16 %v3934_v8  ;;  %v4062_v8 = vld [vmem:[%s12268_s12 + $0x6a0] sm:$0xff] }
 0xa21   : > { %8548 = vmatpush1.bf16.msra.mxu0 %v6844_v63  ;;  %8385 = vmatprep.subr.bf16.mxu1 %v6875_v49  ;;  %v5056_v63 = vunpack.c.h.s8.bf16 %v3936_v15  ;;  %v5087_v49 = vunpack.c.l.s8.bf16 %v3967_v55  ;;  %v4064_v15 = vld [vmem:[%s12268_s12 + $0x6b0] sm:$0xff] }
 0xa22   : > { %8549 = vmatprep.subr.bf16.mxu0 %v6877_v61  ;;  %v5089_v61 = vunpack.c.l.s8.bf16 %v3969_v59 }
 0xa24   : > { %8386 = vmatpush1.bf16.msra.mxu1 %v6874_v62  ;;  %v5086_v62 = vunpack.c.l.s8.bf16 %v3966_v57 }
 0xa25   : > { %8550 = vmatpush1.bf16.msra.mxu0 %v6876_v1  ;;  %8387 = vmatprep.subr.bf16.mxu1 %v6907_v32  ;;  %v5088_v1 = vunpack.c.l.s8.bf16 %v3968_v44  ;;  %v5119_v32 = vunpack.c.h.s8.bf16 %v3967_v55  ;;  %v4095_v55 = vld [vmem:[%s12268_s12 + $0x7a8] sm:$0xff] }
 0xa26   : > { %8551 = vmatprep.subr.bf16.mxu0 %v6909_v11  ;;  %v5121_v11 = vunpack.c.h.s8.bf16 %v3969_v59  ;;  %v4097_v59 = vld [vmem:[%s12268_s12 + $0x7b8] sm:$0xff] }
 0xa28   : > { %8388 = vmatpush1.bf16.msra.mxu1 %v6906_v20  ;;  %v5118_v20 = vunpack.c.h.s8.bf16 %v3966_v57  ;;  %v4094_v57 = vld [vmem:[%s12268_s12 + $0x7a0] sm:$0xff] }
 0xa29   : > { %8552 = vmatpush1.bf16.msra.mxu0 %v6908_v10  ;;  %8562 = vmatprep.subr.bf16.mxu1 %v4895_v43  ;;  %v5120_v10 = vunpack.c.h.s8.bf16 %v3968_v44  ;;  %v5151_v43 = vunpack.c.l.s8.bf16 %v3999_v36  ;;  %v4096_v44 = vld [vmem:[%s12268_s12 + $0x7b0] sm:$0xff] }
 0xa2a   : > { %8726 = vmatprep.subr.bf16.mxu0 %v4897_v3  ;;  %v5153_v3 = vunpack.c.l.s8.bf16 %v4001_v34  ;;  %v4129_v34 = vld [vmem:[%s12268_s12 + $0x8b8] sm:$0xff] }
 0xa2b   : > { %8390 = vmatmul.mubr.bf16.vlgmr.msra.gmra.mrb[28].mxu1 %v12673_v51 }
 0xa2c   : > { %8554 = vmatmul.mubr.bf16.vlgmr.msra.gmra.mrb[32].mxu0 %v12673_v51  ;;  %8563 = vmatpush1.bf16.msra.mxu1 %v4894_v47  ;;  %v5150_v47 = vunpack.c.l.s8.bf16 %v3998_v2 }
 0xa2d   : > { %8594 = vmatprep.mubr.bf16.mxu1 %v12460_v52  ;;  %8727 = vmatpush1.bf16.msra.mxu0 %v4896_v6  ;;  %v5152_v6 = vunpack.c.l.s8.bf16 %v4000_v4 }
 0xa2e   : > { %8758 = vmatprep.mubr.bf16.mxu0 %v12460_v52  ;;  %8564 = vmatprep.subr.bf16.mxu1 %v4927_v7  ;;  %v5183_v7 = vunpack.c.h.s8.bf16 %v3999_v36  ;;  %v4127_v36 = vld [vmem:[%s12268_s12 + $0x8a8] sm:$0xff] }
 0xa2f   : > { %8728 = vmatprep.subr.bf16.mxu0 %v4929_v12  ;;  %v4031_v12 = vld [vmem:[%s12268_s12 + $0x5a8] sm:$0xff] }
 0xa30   : > { %8565 = vmatpush1.bf16.msra.mxu1 %v4926_v17  ;;  %v5182_v17 = vunpack.c.h.s8.bf16 %v3998_v2  ;;  %v4126_v2 = vld [vmem:[%s12268_s12 + $0x8a0] sm:$0xff] }
 0xa31   : > { %8729 = vmatpush1.bf16.msra.mxu0 %v4928_v27  ;;  %8566 = vmatprep.subr.bf16.mxu1 %v4959_v33  ;;  %v5184_v27 = vunpack.c.h.s8.bf16 %v4000_v4  ;;  %v5215_v33 = vunpack.c.l.s8.bf16 %v4031_v12  ;;  %v4128_v4 = vld [vmem:[%s12268_s12 + $0x8b0] sm:$0xff] }
 0xa32   : > { %8730 = vmatprep.subr.bf16.mxu0 %v4961_v25  ;;  %v5217_v25 = vunpack.c.l.s8.bf16 %v4033_v13 }
 0xa34   : > { %8567 = vmatpush1.bf16.msra.mxu1 %v4958_v28  ;;  %v5214_v28 = vunpack.c.l.s8.bf16 %v4030_v24 }
 0xa35   : > { %8731 = vmatpush1.bf16.msra.mxu0 %v4960_v18  ;;  %8568 = vmatprep.subr.bf16.mxu1 %v4991_v41  ;;  %v5216_v18 = vunpack.c.l.s8.bf16 %v4032_v26  ;;  %v5247_v41 = vunpack.c.h.s8.bf16 %v4031_v12  ;;  %v5441_v12 = vunpack.c.h.s8.bf16 %v4129_v34 }
 0xa36   : > { %8732 = vmatprep.subr.bf16.mxu0 %v4993_v9  ;;  %v5249_v9 = vunpack.c.h.s8.bf16 %v4033_v13  ;;  %v4161_v13 = vld [vmem:[%s12268_s12 + $0x9b8] sm:$0xff] }
 0xa38   : > { %8569 = vmatpush1.bf16.msra.mxu1 %v4990_v46  ;;  %v5246_v46 = vunpack.c.h.s8.bf16 %v4030_v24  ;;  %v4158_v24 = vld [vmem:[%s12268_s12 + $0x9a0] sm:$0xff] }
 0xa39   : > { %8733 = vmatpush1.bf16.msra.mxu0 %v4992_v29  ;;  %8570 = vmatprep.subr.bf16.mxu1 %v5023_v35  ;;  %v5248_v29 = vunpack.c.h.s8.bf16 %v4032_v26  ;;  %v5279_v35 = vunpack.c.l.s8.bf16 %v4063_v42  ;;  %v4160_v26 = vld [vmem:[%s12268_s12 + $0x9b0] sm:$0xff] }
 0xa3a   : > { %8734 = vmatprep.subr.bf16.mxu0 %v5025_v30  ;;  %v5281_v30 = vunpack.c.l.s8.bf16 %v4065_v16 }
 0xa3c   : > { %8571 = vmatpush1.bf16.msra.mxu1 %v5022_v38  ;;  %v5278_v38 = vunpack.c.l.s8.bf16 %v4062_v8 }
 0xa3d   : > { %8735 = vmatpush1.bf16.msra.mxu0 %v5024_v53  ;;  %8572 = vmatprep.subr.bf16.mxu1 %v5055_v40  ;;  %v5280_v53 = vunpack.c.l.s8.bf16 %v4064_v15  ;;  %v5311_v40 = vunpack.c.h.s8.bf16 %v4063_v42  ;;  %v4191_v42 = vld [vmem:[%s12268_s12 + $0xaa8] sm:$0xff] }
 0xa3e   : > { %8736 = vmatprep.subr.bf16.mxu0 %v5057_v0  ;;  %v5313_v0 = vunpack.c.h.s8.bf16 %v4065_v16  ;;  %v4193_v16 = vld [vmem:[%s12268_s12 + $0xab8] sm:$0xff] }
 0xa40   : > { %8573 = vmatpush1.bf16.msra.mxu1 %v5054_v22  ;;  %v5310_v22 = vunpack.c.h.s8.bf16 %v4062_v8  ;;  %v4190_v8 = vld [vmem:[%s12268_s12 + $0xaa0] sm:$0xff] }
 0xa41   : > { %8737 = vmatpush1.bf16.msra.mxu0 %v5056_v63  ;;  %8574 = vmatprep.subr.bf16.mxu1 %v5087_v49  ;;  %v5312_v63 = vunpack.c.h.s8.bf16 %v4064_v15  ;;  %v5343_v49 = vunpack.c.l.s8.bf16 %v4095_v55  ;;  %v4192_v15 = vld [vmem:[%s12268_s12 + $0xab0] sm:$0xff] }
 0xa42   : > { %8738 = vmatprep.subr.bf16.mxu0 %v5089_v61  ;;  %v5345_v61 = vunpack.c.l.s8.bf16 %v4097_v59 }
 0xa44   : > { %8575 = vmatpush1.bf16.msra.mxu1 %v5086_v62  ;;  %v5342_v62 = vunpack.c.l.s8.bf16 %v4094_v57 }
 0xa45   : > { %8739 = vmatpush1.bf16.msra.mxu0 %v5088_v1  ;;  %8576 = vmatprep.subr.bf16.mxu1 %v5119_v32  ;;  %v5344_v1 = vunpack.c.l.s8.bf16 %v4096_v44  ;;  %v5375_v32 = vunpack.c.h.s8.bf16 %v4095_v55  ;;  %v4223_v55 = vld [vmem:[%s12268_s12 + $0xba8] sm:$0xff] }
 0xa46   : > { %8740 = vmatprep.subr.bf16.mxu0 %v5121_v11  ;;  %v5377_v11 = vunpack.c.h.s8.bf16 %v4097_v59  ;;  %v4225_v59 = vld [vmem:[%s12268_s12 + $0xbb8] sm:$0xff] }
 0xa48   : > { %8577 = vmatpush1.bf16.msra.mxu1 %v5118_v20  ;;  %v5374_v20 = vunpack.c.h.s8.bf16 %v4094_v57  ;;  %v4222_v57 = vld [vmem:[%s12268_s12 + $0xba0] sm:$0xff] }
 0xa49   : > { %8741 = vmatpush1.bf16.msra.mxu0 %v5120_v10  ;;  %8578 = vmatprep.subr.bf16.mxu1 %v5151_v43  ;;  %v5376_v10 = vunpack.c.h.s8.bf16 %v4096_v44  ;;  %v5407_v43 = vunpack.c.l.s8.bf16 %v4127_v36  ;;  %v4224_v44 = vld [vmem:[%s12268_s12 + $0xbb0] sm:$0xff] }
 0xa4a   : > { %8742 = vmatprep.subr.bf16.mxu0 %v5153_v3  ;;  %v5409_v3 = vunpack.c.l.s8.bf16 %v4129_v34  ;;  %v4257_v34 = vld [vmem:[%s12268_s12 + $0xcb8] sm:$0xff] }
 0xa4c   : > { %8579 = vmatpush1.bf16.msra.mxu1 %v5150_v47  ;;  %v5406_v47 = vunpack.c.l.s8.bf16 %v4126_v2 }
 0xa4d   : > { %8743 = vmatpush1.bf16.msra.mxu0 %v5152_v6  ;;  %8580 = vmatprep.subr.bf16.mxu1 %v5183_v7  ;;  %v5408_v6 = vunpack.c.l.s8.bf16 %v4128_v4  ;;  %v5439_v7 = vunpack.c.h.s8.bf16 %v4127_v36  ;;  %v4255_v36 = vld [vmem:[%s12268_s12 + $0xca8] sm:$0xff] }
 0xa4e   : > { %8744 = vmatprep.subr.bf16.mxu0 %v5185_v45  ;;  %v4159_v45 = vld [vmem:[%s12268_s12 + $0x9a8] sm:$0xff] }
 0xa50   : > { %8581 = vmatpush1.bf16.msra.mxu1 %v5182_v17  ;;  %v5438_v17 = vunpack.c.h.s8.bf16 %v4126_v2  ;;  %v4254_v2 = vld [vmem:[%s12268_s12 + $0xca0] sm:$0xff] }
 0xa51   : > { %8745 = vmatpush1.bf16.msra.mxu0 %v5184_v27  ;;  %8582 = vmatprep.subr.bf16.mxu1 %v5215_v33  ;;  %v5440_v27 = vunpack.c.h.s8.bf16 %v4128_v4  ;;  %v5471_v33 = vunpack.c.l.s8.bf16 %v4159_v45  ;;  %v4256_v4 = vld [vmem:[%s12268_s12 + $0xcb0] sm:$0xff] }
 0xa52   : > { %8746 = vmatprep.subr.bf16.mxu0 %v5217_v25  ;;  %v5473_v25 = vunpack.c.l.s8.bf16 %v4161_v13 }
 0xa54   : > { %8583 = vmatpush1.bf16.msra.mxu1 %v5214_v28  ;;  %v5470_v28 = vunpack.c.l.s8.bf16 %v4158_v24 }
 0xa55   : > { %8747 = vmatpush1.bf16.msra.mxu0 %v5216_v18  ;;  %8584 = vmatprep.subr.bf16.mxu1 %v5247_v41  ;;  %v5472_v18 = vunpack.c.l.s8.bf16 %v4160_v26  ;;  %v5503_v41 = vunpack.c.h.s8.bf16 %v4159_v45  ;;  %v5697_v45 = vunpack.c.h.s8.bf16 %v4257_v34 }
 0xa56   : > { %8748 = vmatprep.subr.bf16.mxu0 %v5249_v9  ;;  %v5505_v9 = vunpack.c.h.s8.bf16 %v4161_v13  ;;  %v4289_v13 = vld [vmem:[%s12268_s12 + $0xdb8] sm:$0xff] }
 0xa58   : > { %8585 = vmatpush1.bf16.msra.mxu1 %v5246_v46  ;;  %v5502_v46 = vunpack.c.h.s8.bf16 %v4158_v24  ;;  %v4286_v24 = vld [vmem:[%s12268_s12 + $0xda0] sm:$0xff] }
 0xa59   : > { %8749 = vmatpush1.bf16.msra.mxu0 %v5248_v29  ;;  %8586 = vmatprep.subr.bf16.mxu1 %v5279_v35  ;;  %v5504_v29 = vunpack.c.h.s8.bf16 %v4160_v26  ;;  %v5535_v35 = vunpack.c.l.s8.bf16 %v4191_v42  ;;  %v4288_v26 = vld [vmem:[%s12268_s12 + $0xdb0] sm:$0xff] }
 0xa5a   : > { %8750 = vmatprep.subr.bf16.mxu0 %v5281_v30  ;;  %v5537_v30 = vunpack.c.l.s8.bf16 %v4193_v16 }
 0xa5c   : > { %8587 = vmatpush1.bf16.msra.mxu1 %v5278_v38  ;;  %v5534_v38 = vunpack.c.l.s8.bf16 %v4190_v8 }
 0xa5d   : > { %8751 = vmatpush1.bf16.msra.mxu0 %v5280_v53  ;;  %8588 = vmatprep.subr.bf16.mxu1 %v5311_v40  ;;  %v5536_v53 = vunpack.c.l.s8.bf16 %v4192_v15  ;;  %v5567_v40 = vunpack.c.h.s8.bf16 %v4191_v42  ;;  %v4319_v42 = vld [vmem:[%s12268_s12 + $0xea8] sm:$0xff] }
 0xa5e   : > { %8752 = vmatprep.subr.bf16.mxu0 %v5313_v0  ;;  %v5569_v0 = vunpack.c.h.s8.bf16 %v4193_v16  ;;  %v4321_v16 = vld [vmem:[%s12268_s12 + $0xeb8] sm:$0xff] }
 0xa60   : > { %8589 = vmatpush1.bf16.msra.mxu1 %v5310_v22  ;;  %v5566_v22 = vunpack.c.h.s8.bf16 %v4190_v8  ;;  %v4318_v8 = vld [vmem:[%s12268_s12 + $0xea0] sm:$0xff] }
 0xa61   : > { %8753 = vmatpush1.bf16.msra.mxu0 %v5312_v63  ;;  %8590 = vmatprep.subr.bf16.mxu1 %v5343_v49  ;;  %v5568_v63 = vunpack.c.h.s8.bf16 %v4192_v15  ;;  %v5599_v49 = vunpack.c.l.s8.bf16 %v4223_v55  ;;  %v4320_v15 = vld [vmem:[%s12268_s12 + $0xeb0] sm:$0xff] }
 0xa62   : > { %8754 = vmatprep.subr.bf16.mxu0 %v5345_v61  ;;  %v5601_v61 = vunpack.c.l.s8.bf16 %v4225_v59 }
 0xa64   : > { %8591 = vmatpush1.bf16.msra.mxu1 %v5342_v62  ;;  %v5598_v62 = vunpack.c.l.s8.bf16 %v4222_v57 }
 0xa65   : > { %8755 = vmatpush1.bf16.msra.mxu0 %v5344_v1  ;;  %8592 = vmatprep.subr.bf16.mxu1 %v5375_v32  ;;  %v5600_v1 = vunpack.c.l.s8.bf16 %v4224_v44  ;;  %v5631_v32 = vunpack.c.h.s8.bf16 %v4223_v55  ;;  %v4351_v55 = vld [vmem:[%s12268_s12 + $0xfa8] sm:$0xff] }
 0xa66   : > { %8756 = vmatprep.subr.bf16.mxu0 %v5377_v11  ;;  %v5633_v11 = vunpack.c.h.s8.bf16 %v4225_v59  ;;  %v4353_v59 = vld [vmem:[%s12268_s12 + $0xfb8] sm:$0xff] }
 0xa68   : > { %8593 = vmatpush1.bf16.msra.mxu1 %v5374_v20  ;;  %v5630_v20 = vunpack.c.h.s8.bf16 %v4222_v57  ;;  %v4350_v57 = vld [vmem:[%s12268_s12 + $0xfa0] sm:$0xff] }
 0xa69   : > { %8757 = vmatpush1.bf16.msra.mxu0 %v5376_v10  ;;  %8603 = vmatprep.subr.bf16.mxu1 %v5407_v43  ;;  %v5632_v10 = vunpack.c.h.s8.bf16 %v4224_v44  ;;  %v5663_v43 = vunpack.c.l.s8.bf16 %v4255_v36  ;;  %v4352_v44 = vld [vmem:[%s12268_s12 + $0xfb0] sm:$0xff] }
 0xa6a   : > { %8767 = vmatprep.subr.bf16.mxu0 %v5409_v3  ;;  %v5665_v3 = vunpack.c.l.s8.bf16 %v4257_v34  ;;  %v4385_v34 = vld [vmem:[%s12268_s12 + $0x10b8] sm:$0xff] }
 0xa6b   : > { %8595 = vmatmul.mubr.bf16.vlgmr.msra.gmra.mrb[32].mxu1 %v12462_v56 }
 0xa6c   : > { %8759 = vmatmul.mubr.bf16.vlgmr.msra.gmra.mrb[36].mxu0 %v12462_v56  ;;  %8604 = vmatpush1.bf16.msra.mxu1 %v5406_v47  ;;  %v5662_v47 = vunpack.c.l.s8.bf16 %v4254_v2 }
 0xa6d   : > { %8635 = vmatprep.mubr.bf16.mxu1 %v12470_v39  ;;  %8768 = vmatpush1.bf16.msra.mxu0 %v5408_v6  ;;  %v5664_v6 = vunpack.c.l.s8.bf16 %v4256_v4 }
 0xa6e   : > { %8799 = vmatprep.mubr.bf16.mxu0 %v12470_v39  ;;  %8605 = vmatprep.subr.bf16.mxu1 %v5439_v7  ;;  %v5695_v7 = vunpack.c.h.s8.bf16 %v4255_v36  ;;  %v4383_v36 = vld [vmem:[%s12268_s12 + $0x10a8] sm:$0xff] }
 0xa6f   : > { %8769 = vmatprep.subr.bf16.mxu0 %v5441_v12  ;;  %v4287_v12 = vld [vmem:[%s12268_s12 + $0xda8] sm:$0xff] }
 0xa70   : > { %8606 = vmatpush1.bf16.msra.mxu1 %v5438_v17  ;;  %v5694_v17 = vunpack.c.h.s8.bf16 %v4254_v2  ;;  %v4382_v2 = vld [vmem:[%s12268_s12 + $0x10a0] sm:$0xff] }
 0xa71   : > { %8770 = vmatpush1.bf16.msra.mxu0 %v5440_v27  ;;  %8607 = vmatprep.subr.bf16.mxu1 %v5471_v33  ;;  %v5696_v27 = vunpack.c.h.s8.bf16 %v4256_v4  ;;  %v5727_v33 = vunpack.c.l.s8.bf16 %v4287_v12  ;;  %v4384_v4 = vld [vmem:[%s12268_s12 + $0x10b0] sm:$0xff] }
 0xa72   : > { %8771 = vmatprep.subr.bf16.mxu0 %v5473_v25  ;;  %v5729_v25 = vunpack.c.l.s8.bf16 %v4289_v13 }
 0xa74   : > { %8608 = vmatpush1.bf16.msra.mxu1 %v5470_v28  ;;  %v5726_v28 = vunpack.c.l.s8.bf16 %v4286_v24 }
 0xa75   : > { %8772 = vmatpush1.bf16.msra.mxu0 %v5472_v18  ;;  %8609 = vmatprep.subr.bf16.mxu1 %v5503_v41  ;;  %v5728_v18 = vunpack.c.l.s8.bf16 %v4288_v26  ;;  %v5759_v41 = vunpack.c.h.s8.bf16 %v4287_v12  ;;  %v5953_v12 = vunpack.c.h.s8.bf16 %v4385_v34 }
 0xa76   : > { %8773 = vmatprep.subr.bf16.mxu0 %v5505_v9  ;;  %v5761_v9 = vunpack.c.h.s8.bf16 %v4289_v13  ;;  %v4417_v13 = vld [vmem:[%s12268_s12 + $0x11b8] sm:$0xff] }
 0xa78   : > { %8610 = vmatpush1.bf16.msra.mxu1 %v5502_v46  ;;  %v5758_v46 = vunpack.c.h.s8.bf16 %v4286_v24  ;;  %v4414_v24 = vld [vmem:[%s12268_s12 + $0x11a0] sm:$0xff] }
 0xa79   : > { %8774 = vmatpush1.bf16.msra.mxu0 %v5504_v29  ;;  %8611 = vmatprep.subr.bf16.mxu1 %v5535_v35  ;;  %v5760_v29 = vunpack.c.h.s8.bf16 %v4288_v26  ;;  %v5791_v35 = vunpack.c.l.s8.bf16 %v4319_v42  ;;  %v4416_v26 = vld [vmem:[%s12268_s12 + $0x11b0] sm:$0xff] }
 0xa7a   : > { %8775 = vmatprep.subr.bf16.mxu0 %v5537_v30  ;;  %v5793_v30 = vunpack.c.l.s8.bf16 %v4321_v16 }
 0xa7c   : > { %8612 = vmatpush1.bf16.msra.mxu1 %v5534_v38  ;;  %v5790_v38 = vunpack.c.l.s8.bf16 %v4318_v8 }
 0xa7d   : > { %8776 = vmatpush1.bf16.msra.mxu0 %v5536_v53  ;;  %8613 = vmatprep.subr.bf16.mxu1 %v5567_v40  ;;  %v5792_v53 = vunpack.c.l.s8.bf16 %v4320_v15  ;;  %v5823_v40 = vunpack.c.h.s8.bf16 %v4319_v42  ;;  %v4447_v42 = vld [vmem:[%s12268_s12 + $0x12a8] sm:$0xff] }
 0xa7e   : > { %8777 = vmatprep.subr.bf16.mxu0 %v5569_v0  ;;  %v5825_v0 = vunpack.c.h.s8.bf16 %v4321_v16  ;;  %v4449_v16 = vld [vmem:[%s12268_s12 + $0x12b8] sm:$0xff] }
 0xa80   : > { %8614 = vmatpush1.bf16.msra.mxu1 %v5566_v22  ;;  %v5822_v22 = vunpack.c.h.s8.bf16 %v4318_v8  ;;  %v4446_v8 = vld [vmem:[%s12268_s12 + $0x12a0] sm:$0xff] }
 0xa81   : > { %8778 = vmatpush1.bf16.msra.mxu0 %v5568_v63  ;;  %8615 = vmatprep.subr.bf16.mxu1 %v5599_v49  ;;  %v5824_v63 = vunpack.c.h.s8.bf16 %v4320_v15  ;;  %v5855_v49 = vunpack.c.l.s8.bf16 %v4351_v55  ;;  %v4448_v15 = vld [vmem:[%s12268_s12 + $0x12b0] sm:$0xff] }
 0xa82   : > { %8779 = vmatprep.subr.bf16.mxu0 %v5601_v61  ;;  %v5857_v61 = vunpack.c.l.s8.bf16 %v4353_v59 }
 0xa84   : > { %8616 = vmatpush1.bf16.msra.mxu1 %v5598_v62  ;;  %v5854_v62 = vunpack.c.l.s8.bf16 %v4350_v57 }
 0xa85   : > { %8780 = vmatpush1.bf16.msra.mxu0 %v5600_v1  ;;  %8617 = vmatprep.subr.bf16.mxu1 %v5631_v32  ;;  %v5856_v1 = vunpack.c.l.s8.bf16 %v4352_v44  ;;  %v5887_v32 = vunpack.c.h.s8.bf16 %v4351_v55  ;;  %v4479_v55 = vld [vmem:[%s12268_s12 + $0x13a8] sm:$0xff] }
 0xa86   : > { %8781 = vmatprep.subr.bf16.mxu0 %v5633_v11  ;;  %v5889_v11 = vunpack.c.h.s8.bf16 %v4353_v59  ;;  %v4481_v59 = vld [vmem:[%s12268_s12 + $0x13b8] sm:$0xff] }
 0xa88   : > { %8618 = vmatpush1.bf16.msra.mxu1 %v5630_v20  ;;  %v5886_v20 = vunpack.c.h.s8.bf16 %v4350_v57  ;;  %v4478_v57 = vld [vmem:[%s12268_s12 + $0x13a0] sm:$0xff] }
 0xa89   : > { %8782 = vmatpush1.bf16.msra.mxu0 %v5632_v10  ;;  %8619 = vmatprep.subr.bf16.mxu1 %v5663_v43  ;;  %v5888_v10 = vunpack.c.h.s8.bf16 %v4352_v44  ;;  %v5919_v43 = vunpack.c.l.s8.bf16 %v4383_v36  ;;  %v4480_v44 = vld [vmem:[%s12268_s12 + $0x13b0] sm:$0xff] }
 0xa8a   : > { %8783 = vmatprep.subr.bf16.mxu0 %v5665_v3  ;;  %v5921_v3 = vunpack.c.l.s8.bf16 %v4385_v34  ;;  %v4513_v34 = vld [vmem:[%s12268_s12 + $0x14b8] sm:$0xff] }
 0xa8c   : > { %8620 = vmatpush1.bf16.msra.mxu1 %v5662_v47  ;;  %v5918_v47 = vunpack.c.l.s8.bf16 %v4382_v2 }
 0xa8d   : > { %8784 = vmatpush1.bf16.msra.mxu0 %v5664_v6  ;;  %8621 = vmatprep.subr.bf16.mxu1 %v5695_v7  ;;  %v5920_v6 = vunpack.c.l.s8.bf16 %v4384_v4  ;;  %v5951_v7 = vunpack.c.h.s8.bf16 %v4383_v36  ;;  %v4511_v36 = vld [vmem:[%s12268_s12 + $0x14a8] sm:$0xff] }
 0xa8e   : > { %8785 = vmatprep.subr.bf16.mxu0 %v5697_v45  ;;  %v4415_v45 = vld [vmem:[%s12268_s12 + $0x11a8] sm:$0xff] }
 0xa90   : > { %8622 = vmatpush1.bf16.msra.mxu1 %v5694_v17  ;;  %v5950_v17 = vunpack.c.h.s8.bf16 %v4382_v2  ;;  %v4510_v2 = vld [vmem:[%s12268_s12 + $0x14a0] sm:$0xff] }
 0xa91   : > { %8786 = vmatpush1.bf16.msra.mxu0 %v5696_v27  ;;  %8623 = vmatprep.subr.bf16.mxu1 %v5727_v33  ;;  %v5952_v27 = vunpack.c.h.s8.bf16 %v4384_v4  ;;  %v5983_v33 = vunpack.c.l.s8.bf16 %v4415_v45  ;;  %v4512_v4 = vld [vmem:[%s12268_s12 + $0x14b0] sm:$0xff] }
 0xa92   : > { %8787 = vmatprep.subr.bf16.mxu0 %v5729_v25  ;;  %v5985_v25 = vunpack.c.l.s8.bf16 %v4417_v13 }
 0xa94   : > { %8624 = vmatpush1.bf16.msra.mxu1 %v5726_v28  ;;  %v5982_v28 = vunpack.c.l.s8.bf16 %v4414_v24 }
 0xa95   : > { %8788 = vmatpush1.bf16.msra.mxu0 %v5728_v18  ;;  %8625 = vmatprep.subr.bf16.mxu1 %v5759_v41  ;;  %v5984_v18 = vunpack.c.l.s8.bf16 %v4416_v26  ;;  %v6015_v41 = vunpack.c.h.s8.bf16 %v4415_v45  ;;  %v6209_v45 = vunpack.c.h.s8.bf16 %v4513_v34 }
 0xa96   : > { %8789 = vmatprep.subr.bf16.mxu0 %v5761_v9  ;;  %v6017_v9 = vunpack.c.h.s8.bf16 %v4417_v13  ;;  %v4545_v13 = vld [vmem:[%s12268_s12 + $0x15b8] sm:$0xff] }
 0xa98   : > { %8626 = vmatpush1.bf16.msra.mxu1 %v5758_v46  ;;  %v6014_v46 = vunpack.c.h.s8.bf16 %v4414_v24  ;;  %v4542_v24 = vld [vmem:[%s12268_s12 + $0x15a0] sm:$0xff] }
 0xa99   : > { %8790 = vmatpush1.bf16.msra.mxu0 %v5760_v29  ;;  %8627 = vmatprep.subr.bf16.mxu1 %v5791_v35  ;;  %v6016_v29 = vunpack.c.h.s8.bf16 %v4416_v26  ;;  %v6047_v35 = vunpack.c.l.s8.bf16 %v4447_v42  ;;  %v4544_v26 = vld [vmem:[%s12268_s12 + $0x15b0] sm:$0xff] }
 0xa9a   : > { %8791 = vmatprep.subr.bf16.mxu0 %v5793_v30  ;;  %v6049_v30 = vunpack.c.l.s8.bf16 %v4449_v16 }
 0xa9c   : > { %8628 = vmatpush1.bf16.msra.mxu1 %v5790_v38  ;;  %v6046_v38 = vunpack.c.l.s8.bf16 %v4446_v8 }
 0xa9d   : > { %8792 = vmatpush1.bf16.msra.mxu0 %v5792_v53  ;;  %8629 = vmatprep.subr.bf16.mxu1 %v5823_v40  ;;  %v6048_v53 = vunpack.c.l.s8.bf16 %v4448_v15  ;;  %v6079_v40 = vunpack.c.h.s8.bf16 %v4447_v42  ;;  %v4575_v42 = vld [vmem:[%s12268_s12 + $0x16a8] sm:$0xff] }
 0xa9e   : > { %8793 = vmatprep.subr.bf16.mxu0 %v5825_v0  ;;  %v6081_v0 = vunpack.c.h.s8.bf16 %v4449_v16  ;;  %v4577_v16 = vld [vmem:[%s12268_s12 + $0x16b8] sm:$0xff] }
 0xaa0   : > { %8630 = vmatpush1.bf16.msra.mxu1 %v5822_v22  ;;  %v6078_v22 = vunpack.c.h.s8.bf16 %v4446_v8  ;;  %v4574_v8 = vld [vmem:[%s12268_s12 + $0x16a0] sm:$0xff] }
 0xaa1   : > { %8794 = vmatpush1.bf16.msra.mxu0 %v5824_v63  ;;  %8631 = vmatprep.subr.bf16.mxu1 %v5855_v49  ;;  %v6080_v63 = vunpack.c.h.s8.bf16 %v4448_v15  ;;  %v6111_v49 = vunpack.c.l.s8.bf16 %v4479_v55  ;;  %v4576_v15 = vld [vmem:[%s12268_s12 + $0x16b0] sm:$0xff] }
 0xaa2   : > { %8795 = vmatprep.subr.bf16.mxu0 %v5857_v61  ;;  %v6113_v61 = vunpack.c.l.s8.bf16 %v4481_v59 }
 0xaa4   : > { %8632 = vmatpush1.bf16.msra.mxu1 %v5854_v62  ;;  %v6110_v62 = vunpack.c.l.s8.bf16 %v4478_v57 }
 0xaa5   : > { %8796 = vmatpush1.bf16.msra.mxu0 %v5856_v1  ;;  %8633 = vmatprep.subr.bf16.mxu1 %v5887_v32  ;;  %v6112_v1 = vunpack.c.l.s8.bf16 %v4480_v44  ;;  %v6143_v32 = vunpack.c.h.s8.bf16 %v4479_v55  ;;  %v4607_v55 = vld [vmem:[%s12268_s12 + $0x17a8] sm:$0xff] }
 0xaa6   : > { %8797 = vmatprep.subr.bf16.mxu0 %v5889_v11  ;;  %v6145_v11 = vunpack.c.h.s8.bf16 %v4481_v59  ;;  %v4609_v59 = vld [vmem:[%s12268_s12 + $0x17b8] sm:$0xff] }
 0xaa8   : > { %8634 = vmatpush1.bf16.msra.mxu1 %v5886_v20  ;;  %v6142_v20 = vunpack.c.h.s8.bf16 %v4478_v57  ;;  %v4606_v57 = vld [vmem:[%s12268_s12 + $0x17a0] sm:$0xff] }
 0xaa9   : > { %8798 = vmatpush1.bf16.msra.mxu0 %v5888_v10  ;;  %8644 = vmatprep.subr.bf16.mxu1 %v5919_v43  ;;  %v6144_v10 = vunpack.c.h.s8.bf16 %v4480_v44  ;;  %v6175_v43 = vunpack.c.l.s8.bf16 %v4511_v36  ;;  %v4608_v44 = vld [vmem:[%s12268_s12 + $0x17b0] sm:$0xff] }
 0xaaa   : > { %8808 = vmatprep.subr.bf16.mxu0 %v5921_v3  ;;  %v6177_v3 = vunpack.c.l.s8.bf16 %v4513_v34  ;;  %v4641_v34 = vld [vmem:[%s12268_s12 + $0x18b8] sm:$0xff] }
 0xaab   : > { %8636 = vmatmul.mubr.bf16.vlgmr.msra.gmra.mrb[32].mxu1 %v12526_v5 }
 0xaac   : > { %8800 = vmatmul.mubr.bf16.vlgmr.msra.gmra.mrb[36].mxu0 %v12526_v5  ;;  %8645 = vmatpush1.bf16.msra.mxu1 %v5918_v47  ;;  %v6174_v47 = vunpack.c.l.s8.bf16 %v4510_v2 }
 0xaad   : > { %8676 = vmatprep.mubr.bf16.mxu1 %v12626_v14  ;;  %8809 = vmatpush1.bf16.msra.mxu0 %v5920_v6  ;;  %v6176_v6 = vunpack.c.l.s8.bf16 %v4512_v4 }
 0xaae   : > { %8840 = vmatprep.mubr.bf16.mxu0 %v12626_v14  ;;  %8646 = vmatprep.subr.bf16.mxu1 %v5951_v7  ;;  %v6207_v7 = vunpack.c.h.s8.bf16 %v4511_v36  ;;  %v4639_v36 = vld [vmem:[%s12268_s12 + $0x18a8] sm:$0xff] }
 0xaaf   : > { %8810 = vmatprep.subr.bf16.mxu0 %v5953_v12  ;;  %v4543_v12 = vld [vmem:[%s12268_s12 + $0x15a8] sm:$0xff] }
 0xab0   : > { %8647 = vmatpush1.bf16.msra.mxu1 %v5950_v17  ;;  %v6206_v17 = vunpack.c.h.s8.bf16 %v4510_v2  ;;  %v4638_v2 = vld [vmem:[%s12268_s12 + $0x18a0] sm:$0xff] }
 0xab1   : > { %8811 = vmatpush1.bf16.msra.mxu0 %v5952_v27  ;;  %8648 = vmatprep.subr.bf16.mxu1 %v5983_v33  ;;  %v6208_v27 = vunpack.c.h.s8.bf16 %v4512_v4  ;;  %v6239_v33 = vunpack.c.l.s8.bf16 %v4543_v12  ;;  %v4640_v4 = vld [vmem:[%s12268_s12 + $0x18b0] sm:$0xff] }
 0xab2   : > { %8812 = vmatprep.subr.bf16.mxu0 %v5985_v25  ;;  %v6241_v25 = vunpack.c.l.s8.bf16 %v4545_v13 }
 0xab4   : > { %8649 = vmatpush1.bf16.msra.mxu1 %v5982_v28  ;;  %v6238_v28 = vunpack.c.l.s8.bf16 %v4542_v24 }
 0xab5   : > { %8813 = vmatpush1.bf16.msra.mxu0 %v5984_v18  ;;  %8650 = vmatprep.subr.bf16.mxu1 %v6015_v41  ;;  %v6240_v18 = vunpack.c.l.s8.bf16 %v4544_v26  ;;  %v6271_v41 = vunpack.c.h.s8.bf16 %v4543_v12  ;;  %v6465_v12 = vunpack.c.h.s8.bf16 %v4641_v34 }
 0xab6   : > { %8814 = vmatprep.subr.bf16.mxu0 %v6017_v9  ;;  %v6273_v9 = vunpack.c.h.s8.bf16 %v4545_v13  ;;  %v4673_v13 = vld [vmem:[%s12268_s12 + $0x19b8] sm:$0xff] }
 0xab8   : > { %8651 = vmatpush1.bf16.msra.mxu1 %v6014_v46  ;;  %v6270_v46 = vunpack.c.h.s8.bf16 %v4542_v24  ;;  %v4670_v24 = vld [vmem:[%s12268_s12 + $0x19a0] sm:$0xff] }
 0xab9   : > { %8815 = vmatpush1.bf16.msra.mxu0 %v6016_v29  ;;  %8652 = vmatprep.subr.bf16.mxu1 %v6047_v35  ;;  %v6272_v29 = vunpack.c.h.s8.bf16 %v4544_v26  ;;  %v6303_v35 = vunpack.c.l.s8.bf16 %v4575_v42  ;;  %v4672_v26 = vld [vmem:[%s12268_s12 + $0x19b0] sm:$0xff] }
 0xaba   : > { %8816 = vmatprep.subr.bf16.mxu0 %v6049_v30  ;;  %v6305_v30 = vunpack.c.l.s8.bf16 %v4577_v16 }
 0xabc   : > { %8653 = vmatpush1.bf16.msra.mxu1 %v6046_v38  ;;  %v6302_v38 = vunpack.c.l.s8.bf16 %v4574_v8 }
 0xabd   : > { %8817 = vmatpush1.bf16.msra.mxu0 %v6048_v53  ;;  %8654 = vmatprep.subr.bf16.mxu1 %v6079_v40  ;;  %v6304_v53 = vunpack.c.l.s8.bf16 %v4576_v15  ;;  %v6335_v40 = vunpack.c.h.s8.bf16 %v4575_v42  ;;  %v4703_v42 = vld [vmem:[%s12268_s12 + $0x1aa8] sm:$0xff] }
 0xabe   : > { %8818 = vmatprep.subr.bf16.mxu0 %v6081_v0  ;;  %v6337_v0 = vunpack.c.h.s8.bf16 %v4577_v16  ;;  %v4705_v16 = vld [vmem:[%s12268_s12 + $0x1ab8] sm:$0xff] }
 0xac0   : > { %8655 = vmatpush1.bf16.msra.mxu1 %v6078_v22  ;;  %v6334_v22 = vunpack.c.h.s8.bf16 %v4574_v8  ;;  %v4702_v8 = vld [vmem:[%s12268_s12 + $0x1aa0] sm:$0xff] }
 0xac1   : > { %8819 = vmatpush1.bf16.msra.mxu0 %v6080_v63  ;;  %8656 = vmatprep.subr.bf16.mxu1 %v6111_v49  ;;  %v6336_v63 = vunpack.c.h.s8.bf16 %v4576_v15  ;;  %v6367_v49 = vunpack.c.l.s8.bf16 %v4607_v55  ;;  %v4704_v15 = vld [vmem:[%s12268_s12 + $0x1ab0] sm:$0xff] }
 0xac2   : > { %8820 = vmatprep.subr.bf16.mxu0 %v6113_v61  ;;  %v6369_v61 = vunpack.c.l.s8.bf16 %v4609_v59 }
 0xac4   : > { %8657 = vmatpush1.bf16.msra.mxu1 %v6110_v62  ;;  %v6366_v62 = vunpack.c.l.s8.bf16 %v4606_v57 }
 0xac5   : > { %8821 = vmatpush1.bf16.msra.mxu0 %v6112_v1  ;;  %8658 = vmatprep.subr.bf16.mxu1 %v6143_v32  ;;  %v6368_v1 = vunpack.c.l.s8.bf16 %v4608_v44  ;;  %v6399_v32 = vunpack.c.h.s8.bf16 %v4607_v55  ;;  %v9748_v55 = vld [vmem:[%s12800_s21 + $0x10] sm:$0xff] }
 0xac6   : > { %8822 = vmatprep.subr.bf16.mxu0 %v6145_v11  ;;  %v6401_v11 = vunpack.c.h.s8.bf16 %v4609_v59  ;;  %v6593_v59 = vunpack.c.h.s8.bf16 %v4705_v16 }
 0xac8   : > { %8659 = vmatpush1.bf16.msra.mxu1 %v6142_v20  ;;  %v6398_v20 = vunpack.c.h.s8.bf16 %v4606_v57 }
 0xac9   : > { %8823 = vmatpush1.bf16.msra.mxu0 %v6144_v10  ;;  %8660 = vmatprep.subr.bf16.mxu1 %v6175_v43  ;;  %v6400_v10 = vunpack.c.h.s8.bf16 %v4608_v44  ;;  %v6431_v43 = vunpack.c.l.s8.bf16 %v4639_v36  ;;  %v6590_v44 = vunpack.c.h.s8.bf16 %v4702_v8 }
 0xaca   : > { %8824 = vmatprep.subr.bf16.mxu0 %v6177_v3  ;;  %v6433_v3 = vunpack.c.l.s8.bf16 %v4641_v34 }
 0xacc   : > { %8661 = vmatpush1.bf16.msra.mxu1 %v6174_v47  ;;  %v6430_v47 = vunpack.c.l.s8.bf16 %v4638_v2 }
 0xacd   : > { %8825 = vmatpush1.bf16.msra.mxu0 %v6176_v6  ;;  %8662 = vmatprep.subr.bf16.mxu1 %v6207_v7  ;;  %v6432_v6 = vunpack.c.l.s8.bf16 %v4640_v4  ;;  %v6463_v7 = vunpack.c.h.s8.bf16 %v4639_v36  ;;  %v4734_v36 = vld [vmem:[%s12268_s12 + $0x1ba0] sm:$0xff] }
 0xace   : > { %8826 = vmatprep.subr.bf16.mxu0 %v6209_v45  ;;  %v4671_v45 = vld [vmem:[%s12268_s12 + $0x19a8] sm:$0xff] }
 0xad0   : > { %8663 = vmatpush1.bf16.msra.mxu1 %v6206_v17  ;;  %v6462_v17 = vunpack.c.h.s8.bf16 %v4638_v2  ;;  %v4736_v2 = vld [vmem:[%s12268_s12 + $0x1bb0] sm:$0xff] }
 0xad1   : > { %8827 = vmatpush1.bf16.msra.mxu0 %v6208_v27  ;;  %8664 = vmatprep.subr.bf16.mxu1 %v6239_v33  ;;  %v6464_v27 = vunpack.c.h.s8.bf16 %v4640_v4  ;;  %v6495_v33 = vunpack.c.l.s8.bf16 %v4671_v45 }
 0xad2   : > { %8828 = vmatprep.subr.bf16.mxu0 %v6241_v25  ;;  %v6497_v25 = vunpack.c.l.s8.bf16 %v4673_v13 }
 0xad4   : > { %8665 = vmatpush1.bf16.msra.mxu1 %v6238_v28  ;;  %v6494_v28 = vunpack.c.l.s8.bf16 %v4670_v24 }
 0xad5   : > { %8829 = vmatpush1.bf16.msra.mxu0 %v6240_v18  ;;  %8666 = vmatprep.subr.bf16.mxu1 %v6271_v41  ;;  %v6496_v18 = vunpack.c.l.s8.bf16 %v4672_v26  ;;  %v6527_v41 = vunpack.c.h.s8.bf16 %v4671_v45 }
 0xad6   : > { %8830 = vmatprep.subr.bf16.mxu0 %v6273_v9  ;;  %v6529_v9 = vunpack.c.h.s8.bf16 %v4673_v13 }
 0xad8   : > { %8667 = vmatpush1.bf16.msra.mxu1 %v6270_v46  ;;  %v6526_v46 = vunpack.c.h.s8.bf16 %v4670_v24 }
 0xad9   : > { %8831 = vmatpush1.bf16.msra.mxu0 %v6272_v29  ;;  %8668 = vmatprep.subr.bf16.mxu1 %v6303_v35  ;;  %v6528_v29 = vunpack.c.h.s8.bf16 %v4672_v26  ;;  %v6559_v35 = vunpack.c.l.s8.bf16 %v4703_v42  ;;  %v6624_v26 = vunpack.c.l.s8.bf16 %v4736_v2 }
 0xada   : > { %8832 = vmatprep.subr.bf16.mxu0 %v6305_v30  ;;  %v6561_v30 = vunpack.c.l.s8.bf16 %v4705_v16  ;;  %v4767_v16 = vld [vmem:[%s12268_s12 + $0x1ca8] sm:$0xff] }
 0xadc   : > { %8669 = vmatpush1.bf16.msra.mxu1 %v6302_v38  ;;  %v6558_v38 = vunpack.c.l.s8.bf16 %v4702_v8  ;;  %v6656_v8 = vunpack.c.h.s8.bf16 %v4736_v2 }
 0xadd   : > { %8833 = vmatpush1.bf16.msra.mxu0 %v6304_v53  ;;  %8670 = vmatprep.subr.bf16.mxu1 %v6335_v40  ;;  %v9548_v53 = vld [vmem:[%s12797_s24 + $0x10] sm:$0xff]  ;;  %v6560_v40 = vunpack.c.l.s8.bf16 %v4704_v15 }
 0xade   : > { %8834 = vmatprep.subr.bf16.mxu0 %v6337_v0  ;;  %v6591_v0 = vunpack.c.h.s8.bf16 %v4703_v42  ;;  %v9629_v57 = vrot.slane %v9548_v53, %v12315_v48 }
 0xae0   : > { %8671 = vmatpush1.bf16.msra.mxu1 %v6334_v22  ;;  %v4735_v22 = vld [vmem:[%s12268_s12 + $0x1ba8] sm:$0xff] }
 0xae1   : > { %8835 = vmatpush1.bf16.msra.mxu0 %v6336_v63  ;;  %8672 = vmatprep.subr.bf16.mxu1 %v6367_v49  ;;  %v9621_v63 = vrot.slane %v9548_v53, %v12280_v21  ;;  %v4737_v49 = vld [vmem:[%s12268_s12 + $0x1bb8] sm:$0xff] }
 0xae2   : > { %8836 = vmatprep.subr.bf16.mxu0 %v6369_v61  ;;  %v9625_v61 = vrot.slane %v9548_v53, %v12283_v23  ;;  %v6657_v42 = vunpack.c.h.s8.bf16 %v4737_v49 }
 0xae4   : > { %8673 = vmatpush1.bf16.msra.mxu1 %v6366_v62  ;;  %v9821_v62 = vrot.slane %v9748_v55, %v12280_v21 }
 0xae5   : > { %8837 = vmatpush1.bf16.msra.mxu0 %v6368_v1  ;;  %8674 = vmatprep.subr.bf16.mxu1 %v6399_v32  ;;  %v9633_v1 = vrot.slane %v9548_v53, %v12318_v50  ;;  %v6592_v32 = vunpack.c.h.s8.bf16 %v4704_v15  ;;  %v4766_v15 = vld [vmem:[%s12268_s12 + $0x1ca0] sm:$0xff]  ;;  %v4768_v53 = vld [vmem:[%s12268_s12 + $0x1cb0] sm:$0xff] }
 0xae6   : > { %8838 = vmatprep.subr.bf16.mxu0 %v6401_v11  ;;  %v6623_v11 = vunpack.c.l.s8.bf16 %v4735_v22 }
 0xae8   : > { %8675 = vmatpush1.bf16.msra.mxu1 %v6398_v20  ;;  %v9829_v20 = vrot.slane %v9748_v55, %v12315_v48 }
 0xae9   : > { %8839 = vmatpush1.bf16.msra.mxu0 %v6400_v10  ;;  %8685 = vmatprep.subr.bf16.mxu1 %v6431_v43  ;;  %v9825_v10 = vrot.slane %v9748_v55, %v12283_v23  ;;  %v6625_v43 = vunpack.c.l.s8.bf16 %v4737_v49  ;;  %v6718_v49 = vunpack.c.h.s8.bf16 %v4766_v15 }
 0xaea   : > { %8849 = vmatprep.subr.bf16.mxu0 %v6433_v3 }
 0xaeb   : > { %8677 = vmatmul.mubr.bf16.vlgmr.msra.gmra.mrb[32].mxu1 %v12628_v19 }
 0xaec   : > { %8841 = vmatmul.mubr.bf16.vlgmr.msra.gmra.mrb[36].mxu0 %v12628_v19  ;;  %8686 = vmatpush1.bf16.msra.mxu1 %v6430_v47 }
 0xaed   : > { %8717 = vmatprep.mubr.bf16.mxu1 %v12634_v31  ;;  %8850 = vmatpush1.bf16.msra.mxu0 %v6432_v6  ;;  %v9833_v6 = vrot.slane %v9748_v55, %v12318_v50  ;;  %v6719_v55 = vunpack.c.h.s8.bf16 %v4767_v16 }
 0xaee   : > { %8881 = vmatprep.mubr.bf16.mxu0 %v12634_v31  ;;  %8687 = vmatprep.subr.bf16.mxu1 %v6463_v7 }
 0xaef   : > { %8851 = vmatprep.subr.bf16.mxu0 %v6465_v12 }
 0xaf0   : > { %8688 = vmatpush1.bf16.msra.mxu1 %v6462_v17  ;;  %v6622_v17 = vunpack.c.l.s8.bf16 %v4734_v36 }
 0xaf1   : > { %8852 = vmatpush1.bf16.msra.mxu0 %v6464_v27  ;;  %8689 = vmatprep.subr.bf16.mxu1 %v6495_v33 }
 0xaf2   : > { %8853 = vmatprep.subr.bf16.mxu0 %v6497_v25 }
 0xaf4   : > { %8690 = vmatpush1.bf16.msra.mxu1 %v6494_v28  ;;  %v6655_v28 = vunpack.c.h.s8.bf16 %v4735_v22  ;;  %v4799_v22 = vld [vmem:[%s12268_s12 + $0x1da8] sm:$0xff] }
 0xaf5   : > { %8854 = vmatpush1.bf16.msra.mxu0 %v6496_v18  ;;  %8691 = vmatprep.subr.bf16.mxu1 %v6527_v41 }
 0xaf6   : > { %8855 = vmatprep.subr.bf16.mxu0 %v6529_v9 }
 0xaf8   : > { %8692 = vmatpush1.bf16.msra.mxu1 %v6526_v46 }
 0xaf9   : > { %8856 = vmatpush1.bf16.msra.mxu0 %v6528_v29  ;;  %8693 = vmatprep.subr.bf16.mxu1 %v6559_v35  ;;  %v4769_v29 = vld [vmem:[%s12268_s12 + $0x1cb8] sm:$0xff]  ;;  %v6654_v35 = vunpack.c.h.s8.bf16 %v4734_v36 }
 0xafa   : > { %8857 = vmatprep.subr.bf16.mxu0 %v6561_v30  ;;  %v6687_v30 = vunpack.c.l.s8.bf16 %v4767_v16  ;;  %v4864_v16 = vld [vmem:[%s12268_s12 + $0x1fb0] sm:$0xff] }
 0xafc   : > { %8694 = vmatpush1.bf16.msra.mxu1 %v6558_v38  ;;  %v6689_v38 = vunpack.c.l.s8.bf16 %v4769_v29 }
 0xafd   : > { %8858 = vmatpush1.bf16.msra.mxu0 %v6560_v40  ;;  %8695 = vmatprep.subr.bf16.mxu1 %v6591_v0  ;;  %v6686_v40 = vunpack.c.l.s8.bf16 %v4766_v15  ;;  %v6688_v0 = vunpack.c.l.s8.bf16 %v4768_v53  ;;  %v3877_v15 = vld [vmem:[%s12268_s12 + $0xd8] sm:$0xff] }
 0xafe   : > { %v8391_v34 = vpop.f32.mrb[28].mxu1  ;;  %8859 = vmatprep.subr.bf16.mxu0 %v6593_v59  ;;  %v6721_v59 = vunpack.c.h.s8.bf16 %v4769_v29  ;;  %v6880_v29 = vunpack.c.l.s8.bf16 %v4864_v16 }
 0xaff   : > { %v9730_v3 = vmul.f32 %v9621_v63, %v8391_v34  ;;  %v8555_v4 = vpop.f32.mrb[32].mxu0  ;;  %v8393_v47 = vpop.f32.mrb[29].mxu1  ;;  %v4801_v63 = vld [vmem:[%s12268_s12 + $0x1db8] sm:$0xff] }
 0xb00   : > { %v9732_v7 = vmul.f32 %v9629_v57, %v8555_v4  ;;  %v9731_v45 = vmul.f32 %v9625_v61, %v8393_v47  ;;  %v8557_v12 = vpop.f32.mrb[33].mxu0  ;;  %v8395_v13 = vpop.f32.mrb[30].mxu1  ;;  %8696 = vmatpush1.bf16.msra.mxu1 %v6590_v44  ;;  %v6720_v61 = vunpack.c.h.s8.bf16 %v4768_v53  ;;  %v6751_v44 = vunpack.c.l.s8.bf16 %v4799_v22  ;;  %v4833_v4 = vld [vmem:[%s12268_s12 + $0x1eb8] sm:$0xff] }
 0xb01   : > { %v9930_v27 = vadd.f32 %v9821_v62, %v9730_v3  ;;  %v9733_v33 = vmul.f32 %v9633_v1, %v8557_v12  ;;  %v8559_v24 = vpop.f32.mrb[34].mxu0  ;;  %8860 = vmatpush1.bf16.msra.mxu0 %v6592_v32  ;;  %v8396_v25 = vpop.f32.mrb[31].mxu1  ;;  %8697 = vmatprep.subr.bf16.mxu1 %v6623_v11  ;;  %v4798_v62 = vld [vmem:[%s12268_s12 + $0x1da0] sm:$0xff]  ;;  %v6753_v32 = vunpack.c.l.s8.bf16 %v4801_v63  ;;  %v4800_v11 = vld [vmem:[%s12268_s12 + $0x1db0] sm:$0xff]  ;;  %v6785_v2 = vunpack.c.h.s8.bf16 %v4801_v63  ;;  %v4831_v3 = vld [vmem:[%s12268_s12 + $0x1ea8] sm:$0xff] }
 0xb02   : > { %v9932_v18 = vadd.f32 %v9829_v20, %v9732_v7  ;;  %v9931_v41 = vadd.f32 %v9825_v10, %v9731_v45  ;;  %v8560_v9 = vpop.f32.mrb[35].mxu0  ;;  %8861 = vmatprep.subr.bf16.mxu0 %v6625_v43  ;;  %v6750_v20 = vunpack.c.l.s8.bf16 %v4798_v62  ;;  %v6752_v10 = vunpack.c.l.s8.bf16 %v4800_v11  ;;  %v4830_v45 = vld [vmem:[%s12268_s12 + $0x1ea0] sm:$0xff]  ;;  %v4832_v13 = vld [vmem:[%s12268_s12 + $0x1eb0] sm:$0xff]  ;;  %v4863_v25 = vld [vmem:[%s12268_s12 + $0x1fa8] sm:$0xff] }
 0xb03   : > { %11191 = vtanh.f32 %v9930_v27  ;;  %v9933_v46 = vadd.f32 %v9833_v6, %v9733_v33  ;;  %v6783_v43 = vunpack.c.h.s8.bf16 %v4799_v22  ;;  %v6782_v47 = vunpack.c.h.s8.bf16 %v4798_v62  ;;  %v4862_v9 = vld [vmem:[%s12268_s12 + $0x1fa0] sm:$0xff] }
 0xb04   : > { %11193 = vtanh.f32 %v9932_v18  ;;  %8698 = vmatpush1.bf16.msra.mxu1 %v6622_v17  ;;  %v6784_v6 = vunpack.c.h.s8.bf16 %v4800_v11  ;;  %v6815_v7 = vunpack.c.l.s8.bf16 %v4831_v3  ;;  %v6817_v12 = vunpack.c.l.s8.bf16 %v4833_v4  ;;  %v3906_v11 = vld [vmem:[%s12268_s12 + $0x1c0] sm:$0xff] }
 0xb05   : > { %11195 = vtanh.f32 %v9931_v41  ;;  %8862 = vmatpush1.bf16.msra.mxu0 %v6624_v26  ;;  %8699 = vmatprep.subr.bf16.mxu1 %v6655_v28  ;;  %v6814_v17 = vunpack.c.l.s8.bf16 %v4830_v45  ;;  %v6816_v27 = vunpack.c.l.s8.bf16 %v4832_v13  ;;  %v6847_v33 = vunpack.c.h.s8.bf16 %v4831_v3  ;;  %v4865_v26 = vld [vmem:[%s12268_s12 + $0x1fb8] sm:$0xff]  ;;  %v3939_v3 = vld [vmem:[%s12268_s12 + $0x2c8] sm:$0xff] }
 0xb06   : > { %11197 = vtanh.f32 %v9933_v46  ;;  %8863 = vmatprep.subr.bf16.mxu0 %v6657_v42  ;;  %v6849_v24 = vunpack.c.h.s8.bf16 %v4833_v4  ;;  %v6846_v28 = vunpack.c.h.s8.bf16 %v4830_v45  ;;  %v6848_v18 = vunpack.c.h.s8.bf16 %v4832_v13  ;;  %v3941_v4 = vld [vmem:[%s12268_s12 + $0x2d8] sm:$0xff]  ;;  %v3938_v45 = vld [vmem:[%s12268_s12 + $0x2c0] sm:$0xff]  ;;  %v3940_v13 = vld [vmem:[%s12268_s12 + $0x2d0] sm:$0xff] }
 0xb07   : > { %v6879_v41 = vunpack.c.l.s8.bf16 %v4863_v25  ;;  %v6881_v42 = vunpack.c.l.s8.bf16 %v4865_v26  ;;  %v6878_v46 = vunpack.c.l.s8.bf16 %v4862_v9  ;;  %v6912_v53 = vunpack.c.h.s8.bf16 %v4864_v16  ;;  %v3972_v16 = vld [vmem:[%s12268_s12 + $0x3d0] sm:$0xff] }
 0xb08   : > { %8700 = vmatpush1.bf16.msra.mxu1 %v6654_v35  ;;  %v6911_v35 = vunpack.c.h.s8.bf16 %v4863_v25  ;;  %v3971_v25 = vld [vmem:[%s12268_s12 + $0x3c8] sm:$0xff] }
 0xb09   : > { %8864 = vmatpush1.bf16.msra.mxu0 %v6656_v8  ;;  %8701 = vmatprep.subr.bf16.mxu1 %v6687_v30  ;;  %v6913_v8 = vunpack.c.h.s8.bf16 %v4865_v26  ;;  %v3875_v30 = vld [vmem:[%s12268_s12 + $0xc8] sm:$0xff]  ;;  %v3973_v26 = vld [vmem:[%s12268_s12 + $0x3d8] sm:$0xff] }
 0xb0a   : > { %8865 = vmatprep.subr.bf16.mxu0 %v6689_v38  ;;  %v6910_v38 = vunpack.c.h.s8.bf16 %v4862_v9  ;;  %v3970_v9 = vld [vmem:[%s12268_s12 + $0x3c0] sm:$0xff] }
 0xb0c   : > { %8702 = vmatpush1.bf16.msra.mxu1 %v6686_v40  ;;  %v4899_v40 = vunpack.c.l.s8.bf16 %v3875_v30 }
 0xb0d   : > { %v11192_v57 = vpop.eup %11191  ;;  %8866 = vmatpush1.bf16.msra.mxu0 %v6688_v0  ;;  %8703 = vmatprep.subr.bf16.mxu1 %v6719_v55  ;;  %v3874_v0 = vld [vmem:[%s12268_s12 + $0xc0] sm:$0xff]  ;;  %v4901_v55 = vunpack.c.l.s8.bf16 %v3877_v15 }
 0xb0e   : > { %v11194_v1 = vpop.eup %11193  ;;  %9994 = vst [vmem:[%s12834_s4 + $0x80] sm:$0xff] %v11192_v57  ;;  %8867 = vmatprep.subr.bf16.mxu0 %v6721_v59  ;;  %v3876_v59 = vld [vmem:[%s12268_s12 + $0xd0] sm:$0xff]  ;;  %v4898_v22 = vunpack.c.l.s8.bf16 %v3874_v0  ;;  %v3907_v57 = vld [vmem:[%s12268_s12 + $0x1c8] sm:$0xff]  ;;  %v4930_v62 = vunpack.c.h.s8.bf16 %v3874_v0  ;;  %v4002_v0 = vld [vmem:[%s12268_s12 + $0x4c0] sm:$0xff] }
 0xb0f   : > { %v11196_v36 = vpop.eup %11195  ;;  %9996 = vst [vmem:[%s12834_s4 + $0x90] sm:$0xff] %v11194_v1  ;;  %v4900_v63 = vunpack.c.l.s8.bf16 %v3876_v59  ;;  %v4932_v1 = vunpack.c.h.s8.bf16 %v3876_v59  ;;  %v4004_v59 = vld [vmem:[%s12268_s12 + $0x4d0] sm:$0xff] }
 0xb10   : > { %v11198_v34 = vpop.eup %11197  ;;  %9995 = vst [vmem:[%s12834_s4 + $0x88] sm:$0xff] %v11196_v36  ;;  %8704 = vmatpush1.bf16.msra.mxu1 %v6718_v49  ;;  %v4931_v49 = vunpack.c.h.s8.bf16 %v3875_v30  ;;  %v4003_v30 = vld [vmem:[%s12268_s12 + $0x4c8] sm:$0xff] }
 0xb11   : > { %9997 = vst [vmem:[%s12834_s4 + $0x98] sm:$0xff] %v11198_v34  ;;  %8868 = vmatpush1.bf16.msra.mxu0 %v6720_v61  ;;  %8705 = vmatprep.subr.bf16.mxu1 %v6751_v44  ;;  %v4933_v61 = vunpack.c.h.s8.bf16 %v3877_v15  ;;  %v3909_v44 = vld [vmem:[%s12268_s12 + $0x1d8] sm:$0xff]  ;;  %v3908_v34 = vld [vmem:[%s12268_s12 + $0x1d0] sm:$0xff] }
 0xb12   : > { %8869 = vmatprep.subr.bf16.mxu0 %v6753_v32  ;;  %v4963_v32 = vunpack.c.l.s8.bf16 %v3907_v57  ;;  %v4965_v36 = vunpack.c.l.s8.bf16 %v3909_v44  ;;  %v4005_v15 = vld [vmem:[%s12268_s12 + $0x4d8] sm:$0xff] }
 0xb14   : > { %8706 = vmatpush1.bf16.msra.mxu1 %v6750_v20  ;;  %v4962_v20 = vunpack.c.l.s8.bf16 %v3906_v11 }
 0xb15   : > { %8870 = vmatpush1.bf16.msra.mxu0 %v6752_v10  ;;  %8707 = vmatprep.subr.bf16.mxu1 %v6783_v43  ;;  %v4964_v10 = vunpack.c.l.s8.bf16 %v3908_v34  ;;  %v4995_v43 = vunpack.c.h.s8.bf16 %v3907_v57  ;;  %v5189_v57 = vunpack.c.h.s8.bf16 %v4005_v15 }
 0xb16   : > { %8871 = vmatprep.subr.bf16.mxu0 %v6785_v2  ;;  %v4997_v2 = vunpack.c.h.s8.bf16 %v3909_v44  ;;  %v4037_v44 = vld [vmem:[%s12268_s12 + $0x5d8] sm:$0xff] }
 0xb18   : > { %8708 = vmatpush1.bf16.msra.mxu1 %v6782_v47  ;;  %v4994_v47 = vunpack.c.h.s8.bf16 %v3906_v11  ;;  %v4034_v11 = vld [vmem:[%s12268_s12 + $0x5c0] sm:$0xff] }
 0xb19   : > { %8872 = vmatpush1.bf16.msra.mxu0 %v6784_v6  ;;  %8709 = vmatprep.subr.bf16.mxu1 %v6815_v7  ;;  %v4996_v6 = vunpack.c.h.s8.bf16 %v3908_v34  ;;  %v5027_v7 = vunpack.c.l.s8.bf16 %v3939_v3  ;;  %v4036_v34 = vld [vmem:[%s12268_s12 + $0x5d0] sm:$0xff] }
 0xb1a   : > { %8873 = vmatprep.subr.bf16.mxu0 %v6817_v12  ;;  %v5029_v12 = vunpack.c.l.s8.bf16 %v3941_v4 }
 0xb1c   : > { %8710 = vmatpush1.bf16.msra.mxu1 %v6814_v17  ;;  %v5026_v17 = vunpack.c.l.s8.bf16 %v3938_v45 }
 0xb1d   : > { %8874 = vmatpush1.bf16.msra.mxu0 %v6816_v27  ;;  %8711 = vmatprep.subr.bf16.mxu1 %v6847_v33  ;;  %v5028_v27 = vunpack.c.l.s8.bf16 %v3940_v13  ;;  %v5059_v33 = vunpack.c.h.s8.bf16 %v3939_v3  ;;  %v4067_v3 = vld [vmem:[%s12268_s12 + $0x6c8] sm:$0xff] }
 0xb1e   : > { %8875 = vmatprep.subr.bf16.mxu0 %v6849_v24  ;;  %v5061_v24 = vunpack.c.h.s8.bf16 %v3941_v4  ;;  %v4069_v4 = vld [vmem:[%s12268_s12 + $0x6d8] sm:$0xff] }
 0xb20   : > { %8712 = vmatpush1.bf16.msra.mxu1 %v6846_v28  ;;  %v5058_v28 = vunpack.c.h.s8.bf16 %v3938_v45  ;;  %v4066_v45 = vld [vmem:[%s12268_s12 + $0x6c0] sm:$0xff] }
 0xb21   : > { %8876 = vmatpush1.bf16.msra.mxu0 %v6848_v18  ;;  %8713 = vmatprep.subr.bf16.mxu1 %v6879_v41  ;;  %v5060_v18 = vunpack.c.h.s8.bf16 %v3940_v13  ;;  %v5091_v41 = vunpack.c.l.s8.bf16 %v3971_v25  ;;  %v4068_v13 = vld [vmem:[%s12268_s12 + $0x6d0] sm:$0xff] }
 0xb22   : > { %8877 = vmatprep.subr.bf16.mxu0 %v6881_v42  ;;  %v5093_v42 = vunpack.c.l.s8.bf16 %v3973_v26 }
 0xb24   : > { %8714 = vmatpush1.bf16.msra.mxu1 %v6878_v46  ;;  %v5090_v46 = vunpack.c.l.s8.bf16 %v3970_v9 }
 0xb25   : > { %8878 = vmatpush1.bf16.msra.mxu0 %v6880_v29  ;;  %8715 = vmatprep.subr.bf16.mxu1 %v6911_v35  ;;  %v5092_v29 = vunpack.c.l.s8.bf16 %v3972_v16  ;;  %v5123_v35 = vunpack.c.h.s8.bf16 %v3971_v25  ;;  %v4099_v25 = vld [vmem:[%s12268_s12 + $0x7c8] sm:$0xff] }
 0xb26   : > { %8879 = vmatprep.subr.bf16.mxu0 %v6913_v8  ;;  %v5125_v8 = vunpack.c.h.s8.bf16 %v3973_v26  ;;  %v4101_v26 = vld [vmem:[%s12268_s12 + $0x7d8] sm:$0xff] }
 0xb28   : > { %8716 = vmatpush1.bf16.msra.mxu1 %v6910_v38  ;;  %v5122_v38 = vunpack.c.h.s8.bf16 %v3970_v9  ;;  %v4098_v9 = vld [vmem:[%s12268_s12 + $0x7c0] sm:$0xff] }
 0xb29   : > { %8880 = vmatpush1.bf16.msra.mxu0 %v6912_v53  ;;  %8890 = vmatprep.subr.bf16.mxu1 %v4899_v40  ;;  %v5124_v53 = vunpack.c.h.s8.bf16 %v3972_v16  ;;  %v5155_v40 = vunpack.c.l.s8.bf16 %v4003_v30  ;;  %v4100_v16 = vld [vmem:[%s12268_s12 + $0x7d0] sm:$0xff] }
 0xb2a   : > { %9054 = vmatprep.subr.bf16.mxu0 %v4901_v55  ;;  %v5157_v55 = vunpack.c.l.s8.bf16 %v4005_v15  ;;  %v4133_v15 = vld [vmem:[%s12268_s12 + $0x8d8] sm:$0xff] }
 0xb2b   : > { %8718 = vmatmul.mubr.bf16.vlgmr.msra.gmra.mrb[32].mxu1 %v12673_v51 }
 0xb2c   : > { %8882 = vmatmul.mubr.bf16.vlgmr.msra.gmra.mrb[36].mxu0 %v12673_v51  ;;  %8891 = vmatpush1.bf16.msra.mxu1 %v4898_v22  ;;  %v5154_v22 = vunpack.c.l.s8.bf16 %v4002_v0 }
 0xb2d   : > { %8922 = vmatprep.mubr.bf16.mxu1 %v12460_v52  ;;  %9055 = vmatpush1.bf16.msra.mxu0 %v4900_v63  ;;  %v5156_v63 = vunpack.c.l.s8.bf16 %v4004_v59 }
 0xb2e   : > { %9086 = vmatprep.mubr.bf16.mxu0 %v12460_v52  ;;  %8892 = vmatprep.subr.bf16.mxu1 %v4931_v49  ;;  %v5187_v49 = vunpack.c.h.s8.bf16 %v4003_v30  ;;  %v4131_v30 = vld [vmem:[%s12268_s12 + $0x8c8] sm:$0xff] }
 0xb2f   : > { %9056 = vmatprep.subr.bf16.mxu0 %v4933_v61  ;;  %v4035_v61 = vld [vmem:[%s12268_s12 + $0x5c8] sm:$0xff] }
 0xb30   : > { %8893 = vmatpush1.bf16.msra.mxu1 %v4930_v62  ;;  %v5186_v62 = vunpack.c.h.s8.bf16 %v4002_v0  ;;  %v4130_v0 = vld [vmem:[%s12268_s12 + $0x8c0] sm:$0xff] }
 0xb31   : > { %9057 = vmatpush1.bf16.msra.mxu0 %v4932_v1  ;;  %8894 = vmatprep.subr.bf16.mxu1 %v4963_v32  ;;  %v5188_v1 = vunpack.c.h.s8.bf16 %v4004_v59  ;;  %v5219_v32 = vunpack.c.l.s8.bf16 %v4035_v61  ;;  %v4132_v59 = vld [vmem:[%s12268_s12 + $0x8d0] sm:$0xff] }
 0xb32   : > { %9058 = vmatprep.subr.bf16.mxu0 %v4965_v36  ;;  %v5221_v36 = vunpack.c.l.s8.bf16 %v4037_v44 }
 0xb34   : > { %8895 = vmatpush1.bf16.msra.mxu1 %v4962_v20  ;;  %v5218_v20 = vunpack.c.l.s8.bf16 %v4034_v11 }
 0xb35   : > { %9059 = vmatpush1.bf16.msra.mxu0 %v4964_v10  ;;  %8896 = vmatprep.subr.bf16.mxu1 %v4995_v43  ;;  %v5220_v10 = vunpack.c.l.s8.bf16 %v4036_v34  ;;  %v5251_v43 = vunpack.c.h.s8.bf16 %v4035_v61  ;;  %v5445_v61 = vunpack.c.h.s8.bf16 %v4133_v15 }
 0xb36   : > { %9060 = vmatprep.subr.bf16.mxu0 %v4997_v2  ;;  %v5253_v2 = vunpack.c.h.s8.bf16 %v4037_v44  ;;  %v4165_v44 = vld [vmem:[%s12268_s12 + $0x9d8] sm:$0xff] }
 0xb38   : > { %8897 = vmatpush1.bf16.msra.mxu1 %v4994_v47  ;;  %v5250_v47 = vunpack.c.h.s8.bf16 %v4034_v11  ;;  %v4162_v11 = vld [vmem:[%s12268_s12 + $0x9c0] sm:$0xff] }
 0xb39   : > { %9061 = vmatpush1.bf16.msra.mxu0 %v4996_v6  ;;  %8898 = vmatprep.subr.bf16.mxu1 %v5027_v7  ;;  %v5252_v6 = vunpack.c.h.s8.bf16 %v4036_v34  ;;  %v5283_v7 = vunpack.c.l.s8.bf16 %v4067_v3  ;;  %v4164_v34 = vld [vmem:[%s12268_s12 + $0x9d0] sm:$0xff] }
 0xb3a   : > { %9062 = vmatprep.subr.bf16.mxu0 %v5029_v12  ;;  %v5285_v12 = vunpack.c.l.s8.bf16 %v4069_v4 }
 0xb3c   : > { %8899 = vmatpush1.bf16.msra.mxu1 %v5026_v17  ;;  %v5282_v17 = vunpack.c.l.s8.bf16 %v4066_v45 }
 0xb3d   : > { %9063 = vmatpush1.bf16.msra.mxu0 %v5028_v27  ;;  %8900 = vmatprep.subr.bf16.mxu1 %v5059_v33  ;;  %v5284_v27 = vunpack.c.l.s8.bf16 %v4068_v13  ;;  %v5315_v33 = vunpack.c.h.s8.bf16 %v4067_v3  ;;  %v4195_v3 = vld [vmem:[%s12268_s12 + $0xac8] sm:$0xff] }
 0xb3e   : > { %9064 = vmatprep.subr.bf16.mxu0 %v5061_v24  ;;  %v5317_v24 = vunpack.c.h.s8.bf16 %v4069_v4  ;;  %v4197_v4 = vld [vmem:[%s12268_s12 + $0xad8] sm:$0xff] }
 0xb40   : > { %8901 = vmatpush1.bf16.msra.mxu1 %v5058_v28  ;;  %v5314_v28 = vunpack.c.h.s8.bf16 %v4066_v45  ;;  %v4194_v45 = vld [vmem:[%s12268_s12 + $0xac0] sm:$0xff] }
 0xb41   : > { %9065 = vmatpush1.bf16.msra.mxu0 %v5060_v18  ;;  %8902 = vmatprep.subr.bf16.mxu1 %v5091_v41  ;;  %v5316_v18 = vunpack.c.h.s8.bf16 %v4068_v13  ;;  %v5347_v41 = vunpack.c.l.s8.bf16 %v4099_v25  ;;  %v4196_v13 = vld [vmem:[%s12268_s12 + $0xad0] sm:$0xff] }
 0xb42   : > { %9066 = vmatprep.subr.bf16.mxu0 %v5093_v42  ;;  %v5349_v42 = vunpack.c.l.s8.bf16 %v4101_v26 }
 0xb44   : > { %8903 = vmatpush1.bf16.msra.mxu1 %v5090_v46  ;;  %v5346_v46 = vunpack.c.l.s8.bf16 %v4098_v9 }
 0xb45   : > { %9067 = vmatpush1.bf16.msra.mxu0 %v5092_v29  ;;  %8904 = vmatprep.subr.bf16.mxu1 %v5123_v35  ;;  %v5348_v29 = vunpack.c.l.s8.bf16 %v4100_v16  ;;  %v5379_v35 = vunpack.c.h.s8.bf16 %v4099_v25  ;;  %v4227_v25 = vld [vmem:[%s12268_s12 + $0xbc8] sm:$0xff] }
 0xb46   : > { %9068 = vmatprep.subr.bf16.mxu0 %v5125_v8  ;;  %v5381_v8 = vunpack.c.h.s8.bf16 %v4101_v26  ;;  %v4229_v26 = vld [vmem:[%s12268_s12 + $0xbd8] sm:$0xff] }
 0xb48   : > { %8905 = vmatpush1.bf16.msra.mxu1 %v5122_v38  ;;  %v5378_v38 = vunpack.c.h.s8.bf16 %v4098_v9  ;;  %v4226_v9 = vld [vmem:[%s12268_s12 + $0xbc0] sm:$0xff] }
 0xb49   : > { %9069 = vmatpush1.bf16.msra.mxu0 %v5124_v53  ;;  %8906 = vmatprep.subr.bf16.mxu1 %v5155_v40  ;;  %v5380_v53 = vunpack.c.h.s8.bf16 %v4100_v16  ;;  %v5411_v40 = vunpack.c.l.s8.bf16 %v4131_v30  ;;  %v4228_v16 = vld [vmem:[%s12268_s12 + $0xbd0] sm:$0xff] }
 0xb4a   : > { %9070 = vmatprep.subr.bf16.mxu0 %v5157_v55  ;;  %v5413_v55 = vunpack.c.l.s8.bf16 %v4133_v15  ;;  %v4261_v15 = vld [vmem:[%s12268_s12 + $0xcd8] sm:$0xff] }
 0xb4c   : > { %8907 = vmatpush1.bf16.msra.mxu1 %v5154_v22  ;;  %v5410_v22 = vunpack.c.l.s8.bf16 %v4130_v0 }
 0xb4d   : > { %9071 = vmatpush1.bf16.msra.mxu0 %v5156_v63  ;;  %8908 = vmatprep.subr.bf16.mxu1 %v5187_v49  ;;  %v5412_v63 = vunpack.c.l.s8.bf16 %v4132_v59  ;;  %v5443_v49 = vunpack.c.h.s8.bf16 %v4131_v30  ;;  %v4259_v30 = vld [vmem:[%s12268_s12 + $0xcc8] sm:$0xff] }
 0xb4e   : > { %9072 = vmatprep.subr.bf16.mxu0 %v5189_v57  ;;  %v4163_v57 = vld [vmem:[%s12268_s12 + $0x9c8] sm:$0xff] }
 0xb50   : > { %8909 = vmatpush1.bf16.msra.mxu1 %v5186_v62  ;;  %v5442_v62 = vunpack.c.h.s8.bf16 %v4130_v0  ;;  %v4258_v0 = vld [vmem:[%s12268_s12 + $0xcc0] sm:$0xff] }
 0xb51   : > { %9073 = vmatpush1.bf16.msra.mxu0 %v5188_v1  ;;  %8910 = vmatprep.subr.bf16.mxu1 %v5219_v32  ;;  %v5444_v1 = vunpack.c.h.s8.bf16 %v4132_v59  ;;  %v5475_v32 = vunpack.c.l.s8.bf16 %v4163_v57  ;;  %v4260_v59 = vld [vmem:[%s12268_s12 + $0xcd0] sm:$0xff] }
 0xb52   : > { %9074 = vmatprep.subr.bf16.mxu0 %v5221_v36  ;;  %v5477_v36 = vunpack.c.l.s8.bf16 %v4165_v44 }
 0xb54   : > { %8911 = vmatpush1.bf16.msra.mxu1 %v5218_v20  ;;  %v5474_v20 = vunpack.c.l.s8.bf16 %v4162_v11 }
 0xb55   : > { %9075 = vmatpush1.bf16.msra.mxu0 %v5220_v10  ;;  %8912 = vmatprep.subr.bf16.mxu1 %v5251_v43  ;;  %v5476_v10 = vunpack.c.l.s8.bf16 %v4164_v34  ;;  %v5507_v43 = vunpack.c.h.s8.bf16 %v4163_v57  ;;  %v5701_v57 = vunpack.c.h.s8.bf16 %v4261_v15 }
 0xb56   : > { %9076 = vmatprep.subr.bf16.mxu0 %v5253_v2  ;;  %v5509_v2 = vunpack.c.h.s8.bf16 %v4165_v44  ;;  %v4293_v44 = vld [vmem:[%s12268_s12 + $0xdd8] sm:$0xff] }
 0xb58   : > { %8913 = vmatpush1.bf16.msra.mxu1 %v5250_v47  ;;  %v5506_v47 = vunpack.c.h.s8.bf16 %v4162_v11  ;;  %v4290_v11 = vld [vmem:[%s12268_s12 + $0xdc0] sm:$0xff] }
 0xb59   : > { %9077 = vmatpush1.bf16.msra.mxu0 %v5252_v6  ;;  %8914 = vmatprep.subr.bf16.mxu1 %v5283_v7  ;;  %v5508_v6 = vunpack.c.h.s8.bf16 %v4164_v34  ;;  %v5539_v7 = vunpack.c.l.s8.bf16 %v4195_v3  ;;  %v4292_v34 = vld [vmem:[%s12268_s12 + $0xdd0] sm:$0xff] }
 0xb5a   : > { %9078 = vmatprep.subr.bf16.mxu0 %v5285_v12  ;;  %v5541_v12 = vunpack.c.l.s8.bf16 %v4197_v4 }
 0xb5c   : > { %8915 = vmatpush1.bf16.msra.mxu1 %v5282_v17  ;;  %v5538_v17 = vunpack.c.l.s8.bf16 %v4194_v45 }
 0xb5d   : > { %9079 = vmatpush1.bf16.msra.mxu0 %v5284_v27  ;;  %8916 = vmatprep.subr.bf16.mxu1 %v5315_v33  ;;  %v5540_v27 = vunpack.c.l.s8.bf16 %v4196_v13  ;;  %v5571_v33 = vunpack.c.h.s8.bf16 %v4195_v3  ;;  %v4323_v3 = vld [vmem:[%s12268_s12 + $0xec8] sm:$0xff] }
 0xb5e   : > { %9080 = vmatprep.subr.bf16.mxu0 %v5317_v24  ;;  %v5573_v24 = vunpack.c.h.s8.bf16 %v4197_v4  ;;  %v4325_v4 = vld [vmem:[%s12268_s12 + $0xed8] sm:$0xff] }
 0xb60   : > { %8917 = vmatpush1.bf16.msra.mxu1 %v5314_v28  ;;  %v5570_v28 = vunpack.c.h.s8.bf16 %v4194_v45  ;;  %v4322_v45 = vld [vmem:[%s12268_s12 + $0xec0] sm:$0xff] }
 0xb61   : > { %9081 = vmatpush1.bf16.msra.mxu0 %v5316_v18  ;;  %8918 = vmatprep.subr.bf16.mxu1 %v5347_v41  ;;  %v5572_v18 = vunpack.c.h.s8.bf16 %v4196_v13  ;;  %v5603_v41 = vunpack.c.l.s8.bf16 %v4227_v25  ;;  %v4324_v13 = vld [vmem:[%s12268_s12 + $0xed0] sm:$0xff] }
 0xb62   : > { %9082 = vmatprep.subr.bf16.mxu0 %v5349_v42  ;;  %v5605_v42 = vunpack.c.l.s8.bf16 %v4229_v26 }
 0xb64   : > { %8919 = vmatpush1.bf16.msra.mxu1 %v5346_v46  ;;  %v5602_v46 = vunpack.c.l.s8.bf16 %v4226_v9 }
 0xb65   : > { %9083 = vmatpush1.bf16.msra.mxu0 %v5348_v29  ;;  %8920 = vmatprep.subr.bf16.mxu1 %v5379_v35  ;;  %v5604_v29 = vunpack.c.l.s8.bf16 %v4228_v16  ;;  %v5635_v35 = vunpack.c.h.s8.bf16 %v4227_v25  ;;  %v4355_v25 = vld [vmem:[%s12268_s12 + $0xfc8] sm:$0xff] }
 0xb66   : > { %9084 = vmatprep.subr.bf16.mxu0 %v5381_v8  ;;  %v5637_v8 = vunpack.c.h.s8.bf16 %v4229_v26  ;;  %v4357_v26 = vld [vmem:[%s12268_s12 + $0xfd8] sm:$0xff] }
 0xb68   : > { %8921 = vmatpush1.bf16.msra.mxu1 %v5378_v38  ;;  %v5634_v38 = vunpack.c.h.s8.bf16 %v4226_v9  ;;  %v4354_v9 = vld [vmem:[%s12268_s12 + $0xfc0] sm:$0xff] }
 0xb69   : > { %9085 = vmatpush1.bf16.msra.mxu0 %v5380_v53  ;;  %8931 = vmatprep.subr.bf16.mxu1 %v5411_v40  ;;  %v5636_v53 = vunpack.c.h.s8.bf16 %v4228_v16  ;;  %v5667_v40 = vunpack.c.l.s8.bf16 %v4259_v30  ;;  %v4356_v16 = vld [vmem:[%s12268_s12 + $0xfd0] sm:$0xff] }
 0xb6a   : > { %9095 = vmatprep.subr.bf16.mxu0 %v5413_v55  ;;  %v5669_v55 = vunpack.c.l.s8.bf16 %v4261_v15  ;;  %v4389_v15 = vld [vmem:[%s12268_s12 + $0x10d8] sm:$0xff] }
 0xb6b   : > { %8923 = vmatmul.mubr.bf16.vlgmr.msra.gmra.mrb[36].mxu1 %v12462_v56 }
 0xb6c   : > { %9087 = vmatmul.mubr.bf16.vlgmr.msra.gmra.mrb[40].mxu0 %v12462_v56  ;;  %8932 = vmatpush1.bf16.msra.mxu1 %v5410_v22  ;;  %v5666_v22 = vunpack.c.l.s8.bf16 %v4258_v0 }
 0xb6d   : > { %8963 = vmatprep.mubr.bf16.mxu1 %v12470_v39  ;;  %9096 = vmatpush1.bf16.msra.mxu0 %v5412_v63  ;;  %v5668_v63 = vunpack.c.l.s8.bf16 %v4260_v59 }
 0xb6e   : > { %9127 = vmatprep.mubr.bf16.mxu0 %v12470_v39  ;;  %8933 = vmatprep.subr.bf16.mxu1 %v5443_v49  ;;  %v5699_v49 = vunpack.c.h.s8.bf16 %v4259_v30  ;;  %v4387_v30 = vld [vmem:[%s12268_s12 + $0x10c8] sm:$0xff] }
 0xb6f   : > { %9097 = vmatprep.subr.bf16.mxu0 %v5445_v61  ;;  %v4291_v61 = vld [vmem:[%s12268_s12 + $0xdc8] sm:$0xff] }
 0xb70   : > { %8934 = vmatpush1.bf16.msra.mxu1 %v5442_v62  ;;  %v5698_v62 = vunpack.c.h.s8.bf16 %v4258_v0  ;;  %v4386_v0 = vld [vmem:[%s12268_s12 + $0x10c0] sm:$0xff] }
 0xb71   : > { %9098 = vmatpush1.bf16.msra.mxu0 %v5444_v1  ;;  %8935 = vmatprep.subr.bf16.mxu1 %v5475_v32  ;;  %v5700_v1 = vunpack.c.h.s8.bf16 %v4260_v59  ;;  %v5731_v32 = vunpack.c.l.s8.bf16 %v4291_v61  ;;  %v4388_v59 = vld [vmem:[%s12268_s12 + $0x10d0] sm:$0xff] }
 0xb72   : > { %9099 = vmatprep.subr.bf16.mxu0 %v5477_v36  ;;  %v5733_v36 = vunpack.c.l.s8.bf16 %v4293_v44 }
 0xb74   : > { %8936 = vmatpush1.bf16.msra.mxu1 %v5474_v20  ;;  %v5730_v20 = vunpack.c.l.s8.bf16 %v4290_v11 }
 0xb75   : > { %9100 = vmatpush1.bf16.msra.mxu0 %v5476_v10  ;;  %8937 = vmatprep.subr.bf16.mxu1 %v5507_v43  ;;  %v5732_v10 = vunpack.c.l.s8.bf16 %v4292_v34  ;;  %v5763_v43 = vunpack.c.h.s8.bf16 %v4291_v61  ;;  %v5957_v61 = vunpack.c.h.s8.bf16 %v4389_v15 }
 0xb76   : > { %9101 = vmatprep.subr.bf16.mxu0 %v5509_v2  ;;  %v5765_v2 = vunpack.c.h.s8.bf16 %v4293_v44  ;;  %v4421_v44 = vld [vmem:[%s12268_s12 + $0x11d8] sm:$0xff] }
 0xb78   : > { %8938 = vmatpush1.bf16.msra.mxu1 %v5506_v47  ;;  %v5762_v47 = vunpack.c.h.s8.bf16 %v4290_v11  ;;  %v4418_v11 = vld [vmem:[%s12268_s12 + $0x11c0] sm:$0xff] }
 0xb79   : > { %9102 = vmatpush1.bf16.msra.mxu0 %v5508_v6  ;;  %8939 = vmatprep.subr.bf16.mxu1 %v5539_v7  ;;  %v5764_v6 = vunpack.c.h.s8.bf16 %v4292_v34  ;;  %v5795_v7 = vunpack.c.l.s8.bf16 %v4323_v3  ;;  %v4420_v34 = vld [vmem:[%s12268_s12 + $0x11d0] sm:$0xff] }
 0xb7a   : > { %9103 = vmatprep.subr.bf16.mxu0 %v5541_v12  ;;  %v5797_v12 = vunpack.c.l.s8.bf16 %v4325_v4 }
 0xb7c   : > { %8940 = vmatpush1.bf16.msra.mxu1 %v5538_v17  ;;  %v5794_v17 = vunpack.c.l.s8.bf16 %v4322_v45 }
 0xb7d   : > { %9104 = vmatpush1.bf16.msra.mxu0 %v5540_v27  ;;  %8941 = vmatprep.subr.bf16.mxu1 %v5571_v33  ;;  %v5796_v27 = vunpack.c.l.s8.bf16 %v4324_v13  ;;  %v5827_v33 = vunpack.c.h.s8.bf16 %v4323_v3  ;;  %v4451_v3 = vld [vmem:[%s12268_s12 + $0x12c8] sm:$0xff] }
 0xb7e   : > { %9105 = vmatprep.subr.bf16.mxu0 %v5573_v24  ;;  %v5829_v24 = vunpack.c.h.s8.bf16 %v4325_v4  ;;  %v4453_v4 = vld [vmem:[%s12268_s12 + $0x12d8] sm:$0xff] }
 0xb80   : > { %8942 = vmatpush1.bf16.msra.mxu1 %v5570_v28  ;;  %v5826_v28 = vunpack.c.h.s8.bf16 %v4322_v45  ;;  %v4450_v45 = vld [vmem:[%s12268_s12 + $0x12c0] sm:$0xff] }
 0xb81   : > { %9106 = vmatpush1.bf16.msra.mxu0 %v5572_v18  ;;  %8943 = vmatprep.subr.bf16.mxu1 %v5603_v41  ;;  %v5828_v18 = vunpack.c.h.s8.bf16 %v4324_v13  ;;  %v5859_v41 = vunpack.c.l.s8.bf16 %v4355_v25  ;;  %v4452_v13 = vld [vmem:[%s12268_s12 + $0x12d0] sm:$0xff] }
 0xb82   : > { %9107 = vmatprep.subr.bf16.mxu0 %v5605_v42  ;;  %v5861_v42 = vunpack.c.l.s8.bf16 %v4357_v26 }
 0xb84   : > { %8944 = vmatpush1.bf16.msra.mxu1 %v5602_v46  ;;  %v5858_v46 = vunpack.c.l.s8.bf16 %v4354_v9 }
 0xb85   : > { %9108 = vmatpush1.bf16.msra.mxu0 %v5604_v29  ;;  %8945 = vmatprep.subr.bf16.mxu1 %v5635_v35  ;;  %v5860_v29 = vunpack.c.l.s8.bf16 %v4356_v16  ;;  %v5891_v35 = vunpack.c.h.s8.bf16 %v4355_v25  ;;  %v4483_v25 = vld [vmem:[%s12268_s12 + $0x13c8] sm:$0xff] }
 0xb86   : > { %9109 = vmatprep.subr.bf16.mxu0 %v5637_v8  ;;  %v5893_v8 = vunpack.c.h.s8.bf16 %v4357_v26  ;;  %v4485_v26 = vld [vmem:[%s12268_s12 + $0x13d8] sm:$0xff] }
 0xb88   : > { %8946 = vmatpush1.bf16.msra.mxu1 %v5634_v38  ;;  %v5890_v38 = vunpack.c.h.s8.bf16 %v4354_v9  ;;  %v4482_v9 = vld [vmem:[%s12268_s12 + $0x13c0] sm:$0xff] }
 0xb89   : > { %9110 = vmatpush1.bf16.msra.mxu0 %v5636_v53  ;;  %8947 = vmatprep.subr.bf16.mxu1 %v5667_v40  ;;  %v5892_v53 = vunpack.c.h.s8.bf16 %v4356_v16  ;;  %v5923_v40 = vunpack.c.l.s8.bf16 %v4387_v30  ;;  %v4484_v16 = vld [vmem:[%s12268_s12 + $0x13d0] sm:$0xff] }
 0xb8a   : > { %9111 = vmatprep.subr.bf16.mxu0 %v5669_v55  ;;  %v5925_v55 = vunpack.c.l.s8.bf16 %v4389_v15  ;;  %v4517_v15 = vld [vmem:[%s12268_s12 + $0x14d8] sm:$0xff] }
 0xb8c   : > { %8948 = vmatpush1.bf16.msra.mxu1 %v5666_v22  ;;  %v5922_v22 = vunpack.c.l.s8.bf16 %v4386_v0 }
 0xb8d   : > { %9112 = vmatpush1.bf16.msra.mxu0 %v5668_v63  ;;  %8949 = vmatprep.subr.bf16.mxu1 %v5699_v49  ;;  %v5924_v63 = vunpack.c.l.s8.bf16 %v4388_v59  ;;  %v5955_v49 = vunpack.c.h.s8.bf16 %v4387_v30  ;;  %v4515_v30 = vld [vmem:[%s12268_s12 + $0x14c8] sm:$0xff] }
 0xb8e   : > { %9113 = vmatprep.subr.bf16.mxu0 %v5701_v57  ;;  %v4419_v57 = vld [vmem:[%s12268_s12 + $0x11c8] sm:$0xff] }
 0xb90   : > { %8950 = vmatpush1.bf16.msra.mxu1 %v5698_v62  ;;  %v5954_v62 = vunpack.c.h.s8.bf16 %v4386_v0  ;;  %v4514_v0 = vld [vmem:[%s12268_s12 + $0x14c0] sm:$0xff] }
 0xb91   : > { %9114 = vmatpush1.bf16.msra.mxu0 %v5700_v1  ;;  %8951 = vmatprep.subr.bf16.mxu1 %v5731_v32  ;;  %v5956_v1 = vunpack.c.h.s8.bf16 %v4388_v59  ;;  %v5987_v32 = vunpack.c.l.s8.bf16 %v4419_v57  ;;  %v4516_v59 = vld [vmem:[%s12268_s12 + $0x14d0] sm:$0xff] }
 0xb92   : > { %9115 = vmatprep.subr.bf16.mxu0 %v5733_v36  ;;  %v5989_v36 = vunpack.c.l.s8.bf16 %v4421_v44 }
 0xb94   : > { %8952 = vmatpush1.bf16.msra.mxu1 %v5730_v20  ;;  %v5986_v20 = vunpack.c.l.s8.bf16 %v4418_v11 }
 0xb95   : > { %9116 = vmatpush1.bf16.msra.mxu0 %v5732_v10  ;;  %8953 = vmatprep.subr.bf16.mxu1 %v5763_v43  ;;  %v5988_v10 = vunpack.c.l.s8.bf16 %v4420_v34  ;;  %v6019_v43 = vunpack.c.h.s8.bf16 %v4419_v57  ;;  %v6213_v57 = vunpack.c.h.s8.bf16 %v4517_v15 }
 0xb96   : > { %9117 = vmatprep.subr.bf16.mxu0 %v5765_v2  ;;  %v6021_v2 = vunpack.c.h.s8.bf16 %v4421_v44  ;;  %v4549_v44 = vld [vmem:[%s12268_s12 + $0x15d8] sm:$0xff] }
 0xb98   : > { %8954 = vmatpush1.bf16.msra.mxu1 %v5762_v47  ;;  %v6018_v47 = vunpack.c.h.s8.bf16 %v4418_v11  ;;  %v4546_v11 = vld [vmem:[%s12268_s12 + $0x15c0] sm:$0xff] }
 0xb99   : > { %9118 = vmatpush1.bf16.msra.mxu0 %v5764_v6  ;;  %8955 = vmatprep.subr.bf16.mxu1 %v5795_v7  ;;  %v6020_v6 = vunpack.c.h.s8.bf16 %v4420_v34  ;;  %v6051_v7 = vunpack.c.l.s8.bf16 %v4451_v3  ;;  %v4548_v34 = vld [vmem:[%s12268_s12 + $0x15d0] sm:$0xff] }
 0xb9a   : > { %9119 = vmatprep.subr.bf16.mxu0 %v5797_v12  ;;  %v6053_v12 = vunpack.c.l.s8.bf16 %v4453_v4 }
 0xb9c   : > { %8956 = vmatpush1.bf16.msra.mxu1 %v5794_v17  ;;  %v6050_v17 = vunpack.c.l.s8.bf16 %v4450_v45 }
 0xb9d   : > { %9120 = vmatpush1.bf16.msra.mxu0 %v5796_v27  ;;  %8957 = vmatprep.subr.bf16.mxu1 %v5827_v33  ;;  %v6052_v27 = vunpack.c.l.s8.bf16 %v4452_v13  ;;  %v6083_v33 = vunpack.c.h.s8.bf16 %v4451_v3  ;;  %v4579_v3 = vld [vmem:[%s12268_s12 + $0x16c8] sm:$0xff] }
 0xb9e   : > { %9121 = vmatprep.subr.bf16.mxu0 %v5829_v24  ;;  %v6085_v24 = vunpack.c.h.s8.bf16 %v4453_v4  ;;  %v4581_v4 = vld [vmem:[%s12268_s12 + $0x16d8] sm:$0xff] }
 0xba0   : > { %8958 = vmatpush1.bf16.msra.mxu1 %v5826_v28  ;;  %v6082_v28 = vunpack.c.h.s8.bf16 %v4450_v45  ;;  %v4578_v45 = vld [vmem:[%s12268_s12 + $0x16c0] sm:$0xff] }
 0xba1   : > { %9122 = vmatpush1.bf16.msra.mxu0 %v5828_v18  ;;  %8959 = vmatprep.subr.bf16.mxu1 %v5859_v41  ;;  %v6084_v18 = vunpack.c.h.s8.bf16 %v4452_v13  ;;  %v6115_v41 = vunpack.c.l.s8.bf16 %v4483_v25  ;;  %v4580_v13 = vld [vmem:[%s12268_s12 + $0x16d0] sm:$0xff] }
 0xba2   : > { %9123 = vmatprep.subr.bf16.mxu0 %v5861_v42  ;;  %v6117_v42 = vunpack.c.l.s8.bf16 %v4485_v26 }
 0xba4   : > { %8960 = vmatpush1.bf16.msra.mxu1 %v5858_v46  ;;  %v6114_v46 = vunpack.c.l.s8.bf16 %v4482_v9 }
 0xba5   : > { %9124 = vmatpush1.bf16.msra.mxu0 %v5860_v29  ;;  %8961 = vmatprep.subr.bf16.mxu1 %v5891_v35  ;;  %v6116_v29 = vunpack.c.l.s8.bf16 %v4484_v16  ;;  %v6147_v35 = vunpack.c.h.s8.bf16 %v4483_v25  ;;  %v4611_v25 = vld [vmem:[%s12268_s12 + $0x17c8] sm:$0xff] }
 0xba6   : > { %9125 = vmatprep.subr.bf16.mxu0 %v5893_v8  ;;  %v6149_v8 = vunpack.c.h.s8.bf16 %v4485_v26  ;;  %v4613_v26 = vld [vmem:[%s12268_s12 + $0x17d8] sm:$0xff] }
 0xba8   : > { %8962 = vmatpush1.bf16.msra.mxu1 %v5890_v38  ;;  %v6146_v38 = vunpack.c.h.s8.bf16 %v4482_v9  ;;  %v4610_v9 = vld [vmem:[%s12268_s12 + $0x17c0] sm:$0xff] }
 0xba9   : > { %9126 = vmatpush1.bf16.msra.mxu0 %v5892_v53  ;;  %8972 = vmatprep.subr.bf16.mxu1 %v5923_v40  ;;  %v6148_v53 = vunpack.c.h.s8.bf16 %v4484_v16  ;;  %v6179_v40 = vunpack.c.l.s8.bf16 %v4515_v30  ;;  %v4612_v16 = vld [vmem:[%s12268_s12 + $0x17d0] sm:$0xff] }
 0xbaa   : > { %9136 = vmatprep.subr.bf16.mxu0 %v5925_v55  ;;  %v6181_v55 = vunpack.c.l.s8.bf16 %v4517_v15  ;;  %v4645_v15 = vld [vmem:[%s12268_s12 + $0x18d8] sm:$0xff] }
 0xbab   : > { %8964 = vmatmul.mubr.bf16.vlgmr.msra.gmra.mrb[36].mxu1 %v12526_v5 }
 0xbac   : > { %9128 = vmatmul.mubr.bf16.vlgmr.msra.gmra.mrb[40].mxu0 %v12526_v5  ;;  %8973 = vmatpush1.bf16.msra.mxu1 %v5922_v22  ;;  %v6178_v22 = vunpack.c.l.s8.bf16 %v4514_v0 }
 0xbad   : > { %9004 = vmatprep.mubr.bf16.mxu1 %v12626_v14  ;;  %9137 = vmatpush1.bf16.msra.mxu0 %v5924_v63  ;;  %v6180_v63 = vunpack.c.l.s8.bf16 %v4516_v59 }
 0xbae   : > { %9168 = vmatprep.mubr.bf16.mxu0 %v12626_v14  ;;  %8974 = vmatprep.subr.bf16.mxu1 %v5955_v49  ;;  %v6211_v49 = vunpack.c.h.s8.bf16 %v4515_v30  ;;  %v4643_v30 = vld [vmem:[%s12268_s12 + $0x18c8] sm:$0xff] }
 0xbaf   : > { %9138 = vmatprep.subr.bf16.mxu0 %v5957_v61  ;;  %v4547_v61 = vld [vmem:[%s12268_s12 + $0x15c8] sm:$0xff] }
 0xbb0   : > { %8975 = vmatpush1.bf16.msra.mxu1 %v5954_v62  ;;  %v6210_v62 = vunpack.c.h.s8.bf16 %v4514_v0  ;;  %v4642_v0 = vld [vmem:[%s12268_s12 + $0x18c0] sm:$0xff] }
 0xbb1   : > { %9139 = vmatpush1.bf16.msra.mxu0 %v5956_v1  ;;  %8976 = vmatprep.subr.bf16.mxu1 %v5987_v32  ;;  %v6212_v1 = vunpack.c.h.s8.bf16 %v4516_v59  ;;  %v6243_v32 = vunpack.c.l.s8.bf16 %v4547_v61  ;;  %v4644_v59 = vld [vmem:[%s12268_s12 + $0x18d0] sm:$0xff] }
 0xbb2   : > { %9140 = vmatprep.subr.bf16.mxu0 %v5989_v36  ;;  %v6245_v36 = vunpack.c.l.s8.bf16 %v4549_v44 }
 0xbb4   : > { %8977 = vmatpush1.bf16.msra.mxu1 %v5986_v20  ;;  %v6242_v20 = vunpack.c.l.s8.bf16 %v4546_v11 }
 0xbb5   : > { %9141 = vmatpush1.bf16.msra.mxu0 %v5988_v10  ;;  %8978 = vmatprep.subr.bf16.mxu1 %v6019_v43  ;;  %v6244_v10 = vunpack.c.l.s8.bf16 %v4548_v34  ;;  %v6275_v43 = vunpack.c.h.s8.bf16 %v4547_v61  ;;  %v6469_v61 = vunpack.c.h.s8.bf16 %v4645_v15 }
 0xbb6   : > { %9142 = vmatprep.subr.bf16.mxu0 %v6021_v2  ;;  %v6277_v2 = vunpack.c.h.s8.bf16 %v4549_v44  ;;  %v4677_v44 = vld [vmem:[%s12268_s12 + $0x19d8] sm:$0xff] }
 0xbb8   : > { %8979 = vmatpush1.bf16.msra.mxu1 %v6018_v47  ;;  %v6274_v47 = vunpack.c.h.s8.bf16 %v4546_v11  ;;  %v4674_v11 = vld [vmem:[%s12268_s12 + $0x19c0] sm:$0xff] }
 0xbb9   : > { %9143 = vmatpush1.bf16.msra.mxu0 %v6020_v6  ;;  %8980 = vmatprep.subr.bf16.mxu1 %v6051_v7  ;;  %v6276_v6 = vunpack.c.h.s8.bf16 %v4548_v34  ;;  %v6307_v7 = vunpack.c.l.s8.bf16 %v4579_v3  ;;  %v4676_v34 = vld [vmem:[%s12268_s12 + $0x19d0] sm:$0xff] }
 0xbba   : > { %9144 = vmatprep.subr.bf16.mxu0 %v6053_v12  ;;  %v6309_v12 = vunpack.c.l.s8.bf16 %v4581_v4 }
 0xbbc   : > { %8981 = vmatpush1.bf16.msra.mxu1 %v6050_v17  ;;  %v6306_v17 = vunpack.c.l.s8.bf16 %v4578_v45 }
 0xbbd   : > { %9145 = vmatpush1.bf16.msra.mxu0 %v6052_v27  ;;  %8982 = vmatprep.subr.bf16.mxu1 %v6083_v33  ;;  %v6308_v27 = vunpack.c.l.s8.bf16 %v4580_v13  ;;  %v6339_v33 = vunpack.c.h.s8.bf16 %v4579_v3  ;;  %v4707_v3 = vld [vmem:[%s12268_s12 + $0x1ac8] sm:$0xff] }
 0xbbe   : > { %9146 = vmatprep.subr.bf16.mxu0 %v6085_v24  ;;  %v6341_v24 = vunpack.c.h.s8.bf16 %v4581_v4  ;;  %v4709_v4 = vld [vmem:[%s12268_s12 + $0x1ad8] sm:$0xff] }
 0xbc0   : > { %8983 = vmatpush1.bf16.msra.mxu1 %v6082_v28  ;;  %v6338_v28 = vunpack.c.h.s8.bf16 %v4578_v45  ;;  %v4706_v45 = vld [vmem:[%s12268_s12 + $0x1ac0] sm:$0xff] }
 0xbc1   : > { %9147 = vmatpush1.bf16.msra.mxu0 %v6084_v18  ;;  %8984 = vmatprep.subr.bf16.mxu1 %v6115_v41  ;;  %v6340_v18 = vunpack.c.h.s8.bf16 %v4580_v13  ;;  %v6371_v41 = vunpack.c.l.s8.bf16 %v4611_v25  ;;  %v4708_v13 = vld [vmem:[%s12268_s12 + $0x1ad0] sm:$0xff] }
 0xbc2   : > { %9148 = vmatprep.subr.bf16.mxu0 %v6117_v42  ;;  %v6373_v42 = vunpack.c.l.s8.bf16 %v4613_v26 }
 0xbc4   : > { %8985 = vmatpush1.bf16.msra.mxu1 %v6114_v46  ;;  %v6370_v46 = vunpack.c.l.s8.bf16 %v4610_v9 }
 0xbc5   : > { %9149 = vmatpush1.bf16.msra.mxu0 %v6116_v29  ;;  %8986 = vmatprep.subr.bf16.mxu1 %v6147_v35  ;;  %v6372_v29 = vunpack.c.l.s8.bf16 %v4612_v16  ;;  %v6403_v35 = vunpack.c.h.s8.bf16 %v4611_v25  ;;  %v4739_v25 = vld [vmem:[%s12268_s12 + $0x1bc8] sm:$0xff] }
 0xbc6   : > { %9150 = vmatprep.subr.bf16.mxu0 %v6149_v8  ;;  %v6405_v8 = vunpack.c.h.s8.bf16 %v4613_v26  ;;  %v11229_v26 = vld [vmem:[%s12797_s24 + $0x10] sm:$0xff] }
 0xbc8   : > { %8987 = vmatpush1.bf16.msra.mxu1 %v6146_v38  ;;  %v6402_v38 = vunpack.c.h.s8.bf16 %v4610_v9  ;;  %v9641_v9 = vrot.slane %v11229_v26, %v12513_v60 }
 0xbc9   : > { %9151 = vmatpush1.bf16.msra.mxu0 %v6148_v53  ;;  %8988 = vmatprep.subr.bf16.mxu1 %v6179_v40  ;;  %v6404_v53 = vunpack.c.h.s8.bf16 %v4612_v16  ;;  %v6435_v40 = vunpack.c.l.s8.bf16 %v4643_v30  ;;  %v11230_v16 = vld [vmem:[%s12800_s21 + $0x10] sm:$0xff] }
 0xbca   : > { %9152 = vmatprep.subr.bf16.mxu0 %v6181_v55  ;;  %v6437_v55 = vunpack.c.l.s8.bf16 %v4645_v15 }
 0xbcc   : > { %8989 = vmatpush1.bf16.msra.mxu1 %v6178_v22  ;;  %v6434_v22 = vunpack.c.l.s8.bf16 %v4642_v0 }
 0xbcd   : > { %9153 = vmatpush1.bf16.msra.mxu0 %v6180_v63  ;;  %8990 = vmatprep.subr.bf16.mxu1 %v6211_v49  ;;  %v6436_v63 = vunpack.c.l.s8.bf16 %v4644_v59  ;;  %v6467_v49 = vunpack.c.h.s8.bf16 %v4643_v30  ;;  %v4738_v30 = vld [vmem:[%s12268_s12 + $0x1bc0] sm:$0xff] }
 0xbce   : > { %9154 = vmatprep.subr.bf16.mxu0 %v6213_v57  ;;  %v4675_v57 = vld [vmem:[%s12268_s12 + $0x19c8] sm:$0xff] }
 0xbd0   : > { %8991 = vmatpush1.bf16.msra.mxu1 %v6210_v62  ;;  %v6466_v62 = vunpack.c.h.s8.bf16 %v4642_v0  ;;  %v4740_v0 = vld [vmem:[%s12268_s12 + $0x1bd0] sm:$0xff] }
 0xbd1   : > { %9155 = vmatpush1.bf16.msra.mxu0 %v6212_v1  ;;  %8992 = vmatprep.subr.bf16.mxu1 %v6243_v32  ;;  %v6468_v1 = vunpack.c.h.s8.bf16 %v4644_v59  ;;  %v6499_v32 = vunpack.c.l.s8.bf16 %v4675_v57 }
 0xbd2   : > { %9156 = vmatprep.subr.bf16.mxu0 %v6245_v36  ;;  %v6501_v36 = vunpack.c.l.s8.bf16 %v4677_v44 }
 0xbd4   : > { %8993 = vmatpush1.bf16.msra.mxu1 %v6242_v20  ;;  %v6498_v20 = vunpack.c.l.s8.bf16 %v4674_v11 }
 0xbd5   : > { %9157 = vmatpush1.bf16.msra.mxu0 %v6244_v10  ;;  %8994 = vmatprep.subr.bf16.mxu1 %v6275_v43  ;;  %v6500_v10 = vunpack.c.l.s8.bf16 %v4676_v34  ;;  %v6531_v43 = vunpack.c.h.s8.bf16 %v4675_v57 }
 0xbd6   : > { %9158 = vmatprep.subr.bf16.mxu0 %v6277_v2  ;;  %v6533_v2 = vunpack.c.h.s8.bf16 %v4677_v44 }
 0xbd8   : > { %8995 = vmatpush1.bf16.msra.mxu1 %v6274_v47  ;;  %v6530_v47 = vunpack.c.h.s8.bf16 %v4674_v11 }
 0xbd9   : > { %9159 = vmatpush1.bf16.msra.mxu0 %v6276_v6  ;;  %8996 = vmatprep.subr.bf16.mxu1 %v6307_v7  ;;  %v6532_v6 = vunpack.c.h.s8.bf16 %v4676_v34  ;;  %v6563_v7 = vunpack.c.l.s8.bf16 %v4707_v3  ;;  %v6628_v34 = vunpack.c.l.s8.bf16 %v4740_v0 }
 0xbda   : > { %9160 = vmatprep.subr.bf16.mxu0 %v6309_v12  ;;  %v6565_v12 = vunpack.c.l.s8.bf16 %v4709_v4 }
 0xbdc   : > { %8997 = vmatpush1.bf16.msra.mxu1 %v6306_v17  ;;  %v6562_v17 = vunpack.c.l.s8.bf16 %v4706_v45 }
 0xbdd   : > { %9161 = vmatpush1.bf16.msra.mxu0 %v6308_v27  ;;  %8998 = vmatprep.subr.bf16.mxu1 %v6339_v33  ;;  %v6564_v27 = vunpack.c.l.s8.bf16 %v4708_v13  ;;  %v6595_v33 = vunpack.c.h.s8.bf16 %v4707_v3 }
 0xbde   : > { %9162 = vmatprep.subr.bf16.mxu0 %v6341_v24  ;;  %v6597_v24 = vunpack.c.h.s8.bf16 %v4709_v4  ;;  %v4771_v4 = vld [vmem:[%s12268_s12 + $0x1cc8] sm:$0xff] }
 0xbe0   : > { %8999 = vmatpush1.bf16.msra.mxu1 %v6338_v28  ;;  %v9637_v28 = vrot.slane %v11229_v26, %v12508_v54 }
 0xbe1   : > { %9163 = vmatpush1.bf16.msra.mxu0 %v6340_v18  ;;  %9000 = vmatprep.subr.bf16.mxu1 %v6371_v41  ;;  %v4741_v18 = vld [vmem:[%s12268_s12 + $0x1bd8] sm:$0xff]  ;;  %v9645_v41 = vrot.slane %v11229_v26, %v12549_v37 }
 0xbe2   : > { %9164 = vmatprep.subr.bf16.mxu0 %v6373_v42  ;;  %v6594_v42 = vunpack.c.h.s8.bf16 %v4706_v45  ;;  %v6661_v3 = vunpack.c.h.s8.bf16 %v4741_v18  ;;  %v6660_v45 = vunpack.c.h.s8.bf16 %v4740_v0 }
 0xbe4   : > { %9001 = vmatpush1.bf16.msra.mxu1 %v6370_v46  ;;  %v9837_v46 = vrot.slane %v11230_v16, %v12508_v54 }
 0xbe5   : > { %9165 = vmatpush1.bf16.msra.mxu0 %v6372_v29  ;;  %9002 = vmatprep.subr.bf16.mxu1 %v6403_v35  ;;  %v9649_v29 = vrot.slane %v11229_v26, %v12516_v58  ;;  %v6596_v35 = vunpack.c.h.s8.bf16 %v4708_v13  ;;  %v4770_v13 = vld [vmem:[%s12268_s12 + $0x1cc0] sm:$0xff] }
 0xbe6   : > { %9166 = vmatprep.subr.bf16.mxu0 %v6405_v8  ;;  %v6627_v8 = vunpack.c.l.s8.bf16 %v4739_v25 }
 0xbe8   : > { %9003 = vmatpush1.bf16.msra.mxu1 %v6402_v38  ;;  %v9845_v38 = vrot.slane %v11230_v16, %v12549_v37 }
 0xbe9   : > { %9167 = vmatpush1.bf16.msra.mxu0 %v6404_v53  ;;  %9013 = vmatprep.subr.bf16.mxu1 %v6435_v40  ;;  %v9841_v53 = vrot.slane %v11230_v16, %v12513_v60  ;;  %v6629_v40 = vunpack.c.l.s8.bf16 %v4741_v18  ;;  %v4805_v18 = vld [vmem:[%s12268_s12 + $0x1dd8] sm:$0xff] }
 0xbea   : > { %9177 = vmatprep.subr.bf16.mxu0 %v6437_v55  ;;  %v6789_v0 = vunpack.c.h.s8.bf16 %v4805_v18 }
 0xbeb   : > { %9005 = vmatmul.mubr.bf16.vlgmr.msra.gmra.mrb[36].mxu1 %v12628_v19 }
 0xbec   : > { %9169 = vmatmul.mubr.bf16.vlgmr.msra.gmra.mrb[40].mxu0 %v12628_v19  ;;  %9014 = vmatpush1.bf16.msra.mxu1 %v6434_v22 }
 0xbed   : > { %9045 = vmatprep.mubr.bf16.mxu1 %v12634_v31  ;;  %9178 = vmatpush1.bf16.msra.mxu0 %v6436_v63  ;;  %v9849_v63 = vrot.slane %v11230_v16, %v12516_v58 }
 0xbee   : > { %9209 = vmatprep.mubr.bf16.mxu0 %v12634_v31  ;;  %9015 = vmatprep.subr.bf16.mxu1 %v6467_v49 }
 0xbef   : > { %9179 = vmatprep.subr.bf16.mxu0 %v6469_v61 }
 0xbf0   : > { %9016 = vmatpush1.bf16.msra.mxu1 %v6466_v62  ;;  %v6626_v62 = vunpack.c.l.s8.bf16 %v4738_v30 }
 0xbf1   : > { %9180 = vmatpush1.bf16.msra.mxu0 %v6468_v1  ;;  %9017 = vmatprep.subr.bf16.mxu1 %v6499_v32 }
 0xbf2   : > { %9181 = vmatprep.subr.bf16.mxu0 %v6501_v36 }
 0xbf4   : > { %9018 = vmatpush1.bf16.msra.mxu1 %v6498_v20  ;;  %v6659_v20 = vunpack.c.h.s8.bf16 %v4739_v25  ;;  %v6723_v25 = vunpack.c.h.s8.bf16 %v4771_v4 }
 0xbf5   : > { %9182 = vmatpush1.bf16.msra.mxu0 %v6500_v10  ;;  %9019 = vmatprep.subr.bf16.mxu1 %v6531_v43 }
 0xbf6   : > { %9183 = vmatprep.subr.bf16.mxu0 %v6533_v2 }
 0xbf8   : > { %9020 = vmatpush1.bf16.msra.mxu1 %v6530_v47 }
 0xbf9   : > { %9184 = vmatpush1.bf16.msra.mxu0 %v6532_v6  ;;  %9021 = vmatprep.subr.bf16.mxu1 %v6563_v7  ;;  %v4773_v6 = vld [vmem:[%s12268_s12 + $0x1cd8] sm:$0xff]  ;;  %v6658_v7 = vunpack.c.h.s8.bf16 %v4738_v30 }
 0xbfa   : > { %9185 = vmatprep.subr.bf16.mxu0 %v6565_v12  ;;  %v6691_v12 = vunpack.c.l.s8.bf16 %v4771_v4  ;;  %v6725_v26 = vunpack.c.h.s8.bf16 %v4773_v6  ;;  %v4868_v4 = vld [vmem:[%s12268_s12 + $0x1fd0] sm:$0xff] }
 0xbfc   : > { %9022 = vmatpush1.bf16.msra.mxu1 %v6562_v17  ;;  %v6693_v17 = vunpack.c.l.s8.bf16 %v4773_v6  ;;  %v6884_v6 = vunpack.c.l.s8.bf16 %v4868_v4 }
 0xbfd   : > { %9186 = vmatpush1.bf16.msra.mxu0 %v6564_v27  ;;  %9023 = vmatprep.subr.bf16.mxu1 %v6595_v33  ;;  %v4772_v27 = vld [vmem:[%s12268_s12 + $0x1cd0] sm:$0xff]  ;;  %v6690_v33 = vunpack.c.l.s8.bf16 %v4770_v13 }
 0xbfe   : > { %v8719_v15 = vpop.f32.mrb[32].mxu1  ;;  %9187 = vmatprep.subr.bf16.mxu0 %v6597_v24  ;;  %v6692_v24 = vunpack.c.l.s8.bf16 %v4772_v27 }
 0xbff   : > { %v9734_v55 = vmul.f32 %v9637_v28, %v8719_v15  ;;  %v8883_v59 = vpop.f32.mrb[36].mxu0  ;;  %v8721_v22 = vpop.f32.mrb[33].mxu1  ;;  %v4803_v28 = vld [vmem:[%s12268_s12 + $0x1dc8] sm:$0xff] }
 0xc00   : > { %v9736_v49 = vmul.f32 %v9645_v41, %v8883_v59  ;;  %v9735_v57 = vmul.f32 %v9641_v9, %v8721_v22  ;;  %v8885_v61 = vpop.f32.mrb[37].mxu0  ;;  %v8723_v44 = vpop.f32.mrb[34].mxu1  ;;  %9024 = vmatpush1.bf16.msra.mxu1 %v6594_v42  ;;  %v6722_v41 = vunpack.c.h.s8.bf16 %v4770_v13  ;;  %v6724_v42 = vunpack.c.h.s8.bf16 %v4772_v27  ;;  %v4837_v59 = vld [vmem:[%s12268_s12 + $0x1ed8] sm:$0xff] }
 0xc01   : > { %v9934_v1 = vadd.f32 %v9837_v46, %v9734_v55  ;;  %v9737_v32 = vmul.f32 %v9649_v29, %v8885_v61  ;;  %v8887_v11 = vpop.f32.mrb[38].mxu0  ;;  %9188 = vmatpush1.bf16.msra.mxu0 %v6596_v35  ;;  %v8724_v36 = vpop.f32.mrb[35].mxu1  ;;  %9025 = vmatprep.subr.bf16.mxu1 %v6627_v8  ;;  %v6755_v16 = vunpack.c.l.s8.bf16 %v4803_v28  ;;  %v4802_v46 = vld [vmem:[%s12268_s12 + $0x1dc0] sm:$0xff]  ;;  %v6757_v35 = vunpack.c.l.s8.bf16 %v4805_v18  ;;  %v4804_v8 = vld [vmem:[%s12268_s12 + $0x1dd0] sm:$0xff]  ;;  %v4835_v55 = vld [vmem:[%s12268_s12 + $0x1ec8] sm:$0xff] }
 0xc02   : > { %v9936_v10 = vadd.f32 %v9845_v38, %v9736_v49  ;;  %v9935_v43 = vadd.f32 %v9841_v53, %v9735_v57  ;;  %v8888_v2 = vpop.f32.mrb[39].mxu0  ;;  %9189 = vmatprep.subr.bf16.mxu0 %v6629_v40  ;;  %v6754_v38 = vunpack.c.l.s8.bf16 %v4802_v46  ;;  %v6756_v53 = vunpack.c.l.s8.bf16 %v4804_v8  ;;  %v4834_v57 = vld [vmem:[%s12268_s12 + $0x1ec0] sm:$0xff]  ;;  %v4836_v44 = vld [vmem:[%s12268_s12 + $0x1ed0] sm:$0xff]  ;;  %v4867_v36 = vld [vmem:[%s12268_s12 + $0x1fc8] sm:$0xff] }
 0xc03   : > { %11199 = vtanh.f32 %v9934_v1  ;;  %v9937_v47 = vadd.f32 %v9849_v63, %v9737_v32  ;;  %v6787_v40 = vunpack.c.h.s8.bf16 %v4803_v28  ;;  %v6786_v22 = vunpack.c.h.s8.bf16 %v4802_v46  ;;  %v4866_v2 = vld [vmem:[%s12268_s12 + $0x1fc0] sm:$0xff]  ;;  %v3881_v13 = vld [vmem:[%s12268_s12 + $0xf8] sm:$0xff] }
 0xc04   : > { %11201 = vtanh.f32 %v9936_v10  ;;  %9026 = vmatpush1.bf16.msra.mxu1 %v6626_v62  ;;  %v6788_v63 = vunpack.c.h.s8.bf16 %v4804_v8  ;;  %v6819_v49 = vunpack.c.l.s8.bf16 %v4835_v55  ;;  %v6821_v61 = vunpack.c.l.s8.bf16 %v4837_v59  ;;  %v3910_v8 = vld [vmem:[%s12268_s12 + $0x1e0] sm:$0xff] }
 0xc05   : > { %11203 = vtanh.f32 %v9935_v43  ;;  %9190 = vmatpush1.bf16.msra.mxu0 %v6628_v34  ;;  %9027 = vmatprep.subr.bf16.mxu1 %v6659_v20  ;;  %v6818_v62 = vunpack.c.l.s8.bf16 %v4834_v57  ;;  %v6820_v1 = vunpack.c.l.s8.bf16 %v4836_v44  ;;  %v6851_v32 = vunpack.c.h.s8.bf16 %v4835_v55  ;;  %v4869_v34 = vld [vmem:[%s12268_s12 + $0x1fd8] sm:$0xff]  ;;  %v3943_v55 = vld [vmem:[%s12268_s12 + $0x2e8] sm:$0xff] }
 0xc06   : > { %11205 = vtanh.f32 %v9937_v47  ;;  %9191 = vmatprep.subr.bf16.mxu0 %v6661_v3  ;;  %v6853_v11 = vunpack.c.h.s8.bf16 %v4837_v59  ;;  %v6850_v20 = vunpack.c.h.s8.bf16 %v4834_v57  ;;  %v6852_v10 = vunpack.c.h.s8.bf16 %v4836_v44  ;;  %v3945_v59 = vld [vmem:[%s12268_s12 + $0x2f8] sm:$0xff] }
 0xc07   : > { %v6883_v43 = vunpack.c.l.s8.bf16 %v4867_v36  ;;  %v6885_v3 = vunpack.c.l.s8.bf16 %v4869_v34  ;;  %v6882_v47 = vunpack.c.l.s8.bf16 %v4866_v2  ;;  %v6916_v27 = vunpack.c.h.s8.bf16 %v4868_v4 }
 0xc08   : > { %9028 = vmatpush1.bf16.msra.mxu1 %v6658_v7  ;;  %v6915_v7 = vunpack.c.h.s8.bf16 %v4867_v36  ;;  %v5033_v57 = vunpack.c.l.s8.bf16 %v3945_v59  ;;  %v3977_v36 = vld [vmem:[%s12268_s12 + $0x3f8] sm:$0xff] }
 0xc09   : > { %9192 = vmatpush1.bf16.msra.mxu0 %v6660_v45  ;;  %9029 = vmatprep.subr.bf16.mxu1 %v6691_v12  ;;  %v6917_v45 = vunpack.c.h.s8.bf16 %v4869_v34  ;;  %v3879_v12 = vld [vmem:[%s12268_s12 + $0xe8] sm:$0xff] }
 0xc0a   : > { %9193 = vmatprep.subr.bf16.mxu0 %v6693_v17  ;;  %v6914_v17 = vunpack.c.h.s8.bf16 %v4866_v2  ;;  %v5097_v2 = vunpack.c.l.s8.bf16 %v3977_v36 }
 0xc0c   : > { %9030 = vmatpush1.bf16.msra.mxu1 %v6690_v33  ;;  %v4903_v33 = vunpack.c.l.s8.bf16 %v3879_v12 }
 0xc0d   : > { %v11200_v9 = vpop.eup %11199  ;;  %9194 = vmatpush1.bf16.msra.mxu0 %v6692_v24  ;;  %9031 = vmatprep.subr.bf16.mxu1 %v6723_v25  ;;  %v3878_v24 = vld [vmem:[%s12268_s12 + $0xe0] sm:$0xff]  ;;  %v4905_v25 = vunpack.c.l.s8.bf16 %v3881_v13 }
 0xc0e   : > { %v11202_v29 = vpop.eup %11201  ;;  %9998 = vst [vmem:[%s12834_s4 + $0xa0] sm:$0xff] %v11200_v9  ;;  %9195 = vmatprep.subr.bf16.mxu0 %v6725_v26  ;;  %v3880_v26 = vld [vmem:[%s12268_s12 + $0xf0] sm:$0xff]  ;;  %v4902_v28 = vunpack.c.l.s8.bf16 %v3878_v24  ;;  %v3911_v9 = vld [vmem:[%s12268_s12 + $0x1e8] sm:$0xff]  ;;  %v4934_v46 = vunpack.c.h.s8.bf16 %v3878_v24 }
 0xc0f   : > { %v11204_v30 = vpop.eup %11203  ;;  %10000 = vst [vmem:[%s12834_s4 + $0xb0] sm:$0xff] %v11202_v29  ;;  %v4904_v18 = vunpack.c.l.s8.bf16 %v3880_v26  ;;  %v4936_v29 = vunpack.c.h.s8.bf16 %v3880_v26 }
 0xc10   : > { %v11206_v15 = vpop.eup %11205  ;;  %9999 = vst [vmem:[%s12834_s4 + $0xa8] sm:$0xff] %v11204_v30  ;;  %9032 = vmatpush1.bf16.msra.mxu1 %v6722_v41  ;;  %v4935_v41 = vunpack.c.h.s8.bf16 %v3879_v12  ;;  %v4009_v12 = vld [vmem:[%s12268_s12 + $0x4f8] sm:$0xff] }
 0xc11   : > { %10001 = vst [vmem:[%s12834_s4 + $0xb8] sm:$0xff] %v11206_v15  ;;  %9196 = vmatpush1.bf16.msra.mxu0 %v6724_v42  ;;  %9033 = vmatprep.subr.bf16.mxu1 %v6755_v16  ;;  %v4937_v42 = vunpack.c.h.s8.bf16 %v3881_v13  ;;  %v3913_v16 = vld [vmem:[%s12268_s12 + $0x1f8] sm:$0xff]  ;;  %v3912_v15 = vld [vmem:[%s12268_s12 + $0x1f0] sm:$0xff]  ;;  %v5161_v24 = vunpack.c.l.s8.bf16 %v4009_v12 }
 0xc12   : > { %9197 = vmatprep.subr.bf16.mxu0 %v6757_v35  ;;  %v4967_v35 = vunpack.c.l.s8.bf16 %v3911_v9  ;;  %v4969_v30 = vunpack.c.l.s8.bf16 %v3913_v16 }
 0xc14   : > { %9034 = vmatpush1.bf16.msra.mxu1 %v6754_v38  ;;  %v4966_v38 = vunpack.c.l.s8.bf16 %v3910_v8 }
 0xc15   : > { %9198 = vmatpush1.bf16.msra.mxu0 %v6756_v53  ;;  %9035 = vmatprep.subr.bf16.mxu1 %v6787_v40  ;;  %v4968_v53 = vunpack.c.l.s8.bf16 %v3912_v15  ;;  %v4999_v40 = vunpack.c.h.s8.bf16 %v3911_v9  ;;  %v4039_v9 = vld [vmem:[%s12268_s12 + $0x5e8] sm:$0xff] }
 0xc16   : > { %9199 = vmatprep.subr.bf16.mxu0 %v6789_v0  ;;  %v5001_v0 = vunpack.c.h.s8.bf16 %v3913_v16 }
 0xc18   : > { %9036 = vmatpush1.bf16.msra.mxu1 %v6786_v22  ;;  %v4998_v22 = vunpack.c.h.s8.bf16 %v3910_v8 }
 0xc19   : > { %9200 = vmatpush1.bf16.msra.mxu0 %v6788_v63  ;;  %9037 = vmatprep.subr.bf16.mxu1 %v6819_v49  ;;  %v5031_v63 = vunpack.c.l.s8.bf16 %v3943_v55  ;;  %v3942_v49 = vld [vmem:[%s12268_s12 + $0x2e0] sm:$0xff] }
 0xc1a   : > { %9201 = vmatprep.subr.bf16.mxu0 %v6821_v61  ;;  %v3944_v61 = vld [vmem:[%s12268_s12 + $0x2f0] sm:$0xff]  ;;  %v5030_v44 = vunpack.c.l.s8.bf16 %v3942_v49  ;;  %v5062_v34 = vunpack.c.h.s8.bf16 %v3942_v49 }
 0xc1c   : > { %9038 = vmatpush1.bf16.msra.mxu1 %v6818_v62  ;;  %v5032_v62 = vunpack.c.l.s8.bf16 %v3944_v61 }
 0xc1d   : > { %9202 = vmatpush1.bf16.msra.mxu0 %v6820_v1  ;;  %9039 = vmatprep.subr.bf16.mxu1 %v6851_v32  ;;  %v5063_v1 = vunpack.c.h.s8.bf16 %v3943_v55  ;;  %v5065_v32 = vunpack.c.h.s8.bf16 %v3945_v59  ;;  %v4073_v55 = vld [vmem:[%s12268_s12 + $0x6f8] sm:$0xff] }
 0xc1e   : > { %9203 = vmatprep.subr.bf16.mxu0 %v6853_v11  ;;  %v3975_v11 = vld [vmem:[%s12268_s12 + $0x3e8] sm:$0xff]  ;;  %v5289_v49 = vunpack.c.l.s8.bf16 %v4073_v55 }
 0xc20   : > { %9040 = vmatpush1.bf16.msra.mxu1 %v6850_v20  ;;  %v5064_v20 = vunpack.c.h.s8.bf16 %v3944_v61 }
 0xc21   : > { %9204 = vmatpush1.bf16.msra.mxu0 %v6852_v10  ;;  %9041 = vmatprep.subr.bf16.mxu1 %v6883_v43  ;;  %v5095_v10 = vunpack.c.l.s8.bf16 %v3975_v11  ;;  %v3974_v43 = vld [vmem:[%s12268_s12 + $0x3e0] sm:$0xff] }
 0xc22   : > { %9205 = vmatprep.subr.bf16.mxu0 %v6885_v3  ;;  %v3976_v3 = vld [vmem:[%s12268_s12 + $0x3f0] sm:$0xff]  ;;  %v5094_v4 = vunpack.c.l.s8.bf16 %v3974_v43  ;;  %v5126_v13 = vunpack.c.h.s8.bf16 %v3974_v43 }
 0xc24   : > { %9042 = vmatpush1.bf16.msra.mxu1 %v6882_v47  ;;  %v5096_v47 = vunpack.c.l.s8.bf16 %v3976_v3 }
 0xc25   : > { %9206 = vmatpush1.bf16.msra.mxu0 %v6884_v6  ;;  %9043 = vmatprep.subr.bf16.mxu1 %v6915_v7  ;;  %v5127_v6 = vunpack.c.h.s8.bf16 %v3975_v11  ;;  %v5129_v7 = vunpack.c.h.s8.bf16 %v3977_v36  ;;  %v4105_v11 = vld [vmem:[%s12268_s12 + $0x7f8] sm:$0xff] }
 0xc26   : > { %9207 = vmatprep.subr.bf16.mxu0 %v6917_v45  ;;  %v4007_v45 = vld [vmem:[%s12268_s12 + $0x4e8] sm:$0xff]  ;;  %v5353_v43 = vunpack.c.l.s8.bf16 %v4105_v11 }
 0xc28   : > { %9044 = vmatpush1.bf16.msra.mxu1 %v6914_v17  ;;  %v5128_v17 = vunpack.c.h.s8.bf16 %v3976_v3 }
 0xc29   : > { %9208 = vmatpush1.bf16.msra.mxu0 %v6916_v27  ;;  %9218 = vmatprep.subr.bf16.mxu1 %v4903_v33  ;;  %v5159_v27 = vunpack.c.l.s8.bf16 %v4007_v45  ;;  %v4006_v33 = vld [vmem:[%s12268_s12 + $0x4e0] sm:$0xff] }
 0xc2a   : > { %9382 = vmatprep.subr.bf16.mxu0 %v4905_v25  ;;  %v4008_v25 = vld [vmem:[%s12268_s12 + $0x4f0] sm:$0xff]  ;;  %v5158_v26 = vunpack.c.l.s8.bf16 %v4006_v33  ;;  %v5190_v16 = vunpack.c.h.s8.bf16 %v4006_v33 }
 0xc2b   : > { %9046 = vmatmul.mubr.bf16.vlgmr.msra.gmra.mrb[36].mxu1 %v12673_v51 }
 0xc2c   : > { %9210 = vmatmul.mubr.bf16.vlgmr.msra.gmra.mrb[40].mxu0 %v12673_v51  ;;  %9219 = vmatpush1.bf16.msra.mxu1 %v4902_v28  ;;  %v5160_v28 = vunpack.c.l.s8.bf16 %v4008_v25 }
 0xc2d   : > { %9250 = vmatprep.mubr.bf16.mxu1 %v12460_v52  ;;  %9383 = vmatpush1.bf16.msra.mxu0 %v4904_v18  ;;  %v5191_v18 = vunpack.c.h.s8.bf16 %v4007_v45  ;;  %v4137_v45 = vld [vmem:[%s12268_s12 + $0x8f8] sm:$0xff] }
 0xc2e   : > { %9414 = vmatprep.mubr.bf16.mxu0 %v12460_v52  ;;  %9220 = vmatprep.subr.bf16.mxu1 %v4935_v41  ;;  %v5000_v52 = vunpack.c.h.s8.bf16 %v3912_v15  ;;  %v5193_v41 = vunpack.c.h.s8.bf16 %v4009_v12  ;;  %v5417_v33 = vunpack.c.l.s8.bf16 %v4137_v45 }
 0xc2f   : > { %9384 = vmatprep.subr.bf16.mxu0 %v4937_v42  ;;  %v4041_v42 = vld [vmem:[%s12268_s12 + $0x5f8] sm:$0xff] }
 0xc30   : > { %9221 = vmatpush1.bf16.msra.mxu1 %v4934_v46  ;;  %v5192_v46 = vunpack.c.h.s8.bf16 %v4008_v25  ;;  %v5225_v8 = vunpack.c.l.s8.bf16 %v4041_v42 }
 0xc31   : > { %9385 = vmatpush1.bf16.msra.mxu0 %v4936_v29  ;;  %9222 = vmatprep.subr.bf16.mxu1 %v4967_v35  ;;  %v5223_v29 = vunpack.c.l.s8.bf16 %v4039_v9  ;;  %v4038_v35 = vld [vmem:[%s12268_s12 + $0x5e0] sm:$0xff] }
 0xc32   : > { %9386 = vmatprep.subr.bf16.mxu0 %v4969_v30  ;;  %v4040_v30 = vld [vmem:[%s12268_s12 + $0x5f0] sm:$0xff]  ;;  %v5222_v15 = vunpack.c.l.s8.bf16 %v4038_v35  ;;  %v5254_v59 = vunpack.c.h.s8.bf16 %v4038_v35 }
 0xc34   : > { %9223 = vmatpush1.bf16.msra.mxu1 %v4966_v38  ;;  %v5224_v38 = vunpack.c.l.s8.bf16 %v4040_v30 }
 0xc35   : > { %9387 = vmatpush1.bf16.msra.mxu0 %v4968_v53  ;;  %9224 = vmatprep.subr.bf16.mxu1 %v4999_v40  ;;  %v5255_v53 = vunpack.c.h.s8.bf16 %v4039_v9  ;;  %v5257_v40 = vunpack.c.h.s8.bf16 %v4041_v42  ;;  %v4169_v9 = vld [vmem:[%s12268_s12 + $0x9f8] sm:$0xff] }
 0xc36   : > { %9388 = vmatprep.subr.bf16.mxu0 %v5001_v0  ;;  %v4071_v0 = vld [vmem:[%s12268_s12 + $0x6e8] sm:$0xff]  ;;  %v5481_v35 = vunpack.c.l.s8.bf16 %v4169_v9 }
 0xc38   : > { %9225 = vmatpush1.bf16.msra.mxu1 %v4998_v22  ;;  %v5256_v22 = vunpack.c.h.s8.bf16 %v4040_v30 }
 0xc39   : > { %9389 = vmatpush1.bf16.msra.mxu0 %v5000_v52  ;;  %9226 = vmatprep.subr.bf16.mxu1 %v5031_v63  ;;  %v5287_v52 = vunpack.c.l.s8.bf16 %v4071_v0  ;;  %v4070_v63 = vld [vmem:[%s12268_s12 + $0x6e0] sm:$0xff] }
 0xc3a   : > { %9390 = vmatprep.subr.bf16.mxu0 %v5033_v57  ;;  %v4072_v57 = vld [vmem:[%s12268_s12 + $0x6f0] sm:$0xff]  ;;  %v5286_v61 = vunpack.c.l.s8.bf16 %v4070_v63  ;;  %v5318_v36 = vunpack.c.h.s8.bf16 %v4070_v63 }
 0xc3c   : > { %9227 = vmatpush1.bf16.msra.mxu1 %v5030_v44  ;;  %v5288_v44 = vunpack.c.l.s8.bf16 %v4072_v57 }
 0xc3d   : > { %9391 = vmatpush1.bf16.msra.mxu0 %v5032_v62  ;;  %9228 = vmatprep.subr.bf16.mxu1 %v5063_v1  ;;  %v5319_v62 = vunpack.c.h.s8.bf16 %v4071_v0  ;;  %v5321_v1 = vunpack.c.h.s8.bf16 %v4073_v55 }
 0xc3e   : > { %9392 = vmatprep.subr.bf16.mxu0 %v5065_v32  ;;  %v4103_v32 = vld [vmem:[%s12268_s12 + $0x7e8] sm:$0xff] }
 0xc40   : > { %9229 = vmatpush1.bf16.msra.mxu1 %v5062_v34  ;;  %v5320_v34 = vunpack.c.h.s8.bf16 %v4072_v57 }
 0xc41   : > { %9393 = vmatpush1.bf16.msra.mxu0 %v5064_v20  ;;  %9230 = vmatprep.subr.bf16.mxu1 %v5095_v10  ;;  %v5351_v20 = vunpack.c.l.s8.bf16 %v4103_v32  ;;  %v4102_v10 = vld [vmem:[%s12268_s12 + $0x7e0] sm:$0xff] }
 0xc42   : > { %9394 = vmatprep.subr.bf16.mxu0 %v5097_v2  ;;  %v4104_v2 = vld [vmem:[%s12268_s12 + $0x7f0] sm:$0xff]  ;;  %v5350_v3 = vunpack.c.l.s8.bf16 %v4102_v10  ;;  %v5382_v12 = vunpack.c.h.s8.bf16 %v4102_v10 }
 0xc44   : > { %9231 = vmatpush1.bf16.msra.mxu1 %v5094_v4  ;;  %v5352_v4 = vunpack.c.l.s8.bf16 %v4104_v2 }
 0xc45   : > { %9395 = vmatpush1.bf16.msra.mxu0 %v5096_v47  ;;  %9232 = vmatprep.subr.bf16.mxu1 %v5127_v6  ;;  %v5383_v47 = vunpack.c.h.s8.bf16 %v4103_v32  ;;  %v5385_v6 = vunpack.c.h.s8.bf16 %v4105_v11 }
 0xc46   : > { %9396 = vmatprep.subr.bf16.mxu0 %v5129_v7  ;;  %v4135_v7 = vld [vmem:[%s12268_s12 + $0x8e8] sm:$0xff] }
 0xc48   : > { %9233 = vmatpush1.bf16.msra.mxu1 %v5126_v13  ;;  %v5384_v13 = vunpack.c.h.s8.bf16 %v4104_v2 }
 0xc49   : > { %9397 = vmatpush1.bf16.msra.mxu0 %v5128_v17  ;;  %9234 = vmatprep.subr.bf16.mxu1 %v5159_v27  ;;  %v5415_v17 = vunpack.c.l.s8.bf16 %v4135_v7  ;;  %v4134_v27 = vld [vmem:[%s12268_s12 + $0x8e0] sm:$0xff] }
 0xc4a   : > { %9398 = vmatprep.subr.bf16.mxu0 %v5161_v24  ;;  %v4136_v24 = vld [vmem:[%s12268_s12 + $0x8f0] sm:$0xff]  ;;  %v5414_v25 = vunpack.c.l.s8.bf16 %v4134_v27  ;;  %v5446_v42 = vunpack.c.h.s8.bf16 %v4134_v27 }
 0xc4c   : > { %9235 = vmatpush1.bf16.msra.mxu1 %v5158_v26  ;;  %v5416_v26 = vunpack.c.l.s8.bf16 %v4136_v24 }
 0xc4d   : > { %9399 = vmatpush1.bf16.msra.mxu0 %v5160_v28  ;;  %9236 = vmatprep.subr.bf16.mxu1 %v5191_v18  ;;  %v5447_v28 = vunpack.c.h.s8.bf16 %v4135_v7  ;;  %v4167_v18 = vld [vmem:[%s12268_s12 + $0x9e8] sm:$0xff] }
 0xc4e   : > { %9400 = vmatprep.subr.bf16.mxu0 %v5193_v41  ;;  %v5449_v41 = vunpack.c.h.s8.bf16 %v4137_v45 }
 0xc50   : > { %9237 = vmatpush1.bf16.msra.mxu1 %v5190_v16  ;;  %v5448_v16 = vunpack.c.h.s8.bf16 %v4136_v24 }
 0xc51   : > { %9401 = vmatpush1.bf16.msra.mxu0 %v5192_v46  ;;  %9238 = vmatprep.subr.bf16.mxu1 %v5223_v29  ;;  %v5479_v46 = vunpack.c.l.s8.bf16 %v4167_v18  ;;  %v4166_v29 = vld [vmem:[%s12268_s12 + $0x9e0] sm:$0xff] }
 0xc52   : > { %9402 = vmatprep.subr.bf16.mxu0 %v5225_v8  ;;  %v4168_v8 = vld [vmem:[%s12268_s12 + $0x9f0] sm:$0xff]  ;;  %v5478_v30 = vunpack.c.l.s8.bf16 %v4166_v29  ;;  %v5510_v0 = vunpack.c.h.s8.bf16 %v4166_v29 }
 0xc54   : > { %9239 = vmatpush1.bf16.msra.mxu1 %v5222_v15  ;;  %v5511_v15 = vunpack.c.h.s8.bf16 %v4167_v18 }
 0xc55   : > { %9403 = vmatpush1.bf16.msra.mxu0 %v5224_v38  ;;  %9240 = vmatprep.subr.bf16.mxu1 %v5255_v53  ;;  %v5513_v38 = vunpack.c.h.s8.bf16 %v4169_v9  ;;  %v4199_v53 = vld [vmem:[%s12268_s12 + $0xae8] sm:$0xff] }
 0xc56   : > { %9404 = vmatprep.subr.bf16.mxu0 %v5257_v40  ;;  %v4201_v40 = vld [vmem:[%s12268_s12 + $0xaf8] sm:$0xff]  ;;  %v5543_v55 = vunpack.c.l.s8.bf16 %v4199_v53  ;;  %v5575_v57 = vunpack.c.h.s8.bf16 %v4199_v53 }
 0xc58   : > { %9241 = vmatpush1.bf16.msra.mxu1 %v5254_v59  ;;  %v4198_v59 = vld [vmem:[%s12268_s12 + $0xae0] sm:$0xff] }
 0xc59   : > { %9405 = vmatpush1.bf16.msra.mxu0 %v5256_v22  ;;  %9242 = vmatprep.subr.bf16.mxu1 %v5287_v52  ;;  %v5545_v22 = vunpack.c.l.s8.bf16 %v4201_v40  ;;  %v4200_v52 = vld [vmem:[%s12268_s12 + $0xaf0] sm:$0xff]  ;;  %v5542_v63 = vunpack.c.l.s8.bf16 %v4198_v59 }
 0xc5a   : > { %9406 = vmatprep.subr.bf16.mxu0 %v5289_v49  ;;  %v5544_v49 = vunpack.c.l.s8.bf16 %v4200_v52  ;;  %v5576_v32 = vunpack.c.h.s8.bf16 %v4200_v52 }
 0xc5c   : > { %9243 = vmatpush1.bf16.msra.mxu1 %v5286_v61  ;;  %v5577_v61 = vunpack.c.h.s8.bf16 %v4201_v40 }
 0xc5d   : > { %9407 = vmatpush1.bf16.msra.mxu0 %v5288_v44  ;;  %9244 = vmatprep.subr.bf16.mxu1 %v5319_v62  ;;  %v4231_v44 = vld [vmem:[%s12268_s12 + $0xbe8] sm:$0xff]  ;;  %v4233_v62 = vld [vmem:[%s12268_s12 + $0xbf8] sm:$0xff] }
 0xc5e   : > { %9408 = vmatprep.subr.bf16.mxu0 %v5321_v1  ;;  %v5574_v1 = vunpack.c.h.s8.bf16 %v4198_v59  ;;  %v5607_v11 = vunpack.c.l.s8.bf16 %v4231_v44  ;;  %v5639_v2 = vunpack.c.h.s8.bf16 %v4231_v44 }
 0xc60   : > { %9245 = vmatpush1.bf16.msra.mxu1 %v5318_v36  ;;  %v4230_v36 = vld [vmem:[%s12268_s12 + $0xbe0] sm:$0xff] }
 0xc61   : > { %9409 = vmatpush1.bf16.msra.mxu0 %v5320_v34  ;;  %9246 = vmatprep.subr.bf16.mxu1 %v5351_v20  ;;  %v5609_v34 = vunpack.c.l.s8.bf16 %v4233_v62  ;;  %v4232_v20 = vld [vmem:[%s12268_s12 + $0xbf0] sm:$0xff]  ;;  %v5606_v10 = vunpack.c.l.s8.bf16 %v4230_v36 }
 0xc62   : > { %9410 = vmatprep.subr.bf16.mxu0 %v5353_v43  ;;  %v5608_v43 = vunpack.c.l.s8.bf16 %v4232_v20  ;;  %v5640_v7 = vunpack.c.h.s8.bf16 %v4232_v20 }
 0xc64   : > { %9247 = vmatpush1.bf16.msra.mxu1 %v5350_v3  ;;  %v5641_v3 = vunpack.c.h.s8.bf16 %v4233_v62 }
 0xc65   : > { %9411 = vmatpush1.bf16.msra.mxu0 %v5352_v4  ;;  %9248 = vmatprep.subr.bf16.mxu1 %v5383_v47  ;;  %v4263_v4 = vld [vmem:[%s12268_s12 + $0xce8] sm:$0xff]  ;;  %v4265_v47 = vld [vmem:[%s12268_s12 + $0xcf8] sm:$0xff] }
 0xc66   : > { %9412 = vmatprep.subr.bf16.mxu0 %v5385_v6  ;;  %v5638_v6 = vunpack.c.h.s8.bf16 %v4230_v36  ;;  %v5671_v45 = vunpack.c.l.s8.bf16 %v4263_v4  ;;  %v5703_v24 = vunpack.c.h.s8.bf16 %v4263_v4 }
 0xc68   : > { %9249 = vmatpush1.bf16.msra.mxu1 %v5382_v12  ;;  %v4262_v12 = vld [vmem:[%s12268_s12 + $0xce0] sm:$0xff] }
 0xc69   : > { %9413 = vmatpush1.bf16.msra.mxu0 %v5384_v13  ;;  %9259 = vmatprep.subr.bf16.mxu1 %v5415_v17  ;;  %v5673_v13 = vunpack.c.l.s8.bf16 %v4265_v47  ;;  %v4264_v17 = vld [vmem:[%s12268_s12 + $0xcf0] sm:$0xff]  ;;  %v5670_v27 = vunpack.c.l.s8.bf16 %v4262_v12  ;;  %v5702_v18 = vunpack.c.h.s8.bf16 %v4262_v12 }
 0xc6a   : > { %9423 = vmatprep.subr.bf16.mxu0 %v5417_v33  ;;  %v5672_v33 = vunpack.c.l.s8.bf16 %v4264_v17 }
 0xc6b   : > { %9251 = vmatmul.mubr.bf16.vlgmr.msra.gmra.mrb[40].mxu1 %v12462_v56 }
 0xc6c   : > { %9415 = vmatmul.mubr.bf16.vlgmr.msra.gmra.mrb[44].mxu0 %v12462_v56  ;;  %9260 = vmatpush1.bf16.msra.mxu1 %v5414_v25  ;;  %v5480_v56 = vunpack.c.l.s8.bf16 %v4168_v8  ;;  %v5705_v25 = vunpack.c.h.s8.bf16 %v4265_v47 }
 0xc6d   : > { %9291 = vmatprep.mubr.bf16.mxu1 %v12470_v39  ;;  %9424 = vmatpush1.bf16.msra.mxu0 %v5416_v26  ;;  %v4295_v26 = vld [vmem:[%s12268_s12 + $0xde8] sm:$0xff] }
 0xc6e   : > { %9455 = vmatprep.mubr.bf16.mxu0 %v12470_v39  ;;  %9261 = vmatprep.subr.bf16.mxu1 %v5447_v28  ;;  %v5512_v39 = vunpack.c.h.s8.bf16 %v4168_v8  ;;  %v4297_v28 = vld [vmem:[%s12268_s12 + $0xdf8] sm:$0xff]  ;;  %v5735_v9 = vunpack.c.l.s8.bf16 %v4295_v26  ;;  %v5767_v8 = vunpack.c.h.s8.bf16 %v4295_v26 }
 0xc6f   : > { %9425 = vmatprep.subr.bf16.mxu0 %v5449_v41  ;;  %v5704_v41 = vunpack.c.h.s8.bf16 %v4264_v17 }
 0xc70   : > { %9262 = vmatpush1.bf16.msra.mxu1 %v5446_v42  ;;  %v4294_v42 = vld [vmem:[%s12268_s12 + $0xde0] sm:$0xff] }
 0xc71   : > { %9426 = vmatpush1.bf16.msra.mxu0 %v5448_v16  ;;  %9263 = vmatprep.subr.bf16.mxu1 %v5479_v46  ;;  %v5737_v16 = vunpack.c.l.s8.bf16 %v4297_v28  ;;  %v4296_v46 = vld [vmem:[%s12268_s12 + $0xdf0] sm:$0xff]  ;;  %v5734_v29 = vunpack.c.l.s8.bf16 %v4294_v42 }
 0xc72   : > { %9427 = vmatprep.subr.bf16.mxu0 %v5481_v35  ;;  %v5736_v35 = vunpack.c.l.s8.bf16 %v4296_v46  ;;  %v5768_v53 = vunpack.c.h.s8.bf16 %v4296_v46 }
 0xc74   : > { %9264 = vmatpush1.bf16.msra.mxu1 %v5478_v30  ;;  %v5769_v30 = vunpack.c.h.s8.bf16 %v4297_v28 }
 0xc75   : > { %9428 = vmatpush1.bf16.msra.mxu0 %v5480_v56  ;;  %9265 = vmatprep.subr.bf16.mxu1 %v5511_v15  ;;  %v4327_v56 = vld [vmem:[%s12268_s12 + $0xee8] sm:$0xff]  ;;  %v4329_v15 = vld [vmem:[%s12268_s12 + $0xef8] sm:$0xff] }
 0xc76   : > { %9429 = vmatprep.subr.bf16.mxu0 %v5513_v38  ;;  %v5766_v38 = vunpack.c.h.s8.bf16 %v4294_v42  ;;  %v5799_v40 = vunpack.c.l.s8.bf16 %v4327_v56  ;;  %v5831_v52 = vunpack.c.h.s8.bf16 %v4327_v56  ;;  %v4454_v56 = vld [vmem:[%s12268_s12 + $0x12e0] sm:$0xff] }
 0xc78   : > { %9266 = vmatpush1.bf16.msra.mxu1 %v5510_v0  ;;  %v4326_v0 = vld [vmem:[%s12268_s12 + $0xee0] sm:$0xff] }
 0xc79   : > { %9430 = vmatpush1.bf16.msra.mxu0 %v5512_v39  ;;  %9267 = vmatprep.subr.bf16.mxu1 %v5543_v55  ;;  %v5801_v39 = vunpack.c.l.s8.bf16 %v4329_v15  ;;  %v4328_v55 = vld [vmem:[%s12268_s12 + $0xef0] sm:$0xff]  ;;  %v5798_v59 = vunpack.c.l.s8.bf16 %v4326_v0 }
 0xc7a   : > { %9431 = vmatprep.subr.bf16.mxu0 %v5545_v22  ;;  %v5800_v22 = vunpack.c.l.s8.bf16 %v4328_v55  ;;  %v5832_v44 = vunpack.c.h.s8.bf16 %v4328_v55  ;;  %v4487_v55 = vld [vmem:[%s12268_s12 + $0x13e8] sm:$0xff] }
 0xc7c   : > { %9268 = vmatpush1.bf16.msra.mxu1 %v5542_v63  ;;  %v5833_v63 = vunpack.c.h.s8.bf16 %v4329_v15 }
 0xc7d   : > { %9432 = vmatpush1.bf16.msra.mxu0 %v5544_v49  ;;  %9269 = vmatprep.subr.bf16.mxu1 %v5575_v57  ;;  %v4359_v49 = vld [vmem:[%s12268_s12 + $0xfe8] sm:$0xff]  ;;  %v4361_v57 = vld [vmem:[%s12268_s12 + $0xff8] sm:$0xff] }
 0xc7e   : > { %9433 = vmatprep.subr.bf16.mxu0 %v5577_v61  ;;  %v5830_v61 = vunpack.c.h.s8.bf16 %v4326_v0  ;;  %v5863_v62 = vunpack.c.l.s8.bf16 %v4359_v49  ;;  %v5895_v20 = vunpack.c.h.s8.bf16 %v4359_v49  ;;  %v4486_v49 = vld [vmem:[%s12268_s12 + $0x13e0] sm:$0xff] }
 0xc80   : > { %9270 = vmatpush1.bf16.msra.mxu1 %v5574_v1  ;;  %v4358_v1 = vld [vmem:[%s12268_s12 + $0xfe0] sm:$0xff] }
 0xc81   : > { %9434 = vmatpush1.bf16.msra.mxu0 %v5576_v32  ;;  %9271 = vmatprep.subr.bf16.mxu1 %v5607_v11  ;;  %v5865_v32 = vunpack.c.l.s8.bf16 %v4361_v57  ;;  %v4360_v11 = vld [vmem:[%s12268_s12 + $0xff0] sm:$0xff]  ;;  %v5862_v36 = vunpack.c.l.s8.bf16 %v4358_v1 }
 0xc82   : > { %9435 = vmatprep.subr.bf16.mxu0 %v5609_v34  ;;  %v5864_v34 = vunpack.c.l.s8.bf16 %v4360_v11  ;;  %v5896_v4 = vunpack.c.h.s8.bf16 %v4360_v11  ;;  %v4519_v11 = vld [vmem:[%s12268_s12 + $0x14e8] sm:$0xff] }
 0xc84   : > { %9272 = vmatpush1.bf16.msra.mxu1 %v5606_v10  ;;  %v5897_v10 = vunpack.c.h.s8.bf16 %v4361_v57 }
 0xc85   : > { %9436 = vmatpush1.bf16.msra.mxu0 %v5608_v43  ;;  %9273 = vmatprep.subr.bf16.mxu1 %v5639_v2  ;;  %v4391_v43 = vld [vmem:[%s12268_s12 + $0x10e8] sm:$0xff]  ;;  %v4393_v2 = vld [vmem:[%s12268_s12 + $0x10f8] sm:$0xff] }
 0xc86   : > { %9437 = vmatprep.subr.bf16.mxu0 %v5641_v3  ;;  %v5894_v3 = vunpack.c.h.s8.bf16 %v4358_v1  ;;  %v5927_v47 = vunpack.c.l.s8.bf16 %v4391_v43  ;;  %v5959_v17 = vunpack.c.h.s8.bf16 %v4391_v43  ;;  %v6151_v1 = vunpack.c.h.s8.bf16 %v4487_v55  ;;  %v4518_v43 = vld [vmem:[%s12268_s12 + $0x14e0] sm:$0xff] }
 0xc88   : > { %9274 = vmatpush1.bf16.msra.mxu1 %v5638_v6  ;;  %v4390_v6 = vld [vmem:[%s12268_s12 + $0x10e0] sm:$0xff] }
 0xc89   : > { %9438 = vmatpush1.bf16.msra.mxu0 %v5640_v7  ;;  %9275 = vmatprep.subr.bf16.mxu1 %v5671_v45  ;;  %v5929_v7 = vunpack.c.l.s8.bf16 %v4393_v2  ;;  %v4392_v45 = vld [vmem:[%s12268_s12 + $0x10f0] sm:$0xff]  ;;  %v5926_v12 = vunpack.c.l.s8.bf16 %v4390_v6 }
 0xc8a   : > { %9439 = vmatprep.subr.bf16.mxu0 %v5673_v13  ;;  %v5928_v13 = vunpack.c.l.s8.bf16 %v4392_v45  ;;  %v5960_v26 = vunpack.c.h.s8.bf16 %v4392_v45  ;;  %v4551_v45 = vld [vmem:[%s12268_s12 + $0x15e8] sm:$0xff] }
 0xc8c   : > { %9276 = vmatpush1.bf16.msra.mxu1 %v5670_v27  ;;  %v4423_v27 = vld [vmem:[%s12268_s12 + $0x11e8] sm:$0xff] }
 0xc8d   : > { %9440 = vmatpush1.bf16.msra.mxu0 %v5672_v33  ;;  %9277 = vmatprep.subr.bf16.mxu1 %v5703_v24  ;;  %v5961_v33 = vunpack.c.h.s8.bf16 %v4393_v2  ;;  %v4425_v24 = vld [vmem:[%s12268_s12 + $0x11f8] sm:$0xff]  ;;  %v5991_v28 = vunpack.c.l.s8.bf16 %v4423_v27 }
 0xc8e   : > { %9441 = vmatprep.subr.bf16.mxu0 %v5705_v25  ;;  %v5958_v25 = vunpack.c.h.s8.bf16 %v4390_v6  ;;  %v6025_v46 = vunpack.c.h.s8.bf16 %v4425_v24  ;;  %v6215_v6 = vunpack.c.h.s8.bf16 %v4519_v11 }
 0xc90   : > { %9278 = vmatpush1.bf16.msra.mxu1 %v5702_v18  ;;  %v4422_v18 = vld [vmem:[%s12268_s12 + $0x11e0] sm:$0xff] }
 0xc91   : > { %9442 = vmatpush1.bf16.msra.mxu0 %v5704_v41  ;;  %9279 = vmatprep.subr.bf16.mxu1 %v5735_v9  ;;  %v5993_v41 = vunpack.c.l.s8.bf16 %v4425_v24  ;;  %v4424_v9 = vld [vmem:[%s12268_s12 + $0x11f0] sm:$0xff]  ;;  %v5990_v42 = vunpack.c.l.s8.bf16 %v4422_v18 }
 0xc92   : > { %9443 = vmatprep.subr.bf16.mxu0 %v5737_v16  ;;  %v6023_v16 = vunpack.c.h.s8.bf16 %v4423_v27  ;;  %v6247_v27 = vunpack.c.l.s8.bf16 %v4551_v45 }
 0xc94   : > { %9280 = vmatpush1.bf16.msra.mxu1 %v5734_v29  ;;  %v4455_v29 = vld [vmem:[%s12268_s12 + $0x12e8] sm:$0xff] }
 0xc95   : > { %9444 = vmatpush1.bf16.msra.mxu0 %v5736_v35  ;;  %9281 = vmatprep.subr.bf16.mxu1 %v5767_v8  ;;  %v4457_v35 = vld [vmem:[%s12268_s12 + $0x12f8] sm:$0xff]  ;;  %v6022_v8 = vunpack.c.h.s8.bf16 %v4422_v18  ;;  %v6087_v0 = vunpack.c.h.s8.bf16 %v4455_v29  ;;  %v6279_v18 = vunpack.c.h.s8.bf16 %v4551_v45  ;;  %v4678_v45 = vld [vmem:[%s12268_s12 + $0x19e0] sm:$0xff] }
 0xc96   : > { %9445 = vmatprep.subr.bf16.mxu0 %v5769_v30  ;;  %v6055_v30 = vunpack.c.l.s8.bf16 %v4455_v29  ;;  %v6057_v15 = vunpack.c.l.s8.bf16 %v4457_v35  ;;  %v4582_v29 = vld [vmem:[%s12268_s12 + $0x16e0] sm:$0xff] }
 0xc98   : > { %9282 = vmatpush1.bf16.msra.mxu1 %v5766_v38  ;;  %v4456_v38 = vld [vmem:[%s12268_s12 + $0x12f0] sm:$0xff] }
 0xc99   : > { %9446 = vmatpush1.bf16.msra.mxu0 %v5768_v53  ;;  %9283 = vmatprep.subr.bf16.mxu1 %v5799_v40  ;;  %v6054_v53 = vunpack.c.l.s8.bf16 %v4454_v56  ;;  %v6056_v40 = vunpack.c.l.s8.bf16 %v4456_v38 }
 0xc9a   : > { %9447 = vmatprep.subr.bf16.mxu0 %v5801_v39  ;;  %v6089_v39 = vunpack.c.h.s8.bf16 %v4457_v35 }
 0xc9c   : > { %9284 = vmatpush1.bf16.msra.mxu1 %v5798_v59  ;;  %v4489_v59 = vld [vmem:[%s12268_s12 + $0x13f8] sm:$0xff] }
 0xc9d   : > { %9448 = vmatpush1.bf16.msra.mxu0 %v5800_v22  ;;  %9285 = vmatprep.subr.bf16.mxu1 %v5831_v52  ;;  %v6086_v22 = vunpack.c.h.s8.bf16 %v4454_v56  ;;  %v6088_v52 = vunpack.c.h.s8.bf16 %v4456_v38  ;;  %v6121_v57 = vunpack.c.l.s8.bf16 %v4489_v59  ;;  %v4615_v38 = vld [vmem:[%s12268_s12 + $0x17e8] sm:$0xff] }
 0xc9e   : > { %9449 = vmatprep.subr.bf16.mxu0 %v5833_v63  ;;  %v6119_v63 = vunpack.c.l.s8.bf16 %v4487_v55  ;;  %v4614_v55 = vld [vmem:[%s12268_s12 + $0x17e0] sm:$0xff] }
 0xca0   : > { %9286 = vmatpush1.bf16.msra.mxu1 %v5830_v61  ;;  %v4488_v61 = vld [vmem:[%s12268_s12 + $0x13f0] sm:$0xff] }
 0xca1   : > { %9450 = vmatpush1.bf16.msra.mxu0 %v5832_v44  ;;  %9287 = vmatprep.subr.bf16.mxu1 %v5863_v62  ;;  %v6118_v44 = vunpack.c.l.s8.bf16 %v4486_v49  ;;  %v6120_v62 = vunpack.c.l.s8.bf16 %v4488_v61 }
 0xca2   : > { %9451 = vmatprep.subr.bf16.mxu0 %v5865_v32  ;;  %v6153_v32 = vunpack.c.h.s8.bf16 %v4489_v59 }
 0xca4   : > { %9288 = vmatpush1.bf16.msra.mxu1 %v5862_v36  ;;  %v4521_v36 = vld [vmem:[%s12268_s12 + $0x14f8] sm:$0xff] }
 0xca5   : > { %9452 = vmatpush1.bf16.msra.mxu0 %v5864_v34  ;;  %9289 = vmatprep.subr.bf16.mxu1 %v5895_v20  ;;  %v6150_v34 = vunpack.c.h.s8.bf16 %v4486_v49  ;;  %v6152_v20 = vunpack.c.h.s8.bf16 %v4488_v61  ;;  %v6185_v2 = vunpack.c.l.s8.bf16 %v4521_v36  ;;  %v6407_v49 = vunpack.c.h.s8.bf16 %v4615_v38  ;;  %v4647_v61 = vld [vmem:[%s12268_s12 + $0x18e8] sm:$0xff] }
 0xca6   : > { %9453 = vmatprep.subr.bf16.mxu0 %v5897_v10  ;;  %v6183_v10 = vunpack.c.l.s8.bf16 %v4519_v11  ;;  %v4646_v11 = vld [vmem:[%s12268_s12 + $0x18e0] sm:$0xff] }
 0xca8   : > { %9290 = vmatpush1.bf16.msra.mxu1 %v5894_v3  ;;  %v4520_v3 = vld [vmem:[%s12268_s12 + $0x14f0] sm:$0xff] }
 0xca9   : > { %9454 = vmatpush1.bf16.msra.mxu0 %v5896_v4  ;;  %9300 = vmatprep.subr.bf16.mxu1 %v5927_v47  ;;  %v6182_v4 = vunpack.c.l.s8.bf16 %v4518_v43  ;;  %v6184_v47 = vunpack.c.l.s8.bf16 %v4520_v3 }
 0xcaa   : > { %9464 = vmatprep.subr.bf16.mxu0 %v5929_v7  ;;  %v6217_v7 = vunpack.c.h.s8.bf16 %v4521_v36 }
 0xcab   : > { %9292 = vmatmul.mubr.bf16.vlgmr.msra.gmra.mrb[40].mxu1 %v12526_v5 }
 0xcac   : > { %9456 = vmatmul.mubr.bf16.vlgmr.msra.gmra.mrb[44].mxu0 %v12526_v5  ;;  %9301 = vmatpush1.bf16.msra.mxu1 %v5926_v12  ;;  %v5992_v5 = vunpack.c.l.s8.bf16 %v4424_v9  ;;  %v4553_v12 = vld [vmem:[%s12268_s12 + $0x15f8] sm:$0xff] }
 0xcad   : > { %9332 = vmatprep.mubr.bf16.mxu1 %v12626_v14  ;;  %9465 = vmatpush1.bf16.msra.mxu0 %v5928_v13  ;;  %v6214_v13 = vunpack.c.h.s8.bf16 %v4518_v43  ;;  %v6249_v24 = vunpack.c.l.s8.bf16 %v4553_v12  ;;  %v6471_v43 = vunpack.c.h.s8.bf16 %v4647_v61 }
 0xcae   : > { %9496 = vmatprep.mubr.bf16.mxu0 %v12626_v14  ;;  %9302 = vmatprep.subr.bf16.mxu1 %v5959_v17  ;;  %v6024_v14 = vunpack.c.h.s8.bf16 %v4424_v9  ;;  %v6216_v17 = vunpack.c.h.s8.bf16 %v4520_v3  ;;  %v4583_v9 = vld [vmem:[%s12268_s12 + $0x16e8] sm:$0xff] }
 0xcaf   : > { %9466 = vmatprep.subr.bf16.mxu0 %v5961_v33  ;;  %v4550_v33 = vld [vmem:[%s12268_s12 + $0x15e0] sm:$0xff]  ;;  %v6343_v56 = vunpack.c.h.s8.bf16 %v4583_v9 }
 0xcb0   : > { %9303 = vmatpush1.bf16.msra.mxu1 %v5958_v25  ;;  %v4552_v25 = vld [vmem:[%s12268_s12 + $0x15f0] sm:$0xff] }
 0xcb1   : > { %9467 = vmatpush1.bf16.msra.mxu0 %v5960_v26  ;;  %9304 = vmatprep.subr.bf16.mxu1 %v5991_v28  ;;  %v6246_v26 = vunpack.c.l.s8.bf16 %v4550_v33  ;;  %v6248_v28 = vunpack.c.l.s8.bf16 %v4552_v25 }
 0xcb2   : > { %9468 = vmatprep.subr.bf16.mxu0 %v5993_v41  ;;  %v6281_v41 = vunpack.c.h.s8.bf16 %v4553_v12 }
 0xcb4   : > { %9305 = vmatpush1.bf16.msra.mxu1 %v5990_v42  ;;  %v4585_v42 = vld [vmem:[%s12268_s12 + $0x16f8] sm:$0xff] }
 0xcb5   : > { %9469 = vmatpush1.bf16.msra.mxu0 %v5992_v5  ;;  %9306 = vmatprep.subr.bf16.mxu1 %v6023_v16  ;;  %v6278_v5 = vunpack.c.h.s8.bf16 %v4550_v33  ;;  %v6280_v16 = vunpack.c.h.s8.bf16 %v4552_v25  ;;  %v6313_v35 = vunpack.c.l.s8.bf16 %v4585_v42  ;;  %v4713_v25 = vld [vmem:[%s12268_s12 + $0x1af8] sm:$0xff] }
 0xcb6   : > { %9470 = vmatprep.subr.bf16.mxu0 %v6025_v46  ;;  %v6311_v46 = vunpack.c.l.s8.bf16 %v4583_v9  ;;  %v4712_v9 = vld [vmem:[%s12268_s12 + $0x1af0] sm:$0xff] }
 0xcb8   : > { %9307 = vmatpush1.bf16.msra.mxu1 %v6022_v8  ;;  %v4584_v8 = vld [vmem:[%s12268_s12 + $0x16f0] sm:$0xff] }
 0xcb9   : > { %9471 = vmatpush1.bf16.msra.mxu0 %v6024_v14  ;;  %9308 = vmatprep.subr.bf16.mxu1 %v6055_v30  ;;  %v6310_v14 = vunpack.c.l.s8.bf16 %v4582_v29  ;;  %v6312_v30 = vunpack.c.l.s8.bf16 %v4584_v8 }
 0xcba   : > { %9472 = vmatprep.subr.bf16.mxu0 %v6057_v15  ;;  %v6345_v15 = vunpack.c.h.s8.bf16 %v4585_v42 }
 0xcbc   : > { %9309 = vmatpush1.bf16.msra.mxu1 %v6054_v53  ;;  %v4617_v53 = vld [vmem:[%s12268_s12 + $0x17f8] sm:$0xff] }
 0xcbd   : > { %9473 = vmatpush1.bf16.msra.mxu0 %v6056_v40  ;;  %9310 = vmatprep.subr.bf16.mxu1 %v6087_v0  ;;  %v6342_v40 = vunpack.c.h.s8.bf16 %v4582_v29  ;;  %v6344_v0 = vunpack.c.h.s8.bf16 %v4584_v8  ;;  %v6377_v59 = vunpack.c.l.s8.bf16 %v4617_v53  ;;  %v13769_v29 = vld [vmem:[%s12800_s21 + $0x18] sm:$0xff]  ;;  %v4743_v8 = vld [vmem:[%s12268_s12 + $0x1be8] sm:$0xff] }
 0xcbe   : > { %9474 = vmatprep.subr.bf16.mxu0 %v6089_v39  ;;  %v6375_v39 = vunpack.c.l.s8.bf16 %v4615_v38 }
 0xcc0   : > { %9311 = vmatpush1.bf16.msra.mxu1 %v6086_v22  ;;  %v4616_v22 = vld [vmem:[%s12268_s12 + $0x17f0] sm:$0xff] }
 0xcc1   : > { %9475 = vmatpush1.bf16.msra.mxu0 %v6088_v52  ;;  %9312 = vmatprep.subr.bf16.mxu1 %v6119_v63  ;;  %v6374_v52 = vunpack.c.l.s8.bf16 %v4614_v55  ;;  %v6376_v63 = vunpack.c.l.s8.bf16 %v4616_v22 }
 0xcc2   : > { %9476 = vmatprep.subr.bf16.mxu0 %v6121_v57  ;;  %v6409_v57 = vunpack.c.h.s8.bf16 %v4617_v53  ;;  %v9853_v53 = vrot.slane %v13769_v29, %v12280_v21 }
 0xcc4   : > { %9313 = vmatpush1.bf16.msra.mxu1 %v6118_v44  ;;  %v4649_v44 = vld [vmem:[%s12268_s12 + $0x18f8] sm:$0xff] }
 0xcc5   : > { %9477 = vmatpush1.bf16.msra.mxu0 %v6120_v62  ;;  %9314 = vmatprep.subr.bf16.mxu1 %v6151_v1  ;;  %v6406_v62 = vunpack.c.h.s8.bf16 %v4614_v55  ;;  %v6408_v1 = vunpack.c.h.s8.bf16 %v4616_v22  ;;  %v6441_v36 = vunpack.c.l.s8.bf16 %v4649_v44  ;;  %v6473_v3 = vunpack.c.h.s8.bf16 %v4649_v44  ;;  %v4742_v55 = vld [vmem:[%s12268_s12 + $0x1be0] sm:$0xff] }
 0xcc6   : > { %9478 = vmatprep.subr.bf16.mxu0 %v6153_v32  ;;  %v6439_v32 = vunpack.c.l.s8.bf16 %v4647_v61  ;;  %v9861_v22 = vrot.slane %v13769_v29, %v12315_v48  ;;  %v9865_v44 = vrot.slane %v13769_v29, %v12318_v50 }
 0xcc8   : > { %9315 = vmatpush1.bf16.msra.mxu1 %v6150_v34  ;;  %v4648_v34 = vld [vmem:[%s12268_s12 + $0x18f0] sm:$0xff] }
 0xcc9   : > { %9479 = vmatpush1.bf16.msra.mxu0 %v6152_v20  ;;  %9316 = vmatprep.subr.bf16.mxu1 %v6183_v10  ;;  %v6438_v20 = vunpack.c.l.s8.bf16 %v4646_v11  ;;  %v6440_v10 = vunpack.c.l.s8.bf16 %v4648_v34 }
 0xcca   : > { %9480 = vmatprep.subr.bf16.mxu0 %v6185_v2  ;;  %v4679_v2 = vld [vmem:[%s12268_s12 + $0x19e8] sm:$0xff] }
 0xccc   : > { %9317 = vmatpush1.bf16.msra.mxu1 %v6182_v4  ;;  %v4681_v4 = vld [vmem:[%s12268_s12 + $0x19f8] sm:$0xff] }
 0xccd   : > { %9481 = vmatpush1.bf16.msra.mxu0 %v6184_v47  ;;  %9318 = vmatprep.subr.bf16.mxu1 %v6215_v6  ;;  %v6470_v47 = vunpack.c.h.s8.bf16 %v4646_v11  ;;  %v6472_v6 = vunpack.c.h.s8.bf16 %v4648_v34  ;;  %v6505_v12 = vunpack.c.l.s8.bf16 %v4681_v4  ;;  %v6537_v33 = vunpack.c.h.s8.bf16 %v4681_v4 }
 0xcce   : > { %9482 = vmatprep.subr.bf16.mxu0 %v6217_v7  ;;  %v6503_v7 = vunpack.c.l.s8.bf16 %v4679_v2 }
 0xcd0   : > { %9319 = vmatpush1.bf16.msra.mxu1 %v6214_v13  ;;  %v4680_v13 = vld [vmem:[%s12268_s12 + $0x19f0] sm:$0xff] }
 0xcd1   : > { %9483 = vmatpush1.bf16.msra.mxu0 %v6216_v17  ;;  %9320 = vmatprep.subr.bf16.mxu1 %v6247_v27  ;;  %v6502_v17 = vunpack.c.l.s8.bf16 %v4678_v45  ;;  %v6535_v27 = vunpack.c.h.s8.bf16 %v4679_v2 }
 0xcd2   : > { %9484 = vmatprep.subr.bf16.mxu0 %v6249_v24  ;;  %v4711_v24 = vld [vmem:[%s12268_s12 + $0x1ae8] sm:$0xff] }
 0xcd4   : > { %9321 = vmatpush1.bf16.msra.mxu1 %v6246_v26  ;;  %v6534_v26 = vunpack.c.h.s8.bf16 %v4678_v45  ;;  %v6662_v45 = vunpack.c.h.s8.bf16 %v4742_v55 }
 0xcd5   : > { %9485 = vmatpush1.bf16.msra.mxu0 %v6248_v28  ;;  %9322 = vmatprep.subr.bf16.mxu1 %v6279_v18  ;;  %v6567_v28 = vunpack.c.l.s8.bf16 %v4711_v24  ;;  %v4710_v18 = vld [vmem:[%s12268_s12 + $0x1ae0] sm:$0xff] }
 0xcd6   : > { %9486 = vmatprep.subr.bf16.mxu0 %v6281_v41  ;;  %v6569_v41 = vunpack.c.l.s8.bf16 %v4713_v25  ;;  %v6566_v42 = vunpack.c.l.s8.bf16 %v4710_v18  ;;  %v6598_v38 = vunpack.c.h.s8.bf16 %v4710_v18 }
 0xcd8   : > { %9323 = vmatpush1.bf16.msra.mxu1 %v6278_v5  ;;  %v13766_v5 = vld [vmem:[%s12797_s24 + $0x18] sm:$0xff] }
 0xcd9   : > { %9487 = vmatpush1.bf16.msra.mxu0 %v6280_v16  ;;  %9324 = vmatprep.subr.bf16.mxu1 %v6311_v46  ;;  %v6568_v16 = vunpack.c.l.s8.bf16 %v4712_v9  ;;  %v6599_v46 = vunpack.c.h.s8.bf16 %v4711_v24 }
 0xcda   : > { %9488 = vmatprep.subr.bf16.mxu0 %v6313_v35  ;;  %v6601_v35 = vunpack.c.h.s8.bf16 %v4713_v25 }
 0xcdc   : > { %9325 = vmatpush1.bf16.msra.mxu1 %v6310_v14  ;;  %v9653_v14 = vrot.slane %v13766_v5, %v12280_v21 }
 0xcdd   : > { %9489 = vmatpush1.bf16.msra.mxu0 %v6312_v30  ;;  %9326 = vmatprep.subr.bf16.mxu1 %v6343_v56  ;;  %v4745_v30 = vld [vmem:[%s12268_s12 + $0x1bf8] sm:$0xff]  ;;  %v9661_v56 = vrot.slane %v13766_v5, %v12315_v48 }
 0xcde   : > { %9490 = vmatprep.subr.bf16.mxu0 %v6345_v15  ;;  %v9657_v15 = vrot.slane %v13766_v5, %v12283_v23  ;;  %v6665_v4 = vunpack.c.h.s8.bf16 %v4745_v30 }
 0xce0   : > { %9327 = vmatpush1.bf16.msra.mxu1 %v6342_v40  ;;  %v9665_v40 = vrot.slane %v13766_v5, %v12318_v50 }
 0xce1   : > { %9491 = vmatpush1.bf16.msra.mxu0 %v6344_v0  ;;  %9328 = vmatprep.subr.bf16.mxu1 %v6375_v39  ;;  %v6600_v0 = vunpack.c.h.s8.bf16 %v4712_v9  ;;  %v6631_v39 = vunpack.c.l.s8.bf16 %v4743_v8 }
 0xce2   : > { %9492 = vmatprep.subr.bf16.mxu0 %v6377_v59 }
 0xce4   : > { %9329 = vmatpush1.bf16.msra.mxu1 %v6374_v52  ;;  %v9857_v52 = vrot.slane %v13769_v29, %v12283_v23 }
 0xce5   : > { %9493 = vmatpush1.bf16.msra.mxu0 %v6376_v63  ;;  %9330 = vmatprep.subr.bf16.mxu1 %v6407_v49  ;;  %v6633_v63 = vunpack.c.l.s8.bf16 %v4745_v30  ;;  %v4744_v49 = vld [vmem:[%s12268_s12 + $0x1bf0] sm:$0xff] }
 0xce6   : > { %9494 = vmatprep.subr.bf16.mxu0 %v6409_v57 }
 0xce8   : > { %9331 = vmatpush1.bf16.msra.mxu1 %v6406_v62 }
 0xce9   : > { %9495 = vmatpush1.bf16.msra.mxu0 %v6408_v1  ;;  %9341 = vmatprep.subr.bf16.mxu1 %v6439_v32 }
 0xcea   : > { %9505 = vmatprep.subr.bf16.mxu0 %v6441_v36  ;;  %v6630_v36 = vunpack.c.l.s8.bf16 %v4742_v55 }
 0xceb   : > { %9333 = vmatmul.mubr.bf16.vlgmr.msra.gmra.mrb[40].mxu1 %v12628_v19 }
 0xcec   : > { %9497 = vmatmul.mubr.bf16.vlgmr.msra.gmra.mrb[44].mxu0 %v12628_v19  ;;  %9342 = vmatpush1.bf16.msra.mxu1 %v6438_v20  ;;  %v6504_v19 = vunpack.c.l.s8.bf16 %v4680_v13 }
 0xced   : > { %9373 = vmatprep.mubr.bf16.mxu1 %v12634_v31  ;;  %9506 = vmatpush1.bf16.msra.mxu0 %v6440_v10  ;;  %v6632_v10 = vunpack.c.l.s8.bf16 %v4744_v49 }
 0xcee   : > { %9537 = vmatprep.mubr.bf16.mxu0 %v12634_v31  ;;  %9343 = vmatprep.subr.bf16.mxu1 %v6471_v43  ;;  %v6536_v31 = vunpack.c.h.s8.bf16 %v4680_v13  ;;  %v6663_v43 = vunpack.c.h.s8.bf16 %v4743_v8  ;;  %v4808_v8 = vld [vmem:[%s12268_s12 + $0x1df0] sm:$0xff] }
 0xcef   : > { %9507 = vmatprep.subr.bf16.mxu0 %v6473_v3  ;;  %v6792_v55 = vunpack.c.h.s8.bf16 %v4808_v8 }
 0xcf0   : > { %9344 = vmatpush1.bf16.msra.mxu1 %v6470_v47  ;;  %v4775_v47 = vld [vmem:[%s12268_s12 + $0x1ce8] sm:$0xff] }
 0xcf1   : > { %9508 = vmatpush1.bf16.msra.mxu0 %v6472_v6  ;;  %9345 = vmatprep.subr.bf16.mxu1 %v6503_v7  ;;  %v4777_v7 = vld [vmem:[%s12268_s12 + $0x1cf8] sm:$0xff]  ;;  %v6695_v13 = vunpack.c.l.s8.bf16 %v4775_v47  ;;  %v6727_v25 = vunpack.c.h.s8.bf16 %v4775_v47  ;;  %v9673_v47 = vrot.slane %v13766_v5, %v12513_v60 }
 0xcf2   : > { %9509 = vmatprep.subr.bf16.mxu0 %v6505_v12  ;;  %v6664_v12 = vunpack.c.h.s8.bf16 %v4744_v49 }
 0xcf4   : > { %9346 = vmatpush1.bf16.msra.mxu1 %v6502_v17  ;;  %v4774_v17 = vld [vmem:[%s12268_s12 + $0x1ce0] sm:$0xff] }
 0xcf5   : > { %9510 = vmatpush1.bf16.msra.mxu0 %v6504_v19  ;;  %9347 = vmatprep.subr.bf16.mxu1 %v6535_v27  ;;  %v6697_v19 = vunpack.c.l.s8.bf16 %v4777_v7  ;;  %v4776_v27 = vld [vmem:[%s12268_s12 + $0x1cf0] sm:$0xff]  ;;  %v6726_v18 = vunpack.c.h.s8.bf16 %v4774_v17 }
 0xcf6   : > { %9511 = vmatprep.subr.bf16.mxu0 %v6537_v33  ;;  %v6694_v33 = vunpack.c.l.s8.bf16 %v4774_v17  ;;  %v6696_v24 = vunpack.c.l.s8.bf16 %v4776_v27  ;;  %v6728_v9 = vunpack.c.h.s8.bf16 %v4776_v27  ;;  %v9881_v27 = vrot.slane %v13769_v29, %v12516_v58 }
 0xcf8   : > { %9348 = vmatpush1.bf16.msra.mxu1 %v6534_v26  ;;  %v6729_v26 = vunpack.c.h.s8.bf16 %v4777_v7  ;;  %v9681_v7 = vrot.slane %v13766_v5, %v12516_v58 }
 0xcf9   : > { %9512 = vmatpush1.bf16.msra.mxu0 %v6536_v31  ;;  %9349 = vmatprep.subr.bf16.mxu1 %v6567_v28  ;;  %v4807_v31 = vld [vmem:[%s12268_s12 + $0x1de8] sm:$0xff]  ;;  %v4809_v28 = vld [vmem:[%s12268_s12 + $0x1df8] sm:$0xff] }
 0xcfa   : > { %9513 = vmatprep.subr.bf16.mxu0 %v6569_v41 }
 0xcfc   : > { %9350 = vmatpush1.bf16.msra.mxu1 %v6566_v42  ;;  %v6759_v42 = vunpack.c.l.s8.bf16 %v4807_v31 }
 0xcfd   : > { %9514 = vmatpush1.bf16.msra.mxu0 %v6568_v16  ;;  %9351 = vmatprep.subr.bf16.mxu1 %v6599_v46  ;;  %v4806_v16 = vld [vmem:[%s12268_s12 + $0x1de0] sm:$0xff] }
 0xcfe   : > { %v9047_v59 = vpop.f32.mrb[36].mxu1  ;;  %9515 = vmatprep.subr.bf16.mxu0 %v6601_v35  ;;  %v6761_v35 = vunpack.c.l.s8.bf16 %v4809_v28 }
 0xcff   : > { %v9738_v57 = vmul.f32 %v9653_v14, %v9047_v59  ;;  %v9211_v61 = vpop.f32.mrb[40].mxu0  ;;  %v9049_v21 = vpop.f32.mrb[37].mxu1 }
 0xd00   : > { %v9740_v62 = vmul.f32 %v9661_v56, %v9211_v61  ;;  %v9739_v1 = vmul.f32 %v9657_v15, %v9049_v21  ;;  %v9213_v32 = vpop.f32.mrb[41].mxu0  ;;  %v9051_v11 = vpop.f32.mrb[38].mxu1  ;;  %9352 = vmatpush1.bf16.msra.mxu1 %v6598_v38  ;;  %v6758_v56 = vunpack.c.l.s8.bf16 %v4806_v16  ;;  %v6760_v15 = vunpack.c.l.s8.bf16 %v4808_v8 }
 0xd01   : > { %v9938_v48 = vadd.f32 %v9853_v53, %v9738_v57  ;;  %v9741_v34 = vmul.f32 %v9665_v40, %v9213_v32  ;;  %v9215_v23 = vpop.f32.mrb[42].mxu0  ;;  %9516 = vmatpush1.bf16.msra.mxu0 %v6600_v0  ;;  %v9052_v20 = vpop.f32.mrb[39].mxu1  ;;  %9353 = vmatprep.subr.bf16.mxu1 %v6631_v39  ;;  %v6791_v38 = vunpack.c.h.s8.bf16 %v4807_v31  ;;  %v6793_v53 = vunpack.c.h.s8.bf16 %v4809_v28  ;;  %v4839_v40 = vld [vmem:[%s12268_s12 + $0x1ee8] sm:$0xff]  ;;  %v4841_v0 = vld [vmem:[%s12268_s12 + $0x1ef8] sm:$0xff] }
 0xd02   : > { %v9940_v2 = vadd.f32 %v9861_v22, %v9740_v62  ;;  %v9939_v3 = vadd.f32 %v9857_v52, %v9739_v1  ;;  %v9216_v50 = vpop.f32.mrb[43].mxu0  ;;  %9517 = vmatprep.subr.bf16.mxu0 %v6633_v63  ;;  %v6790_v39 = vunpack.c.h.s8.bf16 %v4806_v16  ;;  %v6823_v59 = vunpack.c.l.s8.bf16 %v4839_v40  ;;  %v4838_v22 = vld [vmem:[%s12268_s12 + $0x1ee0] sm:$0xff]  ;;  %v4840_v63 = vld [vmem:[%s12268_s12 + $0x1ef0] sm:$0xff]  ;;  %v4873_v62 = vld [vmem:[%s12268_s12 + $0x1ff8] sm:$0xff] }
 0xd03   : > { %11207 = vtanh.f32 %v9938_v48  ;;  %v9941_v6 = vadd.f32 %v9865_v44, %v9741_v34  ;;  %v6825_v52 = vunpack.c.l.s8.bf16 %v4841_v0  ;;  %v6822_v49 = vunpack.c.l.s8.bf16 %v4838_v22  ;;  %v4871_v44 = vld [vmem:[%s12268_s12 + $0x1fe8] sm:$0xff]  ;;  %v4872_v34 = vld [vmem:[%s12268_s12 + $0x1ff0] sm:$0xff] }
 0xd04   : > { %11209 = vtanh.f32 %v9940_v2  ;;  %9354 = vmatpush1.bf16.msra.mxu1 %v6630_v36  ;;  %v6824_v57 = vunpack.c.l.s8.bf16 %v4840_v63  ;;  %v6855_v61 = vunpack.c.h.s8.bf16 %v4839_v40  ;;  %v6857_v21 = vunpack.c.h.s8.bf16 %v4841_v0  ;;  %v4870_v36 = vld [vmem:[%s12268_s12 + $0x1fe0] sm:$0xff] }
 0xd05   : > { %11211 = vtanh.f32 %v9939_v3  ;;  %9518 = vmatpush1.bf16.msra.mxu0 %v6632_v10  ;;  %9355 = vmatprep.subr.bf16.mxu1 %v6663_v43  ;;  %v6854_v1 = vunpack.c.h.s8.bf16 %v4838_v22  ;;  %v6856_v32 = vunpack.c.h.s8.bf16 %v4840_v63  ;;  %v6887_v11 = vunpack.c.l.s8.bf16 %v4871_v44 }
 0xd06   : > { %11213 = vtanh.f32 %v9941_v6  ;;  %9519 = vmatprep.subr.bf16.mxu0 %v6665_v4  ;;  %v6889_v48 = vunpack.c.l.s8.bf16 %v4873_v62  ;;  %v6886_v23 = vunpack.c.l.s8.bf16 %v4870_v36  ;;  %v6888_v20 = vunpack.c.l.s8.bf16 %v4872_v34 }
 0xd07   : > { %v6919_v10 = vunpack.c.h.s8.bf16 %v4871_v44  ;;  %v6921_v43 = vunpack.c.h.s8.bf16 %v4873_v62  ;;  %v6918_v2 = vunpack.c.h.s8.bf16 %v4870_v36  ;;  %v6920_v3 = vunpack.c.h.s8.bf16 %v4872_v34 }
 0xd08   : > { %9356 = vmatpush1.bf16.msra.mxu1 %v6662_v45  ;;  %v9669_v50 = vrot.slane %v13766_v5, %v12508_v54  ;;  %v9677_v4 = vrot.slane %v13766_v5, %v12549_v37  ;;  %v9869_v6 = vrot.slane %v13769_v29, %v12508_v54 }
 0xd09   : > { %9520 = vmatpush1.bf16.msra.mxu0 %v6664_v12  ;;  %9357 = vmatprep.subr.bf16.mxu1 %v6695_v13  ;;  %v9877_v12 = vrot.slane %v13769_v29, %v12549_v37 }
 0xd0a   : > { %9521 = vmatprep.subr.bf16.mxu0 %v6697_v19 }
 0xd0c   : > { %9358 = vmatpush1.bf16.msra.mxu1 %v6694_v33 }
 0xd0d   : > { %v11208_v41 = vpop.eup %11207  ;;  %9522 = vmatpush1.bf16.msra.mxu0 %v6696_v24  ;;  %9359 = vmatprep.subr.bf16.mxu1 %v6727_v25 }
 0xd0e   : > { %v11210_v46 = vpop.eup %11209  ;;  %10002 = vst [vmem:[%s12834_s4 + $0xc0] sm:$0xff] %v11208_v41  ;;  %9523 = vmatprep.subr.bf16.mxu0 %v6729_v26 }
 0xd0f   : > { %v11212_v14 = vpop.eup %11211  ;;  %10004 = vst [vmem:[%s12834_s4 + $0xd0] sm:$0xff] %v11210_v46 }
 0xd10   : > { %v11214_v30 = vpop.eup %11213  ;;  %10003 = vst [vmem:[%s12834_s4 + $0xc8] sm:$0xff] %v11212_v14  ;;  %9360 = vmatpush1.bf16.msra.mxu1 %v6726_v18 }
 0xd11   : > { %10005 = vst [vmem:[%s12834_s4 + $0xd8] sm:$0xff] %v11214_v30  ;;  %9524 = vmatpush1.bf16.msra.mxu0 %v6728_v9  ;;  %9361 = vmatprep.subr.bf16.mxu1 %v6759_v42 }
 0xd12   : > { %9525 = vmatprep.subr.bf16.mxu0 %v6761_v35 }
 0xd14   : > { %9362 = vmatpush1.bf16.msra.mxu1 %v6758_v56 }
 0xd15   : > { %9526 = vmatpush1.bf16.msra.mxu0 %v6760_v15  ;;  %9363 = vmatprep.subr.bf16.mxu1 %v6791_v38 }
 0xd16   : > { %9527 = vmatprep.subr.bf16.mxu0 %v6793_v53 }
 0xd18   : > { %9364 = vmatpush1.bf16.msra.mxu1 %v6790_v39 }
 0xd19   : > { %9528 = vmatpush1.bf16.msra.mxu0 %v6792_v55  ;;  %9365 = vmatprep.subr.bf16.mxu1 %v6823_v59 }
 0xd1a   : > { %9529 = vmatprep.subr.bf16.mxu0 %v6825_v52 }
 0xd1c   : > { %9366 = vmatpush1.bf16.msra.mxu1 %v6822_v49 }
 0xd1d   : > { %9530 = vmatpush1.bf16.msra.mxu0 %v6824_v57  ;;  %9367 = vmatprep.subr.bf16.mxu1 %v6855_v61 }
 0xd1e   : > { %9531 = vmatprep.subr.bf16.mxu0 %v6857_v21 }
 0xd20   : > { %9368 = vmatpush1.bf16.msra.mxu1 %v6854_v1 }
 0xd21   : > { %9532 = vmatpush1.bf16.msra.mxu0 %v6856_v32  ;;  %9369 = vmatprep.subr.bf16.mxu1 %v6887_v11 }
 0xd22   : > { %9533 = vmatprep.subr.bf16.mxu0 %v6889_v48 }
 0xd24   : > { %9370 = vmatpush1.bf16.msra.mxu1 %v6886_v23 }
 0xd25   : > { %9534 = vmatpush1.bf16.msra.mxu0 %v6888_v20  ;;  %9371 = vmatprep.subr.bf16.mxu1 %v6919_v10 }
 0xd26   : > { %9535 = vmatprep.subr.bf16.mxu0 %v6921_v43 }
 0xd28   : > { %9372 = vmatpush1.bf16.msra.mxu1 %v6918_v2 }
 0xd29   : > { %9536 = vmatpush1.bf16.msra.mxu0 %v6920_v3 }
 0xd2b   : > { %9374 = vmatmul.mubr.bf16.vlgmr.msra.gmra.mrb[40].mxu1 %v12673_v51 }
 0xd2c   : > { %9538 = vmatmul.mubr.bf16.vlgmr.msra.gmra.mrb[44].mxu0 %v12673_v51  ;;  %v9873_v51 = vrot.slane %v13769_v29, %v12513_v60 }
 0xdfe   : > { %v9375_v45 = vpop.f32.mrb[40].mxu1 }
 0xdff   : > { %v9742_v13 = vmul.f32 %v9669_v50, %v9375_v45  ;;  %v9539_v17 = vpop.f32.mrb[44].mxu0  ;;  %v9377_v19 = vpop.f32.mrb[41].mxu1 }
 0xe00   : > { %v9744_v33 = vmul.f32 %v9677_v4, %v9539_v17  ;;  %v9743_v24 = vmul.f32 %v9673_v47, %v9377_v19  ;;  %v9541_v25 = vpop.f32.mrb[45].mxu0  ;;  %v9379_v54 = vpop.f32.mrb[42].mxu1 }
 0xe01   : > { %v9942_v26 = vadd.f32 %v9869_v6, %v9742_v13  ;;  %v9745_v5 = vmul.f32 %v9681_v7, %v9541_v25  ;;  %v9543_v31 = vpop.f32.mrb[46].mxu0  ;;  %v9380_v37 = vpop.f32.mrb[43].mxu1 }
 0xe02   : > { %v9944_v28 = vadd.f32 %v9877_v12, %v9744_v33  ;;  %v9943_v60 = vadd.f32 %v9873_v51, %v9743_v24  ;;  %v9544_v18 = vpop.f32.mrb[47].mxu0 }
 0xe03   : > { %11215 = vtanh.f32 %v9942_v26  ;;  %v9945_v41 = vadd.f32 %v9881_v27, %v9745_v5 }
 0xe04   : > { %11217 = vtanh.f32 %v9944_v28 }
 0xe05   : > { %11219 = vtanh.f32 %v9943_v60 }
 0xe06   : > { %11221 = vtanh.f32 %v9945_v41 }
 0xe0d   : > { %v11216_v58 = vpop.eup %11215 }
 0xe0e   : > { %v11218_v29 = vpop.eup %11217  ;;  %10006 = vst [vmem:[%s12834_s4 + $0xe0] sm:$0xff] %v11216_v58 }
 0xe0f   : > { %v11220_v9 = vpop.eup %11219  ;;  %10008 = vst [vmem:[%s12834_s4 + $0xf0] sm:$0xff] %v11218_v29 }
 0xe10   : > { %v11222_v42 = vpop.eup %11221  ;;  %10007 = vst [vmem:[%s12834_s4 + $0xe8] sm:$0xff] %v11220_v9 }
 0xe11   : > { %10009 = vst [vmem:[%s12834_s4 + $0xf8] sm:$0xff] %v11222_v42 }
 0xe12 PF: > { %s13953_s24 = sld [smem:[#allocation34_spill]]  ;;  %s13954_s21 = sld [smem:[#allocation32_spill]] }
 0xe13   : > { %s13955_s0 = sld [smem:[#allocation35_spill]]  ;;  %s13956_s22 = smov %s11715_s23 }
 0xe18   : > { %p30_p0 = scmp.ge.s32.totalorder %s13953_s24, 14  }
 0xe19   : > { %s13957_s23 = smov %s13955_s0 }
 0xe1a   :  { %32 = sbr.rel (!%p30_p0) target bundleno = 19 (0x13), region = 193 }
 0xe21   :  { %10032 = vsyncpa [#allocation3], 1 }
 0xe22   :  { %10034 = vsyncpa [#allocation3 + $0x1], 1 }
 0xe23   :  { %10035 = vsyncpa [#allocation5], 1 }
 0xe24   :  { %10036 = vsyncpa [#allocation8], 1 }
 0xe25   :  { %10037 = vsyncpa [#allocation11], 1 }
 0xe26   :  { %10038 = vsyncpa [#allocation14], 1 }
 0xe27   :  { %10039 = vsyncpa [#allocation17], 1 }
 0xe28   :  { %10040 = vsyncpa [#allocation20], 1 }

</bundles_post_ra>
